<compile_context>
chip_gen: v6e
topology: v6e:2x2x1
jax: 0.10.0
libtpu: 0.0.40
codegen_flags: <defaults>
</compile_context>

<pallas_src>
import functools

import jax
import jax.numpy as jnp
import numpy as np
from jax import lax
from jax.experimental import pallas as pl
from jax.experimental.pallas import tpu as pltpu

EPS = 1e-5
SMEM = pltpu.MemorySpace.SMEM


# ------------------------------ conv helper -------------------------------- #

def _conv3x3_slab(buf_ref, w_ref, ml, mr, *, HW, W, S):
    """3x3 same-padding conv over the flattened (top/bottom padded) layout.

    buf_ref: (2*S + HW, C) bf16 VMEM scratch; rows [S, S+HW) hold the image
             pixels in row-major (h*W + w) order, rows outside are zero.
    Output pixel r = h*W + w is 9 accumulated MXU matmuls of row-slabs
    buf[S + (kh-1)*W + (kw-1) + r] @ w[k].  Left/right boundary taps are
    zeroed by the column masks ml (w != 0) / mr (w != W-1); top/bottom
    boundary taps land in the zero pad bands automatically.

    TODO(synk): at production C (>=128), pack the 9 taps into the contraction
    dim (one (HW, 9C) x (9C, Co) matmul) for better MXU K utilization; neutral
    at the toy test size.
    """
    c_out = w_ref.shape[-1]
    acc = jnp.zeros((HW, c_out), jnp.float32)
    for k in range(9):
        kh, kw = divmod(k, 3)
        off = S + (kh - 1) * W + (kw - 1)
        xs = buf_ref[off:off + HW, :]                 # bf16 row-slab
        if kw == 0:
            xs = xs * ml
        elif kw == 2:
            xs = xs * mr
        acc = acc + jnp.dot(xs, w_ref[k], preferred_element_type=jnp.float32)
    return acc


# ------------------------------ fused kernel ------------------------------- #

def _irblock_kernel(x_ref, ml_ref, mr_ref, w1_ref, w2_ref, b0_ref,
                    s1_ref, b1_ref, s2_ref, b2_ref,
                    w1se_ref, b1se_ref, w2se_ref, b2se_ref,
                    alpha_ref, ase_ref,
                    o_ref, xpad_ref, ypad_ref, *, W, S):
    """Whole IRBlock for one image, entirely in VMEM."""
    HW, C = x_ref.shape
    PB = xpad_ref.shape[0]

    ml = ml_ref[...]                      # (HW, 1) bf16: 0 where w == 0
    mr = mr_ref[...]                      # (HW, 1) bf16: 0 where w == W-1
    alpha = alpha_ref[0, 0]
    pad_zeros = jnp.zeros((S, C), jnp.bfloat16)

    # bn0 (scale pre-folded into w1; bias-only add) + zero-pad, in VMEM.
    x = x_ref[...]                        # (HW, C) f32; also the residual
    xpad_ref[0:S, :] = pad_zeros
    xpad_ref[S + HW:PB, :] = pad_zeros
    xpad_ref[S:S + HW, :] = (x + b0_ref[...]).astype(jnp.bfloat16)

    # conv1 + bn1 + PReLU, handed to conv2 via ONE aligned slab store.
    acc1 = _conv3x3_slab(xpad_ref, w1_ref, ml, mr, HW=HW, W=W, S=S)
    y1 = acc1 * s1_ref[...] + b1_ref[...]
    y1 = jnp.where(y1 >= 0.0, y1, alpha * y1)
    ypad_ref[0:S, :] = pad_zeros
    ypad_ref[S + HW:PB, :] = pad_zeros
    ypad_ref[S:S + HW, :] = y1.astype(jnp.bfloat16)

    # conv2 + bn2.
    acc2 = _conv3x3_slab(ypad_ref, w2_ref, ml, mr, HW=HW, W=W, S=S)
    y2 = acc2 * s2_ref[...] + b2_ref[...]            # (HW, C) f32

    # SE: global average pool + fc1 + PReLU + fc2 + sigmoid, all in-kernel.
    pooled = jnp.sum(y2, axis=0, keepdims=True) * (1.0 / HW)        # (1, C)
    h = jnp.dot(pooled, w1se_ref[...],
                preferred_element_type=jnp.float32) + b1se_ref[...]
    ase = ase_ref[0, 0]
    h = jnp.where(h >= 0.0, h, ase * h)
    z = jnp.dot(h, w2se_ref[...],
                preferred_element_type=jnp.float32) + b2se_ref[...]
    gate = 1.0 / (1.0 + jnp.exp(-z))                                # (1, C)

    # gate * out + residual + final PReLU, one aligned output store.
    out = y2 * gate + x
    o_ref[...] = jnp.where(out >= 0.0, out, alpha * out).astype(o_ref.dtype)


# ------------------------------ param folding ------------------------------ #

def _fold_bn(p):
    g, b, m, v = p
    inv = g / jnp.sqrt(v + EPS)
    c = g.shape[0]
    return (inv.reshape(1, c).astype(jnp.float32),
            (b - m * inv).reshape(1, c).astype(jnp.float32))


def _w_taps(w_oihw):
    """(O, I, 3, 3) -> (9, I, O) tap-major weights (f32; caller casts)."""
    co, ci = w_oihw.shape[0], w_oihw.shape[1]
    return jnp.transpose(w_oihw, (2, 3, 1, 0)).reshape(9, ci, co)


# ------------------------------ IRBlock forward ----------------------------- #

def ir_block_forward(x_nchw, params):
    N, C, H, W = x_nchw.shape
    HW = H * W
    S = -(-(W + 1) // 16) * 16            # pad band, bf16-tile (16-row) aligned
    PB = 2 * S + HW

    # Boundary layout only (module keeps NCHW I/O); padding, bf16 cast, SE,
    # gating and residual all happen inside the fused kernel.
    x_flat = (jnp.transpose(x_nchw, (0, 2, 3, 1))
              .astype(jnp.float32).reshape(N, HW, C))

    # Column-validity masks for the horizontal boundary taps (tiny constants).
    wcol = np.arange(HW, dtype=np.int32) % W
    ml = jnp.asarray((wcol != 0).astype(np.float32).reshape(HW, 1),
                     jnp.bfloat16)
    mr = jnp.asarray((wcol != W - 1).astype(np.float32).reshape(HW, 1),
                     jnp.bfloat16)

    s0, b0 = _fold_bn(params["bn0"])
    s1, b1 = _fold_bn(params["bn1"])
    s2, b2 = _fold_bn(params["bn2"])
    b0p = b0 / s0                          # bn0: scale folded into w1, bias kept

    w1 = (_w_taps(params["conv1_w"]) * s0.reshape(1, C, 1)).astype(jnp.bfloat16)
    w2 = _w_taps(params["conv2_w"]).astype(jnp.bfloat16)

    w1se, b1se, a_se, w2se, b2se = params["se"]
    hid = w1se.shape[0]
    hid_p = max(8, -(-hid // 8) * 8)       # zero-pad SE hidden dim (exact math)
    w1se_t = jnp.zeros((C, hid_p), jnp.float32).at[:, :hid].set(w1se.T)
    b1se_r = jnp.zeros((1, hid_p), jnp.float32).at[:, :hid].set(b1se)
    w2se_t = jnp.zeros((hid_p, C), jnp.float32).at[:hid, :].set(w2se.T)
    b2se_r = b2se.reshape(1, C).astype(jnp.float32)

    alpha = params["prelu_a"].astype(jnp.float32).reshape(1, 1)
    ase = jnp.asarray(a_se, jnp.float32).reshape(1, 1)

    rep2 = lambda n: (0, 0)
    rep3 = lambda n: (0, 0, 0)

    out = pl.pallas_call(
        functools.partial(_irblock_kernel, W=W, S=S),
        out_shape=jax.ShapeDtypeStruct((N, HW, C), jnp.float32),
        grid=(N,),
        in_specs=[
            pl.BlockSpec((None, HW, C), lambda n: (n, 0, 0)),   # x (per image)
            pl.BlockSpec((HW, 1), rep2),                        # mask left
            pl.BlockSpec((HW, 1), rep2),                        # mask right
            pl.BlockSpec((9, C, C), rep3),                      # w1 (resident)
            pl.BlockSpec((9, C, C), rep3),                      # w2 (resident)
            pl.BlockSpec((1, C), rep2),                         # bn0 bias'
            pl.BlockSpec((1, C), rep2),                         # bn1 scale
            pl.BlockSpec((1, C), rep2),                         # bn1 bias
            pl.BlockSpec((1, C), rep2),                         # bn2 scale
            pl.BlockSpec((1, C), rep2),                         # bn2 bias
            pl.BlockSpec((C, hid_p), rep2),                     # SE fc1 w^T
            pl.BlockSpec((1, hid_p), rep2),                     # SE fc1 b
            pl.BlockSpec((hid_p, C), rep2),                     # SE fc2 w^T
            pl.BlockSpec((1, C), rep2),                         # SE fc2 b
            pl.BlockSpec((1, 1), rep2, memory_space=SMEM),      # PReLU alpha
            pl.BlockSpec((1, 1), rep2, memory_space=SMEM),      # SE PReLU alpha
        ],
        out_specs=pl.BlockSpec((None, HW, C), lambda n: (n, 0, 0)),
        scratch_shapes=[pltpu.VMEM((PB, C), jnp.bfloat16),      # padded bn0(x)
                        pltpu.VMEM((PB, C), jnp.bfloat16)],     # padded act1
        compiler_params=pltpu.CompilerParams(
            # One fused step per image; batch is sharded across TensorCores on
            # v7x.  Per-step HBM traffic is only the (HW, C) in/out blocks, so
            # exposed step-0 DMA is negligible; fusing the whole block (no
            # intermediate HBM round trips / launches) wins over deeper
            # per-core pipelining at these sizes.
            dimension_semantics=("parallel",),
            vmem_limit_bytes=32 * 1024 * 1024),     # v7x-safe (64 MiB chip)
    )(x_flat, ml, mr, w1, w2, b0p, s1, b1, s2, b2,
      w1se_t, b1se_r, w2se_t, b2se_r, alpha, ase)

    return jnp.transpose(out.reshape(N, H, W, C), (0, 3, 1, 2))   # back to NCHW


# ------------------------------ reference (JAX) ----------------------------- #

def reference_forward(x_nchw, params):
    def bn(x, p):
        g, b, m, v = p
        return ((x - m[None, :, None, None])
                / jnp.sqrt(v[None, :, None, None] + EPS)
                * g[None, :, None, None] + b[None, :, None, None])

    def prelu(x, a):
        return jnp.where(x >= 0, x, a * x)

    def conv(x, w):
        return lax.conv_general_dilated(
            x, w, (1, 1), ((1, 1), (1, 1)),
            dimension_numbers=("NCHW", "OIHW", "NCHW"))

    out = bn(x_nchw, params["bn0"])
    out = conv(out, params["conv1_w"])
    out = bn(out, params["bn1"])
    out = prelu(out, params["prelu_a"])
    out = conv(out, params["conv2_w"])
    out = bn(out, params["bn2"])
    # SEBlock
    w1, b1, a_se, w2, b2 = params["se"]
    yv = jnp.mean(out, axis=(2, 3))
    h = prelu(yv @ w1.T + b1, a_se)
    g = jax.nn.sigmoid(h @ w2.T + b2)
    out = out * g[:, :, None, None]
    out = out + x_nchw
    return prelu(out, params["prelu_a"])


# ----------------------------------- main ----------------------------------- #

def make_params(key, channels):
    ks = jax.random.split(key, 20)

    def bn_p(k):
        k1, k2, k3, k4 = jax.random.split(k, 4)
        gamma = 1.0 + 0.1 * jax.random.normal(k1, (channels,), jnp.float32)
        beta = 0.1 * jax.random.normal(k2, (channels,), jnp.float32)
        mean = 0.1 * jax.random.normal(k3, (channels,), jnp.float32)
        var = jax.nn.softplus(jax.random.normal(k4, (channels,), jnp.float32)) + 0.5
        return (gamma, beta, mean, var)

    hidden = channels // 16  # SEBlock reduction=16
    params = {
        "bn0": bn_p(ks[0]),
        "conv1_w": 0.05 * jax.random.normal(ks[1], (channels, channels, 3, 3),
                                            jnp.float32),
        "bn1": bn_p(ks[2]),
        "prelu_a": jnp.asarray(0.25, jnp.float32),   # nn.PReLU() default init
        "conv2_w": 0.05 * jax.random.normal(ks[3], (channels, channels, 3, 3),
                                            jnp.float32),
        "bn2": bn_p(ks[4]),
        "se": (
            0.2 * jax.random.normal(ks[5], (hidden, channels), jnp.float32),  # fc1 w
            0.05 * jax.random.normal(ks[6], (hidden,), jnp.float32),          # fc1 b
            jnp.asarray(0.25, jnp.float32),                                   # SE PReLU
            0.2 * jax.random.normal(ks[7], (channels, hidden), jnp.float32),  # fc2 w
            0.05 * jax.random.normal(ks[8], (channels,), jnp.float32),        # fc2 b
        ),
    }
    return params


if __name__ == "__main__":
    key = jax.random.PRNGKey(0)
    k_x, k_p = jax.random.split(key)

    # inplanes == planes (downsample=None); channels >= 16 for SE reduction.
    # NOTE: kept small for the test; production ArcFace uses C=64..512, where
    # lane density and MXU K utilization (tap-in-K packing) become the levers.
    N, C, H, W = 2, 32, 16, 16
    x = jax.random.normal(k_x, (N, C, H, W), jnp.float32)
    params = make_params(k_p, C)

    y = jax.block_until_ready(jax.jit(ir_block_forward)(x, params))
    y_ref = jax.block_until_ready(reference_forward(x, params))

    # bf16 MXU inputs with f32 accumulation -> slightly looser tolerance than
    # the fp32 PyTorch reference (documented inference-precision choice).
    np.testing.assert_allclose(np.asarray(y), np.asarray(y_ref),
                               rtol=3e-2, atol=3e-2)
    print("KERNEL_OK")
</pallas_src>

<mosaic_0001>
module attributes {stable_mosaic.version = 11 : i64} {
  func.func @_irblock_kernel(%arg0: i32, %arg1: memref<1x256x32xf32, #tpu.memory_space<vmem>>, %arg2: memref<256x1xbf16, #tpu.memory_space<vmem>>, %arg3: memref<256x1xbf16, #tpu.memory_space<vmem>>, %arg4: memref<9x32x32xbf16, #tpu.memory_space<vmem>>, %arg5: memref<9x32x32xbf16, #tpu.memory_space<vmem>>, %arg6: memref<1x32xf32, #tpu.memory_space<vmem>>, %arg7: memref<1x32xf32, #tpu.memory_space<vmem>>, %arg8: memref<1x32xf32, #tpu.memory_space<vmem>>, %arg9: memref<1x32xf32, #tpu.memory_space<vmem>>, %arg10: memref<1x32xf32, #tpu.memory_space<vmem>>, %arg11: memref<32x8xf32, #tpu.memory_space<vmem>>, %arg12: memref<1x8xf32, #tpu.memory_space<vmem>>, %arg13: memref<8x32xf32, #tpu.memory_space<vmem>>, %arg14: memref<1x32xf32, #tpu.memory_space<vmem>>, %arg15: memref<1x1xf32, #tpu.memory_space<smem>>, %arg16: memref<1x1xf32, #tpu.memory_space<smem>>, %arg17: memref<1x256x32xf32, #tpu.memory_space<vmem>>, %arg18: memref<320x32xbf16, #tpu.memory_space<vmem>>, %arg19: memref<320x32xbf16, #tpu.memory_space<vmem>>) attributes {dimension_semantics = [#tpu.dimension_semantics<parallel>], iteration_bounds = array<i64: 2>, scalar_prefetch = 0 : i64, scratch_operands = 2 : i64, tpu.core_type = #tpu.core_type<tc>, window_params = [{transform_indices = @transform_0, window_bounds = array<i64: 1, 256, 32>}, {pipeline_mode = #tpu.pipeline_mode<synchronous>, transform_indices = @transform_1, window_bounds = array<i64: 256, 1>}, {pipeline_mode = #tpu.pipeline_mode<synchronous>, transform_indices = @transform_2, window_bounds = array<i64: 256, 1>}, {pipeline_mode = #tpu.pipeline_mode<synchronous>, transform_indices = @transform_3, window_bounds = array<i64: 9, 32, 32>}, {pipeline_mode = #tpu.pipeline_mode<synchronous>, transform_indices = @transform_4, window_bounds = array<i64: 9, 32, 32>}, {pipeline_mode = #tpu.pipeline_mode<synchronous>, transform_indices = @transform_5, window_bounds = array<i64: 1, 32>}, {pipeline_mode = #tpu.pipeline_mode<synchronous>, transform_indices = @transform_6, window_bounds = array<i64: 1, 32>}, {pipeline_mode = #tpu.pipeline_mode<synchronous>, transform_indices = @transform_7, window_bounds = array<i64: 1, 32>}, {pipeline_mode = #tpu.pipeline_mode<synchronous>, transform_indices = @transform_8, window_bounds = array<i64: 1, 32>}, {pipeline_mode = #tpu.pipeline_mode<synchronous>, transform_indices = @transform_9, window_bounds = array<i64: 1, 32>}, {pipeline_mode = #tpu.pipeline_mode<synchronous>, transform_indices = @transform_10, window_bounds = array<i64: 32, 8>}, {pipeline_mode = #tpu.pipeline_mode<synchronous>, transform_indices = @transform_11, window_bounds = array<i64: 1, 8>}, {pipeline_mode = #tpu.pipeline_mode<synchronous>, transform_indices = @transform_12, window_bounds = array<i64: 8, 32>}, {pipeline_mode = #tpu.pipeline_mode<synchronous>, transform_indices = @transform_13, window_bounds = array<i64: 1, 32>}, {transform_indices = @transform_14, window_bounds = array<i64: 1, 1>}, {transform_indices = @transform_15, window_bounds = array<i64: 1, 1>}, {transform_indices = @transform_16, window_bounds = array<i64: 1, 256, 32>}]} {
    %c0 = arith.constant 0 : index
    %c0_0 = arith.constant 0 : index
    %0 = vector.load %arg2[%c0, %c0_0] : memref<256x1xbf16, #tpu.memory_space<vmem>>, vector<256x1xbf16>
    %c0_1 = arith.constant 0 : index
    %c0_2 = arith.constant 0 : index
    %1 = vector.load %arg3[%c0_1, %c0_2] : memref<256x1xbf16, #tpu.memory_space<vmem>>, vector<256x1xbf16>
    %c0_3 = arith.constant 0 : index
    %c0_4 = arith.constant 0 : index
    %2 = memref.load %arg15[%c0_3, %c0_4] : memref<1x1xf32, #tpu.memory_space<smem>>
    %cst = arith.constant 0.000000e+00 : bf16
    %3 = vector.broadcast %cst : bf16 to vector<32x32xbf16>
    %c0_5 = arith.constant 0 : index
    %c0_6 = arith.constant 0 : index
    %c0_7 = arith.constant 0 : index
    %4 = vector.load %arg1[%c0_5, %c0_6, %c0_7] : memref<1x256x32xf32, #tpu.memory_space<vmem>>, vector<1x256x32xf32>
    %5 = vector.shape_cast %4 : vector<1x256x32xf32> to vector<256x32xf32>
    %c0_8 = arith.constant 0 : index
    %c0_9 = arith.constant 0 : index
    %6 = vector.load %arg18[%c0_8, %c0_9] : memref<320x32xbf16, #tpu.memory_space<vmem>>, vector<32x32xbf16>
    tpu.vector_store %arg18[%c0_8, %c0_9], %3 {strides = array<i32>} : memref<320x32xbf16, #tpu.memory_space<vmem>>, vector<32x32xbf16>,
    %c288 = arith.constant 288 : index
    %c0_10 = arith.constant 0 : index
    %7 = vector.load %arg18[%c288, %c0_10] : memref<320x32xbf16, #tpu.memory_space<vmem>>, vector<32x32xbf16>
    tpu.vector_store %arg18[%c288, %c0_10], %3 {strides = array<i32>} : memref<320x32xbf16, #tpu.memory_space<vmem>>, vector<32x32xbf16>,
    %c0_11 = arith.constant 0 : index
    %c0_12 = arith.constant 0 : index
    %8 = vector.load %arg6[%c0_11, %c0_12] : memref<1x32xf32, #tpu.memory_space<vmem>>, vector<1x32xf32>
    %9 = vector.broadcast %8 : vector<1x32xf32> to vector<256x32xf32>
    %10 = arith.addf %5, %9 : vector<256x32xf32>
    %11 = arith.truncf %10 : vector<256x32xf32> to vector<256x32xbf16>
    %c32 = arith.constant 32 : index
    %c0_13 = arith.constant 0 : index
    %12 = vector.load %arg18[%c32, %c0_13] : memref<320x32xbf16, #tpu.memory_space<vmem>>, vector<256x32xbf16>
    tpu.vector_store %arg18[%c32, %c0_13], %11 {strides = array<i32>} : memref<320x32xbf16, #tpu.memory_space<vmem>>, vector<256x32xbf16>,
    %cst_14 = arith.constant 0.000000e+00 : f32
    %13 = vector.broadcast %cst_14 : f32 to vector<256x32xf32>
    %c15 = arith.constant 15 : index
    %c0_15 = arith.constant 0 : index
    %14 = vector.load %arg18[%c15, %c0_15] : memref<320x32xbf16, #tpu.memory_space<vmem>>, vector<256x32xbf16>
    %15 = vector.broadcast %0 : vector<256x1xbf16> to vector<256x32xbf16>
    %16 = arith.mulf %14, %15 : vector<256x32xbf16>
    %c0_16 = arith.constant 0 : index
    %c0_17 = arith.constant 0 : index
    %c0_18 = arith.constant 0 : index
    %17 = vector.load %arg4[%c0_16, %c0_17, %c0_18] : memref<9x32x32xbf16, #tpu.memory_space<vmem>>, vector<1x32x32xbf16>
    %18 = vector.shape_cast %17 : vector<1x32x32xbf16> to vector<32x32xbf16>
    %cst_19 = arith.constant dense<0.000000e+00> : vector<256x32xf32>
    %19 = tpu.matmul %16, %18, %cst_19 {dimension_numbers = #tpu.dot_dimension_numbers<[1], [0], [0], [1], [0, 0, 1, 1], [], []>} : vector<256x32xbf16>, vector<32x32xbf16>, vector<256x32xf32> -> vector<256x32xf32>
    %20 = arith.addf %13, %19 : vector<256x32xf32>
    %c16 = arith.constant 16 : index
    %c0_20 = arith.constant 0 : index
    %21 = vector.load %arg18[%c16, %c0_20] : memref<320x32xbf16, #tpu.memory_space<vmem>>, vector<256x32xbf16>
    %c1 = arith.constant 1 : index
    %c0_21 = arith.constant 0 : index
    %c0_22 = arith.constant 0 : index
    %22 = vector.load %arg4[%c1, %c0_21, %c0_22] : memref<9x32x32xbf16, #tpu.memory_space<vmem>>, vector<1x32x32xbf16>
    %23 = vector.shape_cast %22 : vector<1x32x32xbf16> to vector<32x32xbf16>
    %cst_23 = arith.constant dense<0.000000e+00> : vector<256x32xf32>
    %24 = tpu.matmul %21, %23, %cst_23 {dimension_numbers = #tpu.dot_dimension_numbers<[1], [0], [0], [1], [0, 0, 1, 1], [], []>} : vector<256x32xbf16>, vector<32x32xbf16>, vector<256x32xf32> -> vector<256x32xf32>
    %25 = arith.addf %20, %24 : vector<256x32xf32>
    %c17 = arith.constant 17 : index
    %c0_24 = arith.constant 0 : index
    %26 = vector.load %arg18[%c17, %c0_24] : memref<320x32xbf16, #tpu.memory_space<vmem>>, vector<256x32xbf16>
    %27 = vector.broadcast %1 : vector<256x1xbf16> to vector<256x32xbf16>
    %28 = arith.mulf %26, %27 : vector<256x32xbf16>
    %c2 = arith.constant 2 : index
    %c0_25 = arith.constant 0 : index
    %c0_26 = arith.constant 0 : index
    %29 = vector.load %arg4[%c2, %c0_25, %c0_26] : memref<9x32x32xbf16, #tpu.memory_space<vmem>>, vector<1x32x32xbf16>
    %30 = vector.shape_cast %29 : vector<1x32x32xbf16> to vector<32x32xbf16>
    %cst_27 = arith.constant dense<0.000000e+00> : vector<256x32xf32>
    %31 = tpu.matmul %28, %30, %cst_27 {dimension_numbers = #tpu.dot_dimension_numbers<[1], [0], [0], [1], [0, 0, 1, 1], [], []>} : vector<256x32xbf16>, vector<32x32xbf16>, vector<256x32xf32> -> vector<256x32xf32>
    %32 = arith.addf %25, %31 : vector<256x32xf32>
    %c31 = arith.constant 31 : index
    %c0_28 = arith.constant 0 : index
    %33 = vector.load %arg18[%c31, %c0_28] : memref<320x32xbf16, #tpu.memory_space<vmem>>, vector<256x32xbf16>
    %34 = vector.broadcast %0 : vector<256x1xbf16> to vector<256x32xbf16>
    %35 = arith.mulf %33, %34 : vector<256x32xbf16>
    %c3 = arith.constant 3 : index
    %c0_29 = arith.constant 0 : index
    %c0_30 = arith.constant 0 : index
    %36 = vector.load %arg4[%c3, %c0_29, %c0_30] : memref<9x32x32xbf16, #tpu.memory_space<vmem>>, vector<1x32x32xbf16>
    %37 = vector.shape_cast %36 : vector<1x32x32xbf16> to vector<32x32xbf16>
    %cst_31 = arith.constant dense<0.000000e+00> : vector<256x32xf32>
    %38 = tpu.matmul %35, %37, %cst_31 {dimension_numbers = #tpu.dot_dimension_numbers<[1], [0], [0], [1], [0, 0, 1, 1], [], []>} : vector<256x32xbf16>, vector<32x32xbf16>, vector<256x32xf32> -> vector<256x32xf32>
    %39 = arith.addf %32, %38 : vector<256x32xf32>
    %c32_32 = arith.constant 32 : index
    %c0_33 = arith.constant 0 : index
    %40 = vector.load %arg18[%c32_32, %c0_33] : memref<320x32xbf16, #tpu.memory_space<vmem>>, vector<256x32xbf16>
    %c4 = arith.constant 4 : index
    %c0_34 = arith.constant 0 : index
    %c0_35 = arith.constant 0 : index
    %41 = vector.load %arg4[%c4, %c0_34, %c0_35] : memref<9x32x32xbf16, #tpu.memory_space<vmem>>, vector<1x32x32xbf16>
    %42 = vector.shape_cast %41 : vector<1x32x32xbf16> to vector<32x32xbf16>
    %cst_36 = arith.constant dense<0.000000e+00> : vector<256x32xf32>
    %43 = tpu.matmul %40, %42, %cst_36 {dimension_numbers = #tpu.dot_dimension_numbers<[1], [0], [0], [1], [0, 0, 1, 1], [], []>} : vector<256x32xbf16>, vector<32x32xbf16>, vector<256x32xf32> -> vector<256x32xf32>
    %44 = arith.addf %39, %43 : vector<256x32xf32>
    %c33 = arith.constant 33 : index
    %c0_37 = arith.constant 0 : index
    %45 = vector.load %arg18[%c33, %c0_37] : memref<320x32xbf16, #tpu.memory_space<vmem>>, vector<256x32xbf16>
    %46 = vector.broadcast %1 : vector<256x1xbf16> to vector<256x32xbf16>
    %47 = arith.mulf %45, %46 : vector<256x32xbf16>
    %c5 = arith.constant 5 : index
    %c0_38 = arith.constant 0 : index
    %c0_39 = arith.constant 0 : index
    %48 = vector.load %arg4[%c5, %c0_38, %c0_39] : memref<9x32x32xbf16, #tpu.memory_space<vmem>>, vector<1x32x32xbf16>
    %49 = vector.shape_cast %48 : vector<1x32x32xbf16> to vector<32x32xbf16>
    %cst_40 = arith.constant dense<0.000000e+00> : vector<256x32xf32>
    %50 = tpu.matmul %47, %49, %cst_40 {dimension_numbers = #tpu.dot_dimension_numbers<[1], [0], [0], [1], [0, 0, 1, 1], [], []>} : vector<256x32xbf16>, vector<32x32xbf16>, vector<256x32xf32> -> vector<256x32xf32>
    %51 = arith.addf %44, %50 : vector<256x32xf32>
    %c47 = arith.constant 47 : index
    %c0_41 = arith.constant 0 : index
    %52 = vector.load %arg18[%c47, %c0_41] : memref<320x32xbf16, #tpu.memory_space<vmem>>, vector<256x32xbf16>
    %53 = vector.broadcast %0 : vector<256x1xbf16> to vector<256x32xbf16>
    %54 = arith.mulf %52, %53 : vector<256x32xbf16>
    %c6 = arith.constant 6 : index
    %c0_42 = arith.constant 0 : index
    %c0_43 = arith.constant 0 : index
    %55 = vector.load %arg4[%c6, %c0_42, %c0_43] : memref<9x32x32xbf16, #tpu.memory_space<vmem>>, vector<1x32x32xbf16>
    %56 = vector.shape_cast %55 : vector<1x32x32xbf16> to vector<32x32xbf16>
    %cst_44 = arith.constant dense<0.000000e+00> : vector<256x32xf32>
    %57 = tpu.matmul %54, %56, %cst_44 {dimension_numbers = #tpu.dot_dimension_numbers<[1], [0], [0], [1], [0, 0, 1, 1], [], []>} : vector<256x32xbf16>, vector<32x32xbf16>, vector<256x32xf32> -> vector<256x32xf32>
    %58 = arith.addf %51, %57 : vector<256x32xf32>
    %c48 = arith.constant 48 : index
    %c0_45 = arith.constant 0 : index
    %59 = vector.load %arg18[%c48, %c0_45] : memref<320x32xbf16, #tpu.memory_space<vmem>>, vector<256x32xbf16>
    %c7 = arith.constant 7 : index
    %c0_46 = arith.constant 0 : index
    %c0_47 = arith.constant 0 : index
    %60 = vector.load %arg4[%c7, %c0_46, %c0_47] : memref<9x32x32xbf16, #tpu.memory_space<vmem>>, vector<1x32x32xbf16>
    %61 = vector.shape_cast %60 : vector<1x32x32xbf16> to vector<32x32xbf16>
    %cst_48 = arith.constant dense<0.000000e+00> : vector<256x32xf32>
    %62 = tpu.matmul %59, %61, %cst_48 {dimension_numbers = #tpu.dot_dimension_numbers<[1], [0], [0], [1], [0, 0, 1, 1], [], []>} : vector<256x32xbf16>, vector<32x32xbf16>, vector<256x32xf32> -> vector<256x32xf32>
    %63 = arith.addf %58, %62 : vector<256x32xf32>
    %c49 = arith.constant 49 : index
    %c0_49 = arith.constant 0 : index
    %64 = vector.load %arg18[%c49, %c0_49] : memref<320x32xbf16, #tpu.memory_space<vmem>>, vector<256x32xbf16>
    %65 = vector.broadcast %1 : vector<256x1xbf16> to vector<256x32xbf16>
    %66 = arith.mulf %64, %65 : vector<256x32xbf16>
    %c8 = arith.constant 8 : index
    %c0_50 = arith.constant 0 : index
    %c0_51 = arith.constant 0 : index
    %67 = vector.load %arg4[%c8, %c0_50, %c0_51] : memref<9x32x32xbf16, #tpu.memory_space<vmem>>, vector<1x32x32xbf16>
    %68 = vector.shape_cast %67 : vector<1x32x32xbf16> to vector<32x32xbf16>
    %cst_52 = arith.constant dense<0.000000e+00> : vector<256x32xf32>
    %69 = tpu.matmul %66, %68, %cst_52 {dimension_numbers = #tpu.dot_dimension_numbers<[1], [0], [0], [1], [0, 0, 1, 1], [], []>} : vector<256x32xbf16>, vector<32x32xbf16>, vector<256x32xf32> -> vector<256x32xf32>
    %70 = arith.addf %63, %69 : vector<256x32xf32>
    %c0_53 = arith.constant 0 : index
    %c0_54 = arith.constant 0 : index
    %71 = vector.load %arg7[%c0_53, %c0_54] : memref<1x32xf32, #tpu.memory_space<vmem>>, vector<1x32xf32>
    %72 = vector.broadcast %71 : vector<1x32xf32> to vector<256x32xf32>
    %73 = arith.mulf %70, %72 : vector<256x32xf32>
    %c0_55 = arith.constant 0 : index
    %c0_56 = arith.constant 0 : index
    %74 = vector.load %arg8[%c0_55, %c0_56] : memref<1x32xf32, #tpu.memory_space<vmem>>, vector<1x32xf32>
    %75 = vector.broadcast %74 : vector<1x32xf32> to vector<256x32xf32>
    %76 = arith.addf %73, %75 : vector<256x32xf32>
    %cst_57 = arith.constant 0.000000e+00 : f32
    %77 = vector.broadcast %cst_57 : f32 to vector<256x32xf32>
    %78 = arith.cmpf oge, %76, %77 : vector<256x32xf32>
    %79 = vector.broadcast %2 : f32 to vector<256x32xf32>
    %80 = arith.mulf %79, %76 : vector<256x32xf32>
    %81 = arith.select %78, %76, %80 : vector<256x32xi1>, vector<256x32xf32>
    %c0_58 = arith.constant 0 : index
    %c0_59 = arith.constant 0 : index
    %82 = vector.load %arg19[%c0_58, %c0_59] : memref<320x32xbf16, #tpu.memory_space<vmem>>, vector<32x32xbf16>
    tpu.vector_store %arg19[%c0_58, %c0_59], %3 {strides = array<i32>} : memref<320x32xbf16, #tpu.memory_space<vmem>>, vector<32x32xbf16>,
    %c288_60 = arith.constant 288 : index
    %c0_61 = arith.constant 0 : index
    %83 = vector.load %arg19[%c288_60, %c0_61] : memref<320x32xbf16, #tpu.memory_space<vmem>>, vector<32x32xbf16>
    tpu.vector_store %arg19[%c288_60, %c0_61], %3 {strides = array<i32>} : memref<320x32xbf16, #tpu.memory_space<vmem>>, vector<32x32xbf16>,
    %84 = arith.truncf %81 : vector<256x32xf32> to vector<256x32xbf16>
    %c32_62 = arith.constant 32 : index
    %c0_63 = arith.constant 0 : index
    %85 = vector.load %arg19[%c32_62, %c0_63] : memref<320x32xbf16, #tpu.memory_space<vmem>>, vector<256x32xbf16>
    tpu.vector_store %arg19[%c32_62, %c0_63], %84 {strides = array<i32>} : memref<320x32xbf16, #tpu.memory_space<vmem>>, vector<256x32xbf16>,
    %cst_64 = arith.constant 0.000000e+00 : f32
    %86 = vector.broadcast %cst_64 : f32 to vector<256x32xf32>
    %c15_65 = arith.constant 15 : index
    %c0_66 = arith.constant 0 : index
    %87 = vector.load %arg19[%c15_65, %c0_66] : memref<320x32xbf16, #tpu.memory_space<vmem>>, vector<256x32xbf16>
    %88 = vector.broadcast %0 : vector<256x1xbf16> to vector<256x32xbf16>
    %89 = arith.mulf %87, %88 : vector<256x32xbf16>
    %c0_67 = arith.constant 0 : index
    %c0_68 = arith.constant 0 : index
    %c0_69 = arith.constant 0 : index
    %90 = vector.load %arg5[%c0_67, %c0_68, %c0_69] : memref<9x32x32xbf16, #tpu.memory_space<vmem>>, vector<1x32x32xbf16>
    %91 = vector.shape_cast %90 : vector<1x32x32xbf16> to vector<32x32xbf16>
    %cst_70 = arith.constant dense<0.000000e+00> : vector<256x32xf32>
    %92 = tpu.matmul %89, %91, %cst_70 {dimension_numbers = #tpu.dot_dimension_numbers<[1], [0], [0], [1], [0, 0, 1, 1], [], []>} : vector<256x32xbf16>, vector<32x32xbf16>, vector<256x32xf32> -> vector<256x32xf32>
    %93 = arith.addf %86, %92 : vector<256x32xf32>
    %c16_71 = arith.constant 16 : index
    %c0_72 = arith.constant 0 : index
    %94 = vector.load %arg19[%c16_71, %c0_72] : memref<320x32xbf16, #tpu.memory_space<vmem>>, vector<256x32xbf16>
    %c1_73 = arith.constant 1 : index
    %c0_74 = arith.constant 0 : index
    %c0_75 = arith.constant 0 : index
    %95 = vector.load %arg5[%c1_73, %c0_74, %c0_75] : memref<9x32x32xbf16, #tpu.memory_space<vmem>>, vector<1x32x32xbf16>
    %96 = vector.shape_cast %95 : vector<1x32x32xbf16> to vector<32x32xbf16>
    %cst_76 = arith.constant dense<0.000000e+00> : vector<256x32xf32>
    %97 = tpu.matmul %94, %96, %cst_76 {dimension_numbers = #tpu.dot_dimension_numbers<[1], [0], [0], [1], [0, 0, 1, 1], [], []>} : vector<256x32xbf16>, vector<32x32xbf16>, vector<256x32xf32> -> vector<256x32xf32>
    %98 = arith.addf %93, %97 : vector<256x32xf32>
    %c17_77 = arith.constant 17 : index
    %c0_78 = arith.constant 0 : index
    %99 = vector.load %arg19[%c17_77, %c0_78] : memref<320x32xbf16, #tpu.memory_space<vmem>>, vector<256x32xbf16>
    %100 = vector.broadcast %1 : vector<256x1xbf16> to vector<256x32xbf16>
    %101 = arith.mulf %99, %100 : vector<256x32xbf16>
    %c2_79 = arith.constant 2 : index
    %c0_80 = arith.constant 0 : index
    %c0_81 = arith.constant 0 : index
    %102 = vector.load %arg5[%c2_79, %c0_80, %c0_81] : memref<9x32x32xbf16, #tpu.memory_space<vmem>>, vector<1x32x32xbf16>
    %103 = vector.shape_cast %102 : vector<1x32x32xbf16> to vector<32x32xbf16>
    %cst_82 = arith.constant dense<0.000000e+00> : vector<256x32xf32>
    %104 = tpu.matmul %101, %103, %cst_82 {dimension_numbers = #tpu.dot_dimension_numbers<[1], [0], [0], [1], [0, 0, 1, 1], [], []>} : vector<256x32xbf16>, vector<32x32xbf16>, vector<256x32xf32> -> vector<256x32xf32>
    %105 = arith.addf %98, %104 : vector<256x32xf32>
    %c31_83 = arith.constant 31 : index
    %c0_84 = arith.constant 0 : index
    %106 = vector.load %arg19[%c31_83, %c0_84] : memref<320x32xbf16, #tpu.memory_space<vmem>>, vector<256x32xbf16>
    %107 = vector.broadcast %0 : vector<256x1xbf16> to vector<256x32xbf16>
    %108 = arith.mulf %106, %107 : vector<256x32xbf16>
    %c3_85 = arith.constant 3 : index
    %c0_86 = arith.constant 0 : index
    %c0_87 = arith.constant 0 : index
    %109 = vector.load %arg5[%c3_85, %c0_86, %c0_87] : memref<9x32x32xbf16, #tpu.memory_space<vmem>>, vector<1x32x32xbf16>
    %110 = vector.shape_cast %109 : vector<1x32x32xbf16> to vector<32x32xbf16>
    %cst_88 = arith.constant dense<0.000000e+00> : vector<256x32xf32>
    %111 = tpu.matmul %108, %110, %cst_88 {dimension_numbers = #tpu.dot_dimension_numbers<[1], [0], [0], [1], [0, 0, 1, 1], [], []>} : vector<256x32xbf16>, vector<32x32xbf16>, vector<256x32xf32> -> vector<256x32xf32>
    %112 = arith.addf %105, %111 : vector<256x32xf32>
    %c32_89 = arith.constant 32 : index
    %c0_90 = arith.constant 0 : index
    %113 = vector.load %arg19[%c32_89, %c0_90] : memref<320x32xbf16, #tpu.memory_space<vmem>>, vector<256x32xbf16>
    %c4_91 = arith.constant 4 : index
    %c0_92 = arith.constant 0 : index
    %c0_93 = arith.constant 0 : index
    %114 = vector.load %arg5[%c4_91, %c0_92, %c0_93] : memref<9x32x32xbf16, #tpu.memory_space<vmem>>, vector<1x32x32xbf16>
    %115 = vector.shape_cast %114 : vector<1x32x32xbf16> to vector<32x32xbf16>
    %cst_94 = arith.constant dense<0.000000e+00> : vector<256x32xf32>
    %116 = tpu.matmul %113, %115, %cst_94 {dimension_numbers = #tpu.dot_dimension_numbers<[1], [0], [0], [1], [0, 0, 1, 1], [], []>} : vector<256x32xbf16>, vector<32x32xbf16>, vector<256x32xf32> -> vector<256x32xf32>
    %117 = arith.addf %112, %116 : vector<256x32xf32>
    %c33_95 = arith.constant 33 : index
    %c0_96 = arith.constant 0 : index
    %118 = vector.load %arg19[%c33_95, %c0_96] : memref<320x32xbf16, #tpu.memory_space<vmem>>, vector<256x32xbf16>
    %119 = vector.broadcast %1 : vector<256x1xbf16> to vector<256x32xbf16>
    %120 = arith.mulf %118, %119 : vector<256x32xbf16>
    %c5_97 = arith.constant 5 : index
    %c0_98 = arith.constant 0 : index
    %c0_99 = arith.constant 0 : index
    %121 = vector.load %arg5[%c5_97, %c0_98, %c0_99] : memref<9x32x32xbf16, #tpu.memory_space<vmem>>, vector<1x32x32xbf16>
    %122 = vector.shape_cast %121 : vector<1x32x32xbf16> to vector<32x32xbf16>
    %cst_100 = arith.constant dense<0.000000e+00> : vector<256x32xf32>
    %123 = tpu.matmul %120, %122, %cst_100 {dimension_numbers = #tpu.dot_dimension_numbers<[1], [0], [0], [1], [0, 0, 1, 1], [], []>} : vector<256x32xbf16>, vector<32x32xbf16>, vector<256x32xf32> -> vector<256x32xf32>
    %124 = arith.addf %117, %123 : vector<256x32xf32>
    %c47_101 = arith.constant 47 : index
    %c0_102 = arith.constant 0 : index
    %125 = vector.load %arg19[%c47_101, %c0_102] : memref<320x32xbf16, #tpu.memory_space<vmem>>, vector<256x32xbf16>
    %126 = vector.broadcast %0 : vector<256x1xbf16> to vector<256x32xbf16>
    %127 = arith.mulf %125, %126 : vector<256x32xbf16>
    %c6_103 = arith.constant 6 : index
    %c0_104 = arith.constant 0 : index
    %c0_105 = arith.constant 0 : index
    %128 = vector.load %arg5[%c6_103, %c0_104, %c0_105] : memref<9x32x32xbf16, #tpu.memory_space<vmem>>, vector<1x32x32xbf16>
    %129 = vector.shape_cast %128 : vector<1x32x32xbf16> to vector<32x32xbf16>
    %cst_106 = arith.constant dense<0.000000e+00> : vector<256x32xf32>
    %130 = tpu.matmul %127, %129, %cst_106 {dimension_numbers = #tpu.dot_dimension_numbers<[1], [0], [0], [1], [0, 0, 1, 1], [], []>} : vector<256x32xbf16>, vector<32x32xbf16>, vector<256x32xf32> -> vector<256x32xf32>
    %131 = arith.addf %124, %130 : vector<256x32xf32>
    %c48_107 = arith.constant 48 : index
    %c0_108 = arith.constant 0 : index
    %132 = vector.load %arg19[%c48_107, %c0_108] : memref<320x32xbf16, #tpu.memory_space<vmem>>, vector<256x32xbf16>
    %c7_109 = arith.constant 7 : index
    %c0_110 = arith.constant 0 : index
    %c0_111 = arith.constant 0 : index
    %133 = vector.load %arg5[%c7_109, %c0_110, %c0_111] : memref<9x32x32xbf16, #tpu.memory_space<vmem>>, vector<1x32x32xbf16>
    %134 = vector.shape_cast %133 : vector<1x32x32xbf16> to vector<32x32xbf16>
    %cst_112 = arith.constant dense<0.000000e+00> : vector<256x32xf32>
    %135 = tpu.matmul %132, %134, %cst_112 {dimension_numbers = #tpu.dot_dimension_numbers<[1], [0], [0], [1], [0, 0, 1, 1], [], []>} : vector<256x32xbf16>, vector<32x32xbf16>, vector<256x32xf32> -> vector<256x32xf32>
    %136 = arith.addf %131, %135 : vector<256x32xf32>
    %c49_113 = arith.constant 49 : index
    %c0_114 = arith.constant 0 : index
    %137 = vector.load %arg19[%c49_113, %c0_114] : memref<320x32xbf16, #tpu.memory_space<vmem>>, vector<256x32xbf16>
    %138 = vector.broadcast %1 : vector<256x1xbf16> to vector<256x32xbf16>
    %139 = arith.mulf %137, %138 : vector<256x32xbf16>
    %c8_115 = arith.constant 8 : index
    %c0_116 = arith.constant 0 : index
    %c0_117 = arith.constant 0 : index
    %140 = vector.load %arg5[%c8_115, %c0_116, %c0_117] : memref<9x32x32xbf16, #tpu.memory_space<vmem>>, vector<1x32x32xbf16>
    %141 = vector.shape_cast %140 : vector<1x32x32xbf16> to vector<32x32xbf16>
    %cst_118 = arith.constant dense<0.000000e+00> : vector<256x32xf32>
    %142 = tpu.matmul %139, %141, %cst_118 {dimension_numbers = #tpu.dot_dimension_numbers<[1], [0], [0], [1], [0, 0, 1, 1], [], []>} : vector<256x32xbf16>, vector<32x32xbf16>, vector<256x32xf32> -> vector<256x32xf32>
    %143 = arith.addf %136, %142 : vector<256x32xf32>
    %c0_119 = arith.constant 0 : index
    %c0_120 = arith.constant 0 : index
    %144 = vector.load %arg9[%c0_119, %c0_120] : memref<1x32xf32, #tpu.memory_space<vmem>>, vector<1x32xf32>
    %145 = vector.broadcast %144 : vector<1x32xf32> to vector<256x32xf32>
    %146 = arith.mulf %143, %145 : vector<256x32xf32>
    %c0_121 = arith.constant 0 : index
    %c0_122 = arith.constant 0 : index
    %147 = vector.load %arg10[%c0_121, %c0_122] : memref<1x32xf32, #tpu.memory_space<vmem>>, vector<1x32xf32>
    %148 = vector.broadcast %147 : vector<1x32xf32> to vector<256x32xf32>
    %149 = arith.addf %146, %148 : vector<256x32xf32>
    %cst_123 = arith.constant dense<0.000000e+00> : vector<32xf32>
    %150 = vector.multi_reduction <add>, %149, %cst_123 [0] : vector<256x32xf32> to vector<32xf32>
    %151 = vector.shape_cast %150 : vector<32xf32> to vector<1x32xf32>
    %cst_124 = arith.constant 3.906250e-03 : f32
    %152 = vector.broadcast %cst_124 : f32 to vector<1x32xf32>
    %153 = arith.mulf %151, %152 : vector<1x32xf32>
    %c0_125 = arith.constant 0 : index
    %c0_126 = arith.constant 0 : index
    %154 = vector.load %arg11[%c0_125, %c0_126] : memref<32x8xf32, #tpu.memory_space<vmem>>, vector<32x8xf32>
    %cst_127 = arith.constant dense<0.000000e+00> : vector<1x8xf32>
    %155 = tpu.matmul %153, %154, %cst_127 {dimension_numbers = #tpu.dot_dimension_numbers<[1], [0], [0], [1], [0, 0, 1, 1], [], []>} : vector<1x32xf32>, vector<32x8xf32>, vector<1x8xf32> -> vector<1x8xf32>
    %c0_128 = arith.constant 0 : index
    %c0_129 = arith.constant 0 : index
    %156 = vector.load %arg12[%c0_128, %c0_129] : memref<1x8xf32, #tpu.memory_space<vmem>>, vector<1x8xf32>
    %157 = arith.addf %155, %156 : vector<1x8xf32>
    %c0_130 = arith.constant 0 : index
    %c0_131 = arith.constant 0 : index
    %158 = memref.load %arg16[%c0_130, %c0_131] : memref<1x1xf32, #tpu.memory_space<smem>>
    %cst_132 = arith.constant 0.000000e+00 : f32
    %159 = vector.broadcast %cst_132 : f32 to vector<1x8xf32>
    %160 = arith.cmpf oge, %157, %159 : vector<1x8xf32>
    %161 = vector.broadcast %158 : f32 to vector<1x8xf32>
    %162 = arith.mulf %161, %157 : vector<1x8xf32>
    %163 = arith.select %160, %157, %162 : vector<1x8xi1>, vector<1x8xf32>
    %c0_133 = arith.constant 0 : index
    %c0_134 = arith.constant 0 : index
    %164 = vector.load %arg13[%c0_133, %c0_134] : memref<8x32xf32, #tpu.memory_space<vmem>>, vector<8x32xf32>
    %cst_135 = arith.constant dense<0.000000e+00> : vector<1x32xf32>
    %165 = tpu.matmul %163, %164, %cst_135 {dimension_numbers = #tpu.dot_dimension_numbers<[1], [0], [0], [1], [0, 0, 1, 1], [], []>} : vector<1x8xf32>, vector<8x32xf32>, vector<1x32xf32> -> vector<1x32xf32>
    %c0_136 = arith.constant 0 : index
    %c0_137 = arith.constant 0 : index
    %166 = vector.load %arg14[%c0_136, %c0_137] : memref<1x32xf32, #tpu.memory_space<vmem>>, vector<1x32xf32>
    %167 = arith.addf %165, %166 : vector<1x32xf32>
    %cst_138 = arith.constant 0.000000e+00 : f32
    %168 = vector.broadcast %cst_138 : f32 to vector<1x32xf32>
    %169 = arith.subf %168, %167 : vector<1x32xf32>
    %170 = math.exp %169 : vector<1x32xf32>
    %cst_139 = arith.constant 1.000000e+00 : f32
    %171 = vector.broadcast %cst_139 : f32 to vector<1x32xf32>
    %172 = arith.addf %171, %170 : vector<1x32xf32>
    %cst_140 = arith.constant 1.000000e+00 : f32
    %173 = vector.broadcast %cst_140 : f32 to vector<1x32xf32>
    %174 = arith.divf %173, %172 : vector<1x32xf32>
    %175 = vector.broadcast %174 : vector<1x32xf32> to vector<256x32xf32>
    %176 = arith.mulf %149, %175 : vector<256x32xf32>
    %177 = arith.addf %176, %5 : vector<256x32xf32>
    %cst_141 = arith.constant 0.000000e+00 : f32
    %178 = vector.broadcast %cst_141 : f32 to vector<256x32xf32>
    %179 = arith.cmpf oge, %177, %178 : vector<256x32xf32>
    %180 = vector.broadcast %2 : f32 to vector<256x32xf32>
    %181 = arith.mulf %180, %177 : vector<256x32xf32>
    %182 = arith.select %179, %177, %181 : vector<256x32xi1>, vector<256x32xf32>
    %c0_142 = arith.constant 0 : index
    %c0_143 = arith.constant 0 : index
    %c0_144 = arith.constant 0 : index
    %183 = vector.load %arg17[%c0_142, %c0_143, %c0_144] : memref<1x256x32xf32, #tpu.memory_space<vmem>>, vector<1x256x32xf32>
    %184 = vector.shape_cast %183 : vector<1x256x32xf32> to vector<256x32xf32>
    %185 = vector.shape_cast %182 : vector<256x32xf32> to vector<1x256x32xf32>
    tpu.vector_store %arg17[%c0_142, %c0_143, %c0_144], %185 {strides = array<i32>} : memref<1x256x32xf32, #tpu.memory_space<vmem>>, vector<1x256x32xf32>,
    return
  }
  func.func @transform_0(%arg0: i32) -> (i32, i32, i32) {
    %c0_i32 = arith.constant 0 : i32
    %c0_i32_0 = arith.constant 0 : i32
    %c0_i32_1 = arith.constant 0 : i32
    return %arg0, %c0_i32, %c0_i32_0 : i32, i32, i32
  }
  func.func @transform_1(%arg0: i32) -> (i32, i32) {
    %c0_i32 = arith.constant 0 : i32
    %c0_i32_0 = arith.constant 0 : i32
    %c0_i32_1 = arith.constant 0 : i32
    return %c0_i32, %c0_i32_0 : i32, i32
  }
  func.func @transform_2(%arg0: i32) -> (i32, i32) {
    %c0_i32 = arith.constant 0 : i32
    %c0_i32_0 = arith.constant 0 : i32
    %c0_i32_1 = arith.constant 0 : i32
    return %c0_i32, %c0_i32_0 : i32, i32
  }
  func.func @transform_3(%arg0: i32) -> (i32, i32, i32) {
    %c0_i32 = arith.constant 0 : i32
    %c0_i32_0 = arith.constant 0 : i32
    %c0_i32_1 = arith.constant 0 : i32
    %c0_i32_2 = arith.constant 0 : i32
    return %c0_i32, %c0_i32_0, %c0_i32_1 : i32, i32, i32
  }
  func.func @transform_4(%arg0: i32) -> (i32, i32, i32) {
    %c0_i32 = arith.constant 0 : i32
    %c0_i32_0 = arith.constant 0 : i32
    %c0_i32_1 = arith.constant 0 : i32
    %c0_i32_2 = arith.constant 0 : i32
    return %c0_i32, %c0_i32_0, %c0_i32_1 : i32, i32, i32
  }
  func.func @transform_5(%arg0: i32) -> (i32, i32) {
    %c0_i32 = arith.constant 0 : i32
    %c0_i32_0 = arith.constant 0 : i32
    %c0_i32_1 = arith.constant 0 : i32
    return %c0_i32, %c0_i32_0 : i32, i32
  }
  func.func @transform_6(%arg0: i32) -> (i32, i32) {
    %c0_i32 = arith.constant 0 : i32
    %c0_i32_0 = arith.constant 0 : i32
    %c0_i32_1 = arith.constant 0 : i32
    return %c0_i32, %c0_i32_0 : i32, i32
  }
  func.func @transform_7(%arg0: i32) -> (i32, i32) {
    %c0_i32 = arith.constant 0 : i32
    %c0_i32_0 = arith.constant 0 : i32
    %c0_i32_1 = arith.constant 0 : i32
    return %c0_i32, %c0_i32_0 : i32, i32
  }
  func.func @transform_8(%arg0: i32) -> (i32, i32) {
    %c0_i32 = arith.constant 0 : i32
    %c0_i32_0 = arith.constant 0 : i32
    %c0_i32_1 = arith.constant 0 : i32
    return %c0_i32, %c0_i32_0 : i32, i32
  }
  func.func @transform_9(%arg0: i32) -> (i32, i32) {
    %c0_i32 = arith.constant 0 : i32
    %c0_i32_0 = arith.constant 0 : i32
    %c0_i32_1 = arith.constant 0 : i32
    return %c0_i32, %c0_i32_0 : i32, i32
  }
  func.func @transform_10(%arg0: i32) -> (i32, i32) {
    %c0_i32 = arith.constant 0 : i32
    %c0_i32_0 = arith.constant 0 : i32
    %c0_i32_1 = arith.constant 0 : i32
    return %c0_i32, %c0_i32_0 : i32, i32
  }
  func.func @transform_11(%arg0: i32) -> (i32, i32) {
    %c0_i32 = arith.constant 0 : i32
    %c0_i32_0 = arith.constant 0 : i32
    %c0_i32_1 = arith.constant 0 : i32
    return %c0_i32, %c0_i32_0 : i32, i32
  }
  func.func @transform_12(%arg0: i32) -> (i32, i32) {
    %c0_i32 = arith.constant 0 : i32
    %c0_i32_0 = arith.constant 0 : i32
    %c0_i32_1 = arith.constant 0 : i32
    return %c0_i32, %c0_i32_0 : i32, i32
  }
  func.func @transform_13(%arg0: i32) -> (i32, i32) {
    %c0_i32 = arith.constant 0 : i32
    %c0_i32_0 = arith.constant 0 : i32
    %c0_i32_1 = arith.constant 0 : i32
    return %c0_i32, %c0_i32_0 : i32, i32
  }
  func.func @transform_14(%arg0: i32) -> (i32, i32) {
    %c0_i32 = arith.constant 0 : i32
    %c0_i32_0 = arith.constant 0 : i32
    %c0_i32_1 = arith.constant 0 : i32
    return %c0_i32, %c0_i32_0 : i32, i32
  }
  func.func @transform_15(%arg0: i32) -> (i32, i32) {
    %c0_i32 = arith.constant 0 : i32
    %c0_i32_0 = arith.constant 0 : i32
    %c0_i32_1 = arith.constant 0 : i32
    return %c0_i32, %c0_i32_0 : i32, i32
  }
  func.func @transform_16(%arg0: i32) -> (i32, i32, i32) {
    %c0_i32 = arith.constant 0 : i32
    %c0_i32_0 = arith.constant 0 : i32
    %c0_i32_1 = arith.constant 0 : i32
    return %arg0, %c0_i32, %c0_i32_0 : i32, i32, i32
  }
}

</mosaic_0001>

<bundles_post_ra>
// kernel: ir_block_forward.1
= control target key start
LH: loop header
LB: loop body
LE: loop exit
PB: predicated region body
PF: predicated region fallthrough
CT: control target
= control target key end

     0   :  { %s18675_s0 = inlined_call_operand.vmem [shape: f32[2,256,32], index: 0, kind: input, shape index: {}]   ;;  %s18676_s1 = inlined_call_operand.vmem [shape: bf16[256,1], index: 1, kind: input, shape index: {}]   ;;  %s18677_s2 = inlined_call_operand.vmem [shape: bf16[256,1], index: 2, kind: input, shape index: {}]   ;;  %s18678_s3 = inlined_call_operand.vmem [shape: bf16[9,32,32], index: 3, kind: input, shape index: {}]   ;;  %s18679_s4 = inlined_call_operand.vmem [shape: bf16[9,32,32], index: 4, kind: input, shape index: {}]   ;;  %s18680_s5 = inlined_call_operand.vmem [shape: f32[1,32], index: 5, kind: input, shape index: {}]   ;;  %s18681_s6 = inlined_call_operand.vmem [shape: f32[1,32], index: 6, kind: input, shape index: {}]   ;;  %s18682_s7 = inlined_call_operand.vmem [shape: f32[1,32], index: 7, kind: input, shape index: {}]   ;;  %s18683_s8 = inlined_call_operand.vmem [shape: f32[1,32], index: 8, kind: input, shape index: {}]   ;;  %s18684_s9 = inlined_call_operand.vmem [shape: f32[1,32], index: 9, kind: input, shape index: {}]   ;;  %s18685_s10 = inlined_call_operand.vmem [shape: f32[32,8], index: 10, kind: input, shape index: {}]   ;;  %s18686_s11 = inlined_call_operand.vmem [shape: f32[1,8], index: 11, kind: input, shape index: {}]   ;;  %s18687_s12 = inlined_call_operand.vmem [shape: f32[8,32], index: 12, kind: input, shape index: {}]   ;;  %s18688_s13 = inlined_call_operand.vmem [shape: f32[1,32], index: 13, kind: input, shape index: {}]   ;;  %s18689_s14 = inlined_call_operand.<no memory space> [shape: f32[1,1], index: 14, kind: input, shape index: {}]   ;;  %s18690_s15 = inlined_call_operand.<no memory space> [shape: f32[1,1], index: 15, kind: input, shape index: {}]   ;;  %s18691_s16 = inlined_call_operand.hbm [shape: f32[2,256,32], index: 16, kind: output, shape index: {}]  }
   0x1   :  { %18923 = sst [smem:[#allocation141_spill]] %s18675_s0 }
   0x2   :  { %21 = sst [smem:[#allocation4]] %s18689_s14 }
   0x3   :  { %22 = sst [smem:[#allocation5]] %s18690_s15 }
   0x4   :  { %23 = vsyncpa [#allocation7], 0 }
   0x5   :  { %25 = vsyncpa [#allocation7 + $0x1], 0  ;;  %s13919_s25 = smov 0   ;;  %s13921_s26 = smov 0  }
   0x6   :  { %s13923_s27 = smov 0   ;;  %s13925_s28 = smov 0  }
   0x7 LB: > { %18924 = sst [smem:[#allocation9_spill]] %s13815_s27  ;;  %s13940_s14 = sadd.s32 4294967295, %s13819_s28   ;;  %s13819_s28 = sphi %s13925_s28, %s19603_s28   ;;  %s13815_s27 = sphi %s13923_s27, %s19605_s27   ;;  %s13811_s26 = sphi %s13921_s26, %s19607_s26   ;;  %s13807_s25 = sphi %s13919_s25, %s19606_s25  }
   0x8   : > { %s11691_s15 = sadd.s32 4294967294, %s13819_s28   ;;  %s13944_s29 = sadd.s32 1, %s13819_s28  }
   0x9   : > { %18925 = sst [smem:[#allocation10_spill]] %s13944_s29  ;;  %s379_s30 = sadd.s32 1, %s13815_s27 }
   0xa   : > { %s376_s0 = ssub.s32 %s13819_s28, %s13944_s29  ;;  %p389_p0 = scmp.ne.s32.totalorder %s13815_s27, %s13811_s26 }
   0xb   : > { %p377_p1 = scmp.eq.s32.totalorder %s376_s0, 0  ;;  %p390_p2 = scmp.eq.s32.totalorder %s13940_s14, 1 }
   0xc   : > { %p395_p3 = scmp.ne.s32.totalorder %s13811_s26, %s13807_s25  ;;  %p396_p4 = scmp.eq.s32.totalorder %s11691_s15, 1 }
   0xd   : > { %s13955_s17 = scalar_select %p377_p1, %s13815_s27, %s379_s30  }
   0xe   : > { %p13957_p5 = por %p390_p2, %p389_p0  ;;  %p13961_p6 = por %p396_p4, %p395_p3 }
   0xf   : > { %18926 = sst [smem:[#allocation11_spill]] %s13955_s17  ;;  %p11694_p7 = scmp.ge.s32.totalorder %s13819_s28, 1 }
  0x10   : > { %s18928_s19 = scalar_select %p13961_p6, 1, 0 }
  0x11   : > { %p467_p8 = scmp.lt.s32.totalorder %s13819_s28, 3 }
  0x12   : > { %18929 = sst [smem:[#allocation12_spill]] %s18928_s19 }
  0x13   : > { %p468_p9 = pnand %p11694_p7, %p467_p8 }
  0x15   : > { %471 = sbr.rel (%p468_p9) target bundleno = 1787 (0x6fb), region = 84 }
  0x1a   : > { %vm620_vm0 = vcmask 257024   ;;  %v525_v0 = vld [vmem:[%s18676_s1 + $0x8] sm:$0xf]  ;;  %v523_v1 = vld [vmem:[%s18676_s1] sm:$0xf]  ;;  %v13821_v2 = vmov 0  }
  0x1b   : > { %13569 = vset.pattern.permute.xlu1 %v13821_v2  ;;  %622 = vst.msk [vmem:[#allocation2 + $0x4] sm:$0xf] %vm620_vm0, %v13821_v2  ;;  %623 = vst.msk [vmem:[#allocation2 + $0x8] sm:$0xf] %vm620_vm0, %v13821_v2  ;;  %13568 = vset.pattern.permute.xlu0 %v13821_v2  ;;  %v526_v3 = vld [vmem:[%s18676_s1 + $0xc] sm:$0xf] }
  0x1c   : > { %624 = vst.msk [vmem:[#allocation2 + $0xc] sm:$0xf] %vm620_vm0, %v13821_v2  ;;  %625 = vst.msk [vmem:[#allocation2 + $0x90] sm:$0xf] %vm620_vm0, %v13821_v2  ;;  %887 = vperm.xlu1 %13569, %v525_v0   ;;  %863 = vperm.xlu0 %13568, %v523_v1   ;;  %v524_v4 = vld [vmem:[%s18676_s1 + $0x4] sm:$0xf] }
  0x1d   : > { %626 = vst.msk [vmem:[#allocation2 + $0x94] sm:$0xf] %vm620_vm0, %v13821_v2  ;;  %627 = vst.msk [vmem:[#allocation2 + $0x98] sm:$0xf] %vm620_vm0, %v13821_v2  ;;  %v555_v5 = vld [vmem:[%s18677_s2] sm:$0xf] }
  0x1e   : > { %6696 = vst.msk [vmem:[#allocation3 + $0x4] sm:$0xf] %vm620_vm0, %v13821_v2  ;;  %6697 = vst.msk [vmem:[#allocation3 + $0x8] sm:$0xf] %vm620_vm0, %v13821_v2  ;;  %v527_v6 = vld [vmem:[%s18676_s1 + $0x10] sm:$0xf] }
  0x1f   : > { %6698 = vst.msk [vmem:[#allocation3 + $0xc] sm:$0xf] %vm620_vm0, %v13821_v2  ;;  %6699 = vst.msk [vmem:[#allocation3 + $0x90] sm:$0xf] %vm620_vm0, %v13821_v2  ;;  %v528_v7 = vld [vmem:[%s18676_s1 + $0x14] sm:$0xf] }
  0x20   : > { %6700 = vst.msk [vmem:[#allocation3 + $0x94] sm:$0xf] %vm620_vm0, %v13821_v2  ;;  %6701 = vst.msk [vmem:[#allocation3 + $0x98] sm:$0xf] %vm620_vm0, %v13821_v2  ;;  %899 = vperm.xlu1 %13569, %v526_v3   ;;  %875 = vperm.xlu0 %13568, %v524_v4   ;;  %v556_v8 = vld [vmem:[%s18677_s2 + $0x4] sm:$0xf] }
  0x21   : > { %v558_v9 = vld [vmem:[%s18677_s2 + $0xc] sm:$0xf]  ;;  %v557_v10 = vld [vmem:[%s18677_s2 + $0x8] sm:$0xf]  ;;  %v13570_v11 = vld [vmem:[%s18678_s3 + $0x18] sm:$0xff]   ;;  %p517_p10 = scmp.lt.s32.totalorder %s13940_s14, 1 }
  0x22   : > { %v560_v12 = vld [vmem:[%s18677_s2 + $0x14] sm:$0xf]  ;;  %v559_v14 = vld [vmem:[%s18677_s2 + $0x10] sm:$0xf]  ;;  %12859 = vmatprep.subr.bf16.mxu0 %v13570_v11  ;;  %v14022_v15 = vld [vmem:[#allocation2 + $0x8] sm:$0xf] }
  0x23   : > { %v13571_v13 = vld [vmem:[%s18678_s3 + $0x10] sm:$0xff]   ;;  %v14024_v16 = vld [vmem:[#allocation2 + $0xc] sm:$0xf]  ;;  %12860 = vmatpush3.bf16.msra.mxu0 %v13570_v11  ;;  %vm18912_vm1 = vcmask 261120   ;;  %s518_s27 = scalar_select %p517_p10, %s13940_s14, 1 }
  0x24   : > { %2436 = vperm.xlu1 %13569, %v555_v5   ;;  %911 = vperm.xlu0 %13568, %v527_v6   ;;  %v11735_v17 = vcombine.low %v14022_v15, %v14024_v16  ;;  %v14032_v18 = vld [vmem:[%s18680_s5] ss:$0 sm:$0xff]  ;;  %v13586_v19 = vld [vmem:[%s18678_s3 + $0x8] sm:$0xff]   ;;  %v530_v20 = vld [vmem:[%s18676_s1 + $0x1c] sm:$0xf]  ;;  %s18930_s19 = sld [smem:[#allocation141_spill]] }
  0x25   : > { %12861 = vmatprep.subr.bf16.mxu0 %v13571_v13  ;;  %s12462_s21 = sshll.u32 %s518_s27, 8  ;;  %v529_v21 = vld [vmem:[%s18676_s1 + $0x18] sm:$0xf]  ;;  %12895 = vmatprep.subr.bf16.mxu1 %v13586_v19  ;;  %v532_v37 = vld [vmem:[%s18676_s1 + $0x24] sm:$0xf]  ;;  %s16135_s23 = sld [smem:[#allocation4]] }
  0x26   : > { %12863 = vmatprep.mubr.msk.bf16.mxu0 %vm18912_vm1, %v11735_v17  ;;  %12896 = vmatpush3.bf16.msra.mxu1 %v13586_v19  ;;  %v531_v38 = vld [vmem:[%s18676_s1 + $0x20] sm:$0xf]  ;;  %v562_v51 = vld [vmem:[%s18677_s2 + $0x1c] sm:$0xf]  ;;  %v561_v63 = vld [vmem:[%s18677_s2 + $0x18] sm:$0xf] }
  0x27   : > { %12862 = vmatpush3.bf16.msra.mxu0 %v13571_v13  ;;  %vm1245_vm2 = vsmask.f32 3328  ;;  %vm1246_vm3 = vsmask.f32 7440  ;;  %vm2818_vm5 = vsmask.f32 256 }
  0x28   : > { %923 = vperm.xlu1 %13569, %v528_v7   ;;  %2448 = vperm.xlu0 %13568, %v556_v8   ;;  %vm14350_vm4 = vmor %vm1245_vm2, %vm1246_vm3  ;;  %vm2819_vm6 = vsmask.f32 4368  ;;  %vm2027_vm8 = vsmask.f32 4352  ;;  %vm3262_vm9 = vsmask.f32 7424 }
  0x29   : > { %vm14391_vm7 = vmor %vm2818_vm5, %vm2819_vm6  ;;  %s11332_s17 = sld [smem:[#allocation5]]  ;;  %s12527_s29 = sshll.u32 %s13940_s14, 12 }
  0x2a   : > { %s14047_s22 = scalar_lea.vmem %s18930_s19, %s12462_s21  ;;  %s13825_s15 = smov [#allocation6]  }
  0x2b   : > { %v588_v22 = vld [vmem:[%s14047_s22] sm:$0xff]  ;;  %v589_v23 = vld [vmem:[%s14047_s22 + $0x8] sm:$0xff]  ;;  %v590_v24 = vld [vmem:[%s14047_s22 + $0x10] sm:$0xff]  ;;  %s13763_s30 = sshll.u32 %s13825_s15, 4  ;;  %s13764_s30 = int_to_ptr.vmem [resolvable:$false] %s13763_s30 }
  0x2c   : > { %2472 = vperm.xlu1 %13569, %v558_v9   ;;  %2460 = vperm.xlu0 %13568, %v557_v10   ;;  %v636_v25 = vadd.f32 %v14032_v18, %v588_v22  ;;  %v637_v26 = vadd.f32 %v14032_v18, %v589_v23  ;;  %v591_v27 = vld [vmem:[%s14047_s22 + $0x18] sm:$0xff]  ;;  %v638_v28 = vadd.f32 %v14032_v18, %v590_v24  ;;  %v592_v29 = vld [vmem:[%s14047_s22 + $0x20] sm:$0xff]  ;;  %v593_v30 = vld [vmem:[%s14047_s22 + $0x28] sm:$0xff]  ;;  %s13765_s0 = scalar_lea.vmem %s13764_s30, 8192 }
  0x2d   : > { %v639_v31 = vadd.f32 %v14032_v18, %v591_v27  ;;  %v640_v32 = vadd.f32 %v14032_v18, %v592_v29  ;;  %v641_v33 = vadd.f32 %v14032_v18, %v593_v30  ;;  %v594_v34 = vld [vmem:[%s14047_s22 + $0x30] sm:$0xff]  ;;  %v595_v35 = vld [vmem:[%s14047_s22 + $0x38] sm:$0xff]  ;;  %v596_v36 = vld [vmem:[%s14047_s22 + $0x40] sm:$0xff] }
  0x2e   : > { %v12463_v39 = vpack.c.bf16 %v636_v25, %v636_v25  ;;  %v12464_v40 = vpack.c.bf16 %v637_v26, %v637_v26  ;;  %v12465_v41 = vpack.c.bf16 %v638_v28, %v638_v28  ;;  %v642_v42 = vadd.f32 %v14032_v18, %v594_v34  ;;  %v597_v43 = vld [vmem:[%s14047_s22 + $0x48] sm:$0xff]  ;;  %v598_v48 = vld [vmem:[%s14047_s22 + $0x50] sm:$0xff]  ;;  %v599_v49 = vld [vmem:[%s14047_s22 + $0x58] sm:$0xff] }
  0x2f   : > { %v12466_v44 = vpack.c.bf16 %v639_v31, %v639_v31  ;;  %v12467_v45 = vpack.c.bf16 %v640_v32, %v640_v32  ;;  %v12468_v46 = vpack.c.bf16 %v641_v33, %v641_v33  ;;  %v643_v47 = vadd.f32 %v14032_v18, %v595_v35  ;;  %v600_v50 = vld [vmem:[%s14047_s22 + $0x60] sm:$0xff]  ;;  %v601_v56 = vld [vmem:[%s14047_s22 + $0x68] sm:$0xff]  ;;  %v602_v60 = vld [vmem:[%s14047_s22 + $0x70] sm:$0xff] }
  0x30   : > { %2496 = vperm.xlu1 %13569, %v560_v12   ;;  %2484 = vperm.xlu0 %13568, %v559_v14   ;;  %796 = vst.msk [vmem:[#allocation2 + $0x10] sm:$0xf] %vm620_vm0, %v12463_v39  ;;  %797 = vst.msk [vmem:[#allocation2 + $0x14] sm:$0xf] %vm620_vm0, %v12464_v40  ;;  %v12469_v52 = vpack.c.bf16 %v642_v42, %v642_v42  ;;  %v644_v53 = vadd.f32 %v14032_v18, %v596_v36  ;;  %v603_v61 = vld [vmem:[%s14047_s22 + $0x78] sm:$0xff]  ;;  %v604_v62 = vld [vmem:[%s14047_s22 + $0x80] sm:$0xff] }
  0x31   : > { %798 = vst.msk [vmem:[#allocation2 + $0x18] sm:$0xf] %vm620_vm0, %v12465_v41  ;;  %v645_v54 = vadd.f32 %v14032_v18, %v597_v43  ;;  %v646_v55 = vadd.f32 %v14032_v18, %v598_v48  ;;  %799 = vst.msk [vmem:[#allocation2 + $0x1c] sm:$0xf] %vm620_vm0, %v12466_v44  ;;  %v12470_v57 = vpack.c.bf16 %v643_v47, %v643_v47  ;;  %v605_v4 = vld [vmem:[%s14047_s22 + $0x88] sm:$0xff]  ;;  %v606_v5 = vld [vmem:[%s14047_s22 + $0x90] sm:$0xff] }
  0x32   : > { %800 = vst.msk [vmem:[#allocation2 + $0x20] sm:$0xf] %vm620_vm0, %v12467_v45  ;;  %801 = vst.msk [vmem:[#allocation2 + $0x24] sm:$0xf] %vm620_vm0, %v12468_v46  ;;  %v647_v58 = vadd.f32 %v14032_v18, %v599_v49  ;;  %v648_v59 = vadd.f32 %v14032_v18, %v600_v50  ;;  %v12471_v0 = vpack.c.bf16 %v644_v53, %v644_v53  ;;  %v607_v8 = vld [vmem:[%s14047_s22 + $0x98] sm:$0xff]  ;;  %v608_v17 = vld [vmem:[%s14047_s22 + $0xa0] sm:$0xff] }
  0x33   : > { %802 = vst.msk [vmem:[#allocation2 + $0x28] sm:$0xf] %vm620_vm0, %v12469_v52  ;;  %v12472_v1 = vpack.c.bf16 %v645_v54, %v645_v54  ;;  %v12473_v2 = vpack.c.bf16 %v646_v55, %v646_v55  ;;  %v649_v3 = vadd.f32 %v14032_v18, %v601_v56  ;;  %803 = vst.msk [vmem:[#allocation2 + $0x2c] sm:$0xf] %vm620_vm0, %v12470_v57  ;;  %v564_v9 = vld [vmem:[%s18677_s2 + $0x24] sm:$0xf] }
  0x34   : > { %947 = vperm.xlu1 %13569, %v530_v20   ;;  %935 = vperm.xlu0 %13568, %v529_v21   ;;  %v12474_v6 = vpack.c.bf16 %v647_v58, %v647_v58  ;;  %v12475_v7 = vpack.c.bf16 %v648_v59, %v648_v59  ;;  %v563_v10 = vld [vmem:[%s18677_s2 + $0x20] sm:$0xf]  ;;  %804 = vst.msk [vmem:[#allocation2 + $0x30] sm:$0xf] %vm620_vm0, %v12471_v0  ;;  %v609_v19 = vld [vmem:[%s14047_s22 + $0xa8] sm:$0xff]  ;;  %v610_v22 = vld [vmem:[%s14047_s22 + $0xb0] sm:$0xff] }
  0x35   : > { %805 = vst.msk [vmem:[#allocation2 + $0x34] sm:$0xf] %vm620_vm0, %v12472_v1  ;;  %806 = vst.msk [vmem:[#allocation2 + $0x38] sm:$0xf] %vm620_vm0, %v12473_v2  ;;  %v12476_v11 = vpack.c.bf16 %v649_v3, %v649_v3  ;;  %v650_v12 = vadd.f32 %v14032_v18, %v602_v60  ;;  %v651_v13 = vadd.f32 %v14032_v18, %v603_v61  ;;  %v611_v23 = vld [vmem:[%s14047_s22 + $0xb8] sm:$0xff]  ;;  %v13587_v24 = vld [vmem:[%s18678_s3 + $0x28] sm:$0xff]  }
  0x36   : > { %v652_v14 = vadd.f32 %v14032_v18, %v604_v62  ;;  %807 = vst.msk [vmem:[#allocation2 + $0x3c] sm:$0xf] %vm620_vm0, %v12474_v6  ;;  %808 = vst.msk [vmem:[#allocation2 + $0x40] sm:$0xf] %vm620_vm0, %v12475_v7  ;;  %v653_v20 = vadd.f32 %v14032_v18, %v605_v4  ;;  %v654_v21 = vadd.f32 %v14032_v18, %v606_v5  ;;  %v612_v29 = vld [vmem:[%s14047_s22 + $0xc0] sm:$0xff]  ;;  %12931 = vmatprep.subr.bf16.mxu0 %v13587_v24  ;;  %v613_v42 = vld [vmem:[%s14047_s22 + $0xc8] sm:$0xff] }
  0x37   : > { %809 = vst.msk [vmem:[#allocation2 + $0x44] sm:$0xf] %vm620_vm0, %v12476_v11  ;;  %v12477_v25 = vpack.c.bf16 %v650_v12, %v650_v12  ;;  %v12478_v26 = vpack.c.bf16 %v651_v13, %v651_v13  ;;  %v655_v28 = vadd.f32 %v14032_v18, %v607_v8  ;;  %v14129_v30 = vld [vmem:[#allocation2 + $0x10] sm:$0xf]  ;;  %v14131_v31 = vld [vmem:[#allocation2 + $0x14] sm:$0xf]  ;;  %v656_v35 = vadd.f32 %v14032_v18, %v608_v17 }
  0x38   : > { %971 = vperm.xlu1 %13569, %v532_v37   ;;  %959 = vperm.xlu0 %13568, %v531_v38   ;;  %v12479_v27 = vpack.c.bf16 %v652_v14, %v652_v14  ;;  %v14133_v32 = vld [vmem:[#allocation2 + $0x18] sm:$0xf]  ;;  %v12480_v33 = vpack.c.bf16 %v653_v20, %v653_v20  ;;  %v12481_v34 = vpack.c.bf16 %v654_v21, %v654_v21  ;;  %v834_v38 = vld [vmem:[#allocation2 + $0x1c] sm:$0xf]  ;;  %v534_v45 = vld [vmem:[%s18676_s1 + $0x2c] sm:$0xf] }
  0x39   : > { %v657_v36 = vadd.f32 %v14032_v18, %v609_v19  ;;  %v11736_v37 = vcombine.low %v14129_v30, %v14131_v31  ;;  %810 = vst.msk [vmem:[#allocation2 + $0x48] sm:$0xf] %vm620_vm0, %v12477_v25  ;;  %811 = vst.msk [vmem:[#allocation2 + $0x4c] sm:$0xf] %vm620_vm0, %v12478_v26  ;;  %v12482_v39 = vpack.c.bf16 %v655_v28, %v655_v28  ;;  %v533_v46 = vld [vmem:[%s18676_s1 + $0x28] sm:$0xf] }
  0x3a   : > { %812 = vst.msk [vmem:[#allocation2 + $0x50] sm:$0xf] %vm620_vm0, %v12479_v27  ;;  %v658_v40 = vadd.f32 %v14032_v18, %v610_v22  ;;  %v659_v41 = vadd.f32 %v14032_v18, %v611_v23  ;;  %v11737_v43 = vcombine.low %v14133_v32, %v834_v38  ;;  %813 = vst.msk [vmem:[#allocation2 + $0x54] sm:$0xf] %vm620_vm0, %v12480_v33  ;;  %v836_v52 = vld [vmem:[#allocation2 + $0x24] sm:$0xf] }
  0x3b   : > { %814 = vst.msk [vmem:[#allocation2 + $0x58] sm:$0xf] %vm620_vm0, %v12481_v34  ;;  %v12483_v44 = vpack.c.bf16 %v656_v35, %v656_v35  ;;  %12864 = vmatmul.mubr.msk.bf16.vlgmr.msra.gmra.mxu0 %vm18912_vm1, %v11736_v37  ;;  %815 = vst.msk [vmem:[#allocation2 + $0x5c] sm:$0xf] %vm620_vm0, %v12482_v39  ;;  %v12484_v47 = vpack.c.bf16 %v657_v36, %v657_v36  ;;  %v660_v50 = vadd.f32 %v14032_v18, %v612_v29  ;;  %v837_v54 = vld [vmem:[#allocation2 + $0x28] sm:$0xf] }
  0x3c   : > { %2520 = vperm.xlu1 %13569, %v562_v51   ;;  %2508 = vperm.xlu0 %13568, %v561_v63   ;;  %v12485_v48 = vpack.c.bf16 %v658_v40, %v658_v40  ;;  %v12486_v49 = vpack.c.bf16 %v659_v41, %v659_v41  ;;  %v835_v51 = vld [vmem:[#allocation2 + $0x20] sm:$0xf]  ;;  %v661_v53 = vadd.f32 %v14032_v18, %v613_v42  ;;  %v838_v55 = vld [vmem:[#allocation2 + $0x2c] sm:$0xf]  ;;  %v536_v57 = vld [vmem:[%s18676_s1 + $0x34] sm:$0xf] }
  0x3d   : > { %12867 = vmatprep.mubr.msk.bf16.mxu0 %vm18912_vm1, %v11737_v43  ;;  %816 = vst.msk [vmem:[#allocation2 + $0x60] sm:$0xf] %vm620_vm0, %v12483_v44  ;;  %12932 = vmatpush3.bf16.msra.mxu0 %v13587_v24  ;;  %817 = vst.msk [vmem:[#allocation2 + $0x64] sm:$0xf] %vm620_vm0, %v12484_v47  ;;  %v12487_v56 = vpack.c.bf16 %v660_v50, %v660_v50  ;;  %v535_v58 = vld [vmem:[%s18676_s1 + $0x30] sm:$0xf]  ;;  %v11738_v60 = vcombine.low %v835_v51, %v836_v52 }
  0x3e   : > { %818 = vst.msk [vmem:[#allocation2 + $0x68] sm:$0xf] %vm620_vm0, %v12485_v48  ;;  %819 = vst.msk [vmem:[#allocation2 + $0x6c] sm:$0xf] %vm620_vm0, %v12486_v49  ;;  %v12488_v59 = vpack.c.bf16 %v661_v53, %v661_v53  ;;  %v11739_v61 = vcombine.low %v837_v54, %v838_v55  ;;  %v13588_v62 = vld [vmem:[%s18678_s3] sm:$0xff]   ;;  %v614_v2 = vld [vmem:[%s14047_s22 + $0xd0] sm:$0xff] }
  0x3f   : > { %820 = vst.msk [vmem:[#allocation2 + $0x70] sm:$0xf] %vm620_vm0, %v12487_v56  ;;  %v566_v63 = vld [vmem:[%s18677_s2 + $0x2c] sm:$0xf]  ;;  %v565_v0 = vld [vmem:[%s18677_s2 + $0x28] sm:$0xf]  ;;  %12897 = vmatprep.subr.bf16.mxu1 %v13588_v62  ;;  %v662_v7 = vadd.f32 %v14032_v18, %v614_v2 }
  0x40   : > { %2544 = vperm.xlu1 %13569, %v564_v9   ;;  %2532 = vperm.xlu0 %13568, %v563_v10   ;;  %821 = vst.msk [vmem:[#allocation2 + $0x74] sm:$0xf] %vm620_vm0, %v12488_v59  ;;  %v839_v1 = vld [vmem:[#allocation2 + $0x30] sm:$0xf]  ;;  %v615_v3 = vld [vmem:[%s14047_s22 + $0xd8] sm:$0xff]  ;;  %v616_v9 = vld [vmem:[%s14047_s22 + $0xe0] sm:$0xff] }
  0x41   : > { %v840_v4 = vld [vmem:[#allocation2 + $0x34] sm:$0xf]  ;;  %v841_v5 = vld [vmem:[#allocation2 + $0x38] sm:$0xf]  ;;  %v842_v6 = vld [vmem:[#allocation2 + $0x3c] sm:$0xf]  ;;  %12898 = vmatpush3.bf16.msra.mxu1 %v13588_v62  ;;  %v663_v8 = vadd.f32 %v14032_v18, %v615_v3  ;;  %v12489_v11 = vpack.c.bf16 %v662_v7, %v662_v7  ;;  %v664_v13 = vadd.f32 %v14032_v18, %v616_v9 }
  0x42   : > { %v617_v10 = vld [vmem:[%s14047_s22 + $0xe8] sm:$0xff]  ;;  %v13591_v14 = vld [vmem:[%s18678_s3 + $0x20] sm:$0xff]   ;;  %v568_v17 = vld [vmem:[%s18677_s2 + $0x34] sm:$0xf]  ;;  %v11740_v20 = vcombine.low %v839_v1, %v840_v4  ;;  %v11741_v22 = vcombine.low %v841_v5, %v842_v6 }
  0x43   : > { %12868 = vmatmul.mubr.msk.bf16.gmra.mxu0 %vm18912_vm1, %v11738_v60  ;;  %v12490_v12 = vpack.c.bf16 %v663_v8, %v663_v8  ;;  %v567_v19 = vld [vmem:[%s18677_s2 + $0x30] sm:$0xf]  ;;  %v665_v21 = vadd.f32 %v14032_v18, %v617_v10  ;;  %822 = vst.msk [vmem:[#allocation2 + $0x78] sm:$0xf] %vm620_vm0, %v12489_v11  ;;  %v12491_v23 = vpack.c.bf16 %v664_v13, %v664_v13  ;;  %v538_v24 = vld [vmem:[%s18676_s1 + $0x3c] sm:$0xf] }
  0x44   : > { %995 = vperm.xlu1 %13569, %v534_v45   ;;  %983 = vperm.xlu0 %13568, %v533_v46   ;;  %v537_v25 = vld [vmem:[%s18676_s1 + $0x38] sm:$0xf]  ;;  %v843_v18 = vld [vmem:[#allocation2 + $0x40] sm:$0xf]  ;;  %v844_v27 = vld [vmem:[#allocation2 + $0x44] sm:$0xf] }
  0x45   : > { %12871 = vmatprep.mubr.msk.bf16.mxu0 %vm18912_vm1, %v11739_v61  ;;  %823 = vst.msk [vmem:[#allocation2 + $0x7c] sm:$0xf] %vm620_vm0, %v12490_v12  ;;  %12933 = vmatprep.subr.bf16.mxu0 %v13591_v14  ;;  %v12492_v26 = vpack.c.bf16 %v665_v21, %v665_v21  ;;  %824 = vst.msk [vmem:[#allocation2 + $0x80] sm:$0xf] %vm620_vm0, %v12491_v23  ;;  %v845_v28 = vld [vmem:[#allocation2 + $0x48] sm:$0xf]  ;;  %v11742_v35 = vcombine.low %v843_v18, %v844_v27 }
  0x46   : > { %12934 = vmatpush3.bf16.msra.mxu0 %v13591_v14  ;;  %v846_v29 = vld [vmem:[#allocation2 + $0x4c] sm:$0xf]  ;;  %v540_v33 = vld [vmem:[%s18676_s1 + $0x44] sm:$0xf]  ;;  %v539_v34 = vld [vmem:[%s18676_s1 + $0x40] sm:$0xf] }
  0x47   : > { %825 = vst.msk [vmem:[#allocation2 + $0x84] sm:$0xf] %vm620_vm0, %v12492_v26  ;;  %v11743_v36 = vcombine.low %v845_v28, %v846_v29  ;;  %v570_v37 = vld [vmem:[%s18677_s2 + $0x3c] sm:$0xf]  ;;  %v569_v38 = vld [vmem:[%s18677_s2 + $0x38] sm:$0xf] }
  0x48   : > { %1019 = vperm.xlu1 %13569, %v536_v57   ;;  %1007 = vperm.xlu0 %13568, %v535_v58   ;;  %v847_v39 = vld [vmem:[#allocation2 + $0x50] sm:$0xf]  ;;  %v848_v40 = vld [vmem:[#allocation2 + $0x54] sm:$0xf]  ;;  %v849_v41 = vld [vmem:[#allocation2 + $0x58] sm:$0xf] }
  0x49   : > { %v850_v42 = vld [vmem:[#allocation2 + $0x5c] sm:$0xf]  ;;  %v572_v43 = vld [vmem:[%s18677_s2 + $0x44] sm:$0xf]  ;;  %v571_v44 = vld [vmem:[%s18677_s2 + $0x40] sm:$0xf]  ;;  %v11744_v45 = vcombine.low %v847_v39, %v848_v40 }
  0x4a   : > { %v11745_v46 = vcombine.low %v849_v41, %v850_v42  ;;  %v542_v47 = vld [vmem:[%s18676_s1 + $0x4c] sm:$0xf]  ;;  %v541_v48 = vld [vmem:[%s18676_s1 + $0x48] sm:$0xf]  ;;  %v851_v49 = vld [vmem:[#allocation2 + $0x60] sm:$0xf] }
  0x4b   : > { %12872 = vmatmul.mubr.msk.bf16.gmra.mxu0 %vm18912_vm1, %v11740_v20  ;;  %v852_v50 = vld [vmem:[#allocation2 + $0x64] sm:$0xf]  ;;  %v853_v51 = vld [vmem:[#allocation2 + $0x68] sm:$0xf]  ;;  %v854_v52 = vld [vmem:[#allocation2 + $0x6c] sm:$0xf] }
  0x4c   : > { %2568 = vperm.xlu1 %13569, %v566_v63   ;;  %2556 = vperm.xlu0 %13568, %v565_v0   ;;  %v544_v53 = vld [vmem:[%s18676_s1 + $0x54] sm:$0xf]  ;;  %v543_v54 = vld [vmem:[%s18676_s1 + $0x50] sm:$0xf]  ;;  %v11746_v55 = vcombine.low %v851_v49, %v852_v50  ;;  %v11747_v56 = vcombine.low %v853_v51, %v854_v52  ;;  %v574_v57 = vld [vmem:[%s18677_s2 + $0x4c] sm:$0xf] }
  0x4d   : > { %12875 = vmatprep.mubr.msk.bf16.mxu0 %vm18912_vm1, %v11741_v22  ;;  %v573_v58 = vld [vmem:[%s18677_s2 + $0x48] sm:$0xf]  ;;  %v855_v59 = vld [vmem:[#allocation2 + $0x70] sm:$0xf]  ;;  %v856_v60 = vld [vmem:[#allocation2 + $0x74] sm:$0xf] }
  0x4e   : > { %v857_v61 = vld [vmem:[#allocation2 + $0x78] sm:$0xf]  ;;  %v858_v62 = vld [vmem:[#allocation2 + $0x7c] sm:$0xf]  ;;  %v576_v63 = vld [vmem:[%s18677_s2 + $0x54] sm:$0xf]  ;;  %v11748_v1 = vcombine.low %v855_v59, %v856_v60 }
  0x4f   : > { %v575_v0 = vld [vmem:[%s18677_s2 + $0x50] sm:$0xf]  ;;  %v11749_v2 = vcombine.low %v857_v61, %v858_v62  ;;  %v546_v3 = vld [vmem:[%s18676_s1 + $0x5c] sm:$0xf]  ;;  %v545_v4 = vld [vmem:[%s18676_s1 + $0x58] sm:$0xf] }
  0x50   : > { %2592 = vperm.xlu1 %13569, %v568_v17   ;;  %2580 = vperm.xlu0 %13568, %v567_v19   ;;  %v859_v5 = vld [vmem:[#allocation2 + $0x80] sm:$0xf]  ;;  %v860_v6 = vld [vmem:[#allocation2 + $0x84] sm:$0xf]  ;;  %v578_v10 = vld [vmem:[%s18677_s2 + $0x5c] sm:$0xf] }
  0x51   : > { %v548_v7 = vld [vmem:[%s18676_s1 + $0x64] sm:$0xf]  ;;  %v547_v8 = vld [vmem:[%s18676_s1 + $0x60] sm:$0xf]  ;;  %v11750_v9 = vcombine.low %v859_v5, %v860_v6  ;;  %v577_v11 = vld [vmem:[%s18677_s2 + $0x58] sm:$0xf] }
  0x52   : > { %v580_v12 = vld [vmem:[%s18677_s2 + $0x64] sm:$0xf]  ;;  %v579_v13 = vld [vmem:[%s18677_s2 + $0x60] sm:$0xf]  ;;  %v550_v14 = vld [vmem:[%s18676_s1 + $0x6c] sm:$0xf] }
  0x53   : > { %12876 = vmatmul.mubr.msk.bf16.gmra.mxu0 %vm18912_vm1, %v11742_v35  ;;  %v549_v17 = vld [vmem:[%s18676_s1 + $0x68] sm:$0xf]  ;;  %v552_v19 = vld [vmem:[%s18676_s1 + $0x74] sm:$0xf]  ;;  %v551_v20 = vld [vmem:[%s18676_s1 + $0x70] sm:$0xf] }
  0x54   : > { %1043 = vperm.xlu1 %13569, %v538_v24   ;;  %1031 = vperm.xlu0 %13568, %v537_v25   ;;  %v582_v21 = vld [vmem:[%s18677_s2 + $0x6c] sm:$0xf]  ;;  %v581_v22 = vld [vmem:[%s18677_s2 + $0x68] sm:$0xf]  ;;  %v13822_v23 = vmov 839922192   ;;  %v869_v25 = vlaneseq }
  0x55   : > { %12879 = vmatprep.mubr.msk.bf16.mxu0 %vm18912_vm1, %v11743_v36  ;;  %v867_v24 = vunpack.c.l.s4 %v13822_v23  ;;  %v584_v26 = vld [vmem:[%s18677_s2 + $0x74] sm:$0xf]  ;;  %v583_v18 = vld [vmem:[%s18677_s2 + $0x70] sm:$0xf]  ;;  %v554_v29 = vld [vmem:[%s18676_s1 + $0x7c] sm:$0xf] }
  0x56   : > { %v14310_v28 = vshrl.u32 %v869_v25, 7  ;;  %v586_v35 = vld [vmem:[%s18677_s2 + $0x7c] sm:$0xf]  ;;  %v585_v36 = vld [vmem:[%s18677_s2 + $0x78] sm:$0xf]  ;;  %v14342_v52 = vld [vmem:[%s18678_s3 + $0x48] sm:$0xff]  }
  0x57   : > { %v868_v27 = vunpack.c.0.s8 %v867_v24  ;;  %v14332_v41 = vld [vmem:[%s18678_s3 + $0x38] sm:$0xff]   ;;  %13003 = vmatprep.subr.bf16.mxu0 %v14342_v52 }
  0x58   : > { %1067 = vperm.xlu1 %13569, %v540_v33   ;;  %1055 = vperm.xlu0 %13568, %v539_v34   ;;  %18931 = vst [vmem:[#allocation13_spill] sm:$0xff] %v14310_v28  ;;  %v553_v33 = vld [vmem:[%s18676_s1 + $0x78] sm:$0xf] }
  0x59   : > { %v14319_v34 = vsub.s32 %v868_v27, %v14310_v28  ;;  %12967 = vmatprep.subr.bf16.mxu1 %v14332_v41 }
  0x5b   : > { %12880 = vmatmul.mubr.msk.bf16.gmra.mxu0 %vm18912_vm1, %v11744_v45 }
  0x5c   : > { %2616 = vperm.xlu1 %13569, %v570_v37   ;;  %2604 = vperm.xlu0 %13568, %v569_v38  }
  0x5d   : > { %12883 = vmatprep.mubr.msk.bf16.mxu0 %vm18912_vm1, %v11745_v46 }
  0x60   : > { %2640 = vperm.xlu1 %13569, %v572_v43   ;;  %2628 = vperm.xlu0 %13568, %v571_v44  }
  0x63   : > { %12884 = vmatmul.mubr.msk.bf16.gmra.mxu0 %vm18912_vm1, %v11746_v55 }
  0x64   : > { %1091 = vperm.xlu1 %13569, %v542_v47   ;;  %1079 = vperm.xlu0 %13568, %v541_v48  }
  0x65   : > { %12887 = vmatprep.mubr.msk.bf16.mxu0 %vm18912_vm1, %v11747_v56 }
  0x68   : > { %1115 = vperm.xlu1 %13569, %v544_v53   ;;  %1103 = vperm.xlu0 %13568, %v543_v54  }
  0x6b   : > { %12888 = vmatmul.mubr.msk.bf16.gmra.mxu0 %vm18912_vm1, %v11748_v1 }
  0x6c   : > { %2664 = vperm.xlu1 %13569, %v574_v57   ;;  %2652 = vperm.xlu0 %13568, %v573_v58  }
  0x6d   : > { %12891 = vmatprep.mubr.msk.bf16.mxu0 %vm18912_vm1, %v11749_v2 }
  0x70   : > { %2688 = vperm.xlu1 %13569, %v576_v63   ;;  %2676 = vperm.xlu0 %13568, %v575_v0  }
  0x73   : > { %12892 = vmatmul.mubr.msk.bf16.gmra.mxu0 %vm18912_vm1, %v11750_v9 }
  0x74   : > { %1139 = vperm.xlu1 %13569, %v546_v3   ;;  %1127 = vperm.xlu0 %13568, %v545_v4  }
  0x78   : > { %1163 = vperm.xlu1 %13569, %v548_v7   ;;  %1151 = vperm.xlu0 %13568, %v547_v8  }
  0x7c   : > { %2712 = vperm.xlu1 %13569, %v578_v10   ;;  %2700 = vperm.xlu0 %13568, %v577_v11  }
  0x80   : > { %2736 = vperm.xlu1 %13569, %v580_v12   ;;  %2724 = vperm.xlu0 %13568, %v579_v13   ;;  %v828_v12 = vld [vmem:[#allocation2 + $0x4] sm:$0x8] }
  0x84   : > { %1187 = vperm.xlu1 %13569, %v550_v14   ;;  %1175 = vperm.xlu0 %13568, %v549_v17  }
  0x88   : > { %1211 = vperm.xlu1 %13569, %v552_v19   ;;  %1199 = vperm.xlu0 %13568, %v551_v20  }
  0x8c   : > { %2760 = vperm.xlu1 %13569, %v582_v21   ;;  %2748 = vperm.xlu0 %13568, %v581_v22  }
  0x90   : > { %2784 = vperm.xlu1 %13569, %v584_v26   ;;  %2772 = vperm.xlu0 %13568, %v583_v18  }
  0x94   : > { %1235 = vperm.xlu1 %13569, %v554_v29   ;;  %1223 = vperm.xlu0 %13568, %v553_v33  }
  0x97   : > { %v888_v37 = vpop.permute.xlu1 %887  ;;  %v864_v38 = vpop.permute.xlu0 %863 }
  0x98   : > { %v896_v39 = vrot.slane %v888_v37, %v14319_v34  ;;  %v872_v40 = vrot.slane %v864_v38, %v14319_v34  ;;  %2808 = vperm.xlu1 %13569, %v586_v35   ;;  %2796 = vperm.xlu0 %13568, %v585_v36   ;;  %v14356_v36 = vld [vmem:[#allocation2 + $0xc] sm:$0x8] }
  0x9a   : > { %v1268_v42 = vshll.u32 %v896_v39, 16  ;;  %v1272_v43 = vshrl.u32 %v896_v39, 16  ;;  %v1249_v44 = vshll.u32 %v872_v40, 16  ;;  %v1252_v45 = vshrl.u32 %v872_v40, 16 }
  0x9b   : > { %v900_v46 = vpop.permute.xlu1 %899  ;;  %v876_v47 = vpop.permute.xlu0 %875 }
  0x9c   : > { %v14335_v48 = vrot.slane %v1249_v44, 5  ;;  %v1254_v49 = vrot.slane %v1252_v45, 4  ;;  %v908_v50 = vrot.slane %v900_v46, %v14319_v34  ;;  %v884_v51 = vrot.slane %v876_v47, %v14319_v34 }
  0x9d   : > { %v1270_v53 = vrot.slane %v1268_v42, 5  ;;  %v1274_v54 = vrot.slane %v1272_v43, 4 }
  0x9e   : > { %18932 = vst [vmem:[#allocation14_spill] sm:$0xff] %v14335_v48  ;;  %v1255_v55 = vor.u32 %v1254_v49, %v14335_v48  ;;  %v1278_v56 = vshll.u32 %v908_v50, 16  ;;  %v1282_v57 = vshrl.u32 %v908_v50, 16  ;;  %v1258_v58 = vshll.u32 %v884_v51, 16 }
  0x9f   : > { %v1262_v59 = vshrl.u32 %v884_v51, 16  ;;  %v2437_v60 = vpop.permute.xlu1 %2436  ;;  %v912_v61 = vpop.permute.xlu0 %911  ;;  %v1275_v6 = vor.u32 %v1274_v54, %v1270_v53  ;;  %v1600_v25 = vmul.bf16 %v14335_v48, %v828_v12 }
  0xa0   : > { %v2445_v62 = vrot.slane %v2437_v60, %v14319_v34  ;;  %v920_v63 = vrot.slane %v912_v61, %v14319_v34  ;;  %v1280_v0 = vrot.slane %v1278_v56, 5  ;;  %v1284_v1 = vrot.slane %v1282_v57, 4 }
  0xa1   : > { %v1260_v2 = vrot.slane %v1258_v58, 5  ;;  %v1264_v3 = vrot.slane %v1262_v59, 4  ;;  %v1256_v7 = vrot.slane %v1255_v55, 4  ;;  %v1276_v26 = vrot.slane %v1275_v6, 4 }
  0xa2   : > { %v1288_v4 = vshll.u32 %v920_v63, 16  ;;  %v1292_v5 = vshrl.u32 %v920_v63, 16  ;;  %v2822_v9 = vshrl.u32 %v2445_v62, 16  ;;  %v1285_v13 = vor.u32 %v1284_v1, %v1280_v0 }
  0xa3   : > { %v1265_v8 = vor.u32 %v1264_v3, %v1260_v2  ;;  %v924_v10 = vpop.permute.xlu1 %923  ;;  %v2449_v11 = vpop.permute.xlu0 %2448  ;;  %v14360_v38 = vsel %vm14350_vm4, %v1256_v7, %v1260_v2  ;;  %v2825_v39 = vshll.u32 %v2445_v62, 16  ;;  %v14374_v51 = vsel %vm14350_vm4, %v1276_v26, %v1280_v0 }
  0xa4   : > { %v1290_v14 = vrot.slane %v1288_v4, 5  ;;  %v1294_v17 = vrot.slane %v1292_v5, 4  ;;  %v932_v19 = vrot.slane %v924_v10, %v14319_v34  ;;  %v2457_v21 = vrot.slane %v2449_v11, %v14319_v34  ;;  %18935 = vst [vmem:[#allocation15_spill] sm:$0xff] %v14360_v38  ;;  %18937 = vst [vmem:[#allocation17_spill] sm:$0xff] %v14374_v51 }
  0xa5   : > { %v1266_v22 = vrot.slane %v1265_v8, 4  ;;  %v2824_v18 = vrot.slane %v2822_v9, 7  ;;  %v1286_v37 = vrot.slane %v1285_v13, 4  ;;  %v1601_v58 = vmul.bf16 %v14360_v38, %v14022_v15 }
  0xa6   : > { %v1295_v23 = vor.u32 %v1294_v17, %v1290_v14  ;;  %v1298_v24 = vshll.u32 %v932_v19, 16  ;;  %v1302_v27 = vshrl.u32 %v932_v19, 16  ;;  %v2830_v29 = vshrl.u32 %v2457_v21, 16 }
  0xa7   : > { %v2473_v33 = vpop.permute.xlu1 %2472  ;;  %v2461_v35 = vpop.permute.xlu0 %2460  ;;  %v14367_v46 = vsel %vm14350_vm4, %v1266_v22, %v1270_v53  ;;  %v2833_v47 = vshll.u32 %v2457_v21, 16  ;;  %v14376_v54 = vor.u32 %v2825_v39, %v2824_v18  ;;  %v2828_v53 = vrot.slane %v2824_v18, 4 }
  0xa8   : > { %v1300_v40 = vrot.slane %v1298_v24, 5  ;;  %v1296_v42 = vrot.slane %v1295_v23, 4  ;;  %v1304_v43 = vrot.slane %v1302_v27, 4  ;;  %v14362_v44 = vrot.slane %v2830_v29, 7  ;;  %18936 = vst [vmem:[#allocation16_spill] sm:$0xff] %v14367_v46 }
  0xa9   : > { %v2481_v45 = vrot.slane %v2473_v33, %v14319_v34  ;;  %v2469_v49 = vrot.slane %v2461_v35, %v14319_v34  ;;  %18938 = vst [vmem:[#allocation18_spill] sm:$0xff] %v14376_v54  ;;  %v14383_v62 = vsel %vm14350_vm4, %v1286_v37, %v1290_v14  ;;  %v1602_v1 = vmul.bf16 %v14367_v46, %v14024_v16 }
  0xaa   : > { %v1305_v55 = vor.u32 %v1304_v43, %v1300_v40  ;;  %v2835_v59 = vor.u32 %v2833_v47, %v14362_v44  ;;  %18939 = vst [vmem:[#allocation19_spill] sm:$0xff] %v14383_v62  ;;  %v14387_v63 = vsel %vm14350_vm4, %v1296_v42, %v1300_v40  ;;  %v1603_v5 = vmul.bf16 %v14374_v51, %v14129_v30 }
  0xab   : > { %v2497_v56 = vpop.permute.xlu1 %2496  ;;  %v2485_v57 = vpop.permute.xlu0 %2484  ;;  %v2848_v60 = vshrl.u32 %v2481_v45, 16  ;;  %v2839_v61 = vshrl.u32 %v2469_v49, 16  ;;  %18940 = vst [vmem:[#allocation20_spill] sm:$0xff] %v14387_v63  ;;  %v2837_v7 = vrot.slane %v14362_v44, 4  ;;  %v2851_v8 = vshll.u32 %v2481_v45, 16 }
  0xac   : > { %v2505_v15 = vrot.slane %v2497_v56, %v14319_v34  ;;  %v2493_v4 = vrot.slane %v2485_v57, %v14319_v34  ;;  %v14401_v6 = vrot.slane %v1305_v55, 4  ;;  %v11769_v11 = vcombine.low %v1600_v25, %v1601_v58 }
  0xad   : > { %v2850_v2 = vrot.slane %v2848_v60, 7  ;;  %v2841_v3 = vrot.slane %v2839_v61, 7  ;;  %v14406_v12 = vsel %vm14391_vm7, %v2828_v53, %v2835_v59  ;;  %v2842_v16 = vshll.u32 %v2469_v49, 16 }
  0xae   : > { %18943 = vst [vmem:[#allocation21_spill] sm:$0xff] %v14406_v12  ;;  %v2866_v13 = vshrl.u32 %v2505_v15, 16  ;;  %v2869_v14 = vshll.u32 %v2505_v15, 16  ;;  %v2857_v17 = vshrl.u32 %v2493_v4, 16  ;;  %v11770_v21 = vcombine.low %v1602_v1, %v1603_v5 }
  0xaf   : > { %v948_v9 = vpop.permute.xlu1 %947  ;;  %v936_v10 = vpop.permute.xlu0 %935  ;;  %v1604_v30 = vmul.bf16 %v14383_v62, %v14131_v31  ;;  %v2853_v22 = vor.u32 %v2851_v8, %v2850_v2  ;;  %v2844_v23 = vor.u32 %v2842_v16, %v2841_v3  ;;  %v2846_v24 = vrot.slane %v2841_v3, 4 }
  0xb0   : > { %v956_v19 = vrot.slane %v948_v9, %v14319_v34  ;;  %v944_v26 = vrot.slane %v936_v10, %v14319_v34  ;;  %v2859_v25 = vrot.slane %v2857_v17, 7  ;;  %v2860_v18 = vshll.u32 %v2493_v4, 16 }
  0xb1   : > { %v2029_v29 = vshrl.u32 %v11769_v11, 16  ;;  %v14412_v37 = vrot.slane %v2866_v13, 7  ;;  %v2855_v43 = vrot.slane %v2850_v2, 4  ;;  %v2032_v45 = vshll.u32 %v11769_v11, 16 }
  0xb2   : > { %v1318_v27 = vshll.u32 %v956_v19, 16  ;;  %v1322_v39 = vshrl.u32 %v956_v19, 16  ;;  %v1308_v40 = vshll.u32 %v944_v26, 16  ;;  %v1312_v42 = vshrl.u32 %v944_v26, 16 }
  0xb3   : > { %v972_v33 = vpop.permute.xlu1 %971  ;;  %v960_v35 = vpop.permute.xlu0 %959  ;;  %v2862_v44 = vor.u32 %v2860_v18, %v2859_v25  ;;  %v2037_v56 = vshrl.u32 %v11770_v21, 16  ;;  %v14416_v57 = vsel %vm14391_vm7, %v2837_v7, %v2844_v23  ;;  %v2031_v58 = vrot.slane %v2029_v29, 3 }
  0xb4   : > { %v1320_v31 = vrot.slane %v1318_v27, 5  ;;  %v1324_v47 = vrot.slane %v1322_v39, 4  ;;  %v1310_v49 = vrot.slane %v1308_v40, 5  ;;  %v1314_v55 = vrot.slane %v1312_v42, 4  ;;  %18944 = vst [vmem:[#allocation22_spill] sm:$0xff] %v14416_v57 }
  0xb5   : > { %v2034_v53 = vrot.slane %v2032_v45, 4  ;;  %v2040_v59 = vshll.u32 %v11770_v21, 16  ;;  %v14420_v15 = vsel %vm14391_vm7, %v2846_v24, %v2853_v22  ;;  %v2871_v1 = vor.u32 %v2869_v14, %v14412_v37 }
  0xb6   : > { %18945 = vst [vmem:[#allocation23_spill] sm:$0xff] %v14420_v15  ;;  %v2873_v2 = vrot.slane %v14412_v37, 4  ;;  %v2864_v3 = vrot.slane %v2859_v25, 4  ;;  %v14426_v4 = vsel %vm14391_vm7, %v2855_v43, %v2862_v44  ;;  %v1315_v5 = vor.u32 %v1314_v55, %v1310_v49 }
  0xb7   : > { %v2521_v60 = vpop.permute.xlu1 %2520  ;;  %v2509_v61 = vpop.permute.xlu0 %2508  ;;  %18946 = vst [vmem:[#allocation24_spill] sm:$0xff] %v14426_v4  ;;  %v2039_v7 = vrot.slane %v2037_v56, 3  ;;  %v2042_v8 = vrot.slane %v2040_v59, 4  ;;  %v1325_v9 = vor.u32 %v1324_v47, %v1320_v31  ;;  %v980_v10 = vrot.slane %v972_v33, %v14319_v34  ;;  %v2401_v47 = vld [vmem:[#allocation2 + $0x8] sm:$0xf] }
  0xb8   : > { %v968_v11 = vrot.slane %v960_v35, %v14319_v34  ;;  %v1605_v16 = vmul.bf16 %v14387_v63, %v14133_v32  ;;  %v2035_v13 = vor.u32 %v2034_v53, %v2031_v58  ;;  %v2529_v17 = vrot.slane %v2521_v60, %v14319_v34  ;;  %v2403_v59 = vld [vmem:[#allocation2 + $0x10] sm:$0xf] }
  0xb9   : > { %v2043_v14 = vor.u32 %v2042_v8, %v2039_v7  ;;  %v2517_v19 = vrot.slane %v2509_v61, %v14319_v34  ;;  %v1338_v22 = vshll.u32 %v980_v10, 16  ;;  %v1342_v23 = vshrl.u32 %v980_v10, 16 }
  0xba   : > { %v1328_v24 = vshll.u32 %v968_v11, 16  ;;  %v1332_v26 = vshrl.u32 %v968_v11, 16  ;;  %v1316_v18 = vrot.slane %v1315_v5, 4  ;;  %v11771_v29 = vcombine.low %v1604_v30, %v1605_v16  ;;  %v2402_v30 = vld [vmem:[#allocation2 + $0xc] sm:$0xf] }
  0xbb   : > { %v2545_v21 = vpop.permute.xlu1 %2544  ;;  %v2533_v25 = vpop.permute.xlu0 %2532  ;;  %v2044_v27 = vsel %vm2027_vm8, %v2035_v13, %v2043_v14  ;;  %v2884_v33 = vshrl.u32 %v2529_v17, 16  ;;  %v1340_v32 = vrot.slane %v1338_v22, 5  ;;  %v1344_v35 = vrot.slane %v1342_v23, 4  ;;  %v2404_v5 = vld [vmem:[#allocation2 + $0x14] sm:$0xf] }
  0xbc   : > { %12899 = vmatprep.mubr.msk.bf16.mxu1 %vm18912_vm1, %v2044_v27  ;;  %v1330_v39 = vrot.slane %v1328_v24, 5  ;;  %v1334_v40 = vrot.slane %v1332_v26, 4  ;;  %v14438_v42 = vsel %vm14391_vm7, %v2864_v3, %v2871_v1  ;;  %v14443_v43 = vsel %vm14350_vm4, %v14401_v6, %v1310_v49 }
  0xbd   : > { %18947 = vst [vmem:[#allocation25_spill] sm:$0xff] %v14438_v42  ;;  %18948 = vst [vmem:[#allocation26_spill] sm:$0xff] %v14443_v43  ;;  %v2046_v44 = vshrl.u32 %v11771_v29, 16  ;;  %v2049_v45 = vshll.u32 %v11771_v29, 16  ;;  %v1326_v55 = vrot.slane %v1325_v9, 4  ;;  %v14445_v58 = vrot.slane %v2884_v33, 7 }
  0xbe   : > { %v1335_v56 = vor.u32 %v1334_v40, %v1330_v39  ;;  %v2875_v53 = vshrl.u32 %v2517_v19, 16  ;;  %v14449_v60 = vsel %vm14350_vm4, %v1316_v18, %v1320_v31  ;;  %v2887_v3 = vshll.u32 %v2529_v17, 16 }
  0xbf   : > { %18949 = vst [vmem:[#allocation27_spill] sm:$0xff] %v14449_v60  ;;  %v2048_v61 = vrot.slane %v2046_v44, 3  ;;  %v2051_v1 = vrot.slane %v2049_v45, 4  ;;  %v996_v6 = vpop.permute.xlu1 %995  ;;  %v1345_v49 = vor.u32 %v1344_v35, %v1340_v32  ;;  %v2878_v10 = vshll.u32 %v2517_v19, 16  ;;  %v984_v9 = vpop.permute.xlu0 %983  ;;  %v2405_v19 = vld [vmem:[#allocation2 + $0x18] sm:$0xf] }
  0xc0   : > { %v1336_v7 = vrot.slane %v1335_v56, 4  ;;  %v2877_v8 = vrot.slane %v2875_v53, 7  ;;  %v3141_v16 = vmul.bf16 %v14376_v54, %v2401_v47  ;;  %v3142_v13 = vmul.bf16 %v14406_v12, %v2402_v30  ;;  %v2406_v44 = vld [vmem:[#allocation2 + $0x1c] sm:$0xf] }
  0xc1   : > { %v14451_v11 = vor.u32 %v2051_v1, %v2048_v61  ;;  %v3143_v31 = vmul.bf16 %v14416_v57, %v2403_v59  ;;  %v14458_v22 = vsel %vm14350_vm4, %v1326_v55, %v1330_v39  ;;  %v2889_v17 = vor.u32 %v2887_v3, %v14445_v58 }
  0xc2   : > { %18950 = vst [vmem:[#allocation28_spill] sm:$0xff] %v14458_v22  ;;  %v2880_v23 = vor.u32 %v2878_v10, %v2877_v8  ;;  %v3144_v24 = vmul.bf16 %v14420_v15, %v2404_v5  ;;  %v11808_v18 = vcombine.low %v3141_v16, %v3142_v13  ;;  %v2553_v27 = vrot.slane %v2545_v21, %v14319_v34 }
  0xc3   : > { %v2053_v26 = vsel %vm2027_vm8, %v2043_v14, %v14451_v11  ;;  %v2541_v29 = vrot.slane %v2533_v25, %v14319_v34  ;;  %v14466_v33 = vrot.slane %v1345_v49, 4  ;;  %v2891_v35 = vrot.slane %v14445_v58, 4  ;;  %v1020_v21 = vpop.permute.xlu1 %1019  ;;  %v1008_v59 = vpop.permute.xlu0 %1007 }
  0xc4   : > { %12900 = vmatmul.mubr.msk.bf16.vlgmr.msra.gmra.mxu1 %vm18912_vm1, %v2053_v26  ;;  %v2882_v39 = vrot.slane %v2877_v8, 4  ;;  %v11809_v40 = vcombine.low %v3143_v31, %v3144_v24  ;;  %v14472_v45 = vsel %vm14350_vm4, %v1336_v7, %v1340_v32  ;;  %v3266_v47 = vshll.u32 %v11808_v18, 16  ;;  %v13594_v32 = vld [vmem:[%s18678_s3 + $0x30] sm:$0xff]  }
  0xc5   : > { %18951 = vst [vmem:[#allocation29_spill] sm:$0xff] %v14472_v45  ;;  %v2902_v14 = vshrl.u32 %v2553_v27, 16  ;;  %v3145_v30 = vmul.bf16 %v14426_v4, %v2405_v19  ;;  %12968 = vmatpush3.bf16.msra.mxu1 %v14332_v41  ;;  %v14480_v25 = vsel %vm14391_vm7, %v2873_v2, %v2880_v23  ;;  %v3264_v55 = vshrl.u32 %v11808_v18, 16  ;;  %v13704_v4 = vld [vmem:[#allocation2 + $0x48] sm:$0xf] }
  0xc6   : > { %18952 = vst [vmem:[#allocation30_spill] sm:$0xff] %v14480_v25  ;;  %v3271_v56 = vshll.u32 %v11809_v40, 16  ;;  %v2893_v53 = vshrl.u32 %v2541_v29, 16  ;;  %v3268_v61 = vrot.slane %v3266_v47, 1  ;;  %v3146_v3 = vmul.bf16 %v14438_v42, %v2406_v44  ;;  %12969 = vmatprep.subr.bf16.mxu1 %v13594_v32 }
  0xc7   : > { %v14485_v1 = vrot.slane %v2902_v14, 7  ;;  %v1004_v41 = vrot.slane %v996_v6, %v14319_v34  ;;  %v14491_v37 = vsel %vm14391_vm7, %v2882_v39, %v2889_v17  ;;  %v2905_v5 = vshll.u32 %v2553_v27, 16  ;;  %v2557_v44 = vpop.permute.xlu0 %2556 }
  0xc8   : > { %18953 = vst [vmem:[#allocation31_spill] sm:$0xff] %v14491_v37  ;;  %v3273_v2 = vrot.slane %v3271_v56, 1  ;;  %v992_v49 = vrot.slane %v984_v9, %v14319_v34  ;;  %v3269_v7 = vor.u32 %v3268_v61, %v3264_v55  ;;  %v3275_v8 = vshrl.u32 %v11809_v40, 16  ;;  %v2569_v9 = vpop.permute.xlu1 %2568 }
  0xc9   : > { %v14494_v10 = vcombine.low %v3145_v30, %v3146_v3  ;;  %v1028_v16 = vrot.slane %v1020_v21, %v14319_v34  ;;  %12970 = vmatpush3.bf16.msra.mxu1 %v13594_v32  ;;  %v2907_v13 = vor.u32 %v2905_v5, %v14485_v1  ;;  %v2895_v31 = vrot.slane %v2893_v53, 7  ;;  %v13595_v32 = vld [vmem:[%s18678_s3 + $0x40] sm:$0xff]  }
  0xca   : > { %v2896_v6 = vshll.u32 %v2541_v29, 16  ;;  %v1358_v23 = vshll.u32 %v1004_v41, 16  ;;  %v3274_v17 = vsel %vm3262_vm9, %v3269_v7, %v3273_v2  ;;  %v1362_v19 = vshrl.u32 %v1004_v41, 16 }
  0xcb   : > { %v3279_v24 = vshll.u32 %v14494_v10, 16  ;;  %v1348_v26 = vshll.u32 %v992_v49, 16  ;;  %v3277_v18 = vor.u32 %v3275_v8, %v3273_v2  ;;  %12935 = vmatprep.mubr.msk.bf16.mxu0 %vm18912_vm1, %v3274_v17  ;;  %v2909_v27 = vrot.slane %v14485_v1, 4 }
  0xcc   : > { %v1360_v39 = vrot.slane %v1358_v23, 5  ;;  %v1352_v40 = vshrl.u32 %v992_v49, 16  ;;  %v1364_v14 = vrot.slane %v1362_v19, 4  ;;  %v1378_v30 = vshll.u32 %v1028_v16, 16 }
  0xcd   : > { %v14502_v47 = vrot.slane %v3279_v24, 1  ;;  %v1350_v29 = vrot.slane %v1348_v26, 5  ;;  %v2898_v21 = vor.u32 %v2896_v6, %v2895_v31  ;;  %v1382_v56 = vshrl.u32 %v1028_v16, 16  ;;  %v13693_v6 = vld [vmem:[#allocation2 + $0x1c] sm:$0xf]  ;;  %v2593_v24 = vpop.permute.xlu1 %2592 }
  0xce   : > { %v1354_v55 = vrot.slane %v1352_v40, 4  ;;  %v1016_v53 = vrot.slane %v1008_v59, %v14319_v34  ;;  %v2900_v61 = vrot.slane %v2895_v31, 4  ;;  %v1365_v41 = vor.u32 %v1364_v14, %v1360_v39  ;;  %v13694_v59 = vld [vmem:[#allocation2 + $0x20] sm:$0xf]  ;;  %v2581_v14 = vpop.permute.xlu0 %2580 }
  0xcf   : > { %v3282_v3 = vsel %vm3262_vm9, %v3277_v18, %v14502_v47  ;;  %v1380_v2 = vrot.slane %v1378_v30, 5  ;;  %v1384_v49 = vrot.slane %v1382_v56, 4  ;;  %v1606_v16 = vmul.bf16 %v13693_v6, %v14443_v43 }
  0xd0   : > { %12936 = vmatmul.mubr.msk.bf16.vlgmr.msra.gmra.mxu0 %vm18912_vm1, %v3282_v3  ;;  %v1355_v5 = vor.u32 %v1354_v55, %v1350_v29  ;;  %v1368_v7 = vshll.u32 %v1016_v53, 16  ;;  %v1372_v8 = vshrl.u32 %v1016_v53, 16  ;;  %v1607_v23 = vmul.bf16 %v13694_v59, %v14449_v60 }
  0xd1   : > { %v2577_v17 = vrot.slane %v2569_v9, %v14319_v34  ;;  %v2565_v31 = vrot.slane %v2557_v44, %v14319_v34  ;;  %13004 = vmatpush3.bf16.msra.mxu0 %v14342_v52  ;;  %v14520_v19 = vsel %vm14391_vm7, %v2891_v35, %v2898_v21  ;;  %v1385_v30 = vor.u32 %v1384_v49, %v1380_v2 }
  0xd2   : > { %18954 = vst [vmem:[#allocation32_spill] sm:$0xff] %v14520_v19  ;;  %v1356_v26 = vrot.slane %v1355_v5, 4  ;;  %v1370_v18 = vrot.slane %v1368_v7, 5  ;;  %v1374_v40 = vrot.slane %v1372_v8, 4  ;;  %13005 = vmatprep.subr.bf16.mxu0 %v13595_v32  ;;  %v11772_v55 = vcombine.low %v1606_v16, %v1607_v23  ;;  %v13695_v8 = vld [vmem:[#allocation2 + $0x24] sm:$0xf] }
  0xd3   : > { %v2920_v56 = vshrl.u32 %v2577_v17, 16  ;;  %v2911_v9 = vshrl.u32 %v2565_v31, 16  ;;  %v14524_v44 = vsel %vm14391_vm7, %v2900_v61, %v2907_v13  ;;  %v1366_v52 = vrot.slane %v1365_v41, 4  ;;  %v13696_v13 = vld [vmem:[#allocation2 + $0x28] sm:$0xf] }
  0xd4   : > { %18955 = vst [vmem:[#allocation33_spill] sm:$0xff] %v14524_v44  ;;  %v14529_v58 = vsel %vm14350_vm4, %v14466_v33, %v1350_v29  ;;  %v1375_v35 = vor.u32 %v1374_v40, %v1370_v18  ;;  %v2055_v21 = vshrl.u32 %v11772_v55, 16  ;;  %v2058_v53 = vshll.u32 %v11772_v55, 16  ;;  %v2407_v41 = vld [vmem:[#allocation2 + $0x20] sm:$0xf] }
  0xd5   : > { %18956 = vst [vmem:[#allocation34_spill] sm:$0xff] %v14529_v58  ;;  %v14531_v3 = vrot.slane %v2920_v56, 7  ;;  %v2923_v5 = vshll.u32 %v2577_v17, 16  ;;  %13006 = vmatpush3.bf16.msra.mxu0 %v13595_v32  ;;  %v2913_v7 = vrot.slane %v2911_v9, 7  ;;  %v1608_v6 = vmul.bf16 %v13695_v8, %v14458_v22  ;;  %v2408_v16 = vld [vmem:[#allocation2 + $0x24] sm:$0xf]  ;;  %v1044_v17 = vpop.permute.xlu1 %1043  ;;  %v1032_v9 = vpop.permute.xlu0 %1031 }
  0xd6   : > { %v1376_v49 = vrot.slane %v1375_v35, 4  ;;  %v1609_v61 = vmul.bf16 %v13696_v13, %v14472_v45  ;;  %v14537_v33 = vsel %vm14350_vm4, %v1356_v26, %v1360_v39  ;;  %v14539_v29 = vrot.slane %v1385_v30, 4  ;;  %v2409_v30 = vld [vmem:[#allocation2 + $0x28] sm:$0xf]  ;;  %v2410_v13 = vld [vmem:[#allocation2 + $0x2c] sm:$0xf] }
  0xd7   : > { %18957 = vst [vmem:[#allocation35_spill] sm:$0xff] %v14537_v33  ;;  %v2057_v59 = vrot.slane %v2055_v21, 3  ;;  %v2060_v23 = vrot.slane %v2058_v53, 4  ;;  %v14543_v32 = vsel %vm14350_vm4, %v1366_v52, %v1370_v18  ;;  %v2925_v40 = vor.u32 %v2923_v5, %v14531_v3 }
  0xd8   : > { %18958 = vst [vmem:[#allocation36_spill] sm:$0xff] %v14543_v32  ;;  %v2914_v55 = vshll.u32 %v2565_v31, 16  ;;  %v11773_v56 = vcombine.low %v1608_v6, %v1609_v61  ;;  %v3147_v39 = vmul.bf16 %v14480_v25, %v2407_v41  ;;  %v3148_v26 = vmul.bf16 %v14491_v37, %v2408_v16  ;;  %v13700_v37 = vld [vmem:[#allocation2 + $0x38] sm:$0xf] }
  0xd9   : > { %v2061_v35 = vor.u32 %v2060_v23, %v2057_v59  ;;  %v14551_v21 = vsel %vm14350_vm4, %v1376_v49, %v1380_v2  ;;  %v3283_v6 = vshrl.u32 %v14494_v10, 16  ;;  %v2601_v61 = vrot.slane %v2593_v24, %v14319_v34  ;;  %v1068_v50 = vpop.permute.xlu1 %1067 }
  0xda   : > { %18959 = vst [vmem:[#allocation37_spill] sm:$0xff] %v14551_v21  ;;  %v2916_v53 = vor.u32 %v2914_v55, %v2913_v7  ;;  %v2064_v18 = vshrl.u32 %v11773_v56, 16  ;;  %v2067_v52 = vshll.u32 %v11773_v56, 16  ;;  %v11811_v5 = vcombine.low %v3147_v39, %v3148_v26  ;;  %v1056_v26 = vpop.permute.xlu0 %1055 }
  0xdb   : > { %v2062_v31 = vsel %vm2027_vm8, %v14451_v11, %v2061_v35  ;;  %v2589_v59 = vrot.slane %v2581_v14, %v14319_v34  ;;  %v3149_v2 = vmul.bf16 %v14520_v19, %v2409_v30  ;;  %v2918_v49 = vrot.slane %v2913_v7, 4 }
  0xdc   : > { %12903 = vmatprep.mubr.msk.bf16.mxu1 %vm18912_vm1, %v2062_v31  ;;  %v2066_v41 = vrot.slane %v2064_v18, 3  ;;  %v2069_v16 = vrot.slane %v2067_v52, 4  ;;  %v3287_v23 = vshll.u32 %v11811_v5, 16  ;;  %v2938_v55 = vshrl.u32 %v2601_v61, 16 }
  0xdd   : > { %v3150_v56 = vmul.bf16 %v14524_v44, %v2410_v13  ;;  %v3285_v10 = vor.u32 %v3283_v6, %v14502_v47  ;;  %v2941_v39 = vshll.u32 %v2601_v61, 16  ;;  %v2929_v24 = vshrl.u32 %v2589_v59, 16  ;;  %v13699_v44 = vld [vmem:[#allocation2 + $0x34] sm:$0xf] }
  0xde   : > { %v14561_v11 = vor.u32 %v2069_v16, %v2066_v41  ;;  %v3289_v31 = vrot.slane %v3287_v23, 1  ;;  %v14564_v18 = vrot.slane %v2938_v55, 7  ;;  %v1052_v14 = vrot.slane %v1044_v17, %v14319_v34 }
  0xdf   : > { %v14566_v52 = vcombine.low %v3149_v2, %v3150_v56  ;;  %v2931_v30 = vrot.slane %v2929_v24, 7  ;;  %v1040_v13 = vrot.slane %v1032_v9, %v14319_v34  ;;  %v1076_v41 = vrot.slane %v1068_v50, %v14319_v34  ;;  %v2617_v56 = vpop.permute.xlu1 %2616 }
  0xe0   : > { %v2071_v7 = vsel %vm2027_vm8, %v2061_v35, %v14561_v11  ;;  %v14577_v47 = vsel %vm14391_vm7, %v2909_v27, %v2916_v53  ;;  %v14581_v6 = vsel %vm14391_vm7, %v2918_v49, %v2925_v40  ;;  %v3290_v17 = vsel %vm3262_vm9, %v3285_v10, %v3289_v31  ;;  %v2605_v10 = vpop.permute.xlu0 %2604 }
  0xe1   : > { %18960 = vst [vmem:[#allocation38_spill] sm:$0xff] %v14577_v47  ;;  %18961 = vst [vmem:[#allocation39_spill] sm:$0xff] %v14581_v6  ;;  %12904 = vmatmul.mubr.msk.bf16.gmra.mxu1 %vm18912_vm1, %v2071_v7  ;;  %v2932_v35 = vshll.u32 %v2589_v59, 16  ;;  %12939 = vmatprep.mubr.msk.bf16.mxu0 %vm18912_vm1, %v3290_v17  ;;  %v2943_v9 = vor.u32 %v2941_v39, %v14564_v18  ;;  %v3291_v50 = vshrl.u32 %v11811_v5, 16  ;;  %v3295_v1 = vshll.u32 %v14566_v52, 16 }
  0xe2   : > { %v1398_v61 = vshll.u32 %v1052_v14, 16  ;;  %v1402_v16 = vshrl.u32 %v1052_v14, 16  ;;  %v1388_v27 = vshll.u32 %v1040_v13, 16  ;;  %v1392_v53 = vshrl.u32 %v1040_v13, 16 }
  0xe3   : > { %v1418_v2 = vshll.u32 %v1076_v41, 16  ;;  %v2934_v23 = vor.u32 %v2932_v35, %v2931_v30  ;;  %v3293_v40 = vor.u32 %v3291_v50, %v3289_v31  ;;  %v14588_v49 = vrot.slane %v3295_v1, 1  ;;  %v13697_v50 = vld [vmem:[#allocation2 + $0x2c] sm:$0xf] }
  0xe4   : > { %v1400_v55 = vrot.slane %v1398_v61, 5  ;;  %v2936_v59 = vrot.slane %v2931_v30, 4  ;;  %v1404_v24 = vrot.slane %v1402_v16, 4  ;;  %v1390_v7 = vrot.slane %v1388_v27, 5  ;;  %v13698_v61 = vld [vmem:[#allocation2 + $0x30] sm:$0xf]  ;;  %v2629_v28 = vpop.permute.xlu0 %2628 }
  0xe5   : > { %v1394_v17 = vrot.slane %v1392_v53, 4  ;;  %v3298_v5 = vsel %vm3262_vm9, %v3293_v40, %v14588_v49  ;;  %v14592_v39 = vrot.slane %v1418_v2, 5  ;;  %v1422_v14 = vshrl.u32 %v1076_v41, 16  ;;  %v13596_v41 = vld [vmem:[%s18678_s3 + $0x58] sm:$0xff]  }
  0xe6   : > { %v1064_v13 = vrot.slane %v1056_v26, %v14319_v34  ;;  %12940 = vmatmul.mubr.msk.bf16.gmra.mxu0 %vm18912_vm1, %v3298_v5  ;;  %v1405_v31 = vor.u32 %v1404_v24, %v1400_v55  ;;  %v1610_v1 = vmul.bf16 %v13697_v50, %v14529_v58  ;;  %v1611_v30 = vmul.bf16 %v13698_v61, %v14537_v33 }
  0xe7   : > { %v1395_v35 = vor.u32 %v1394_v17, %v1390_v7  ;;  %v1424_v16 = vrot.slane %v1422_v14, 4  ;;  %v2625_v40 = vrot.slane %v2617_v56, %v14319_v34  ;;  %v2613_v17 = vrot.slane %v2605_v10, %v14319_v34  ;;  %v2641_v14 = vpop.permute.xlu1 %2640  ;;  %13039 = vmatprep.subr.bf16.mxu1 %v13596_v41 }
  0xe8   : > { %v1408_v27 = vshll.u32 %v1064_v13, 16  ;;  %v1412_v53 = vshrl.u32 %v1064_v13, 16  ;;  %v11774_v24 = vcombine.low %v1610_v1, %v1611_v30  ;;  %v18962_v56 = vrot.slane %v14531_v3, 4 }
  0xe9   : > { %v1396_v2 = vrot.slane %v1395_v35, 4  ;;  %v1425_v5 = vor.u32 %v1424_v16, %v14592_v39  ;;  %v2956_v61 = vshrl.u32 %v2625_v40, 16  ;;  %v14613_v35 = vsel %vm14391_vm7, %v2936_v59, %v2943_v9  ;;  %v2412_v59 = vld [vmem:[#allocation2 + $0x34] sm:$0xf] }
  0xea   : > { %v1410_v50 = vrot.slane %v1408_v27, 5  ;;  %v1414_v8 = vrot.slane %v1412_v53, 4  ;;  %v14609_v13 = vsel %vm14391_vm7, %v18962_v56, %v2934_v23  ;;  %18964 = vst [vmem:[#allocation41_spill] sm:$0xff] %v14613_v35  ;;  %v2073_v1 = vshrl.u32 %v11774_v24, 16  ;;  %v2411_v53 = vld [vmem:[#allocation2 + $0x30] sm:$0xf] }
  0xeb   : > { %18963 = vst [vmem:[#allocation40_spill] sm:$0xff] %v14609_v13  ;;  %v2076_v10 = vshll.u32 %v11774_v24, 16  ;;  %v1406_v30 = vrot.slane %v1405_v31, 4  ;;  %v14618_v16 = vsel %vm14350_vm4, %v14539_v29, %v1390_v7  ;;  %v14622_v27 = vsel %vm14350_vm4, %v1396_v2, %v1400_v55 }
  0xec   : > { %18965 = vst [vmem:[#allocation42_spill] sm:$0xff] %v14618_v16  ;;  %18966 = vst [vmem:[#allocation43_spill] sm:$0xff] %v14622_v27  ;;  %v1415_v3 = vor.u32 %v1414_v8, %v1410_v50  ;;  %v2075_v23 = vrot.slane %v2073_v1, 3  ;;  %v14624_v56 = vrot.slane %v2956_v61, 7  ;;  %v2947_v9 = vshrl.u32 %v2613_v17, 16 }
  0xed   : > { %v2078_v41 = vrot.slane %v2076_v10, 4  ;;  %v14626_v26 = vrot.slane %v1425_v5, 4  ;;  %v2959_v24 = vshll.u32 %v2625_v40, 16  ;;  %v1612_v29 = vmul.bf16 %v13699_v44, %v14543_v32  ;;  %v1092_v40 = vpop.permute.xlu1 %1091  ;;  %v1080_v10 = vpop.permute.xlu0 %1079  ;;  %v13598_v44 = vld [vmem:[%s18678_s3 + $0x68] sm:$0xff]  }
  0xee   : > { %v1416_v31 = vrot.slane %v1415_v3, 4  ;;  %v2949_v19 = vrot.slane %v2947_v9, 7  ;;  %v1613_v55 = vmul.bf16 %v13700_v37, %v14551_v21  ;;  %v3151_v8 = vmul.bf16 %v14577_v47, %v2411_v53  ;;  %v2414_v9 = vld [vmem:[#allocation2 + $0x3c] sm:$0xf]  ;;  %13075 = vmatprep.subr.bf16.mxu0 %v13598_v44 }
  0xef   : > { %v2079_v7 = vor.u32 %v2078_v41, %v2075_v23  ;;  %v14633_v2 = vsel %vm14350_vm4, %v1406_v30, %v1410_v50  ;;  %v2950_v61 = vshll.u32 %v2613_v17, 16  ;;  %v3152_v5 = vmul.bf16 %v14581_v6, %v2412_v59  ;;  %v2413_v30 = vld [vmem:[#allocation2 + $0x38] sm:$0xf] }
  0xf0   : > { %18967 = vst [vmem:[#allocation44_spill] sm:$0xff] %v14633_v2  ;;  %v2649_v1 = vrot.slane %v2641_v14, %v14319_v34  ;;  %v2961_v3 = vor.u32 %v2959_v24, %v14624_v56  ;;  %v11775_v50 = vcombine.low %v1612_v29, %v1613_v55  ;;  %v2954_v23 = vrot.slane %v2949_v19, 4 }
  0xf1   : > { %v2080_v37 = vsel %vm2027_vm8, %v14561_v11, %v2079_v7  ;;  %v2952_v17 = vor.u32 %v2950_v61, %v2949_v19  ;;  %v11813_v14 = vcombine.low %v3151_v8, %v3152_v5  ;;  %v3299_v41 = vshrl.u32 %v14566_v52, 16 }
  0xf2   : > { %12907 = vmatprep.mubr.msk.bf16.mxu1 %vm18912_vm1, %v2080_v37  ;;  %v14649_v59 = vsel %vm14350_vm4, %v1416_v31, %v14592_v39  ;;  %v2082_v11 = vshrl.u32 %v11775_v50, 16  ;;  %v2085_v24 = vshll.u32 %v11775_v50, 16  ;;  %v2974_v6 = vshrl.u32 %v2649_v1, 16 }
  0xf3   : > { %18968 = vst [vmem:[#allocation45_spill] sm:$0xff] %v14649_v59  ;;  %v3301_v29 = vor.u32 %v3299_v41, %v14588_v49  ;;  %v3303_v55 = vshll.u32 %v11813_v14, 16  ;;  %v2637_v37 = vrot.slane %v2629_v28, %v14319_v34  ;;  %v3153_v19 = vmul.bf16 %v14609_v13, %v2413_v30  ;;  %v1116_v28 = vpop.permute.xlu1 %1115  ;;  %v1104_v41 = vpop.permute.xlu0 %1103 }
  0xf4   : > { %v2084_v8 = vrot.slane %v2082_v11, 3  ;;  %v2087_v61 = vrot.slane %v2085_v24, 4  ;;  %v2977_v52 = vshll.u32 %v2649_v1, 16  ;;  %v3154_v5 = vmul.bf16 %v14613_v35, %v2414_v9 }
  0xf5   : > { %v18969_v44 = vrot.slane %v14564_v18, 4  ;;  %v14663_v31 = vsel %vm14391_vm7, %v2954_v23, %v2961_v3  ;;  %v3305_v49 = vrot.slane %v3303_v55, 1  ;;  %v2965_v50 = vshrl.u32 %v2637_v37, 16 }
  0xf6   : > { %18971 = vst [vmem:[#allocation47_spill] sm:$0xff] %v14663_v31  ;;  %v14665_v30 = vor.u32 %v2087_v61, %v2084_v8  ;;  %v14667_v11 = vrot.slane %v2974_v6, 7  ;;  %v14669_v1 = vcombine.low %v3153_v19, %v3154_v5  ;;  %v1100_v18 = vrot.slane %v1092_v40, %v14319_v34 }
  0xf7   : > { %v14659_v39 = vsel %vm14391_vm7, %v18969_v44, %v2952_v17  ;;  %v3306_v9 = vsel %vm3262_vm9, %v3301_v29, %v3305_v49  ;;  %v2967_v17 = vrot.slane %v2965_v50, 7  ;;  %v3307_v24 = vshrl.u32 %v11813_v14, 16  ;;  %v2665_v35 = vpop.permute.xlu1 %2664  ;;  %v2653_v13 = vpop.permute.xlu0 %2652 }
  0xf8   : > { %18970 = vst [vmem:[#allocation46_spill] sm:$0xff] %v14659_v39  ;;  %v1088_v44 = vrot.slane %v1080_v10, %v14319_v34  ;;  %v2089_v3 = vsel %vm2027_vm8, %v2079_v7, %v14665_v30  ;;  %12943 = vmatprep.mubr.msk.bf16.mxu0 %vm18912_vm1, %v3306_v9  ;;  %v3311_v23 = vshll.u32 %v14669_v1, 16  ;;  %v1438_v55 = vshll.u32 %v1100_v18, 16 }
  0xf9   : > { %v1442_v6 = vshrl.u32 %v1100_v18, 16  ;;  %12908 = vmatmul.mubr.msk.bf16.gmra.mxu1 %vm18912_vm1, %v2089_v3  ;;  %v2968_v19 = vshll.u32 %v2637_v37, 16  ;;  %v3309_v8 = vor.u32 %v3307_v24, %v3305_v49  ;;  %v1124_v10 = vrot.slane %v1116_v28, %v14319_v34 }
  0xfa   : > { %v1428_v40 = vshll.u32 %v1088_v44, 16  ;;  %v1432_v61 = vshrl.u32 %v1088_v44, 16  ;;  %v14679_v29 = vrot.slane %v3311_v23, 1  ;;  %v1440_v14 = vrot.slane %v1438_v55, 5 }
  0xfb   : > { %v1444_v5 = vrot.slane %v1442_v6, 4  ;;  %v2979_v7 = vor.u32 %v2977_v52, %v14667_v11  ;;  %v2970_v50 = vor.u32 %v2968_v19, %v2967_v17  ;;  %v1458_v49 = vshll.u32 %v1124_v10, 16  ;;  %v13701_v6 = vld [vmem:[#allocation2 + $0x3c] sm:$0xf]  ;;  %v2689_v47 = vpop.permute.xlu1 %2688  ;;  %v2677_v25 = vpop.permute.xlu0 %2676 }
  0xfc   : > { %v1430_v9 = vrot.slane %v1428_v40, 5  ;;  %v1434_v53 = vrot.slane %v1432_v61, 4  ;;  %v3314_v37 = vsel %vm3262_vm9, %v3309_v8, %v14679_v29  ;;  %v1462_v24 = vshrl.u32 %v1124_v10, 16  ;;  %v13702_v40 = vld [vmem:[#allocation2 + $0x40] sm:$0xf] }
  0xfd   : > { %v2972_v44 = vrot.slane %v2967_v17, 4  ;;  %12944 = vmatmul.mubr.msk.bf16.gmra.mxu0 %vm18912_vm1, %v3314_v37  ;;  %v1445_v3 = vor.u32 %v1444_v5, %v1440_v14  ;;  %v1112_v28 = vrot.slane %v1104_v41, %v14319_v34  ;;  %v1460_v52 = vrot.slane %v1458_v49, 5 }
  0xfe   : > { %v1435_v23 = vor.u32 %v1434_v53, %v1430_v9  ;;  %v1464_v55 = vrot.slane %v1462_v24, 4  ;;  %v1614_v19 = vmul.bf16 %v13701_v6, %v14618_v16  ;;  %v1615_v61 = vmul.bf16 %v13702_v40, %v14622_v27 }
  0xff   : > { %v18972_v18 = vrot.slane %v14624_v56, 4  ;;  %v1448_v17 = vshll.u32 %v1112_v28, 16  ;;  %v1452_v10 = vshrl.u32 %v1112_v28, 16  ;;  %v2673_v53 = vrot.slane %v2665_v35, %v14319_v34 }
 0x100   : > { %v1436_v5 = vrot.slane %v1435_v23, 4  ;;  %v1465_v41 = vor.u32 %v1464_v55, %v1460_v52  ;;  %v11776_v37 = vcombine.low %v1614_v19, %v1615_v61  ;;  %v2661_v49 = vrot.slane %v2653_v13, %v14319_v34  ;;  %v13703_v19 = vld [vmem:[#allocation2 + $0x44] sm:$0xf] }
 0x101   : > { %v14694_v8 = vsel %vm14391_vm7, %v18972_v18, %v2970_v50  ;;  %v14700_v24 = vsel %vm14391_vm7, %v2972_v44, %v2979_v7  ;;  %v1450_v6 = vrot.slane %v1448_v17, 5  ;;  %v1454_v40 = vrot.slane %v1452_v10, 4  ;;  %v2415_v44 = vld [vmem:[#allocation2 + $0x40] sm:$0xf]  ;;  %v2416_v61 = vld [vmem:[#allocation2 + $0x44] sm:$0xf] }
 0x102   : > { %18973 = vst [vmem:[#allocation48_spill] sm:$0xff] %v14694_v8  ;;  %18974 = vst [vmem:[#allocation49_spill] sm:$0xff] %v14700_v24  ;;  %v2992_v56 = vshrl.u32 %v2673_v53, 16  ;;  %v1446_v50 = vrot.slane %v1445_v3, 4  ;;  %v14705_v18 = vsel %vm14350_vm4, %v14626_v26, %v1430_v9  ;;  %v2091_v35 = vshrl.u32 %v11776_v37, 16 }
 0x103   : > { %18975 = vst [vmem:[#allocation50_spill] sm:$0xff] %v14705_v18  ;;  %v2094_v23 = vshll.u32 %v11776_v37, 16  ;;  %v1455_v28 = vor.u32 %v1454_v40, %v1450_v6  ;;  %v2983_v13 = vshrl.u32 %v2661_v49, 16  ;;  %v1616_v7 = vmul.bf16 %v13703_v19, %v14633_v2 }
 0x104   : > { %v14707_v55 = vrot.slane %v2992_v56, 7  ;;  %v14712_v17 = vsel %vm14350_vm4, %v1436_v5, %v1440_v14  ;;  %v14714_v3 = vrot.slane %v1465_v41, 4  ;;  %v2093_v10 = vrot.slane %v2091_v35, 3 }
 0x105   : > { %18976 = vst [vmem:[#allocation51_spill] sm:$0xff] %v14712_v17  ;;  %v2096_v26 = vrot.slane %v2094_v23, 4  ;;  %v1456_v9 = vrot.slane %v1455_v28, 4  ;;  %v2995_v42 = vshll.u32 %v2673_v53, 16  ;;  %v2985_v37 = vrot.slane %v2983_v13, 7  ;;  %v1140_v53 = vpop.permute.xlu1 %1139  ;;  %v1128_v23 = vpop.permute.xlu0 %1127 }
 0x106   : > { %v2986_v40 = vshll.u32 %v2661_v49, 16  ;;  %v1617_v15 = vmul.bf16 %v13704_v4, %v14649_v59  ;;  %v3155_v19 = vmul.bf16 %v14659_v39, %v2415_v44  ;;  %v3156_v57 = vmul.bf16 %v14663_v31, %v2416_v61  ;;  %v2417_v44 = vld [vmem:[#allocation2 + $0x48] sm:$0xf] }
 0x107   : > { %v2097_v56 = vor.u32 %v2096_v26, %v2093_v10  ;;  %v14721_v14 = vsel %vm14350_vm4, %v1446_v50, %v1450_v6  ;;  %v2997_v5 = vor.u32 %v2995_v42, %v14707_v55  ;;  %v2697_v13 = vrot.slane %v2689_v47, %v14319_v34 }
 0x108   : > { %18977 = vst [vmem:[#allocation52_spill] sm:$0xff] %v14721_v14  ;;  %v2988_v35 = vor.u32 %v2986_v40, %v2985_v37  ;;  %v11777_v28 = vcombine.low %v1616_v7, %v1617_v15  ;;  %v11815_v4 = vcombine.low %v3155_v19, %v3156_v57  ;;  %v14730_v61 = vsel %vm14350_vm4, %v1456_v9, %v1460_v52  ;;  %v2418_v15 = vld [vmem:[#allocation2 + $0x4c] sm:$0xf] }
 0x109   : > { %v2098_v49 = vsel %vm2027_vm8, %v14665_v30, %v2097_v56  ;;  %18978 = vst [vmem:[#allocation53_spill] sm:$0xff] %v14730_v61  ;;  %v2990_v42 = vrot.slane %v2985_v37, 4  ;;  %v3315_v6 = vshrl.u32 %v14669_v1, 16  ;;  %v2685_v50 = vrot.slane %v2677_v25, %v14319_v34  ;;  %v1164_v31 = vpop.permute.xlu1 %1163  ;;  %v1152_v39 = vpop.permute.xlu0 %1151 }
 0x10a   : > { %12911 = vmatprep.mubr.msk.bf16.mxu1 %vm18912_vm1, %v2098_v49  ;;  %v2100_v10 = vshrl.u32 %v11777_v28, 16  ;;  %v2103_v26 = vshll.u32 %v11777_v28, 16  ;;  %v3319_v40 = vshll.u32 %v11815_v4, 16  ;;  %v3010_v30 = vshrl.u32 %v2697_v13, 16 }
 0x10b   : > { %v18979_v57 = vrot.slane %v14667_v11, 4  ;;  %v3317_v52 = vor.u32 %v3315_v6, %v14679_v29  ;;  %v3001_v7 = vshrl.u32 %v2685_v50, 16  ;;  %v3157_v9 = vmul.bf16 %v14694_v8, %v2417_v44 }
 0x10c   : > { %v2102_v37 = vrot.slane %v2100_v10, 3  ;;  %v2105_v1 = vrot.slane %v2103_v26, 4  ;;  %v3321_v19 = vrot.slane %v3319_v40, 1  ;;  %v14743_v25 = vrot.slane %v3010_v30, 7  ;;  %v13705_v10 = vld [vmem:[#allocation2 + $0x4c] sm:$0xf] }
 0x10d   : > { %v14739_v47 = vsel %vm14391_vm7, %v18979_v57, %v2988_v35  ;;  %v3013_v49 = vshll.u32 %v2697_v13, 16  ;;  %v3003_v28 = vrot.slane %v3001_v7, 7  ;;  %v3158_v41 = vmul.bf16 %v14700_v24, %v2418_v15 }
 0x10e   : > { %18980 = vst [vmem:[#allocation54_spill] sm:$0xff] %v14739_v47  ;;  %v1148_v11 = vrot.slane %v1140_v53, %v14319_v34  ;;  %v14749_v35 = vsel %vm14391_vm7, %v2990_v42, %v2997_v5  ;;  %v14751_v29 = vor.u32 %v2105_v1, %v2102_v37  ;;  %v3322_v44 = vsel %vm3262_vm9, %v3317_v52, %v3321_v19 }
 0x10f   : > { %18981 = vst [vmem:[#allocation55_spill] sm:$0xff] %v14749_v35  ;;  %v3004_v6 = vshll.u32 %v2685_v50, 16  ;;  %12947 = vmatprep.mubr.msk.bf16.mxu0 %vm18912_vm1, %v3322_v44  ;;  %v3015_v13 = vor.u32 %v3013_v49, %v14743_v25  ;;  %v14757_v26 = vcombine.low %v3157_v9, %v3158_v41  ;;  %v3323_v53 = vshrl.u32 %v11815_v4, 16 }
 0x110   : > { %v2107_v40 = vsel %vm2027_vm8, %v2097_v56, %v14751_v29  ;;  %v1478_v30 = vshll.u32 %v1148_v11, 16  ;;  %v1482_v5 = vshrl.u32 %v1148_v11, 16  ;;  %v1136_v42 = vrot.slane %v1128_v23, %v14319_v34  ;;  %v2713_v11 = vpop.permute.xlu1 %2712  ;;  %v2701_v23 = vpop.permute.xlu0 %2700 }
 0x111   : > { %12912 = vmatmul.mubr.msk.bf16.gmra.mxu1 %vm18912_vm1, %v2107_v40  ;;  %v3006_v15 = vor.u32 %v3004_v6, %v3003_v28  ;;  %v3325_v50 = vor.u32 %v3323_v53, %v3321_v19  ;;  %v3327_v57 = vshll.u32 %v14757_v26, 16  ;;  %v1172_v52 = vrot.slane %v1164_v31, %v14319_v34  ;;  %v14768_v53 = vpop.f32.mrf.mxu0 }
 0x112   : > { %v1480_v7 = vrot.slane %v1478_v30, 5  ;;  %v1484_v37 = vrot.slane %v1482_v5, 4  ;;  %v1468_v41 = vshll.u32 %v1136_v42, 16  ;;  %v1472_v9 = vshrl.u32 %v1136_v42, 16  ;;  %18982 = vst [vmem:[#allocation56_spill] sm:$0xff] %v14768_v53 }
 0x113   : > { %v14765_v4 = vrot.slane %v3327_v57, 1  ;;  %v1498_v1 = vshll.u32 %v1172_v52, 16  ;;  %v1502_v56 = vshrl.u32 %v1172_v52, 16  ;;  %v1160_v49 = vrot.slane %v1152_v39, %v14319_v34  ;;  %v13708_v53 = vld [vmem:[#allocation2 + $0x58] sm:$0xf] }
 0x114   : > { %v3008_v44 = vrot.slane %v3003_v28, 4  ;;  %v1485_v40 = vor.u32 %v1484_v37, %v1480_v7  ;;  %v1470_v6 = vrot.slane %v1468_v41, 5  ;;  %v1474_v19 = vrot.slane %v1472_v9, 4  ;;  %v13706_v9 = vld [vmem:[#allocation2 + $0x50] sm:$0xf] }
 0x115   : > { %v3330_v31 = vsel %vm3262_vm9, %v3325_v50, %v14765_v4  ;;  %v14772_v30 = vrot.slane %v1498_v1, 5  ;;  %v1504_v5 = vrot.slane %v1502_v56, 4  ;;  %v1488_v42 = vshll.u32 %v1160_v49, 16 }
 0x116   : > { %12948 = vmatmul.mubr.msk.bf16.gmra.mxu0 %vm18912_vm1, %v3330_v31  ;;  %v1486_v57 = vrot.slane %v1485_v40, 4  ;;  %v1475_v52 = vor.u32 %v1474_v19, %v1470_v6  ;;  %v1492_v39 = vshrl.u32 %v1160_v49, 16  ;;  %v1618_v28 = vmul.bf16 %v13705_v10, %v14705_v18  ;;  %v14786_v31 = vpop.f32.mrf.mxu0 }
 0x117   : > { %v1505_v37 = vor.u32 %v1504_v5, %v14772_v30  ;;  %v1490_v41 = vrot.slane %v1488_v42, 5  ;;  %v1619_v24 = vmul.bf16 %v13706_v9, %v14712_v17  ;;  %v2721_v50 = vrot.slane %v2713_v11, %v14319_v34  ;;  %18985 = vst [vmem:[#allocation58_spill] sm:$0xff] %v14786_v31  ;;  %v2737_v42 = vpop.permute.xlu1 %2736 }
 0x118   : > { %v18983_v1 = vrot.slane %v14707_v55, 4  ;;  %v1476_v40 = vrot.slane %v1475_v52, 4  ;;  %v1494_v19 = vrot.slane %v1492_v39, 4  ;;  %v2709_v49 = vrot.slane %v2701_v23, %v14319_v34  ;;  %v13707_v39 = vld [vmem:[#allocation2 + $0x54] sm:$0xf] }
 0x119   : > { %v14790_v10 = vsel %vm14391_vm7, %v3008_v44, %v3015_v13  ;;  %v14795_v11 = vsel %vm14350_vm4, %v14714_v3, %v1470_v6  ;;  %v11778_v55 = vcombine.low %v1618_v28, %v1619_v24  ;;  %v3028_v5 = vshrl.u32 %v2721_v50, 16  ;;  %v2419_v44 = vld [vmem:[#allocation2 + $0x50] sm:$0xf]  ;;  %v2420_v24 = vld [vmem:[#allocation2 + $0x54] sm:$0xf] }
 0x11a   : > { %v14783_v56 = vsel %vm14391_vm7, %v18983_v1, %v3006_v15  ;;  %18986 = vst [vmem:[#allocation59_spill] sm:$0xff] %v14790_v10  ;;  %18987 = vst [vmem:[#allocation60_spill] sm:$0xff] %v14795_v11  ;;  %v2725_v15 = vpop.permute.xlu0 %2724  ;;  %v14797_v9 = vrot.slane %v1505_v37, 4  ;;  %v14801_v23 = vsel %vm14350_vm4, %v1486_v57, %v1490_v41  ;;  %v1495_v52 = vor.u32 %v1494_v19, %v1490_v41  ;;  %v14811_v41 = vpop.f32.mrf.mxu0 }
 0x11b   : > { %18984 = vst [vmem:[#allocation57_spill] sm:$0xff] %v14783_v56  ;;  %18988 = vst [vmem:[#allocation61_spill] sm:$0xff] %v14801_v23  ;;  %v1620_v13 = vmul.bf16 %v13707_v39, %v14721_v14  ;;  %v2109_v1 = vshrl.u32 %v11778_v55, 16  ;;  %v2112_v8 = vshll.u32 %v11778_v55, 16  ;;  %v14804_v31 = vrot.slane %v3028_v5, 7 }
 0x11c   : > { %v3019_v3 = vshrl.u32 %v2709_v49, 16  ;;  %v14808_v6 = vsel %vm14350_vm4, %v1476_v40, %v1480_v7  ;;  %v1496_v28 = vrot.slane %v1495_v52, 4  ;;  %v3031_v37 = vshll.u32 %v2721_v50, 16  ;;  %18990 = vst [vmem:[#allocation63_spill] sm:$0xff] %v14811_v41  ;;  %v1188_v52 = vpop.permute.xlu1 %1187 }
 0x11d   : > { %18989 = vst [vmem:[#allocation62_spill] sm:$0xff] %v14808_v6  ;;  %v1621_v57 = vmul.bf16 %v13708_v53, %v14730_v61  ;;  %v2111_v19 = vrot.slane %v2109_v1, 3  ;;  %v2114_v39 = vrot.slane %v2112_v8, 4  ;;  %v3022_v54 = vshll.u32 %v2709_v49, 16 }
 0x11e   : > { %v3159_v55 = vmul.bf16 %v14739_v47, %v2419_v44  ;;  %v3033_v5 = vor.u32 %v3031_v37, %v14804_v31  ;;  %v3021_v12 = vrot.slane %v3019_v3, 7  ;;  %v3160_v18 = vmul.bf16 %v14749_v35, %v2420_v24  ;;  %v1176_v41 = vpop.permute.xlu0 %1175  ;;  %v14820_v47 = vpop.f32.mrf.mxu0 }
 0x11f   : > { %v11779_v14 = vcombine.low %v1620_v13, %v1621_v57  ;;  %v2115_v7 = vor.u32 %v2114_v39, %v2111_v19  ;;  %v3035_v40 = vrot.slane %v14804_v31, 4  ;;  %v2745_v50 = vrot.slane %v2737_v42, %v14319_v34  ;;  %18991 = vst [vmem:[#allocation64_spill] sm:$0xff] %v14820_v47  ;;  %v2421_v31 = vld [vmem:[#allocation2 + $0x58] sm:$0xf]  ;;  %v2422_v57 = vld [vmem:[#allocation2 + $0x5c] sm:$0xf] }
 0x120   : > { %v2733_v53 = vrot.slane %v2725_v15, %v14319_v34  ;;  %v3024_v1 = vor.u32 %v3022_v54, %v3021_v12  ;;  %v3331_v44 = vshrl.u32 %v14757_v26, 16  ;;  %v3026_v3 = vrot.slane %v3021_v12, 4 }
 0x121   : > { %v2118_v8 = vshrl.u32 %v11779_v14, 16  ;;  %v2121_v49 = vshll.u32 %v11779_v14, 16  ;;  %v2116_v13 = vsel %vm2027_vm8, %v14751_v29, %v2115_v7  ;;  %v11817_v24 = vcombine.low %v3159_v55, %v3160_v18 }
 0x122   : > { %v3046_v37 = vshrl.u32 %v2745_v50, 16  ;;  %v14827_v42 = vsel %vm14350_vm4, %v1496_v28, %v14772_v30  ;;  %12915 = vmatprep.mubr.msk.bf16.mxu1 %vm18912_vm1, %v2116_v13  ;;  %v3333_v26 = vor.u32 %v3331_v44, %v14765_v4  ;;  %v18993_v15 = vrot.slane %v14743_v25, 4  ;;  %v1212_v44 = vpop.permute.xlu1 %1211  ;;  %v1200_v13 = vpop.permute.xlu0 %1199 }
 0x123   : > { %18992 = vst [vmem:[#allocation65_spill] sm:$0xff] %v14827_v42  ;;  %v2120_v54 = vrot.slane %v2118_v8, 3  ;;  %v2123_v14 = vrot.slane %v2121_v49, 4  ;;  %v3335_v18 = vshll.u32 %v11817_v24, 16  ;;  %v3037_v19 = vshrl.u32 %v2733_v53, 16  ;;  %v14843_v8 = vpop.f32.mrf.mxu0 }
 0x124   : > { %v14835_v12 = vsel %vm14391_vm7, %v18993_v15, %v3024_v1  ;;  %v14837_v29 = vrot.slane %v3046_v37, 7  ;;  %v3049_v30 = vshll.u32 %v2745_v50, 16  ;;  %v3161_v28 = vmul.bf16 %v14783_v56, %v2421_v31  ;;  %18995 = vst [vmem:[#allocation67_spill] sm:$0xff] %v14843_v8  ;;  %v13710_v56 = vld [vmem:[#allocation2 + $0x60] sm:$0xf] }
 0x125   : > { %18994 = vst [vmem:[#allocation66_spill] sm:$0xff] %v14835_v12  ;;  %v14839_v39 = vor.u32 %v2123_v14, %v2120_v54  ;;  %v3162_v55 = vmul.bf16 %v14790_v10, %v2422_v57  ;;  %v14847_v25 = vsel %vm14391_vm7, %v3026_v3, %v3033_v5  ;;  %v3337_v4 = vrot.slane %v3335_v18, 1 }
 0x126   : > { %18996 = vst [vmem:[#allocation68_spill] sm:$0xff] %v14847_v25  ;;  %v3039_v1 = vrot.slane %v3037_v19, 7  ;;  %v3040_v49 = vshll.u32 %v2733_v53, 16  ;;  %v3051_v50 = vor.u32 %v3049_v30, %v14837_v29  ;;  %v1196_v31 = vrot.slane %v1188_v52, %v14319_v34  ;;  %v14861_v19 = vpop.f32.mrf.mxu0  ;;  %v2761_v47 = vpop.permute.xlu1 %2760 }
 0x127   : > { %v2125_v37 = vsel %vm2027_vm8, %v2115_v7, %v14839_v39  ;;  %v14852_v54 = vcombine.low %v3161_v28, %v3162_v55  ;;  %v3338_v57 = vsel %vm3262_vm9, %v3333_v26, %v3337_v4  ;;  %v3339_v3 = vshrl.u32 %v11817_v24, 16  ;;  %18997 = vst [vmem:[#allocation69_spill] sm:$0xff] %v14861_v19  ;;  %v2749_v10 = vpop.permute.xlu0 %2748 }
 0x128   : > { %12916 = vmatmul.mubr.msk.bf16.gmra.mxu1 %vm18912_vm1, %v2125_v37  ;;  %v3042_v5 = vor.u32 %v3040_v49, %v3039_v1  ;;  %v1184_v14 = vrot.slane %v1176_v41, %v14319_v34  ;;  %12951 = vmatprep.mubr.msk.bf16.mxu0 %vm18912_vm1, %v3338_v57  ;;  %v1518_v15 = vshll.u32 %v1196_v31, 16  ;;  %v1522_v18 = vshrl.u32 %v1196_v31, 16 }
 0x129   : > { %v3343_v7 = vshll.u32 %v14852_v54, 16  ;;  %v3044_v30 = vrot.slane %v3039_v1, 4  ;;  %v3341_v52 = vor.u32 %v3339_v3, %v3337_v4  ;;  %v1220_v41 = vrot.slane %v1212_v44, %v14319_v34 }
 0x12a   : > { %v1508_v28 = vshll.u32 %v1184_v14, 16  ;;  %v1512_v55 = vshrl.u32 %v1184_v14, 16  ;;  %v1520_v26 = vrot.slane %v1518_v15, 5  ;;  %v1524_v24 = vrot.slane %v1522_v18, 4 }
 0x12b   : > { %v14863_v37 = vrot.slane %v3343_v7, 1  ;;  %v14868_v49 = vsel %vm14391_vm7, %v3035_v40, %v3042_v5  ;;  %v1208_v31 = vrot.slane %v1200_v13, %v14319_v34  ;;  %v1538_v3 = vshll.u32 %v1220_v41, 16  ;;  %v14873_v7 = vpop.f32.mrf.mxu0  ;;  %v13709_v5 = vld [vmem:[#allocation2 + $0x5c] sm:$0xf] }
 0x12c   : > { %18998 = vst [vmem:[#allocation70_spill] sm:$0xff] %v14868_v49  ;;  %v1510_v57 = vrot.slane %v1508_v28, 5  ;;  %v1514_v53 = vrot.slane %v1512_v55, 4  ;;  %v1525_v1 = vor.u32 %v1524_v24, %v1520_v26  ;;  %v1542_v14 = vshrl.u32 %v1220_v41, 16  ;;  %18999 = vst [vmem:[#allocation71_spill] sm:$0xff] %v14873_v7 }
 0x12d   : > { %v3346_v4 = vsel %vm3262_vm9, %v3341_v52, %v14863_v37  ;;  %v1528_v15 = vshll.u32 %v1208_v31, 16  ;;  %v1532_v40 = vshrl.u32 %v1208_v31, 16  ;;  %v1622_v18 = vmul.bf16 %v13709_v5, %v14795_v11  ;;  %v14884_v5 = vpop.f32.mrf.mxu0 }
 0x12e   : > { %12952 = vmatmul.mubr.msk.bf16.gmra.mxu0 %vm18912_vm1, %v3346_v4  ;;  %v1515_v44 = vor.u32 %v1514_v53, %v1510_v57  ;;  %v1526_v28 = vrot.slane %v1525_v1, 4  ;;  %v1540_v13 = vrot.slane %v1538_v3, 5  ;;  %v1544_v55 = vrot.slane %v1542_v14, 4  ;;  %19001 = vst [vmem:[#allocation73_spill] sm:$0xff] %v14884_v5  ;;  %v13711_v14 = vld [vmem:[#allocation2 + $0x64] sm:$0xf] }
 0x12f   : > { %v1623_v19 = vmul.bf16 %v13710_v56, %v14808_v6  ;;  %v1530_v24 = vrot.slane %v1528_v15, 5  ;;  %v1534_v35 = vrot.slane %v1532_v40, 4  ;;  %v2769_v41 = vrot.slane %v2761_v47, %v14319_v34  ;;  %v2773_v15 = vpop.permute.xlu0 %2772  ;;  %v2423_v40 = vld [vmem:[#allocation2 + $0x60] sm:$0xf] }
 0x130   : > { %v1516_v52 = vrot.slane %v1515_v44, 4  ;;  %v14881_v4 = vsel %vm14391_vm7, %v3044_v30, %v3051_v50  ;;  %v1545_v53 = vor.u32 %v1544_v55, %v1540_v13  ;;  %v2757_v7 = vrot.slane %v2749_v10, %v14319_v34  ;;  %v2785_v44 = vpop.permute.xlu1 %2784  ;;  %v2424_v55 = vld [vmem:[#allocation2 + $0x64] sm:$0xf] }
 0x131   : > { %19000 = vst [vmem:[#allocation72_spill] sm:$0xff] %v14881_v4  ;;  %v11780_v31 = vcombine.low %v1622_v18, %v1623_v19  ;;  %v14889_v1 = vsel %vm14350_vm4, %v14797_v9, %v1510_v57  ;;  %v1535_v56 = vor.u32 %v1534_v35, %v1530_v24  ;;  %v3064_v3 = vshrl.u32 %v2769_v41, 16 }
 0x132   : > { %19002 = vst [vmem:[#allocation74_spill] sm:$0xff] %v14889_v1  ;;  %v1624_v47 = vmul.bf16 %v13711_v14, %v14801_v23  ;;  %v14894_v50 = vsel %vm14350_vm4, %v1516_v52, %v1520_v26  ;;  %v14898_v10 = vsel %vm14350_vm4, %v1526_v28, %v1530_v24  ;;  %v3067_v35 = vshll.u32 %v2769_v41, 16  ;;  %v13712_v23 = vld [vmem:[#allocation2 + $0x68] sm:$0xf]  ;;  %v14905_v52 = vpop.f32.mrf.mxu0 }
 0x133   : > { %19003 = vst [vmem:[#allocation75_spill] sm:$0xff] %v14894_v50  ;;  %19004 = vst [vmem:[#allocation76_spill] sm:$0xff] %v14898_v10  ;;  %v2127_v19 = vshrl.u32 %v11780_v31, 16  ;;  %v2130_v30 = vshll.u32 %v11780_v31, 16  ;;  %v1536_v9 = vrot.slane %v1535_v56, 4  ;;  %v14900_v57 = vrot.slane %v3064_v3, 7  ;;  %v1224_v6 = vpop.permute.xlu0 %1223 }
 0x134   : > { %v3055_v18 = vshrl.u32 %v2757_v7, 16  ;;  %v14902_v14 = vrot.slane %v1545_v53, 4  ;;  %v1625_v26 = vmul.bf16 %v13712_v23, %v14827_v42  ;;  %19005 = vst [vmem:[#allocation77_spill] sm:$0xff] %v14905_v52  ;;  %v3058_v56 = vshll.u32 %v2757_v7, 16  ;;  %v1236_v42 = vpop.permute.xlu1 %1235 }
 0x135   : > { %v2129_v5 = vrot.slane %v2127_v19, 3  ;;  %v2132_v8 = vrot.slane %v2130_v30, 4  ;;  %v14909_v28 = vsel %vm14350_vm4, %v1536_v9, %v1540_v13  ;;  %v3069_v24 = vor.u32 %v3067_v35, %v14900_v57 }
 0x136   : > { %19006 = vst [vmem:[#allocation78_spill] sm:$0xff] %v14909_v28  ;;  %v3057_v31 = vrot.slane %v3055_v18, 7  ;;  %v11781_v3 = vcombine.low %v1624_v47, %v1625_v26  ;;  %v3163_v53 = vmul.bf16 %v14835_v12, %v2423_v40  ;;  %v3164_v19 = vmul.bf16 %v14847_v25, %v2424_v55  ;;  %v14918_v47 = vpop.f32.mrf.mxu0 }
 0x137   : > { %v2133_v41 = vor.u32 %v2132_v8, %v2129_v5  ;;  %v3071_v30 = vrot.slane %v14900_v57, 4  ;;  %v2793_v52 = vrot.slane %v2785_v44, %v14319_v34  ;;  %v2425_v8 = vld [vmem:[#allocation2 + $0x68] sm:$0xf]  ;;  %v2426_v5 = vld [vmem:[#allocation2 + $0x6c] sm:$0xf]  ;;  %19007 = vst [vmem:[#allocation79_spill] sm:$0xff] %v14918_v47 }
 0x138   : > { %v3060_v11 = vor.u32 %v3058_v56, %v3057_v31  ;;  %v3062_v23 = vrot.slane %v3057_v31, 4  ;;  %v2136_v9 = vshrl.u32 %v11781_v3, 16  ;;  %v2139_v35 = vshll.u32 %v11781_v3, 16 }
 0x139   : > { %v2134_v13 = vsel %vm2027_vm8, %v14839_v39, %v2133_v41  ;;  %v11819_v7 = vcombine.low %v3163_v53, %v3164_v19  ;;  %v19008_v40 = vrot.slane %v14837_v29, 4  ;;  %v3347_v39 = vshrl.u32 %v14852_v54, 16 }
 0x13a   : > { %12919 = vmatprep.mubr.msk.bf16.mxu1 %vm18912_vm1, %v2134_v13  ;;  %v14929_v44 = vsel %vm14391_vm7, %v3062_v23, %v3069_v24  ;;  %v3082_v18 = vshrl.u32 %v2793_v52, 16  ;;  %v2138_v55 = vrot.slane %v2136_v9, 3  ;;  %v2141_v26 = vrot.slane %v2139_v35, 4  ;;  %v14941_v13 = vpop.f32.mrf.mxu0 }
 0x13b   : > { %v14925_v57 = vsel %vm14391_vm7, %v19008_v40, %v3060_v11  ;;  %19010 = vst [vmem:[#allocation81_spill] sm:$0xff] %v14929_v44  ;;  %v3351_v31 = vshll.u32 %v11819_v7, 16  ;;  %v3085_v56 = vshll.u32 %v2793_v52, 16  ;;  %v2781_v53 = vrot.slane %v2773_v15, %v14319_v34  ;;  %19011 = vst [vmem:[#allocation82_spill] sm:$0xff] %v14941_v13  ;;  %v2809_v15 = vpop.permute.xlu1 %2808 }
 0x13c   : > { %19009 = vst [vmem:[#allocation80_spill] sm:$0xff] %v14925_v57  ;;  %v14932_v3 = vrot.slane %v3082_v18, 7  ;;  %v3165_v29 = vmul.bf16 %v14868_v49, %v2425_v8  ;;  %v3166_v11 = vmul.bf16 %v14881_v4, %v2426_v5  ;;  %v14937_v19 = vor.u32 %v2141_v26, %v2138_v55  ;;  %v2797_v18 = vpop.permute.xlu0 %2796 }
 0x13d   : > { %v3349_v24 = vor.u32 %v3347_v39, %v14863_v37  ;;  %v3353_v23 = vrot.slane %v3351_v31, 1  ;;  %v1244_v54 = vrot.slane %v1236_v42, %v14319_v34  ;;  %v3073_v35 = vshrl.u32 %v2781_v53, 16 }
 0x13e   : > { %v3087_v9 = vor.u32 %v3085_v56, %v14932_v3  ;;  %v3355_v40 = vshrl.u32 %v11819_v7, 16  ;;  %v2143_v8 = vsel %vm2027_vm8, %v2133_v41, %v14937_v19  ;;  %v3076_v55 = vshll.u32 %v2781_v53, 16  ;;  %v14953_v41 = vpop.f32.mrf.mxu0 }
 0x13f   : > { %v3354_v5 = vsel %vm3262_vm9, %v3349_v24, %v3353_v23  ;;  %v11820_v37 = vcombine.low %v3165_v29, %v3166_v11  ;;  %12920 = vmatmul.mubr.msk.bf16.gmra.mxu1 %vm18912_vm1, %v2143_v8  ;;  %v3075_v42 = vrot.slane %v3073_v35, 7  ;;  %v1558_v39 = vshll.u32 %v1244_v54, 16  ;;  %19012 = vst [vmem:[#allocation83_spill] sm:$0xff] %v14953_v41 }
 0x140   : > { %12955 = vmatprep.mubr.msk.bf16.mxu0 %vm18912_vm1, %v3354_v5  ;;  %v1562_v26 = vshrl.u32 %v1244_v54, 16  ;;  %v1232_v31 = vrot.slane %v1224_v6, %v14319_v34  ;;  %v3357_v56 = vor.u32 %v3355_v40, %v3353_v23  ;;  %v2817_v52 = vrot.slane %v2809_v15, %v14319_v34  ;;  %v13713_v40 = vld [vmem:[#allocation2 + $0x6c] sm:$0xf] }
 0x141   : > { %v3359_v7 = vshll.u32 %v11820_v37, 16  ;;  %v2805_v13 = vrot.slane %v2797_v18, %v14319_v34  ;;  %v3078_v24 = vor.u32 %v3076_v55, %v3075_v42  ;;  %v3080_v53 = vrot.slane %v3075_v42, 4 }
 0x142   : > { %v1560_v29 = vrot.slane %v1558_v39, 5  ;;  %v1564_v11 = vrot.slane %v1562_v26, 4  ;;  %v1548_v47 = vshll.u32 %v1232_v31, 16  ;;  %v1552_v5 = vshrl.u32 %v1232_v31, 16  ;;  %v14963_v39 = vpop.f32.mrf.mxu0  ;;  %v13714_v31 = vld [vmem:[#allocation2 + $0x70] sm:$0xf] }
 0x143   : > { %v3361_v8 = vrot.slane %v3359_v7, 1  ;;  %v3100_v35 = vshrl.u32 %v2817_v52, 16  ;;  %v14957_v54 = vsel %vm14391_vm7, %v3071_v30, %v3078_v24  ;;  %v3103_v23 = vshll.u32 %v2817_v52, 16  ;;  %19014 = vst [vmem:[#allocation85_spill] sm:$0xff] %v14963_v39  ;;  %v2427_v24 = vld [vmem:[#allocation2 + $0x70] sm:$0xf] }
 0x144   : > { %19013 = vst [vmem:[#allocation84_spill] sm:$0xff] %v14957_v54  ;;  %v1565_v6 = vor.u32 %v1564_v11, %v1560_v29  ;;  %v1626_v15 = vmul.bf16 %v13713_v40, %v14889_v1  ;;  %v1550_v18 = vrot.slane %v1548_v47, 5  ;;  %v1554_v55 = vrot.slane %v1552_v5, 4  ;;  %v13715_v40 = vld [vmem:[#allocation2 + $0x74] sm:$0xf] }
 0x145   : > { %v3362_v34 = vsel %vm3262_vm9, %v3357_v56, %v3361_v8  ;;  %v14961_v42 = vrot.slane %v3100_v35, 7  ;;  %v14967_v26 = vsel %vm14391_vm7, %v3080_v53, %v3087_v9  ;;  %v3091_v52 = vshrl.u32 %v2805_v13, 16  ;;  %v2428_v56 = vld [vmem:[#allocation2 + $0x74] sm:$0xf] }
 0x146   : > { %19015 = vst [vmem:[#allocation86_spill] sm:$0xff] %v14967_v26  ;;  %12956 = vmatmul.mubr.msk.bf16.gmra.mxu0 %vm18912_vm1, %v3362_v34  ;;  %v14970_v30 = vrot.slane %v1565_v6, 4  ;;  %v1627_v7 = vmul.bf16 %v13714_v31, %v14894_v50  ;;  %v14976_v47 = vsel %vm14350_vm4, %v14902_v14, %v1550_v18  ;;  %v1555_v11 = vor.u32 %v1554_v55, %v1550_v18  ;;  %v13716_v34 = vld [vmem:[#allocation2 + $0x78] sm:$0xf]  ;;  %v14983_v14 = vpop.f32.mrf.mxu0 }
 0x147   : > { %19017 = vst [vmem:[#allocation88_spill] sm:$0xff] %v14976_v47  ;;  %v3105_v5 = vor.u32 %v3103_v23, %v14961_v42  ;;  %v3094_v9 = vshll.u32 %v2805_v13, 16  ;;  %v3093_v53 = vrot.slane %v3091_v52, 7  ;;  %v1628_v6 = vmul.bf16 %v13715_v40, %v14898_v10  ;;  %19018 = vst [vmem:[#allocation89_spill] sm:$0xff] %v14983_v14  ;;  %v2429_v52 = vld [vmem:[#allocation2 + $0x78] sm:$0xf] }
 0x148   : > { %19016 = vst [vmem:[#allocation87_spill] sm:$0xff] %v14970_v30  ;;  %v11782_v35 = vcombine.low %v1626_v15, %v1627_v7  ;;  %v1629_v41 = vmul.bf16 %v13716_v34, %v14909_v28  ;;  %v1556_v31 = vrot.slane %v1555_v11, 4  ;;  %v3167_v39 = vmul.bf16 %v14925_v57, %v2427_v24  ;;  %v2430_v11 = vld [vmem:[#allocation2 + $0x7c] sm:$0xf] }
 0x149   : > { %v3168_v4 = vmul.bf16 %v14929_v44, %v2428_v56  ;;  %v3363_v49 = vshrl.u32 %v11820_v37, 16  ;;  %v3096_v18 = vor.u32 %v3094_v9, %v3093_v53  ;;  %v3098_v55 = vrot.slane %v3093_v53, 4 }
 0x14a   : > { %v2145_v23 = vshrl.u32 %v11782_v35, 16  ;;  %v2148_v13 = vshll.u32 %v11782_v35, 16  ;;  %v14987_v15 = vsel %vm14350_vm4, %v1556_v31, %v1560_v29  ;;  %v11783_v7 = vcombine.low %v1628_v6, %v1629_v41  ;;  %v2431_v35 = vld [vmem:[#allocation2 + $0x80] sm:$0xf]  ;;  %v15000_v41 = vpop.f32.mrf.mxu0 }
 0x14b   : > { %19019 = vst [vmem:[#allocation90_spill] sm:$0xff] %v14987_v15  ;;  %v11821_v40 = vcombine.low %v3167_v39, %v3168_v4  ;;  %v3365_v34 = vor.u32 %v3363_v49, %v3361_v8  ;;  %v19020_v24 = vrot.slane %v14932_v3, 4  ;;  %v14997_v56 = vsel %vm14391_vm7, %v3098_v55, %v3105_v5  ;;  %v2432_v49 = vld [vmem:[#allocation2 + $0x84] sm:$0xf]  ;;  %19023 = vst [vmem:[#allocation93_spill] sm:$0xff] %v15000_v41 }
 0x14c   : > { %19022 = vst [vmem:[#allocation92_spill] sm:$0xff] %v14997_v56  ;;  %v2147_v9 = vrot.slane %v2145_v23, 3  ;;  %v2150_v53 = vrot.slane %v2148_v13, 4  ;;  %v2154_v20 = vshrl.u32 %v11783_v7, 16  ;;  %v2157_v29 = vshll.u32 %v11783_v7, 16 }
 0x14d   : > { %v14993_v37 = vsel %vm14391_vm7, %v19020_v24, %v3096_v18  ;;  %v3367_v31 = vshll.u32 %v11821_v40, 16  ;;  %v3169_v4 = vmul.bf16 %v14957_v54, %v2429_v52  ;;  %v15002_v3 = vld [vmem:[#allocation2 + $0x20] sm:$0xf]  ;;  %v3170_v39 = vmul.bf16 %v14967_v26, %v2430_v11  ;;  %v13717_v5 = vld [vmem:[#allocation2 + $0x7c] sm:$0xf] }
 0x14e   : > { %19021 = vst [vmem:[#allocation91_spill] sm:$0xff] %v14993_v37  ;;  %v2151_v8 = vor.u32 %v2150_v53, %v2147_v9  ;;  %v3371_v0 = vshrl.u32 %v11821_v40, 16  ;;  %v1630_v6 = vmul.bf16 %v13717_v5, %v14976_v47  ;;  %v2156_v18 = vrot.slane %v2154_v20, 3  ;;  %v13718_v13 = vld [vmem:[#allocation2 + $0x80] sm:$0xf]  ;;  %v618_v53 = vld [vmem:[%s14047_s22 + $0xf0] sm:$0xff] }
 0x14f   : > { %v2159_v55 = vrot.slane %v2157_v29, 4  ;;  %v3369_v23 = vrot.slane %v3367_v31, 1  ;;  %v1631_v7 = vmul.bf16 %v13718_v13, %v14987_v15  ;;  %v11822_v24 = vcombine.low %v3169_v4, %v3170_v39  ;;  %v15016_v31 = vpop.f32.mrf.mxu0  ;;  %v15022_v5 = vld [vmem:[#allocation2 + $0x10] sm:$0xf] }
 0x150   : > { %v2152_v52 = vsel %vm2027_vm8, %v14937_v19, %v2151_v8  ;;  %v3171_v41 = vmul.bf16 %v14993_v37, %v2431_v35  ;;  %v3172_v9 = vmul.bf16 %v14997_v56, %v2432_v49  ;;  %v3686_v40 = vmul.bf16 %v15002_v3, %v14387_v63  ;;  %19024 = vst [vmem:[#allocation94_spill] sm:$0xff] %v15016_v31  ;;  %v13719_v35 = vld [vmem:[#allocation2 + $0x84] sm:$0xf] }
 0x151   : > { %12923 = vmatprep.mubr.msk.bf16.mxu1 %vm18912_vm1, %v2152_v52  ;;  %v2160_v11 = vor.u32 %v2159_v55, %v2156_v18  ;;  %v3370_v20 = vsel %vm3262_vm9, %v3365_v34, %v3369_v23  ;;  %v11784_v29 = vcombine.low %v1630_v6, %v1631_v7  ;;  %v3373_v19 = vor.u32 %v3371_v0, %v3369_v23  ;;  %v15028_v34 = vld [vmem:[%s18680_s5] ss:$0 sm:$0xff]  ;;  %v15031_v0 = vld [vmem:[#allocation2 + $0x18] sm:$0xf] }
 0x152   : > { %12959 = vmatprep.mubr.msk.bf16.mxu0 %vm18912_vm1, %v3370_v20  ;;  %v3375_v4 = vshll.u32 %v11822_v24, 16  ;;  %v15019_v39 = vcombine.low %v3171_v41, %v3172_v9  ;;  %v1632_v49 = vmul.bf16 %v13719_v35, %v14970_v30  ;;  %v666_v6 = vadd.f32 %v15028_v34, %v618_v53  ;;  %v15035_v9 = vld [vmem:[#allocation2 + $0x14] sm:$0xf]  ;;  %v15041_v53 = vpop.f32.mrf.mxu0 }
 0x153   : > { %v2161_v13 = vsel %vm2027_vm8, %v2151_v8, %v2160_v11  ;;  %v2163_v52 = vshrl.u32 %v11784_v29, 16  ;;  %v2166_v18 = vshll.u32 %v11784_v29, 16  ;;  %v3379_v55 = vshrl.u32 %v11822_v24, 16  ;;  %v15037_v8 = vld [vmem:[#allocation2 + $0x1c] sm:$0xf]  ;;  %19025 = vst [vmem:[#allocation95_spill] sm:$0xff] %v15041_v53 }
 0x154   : > { %12924 = vmatmul.mubr.msk.bf16.gmra.mxu1 %vm18912_vm1, %v2161_v13  ;;  %v3377_v41 = vrot.slane %v3375_v4, 1  ;;  %v3383_v23 = vshll.u32 %v15019_v39, 16  ;;  %v11785_v7 = vcombine.low %v1632_v49, %v1632_v49  ;;  %v12493_v35 = vpack.c.bf16 %v666_v6, %v666_v6 }
 0x155   : > { %v2165_v20 = vrot.slane %v2163_v52, 3  ;;  %v2168_v29 = vrot.slane %v2166_v18, 4  ;;  %v3682_v31 = vmul.bf16 %v15022_v5, %v14360_v38  ;;  %v3683_v52 = vmul.bf16 %v15035_v9, %v14367_v46 }
 0x156   : > { %v3378_v14 = vsel %vm3262_vm9, %v3373_v19, %v3377_v41  ;;  %v3381_v13 = vor.u32 %v3379_v55, %v3377_v41  ;;  %v3385_v4 = vrot.slane %v3383_v23, 1  ;;  %v2172_v24 = vshrl.u32 %v11785_v7, 16  ;;  %826 = vst.msk [vmem:[#allocation2 + $0x88] sm:$0xf] %vm620_vm0, %v12493_v35  ;;  %v15056_v23 = vld [vmem:[#allocation2 + $0x24] sm:$0xf]  ;;  %v15060_v35 = vpop.f32.mrf.mxu0 }
 0x157   : > { %12960 = vmatmul.mubr.msk.bf16.gmra.mxu0 %vm18912_vm1, %v3378_v14  ;;  %v2169_v49 = vor.u32 %v2168_v29, %v2165_v20  ;;  %v2175_v56 = vshll.u32 %v11785_v7, 16  ;;  %v3684_v18 = vmul.bf16 %v15031_v0, %v14374_v51  ;;  %v3685_v6 = vmul.bf16 %v15037_v8, %v14383_v62  ;;  %19027 = vst [vmem:[#allocation96_spill] sm:$0xff] %v15060_v35  ;;  %v15072_v35 = vld [vmem:[#allocation2 + $0x30] sm:$0xf] }
 0x158   : > { %v3386_v19 = vsel %vm3262_vm9, %v3381_v13, %v3385_v4  ;;  %v2174_v41 = vrot.slane %v2172_v24, 3  ;;  %v19026_v55 = vmul.bf16 %v14356_v36, %v14335_v48  ;;  %v15063_v53 = vrot.slane %v14961_v42, 4  ;;  %v15066_v36 = vld [vmem:[#allocation2 + $0x28] sm:$0xf] }
 0x159   : > { %v2170_v7 = vsel %vm2027_vm8, %v2160_v11, %v2169_v49  ;;  %12963 = vmatprep.mubr.msk.bf16.mxu0 %vm18912_vm1, %v3386_v19  ;;  %v2177_v20 = vrot.slane %v2175_v56, 4  ;;  %v11848_v29 = vcombine.low %v3683_v52, %v3684_v18  ;;  %v11849_v37 = vcombine.low %v3685_v6, %v3686_v40  ;;  %v15070_v56 = vld [vmem:[#allocation2 + $0x2c] sm:$0xf] }
 0x15a   : > { %v11847_v14 = vcombine.low %v19026_v55, %v3682_v31  ;;  %19028 = vst [vmem:[#allocation97_spill] sm:$0xff] %v15063_v53  ;;  %12927 = vmatprep.mubr.msk.bf16.mxu1 %vm18912_vm1, %v2170_v7  ;;  %v3687_v11 = vmul.bf16 %v15056_v23, %v14443_v43  ;;  %v3688_v6 = vmul.bf16 %v15066_v36, %v14449_v60 }
 0x15b   : > { %v2178_v31 = vor.u32 %v2177_v20, %v2174_v41  ;;  %v3811_v55 = vshrl.u32 %v11848_v29, 16  ;;  %v3814_v26 = vshll.u32 %v11848_v29, 16  ;;  %v3820_v19 = vshrl.u32 %v11849_v37, 16  ;;  %v15077_v41 = vld [vmem:[#allocation2 + $0x34] sm:$0xf]  ;;  %v15081_v29 = vpop.f32.mrf.mxu0 }
 0x15c   : > { %v3803_v13 = vshrl.u32 %v11847_v14, 16  ;;  %v3806_v24 = vshll.u32 %v11847_v14, 16  ;;  %v3823_v42 = vshll.u32 %v11849_v37, 16  ;;  %v15079_v20 = vld [vmem:[#allocation2 + $0x38] sm:$0xf]  ;;  %19029 = vst [vmem:[#allocation98_spill] sm:$0xff] %v15081_v29  ;;  %v3689_v25 = vmul.bf16 %v15070_v56, %v14458_v22 }
 0x15d   : > { %v2179_v7 = vsel %vm2027_vm8, %v2169_v49, %v2178_v31  ;;  %v3813_v14 = vrot.slane %v3811_v55, 3  ;;  %v3816_v40 = vrot.slane %v3814_v26, 4  ;;  %v3387_v37 = vshrl.u32 %v15019_v39, 16 }
 0x15e   : > { %v3805_v52 = vrot.slane %v3803_v13, 3  ;;  %v3808_v18 = vrot.slane %v3806_v24, 4  ;;  %12928 = vmatmul.mubr.msk.bf16.gmra.mxu1 %vm18912_vm1, %v2179_v7  ;;  %v2433_v13 = vld [vmem:[#allocation2 + $0x88] sm:$0x1]  ;;  %v3822_v54 = vrot.slane %v3820_v19, 3  ;;  %v3825_v44 = vrot.slane %v3823_v42, 4 }
 0x15f   : > { %v3173_v49 = vmul.bf16 %v15063_v53, %v2433_v13  ;;  %v3817_v26 = vor.u32 %v3816_v40, %v3813_v14  ;;  %v11850_v31 = vcombine.low %v3687_v11, %v3688_v6  ;;  %v3690_v55 = vmul.bf16 %v15072_v35, %v14472_v45  ;;  %v15095_v14 = vpop.f32.mrf.mxu0  ;;  %v15100_v6 = vld [vmem:[#allocation2 + $0x3c] sm:$0xf]  ;;  %v15102_v13 = vld [vmem:[#allocation2 + $0x40] sm:$0xf] }
 0x160   : > { %v3809_v24 = vor.u32 %v3808_v18, %v3805_v52  ;;  %v3826_v57 = vor.u32 %v3825_v44, %v3822_v54  ;;  %v3691_v7 = vmul.bf16 %v15077_v41, %v14529_v58  ;;  %v3692_v39 = vmul.bf16 %v15079_v20, %v14537_v33  ;;  %19030 = vst [vmem:[#allocation99_spill] sm:$0xff] %v15095_v14 }
 0x161   : > { %v11824_v52 = vcombine.low %v3173_v49, %v3173_v49  ;;  %v3829_v19 = vshrl.u32 %v11850_v31, 16  ;;  %v3832_v42 = vshll.u32 %v11850_v31, 16  ;;  %v3389_v11 = vor.u32 %v3387_v37, %v3385_v4 }
 0x162   : > { %v3818_v18 = vsel %vm2027_vm8, %v3809_v24, %v3817_v26  ;;  %v11886_v44 = vcombine.low %v15022_v5, %v15035_v9  ;;  %v11851_v54 = vcombine.low %v3689_v25, %v3690_v55  ;;  %v11852_v40 = vcombine.low %v3691_v7, %v3692_v39  ;;  %v15109_v9 = vld [vmem:[#allocation2 + $0x44] sm:$0xf]  ;;  %v15111_v55 = vld [vmem:[#allocation2 + $0x48] sm:$0xf]  ;;  %v15116_v7 = vpop.f32.mrf.mxu0 }
 0x163   : > { %12971 = vmatprep.mubr.msk.bf16.mxu1 %vm18912_vm1, %v3818_v18  ;;  %v3391_v29 = vshll.u32 %v11824_v52, 16  ;;  %v3827_v49 = vsel %vm2027_vm8, %v3817_v26, %v3826_v57  ;;  %v3831_v24 = vrot.slane %v3829_v19, 3  ;;  %v3834_v53 = vrot.slane %v3832_v42, 4  ;;  %v13604_v26 = vld [vmem:[%s18678_s3 + $0x50] sm:$0xff]   ;;  %19031 = vst [vmem:[#allocation100_spill] sm:$0xff] %v15116_v7  ;;  %v13721_v42 = vld [vmem:[%s18678_s3 + $0x58] sm:$0xff]  }
 0x164   : > { %v3838_v31 = vshrl.u32 %v11851_v54, 16  ;;  %v3841_v12 = vshll.u32 %v11851_v54, 16  ;;  %v3847_v14 = vshrl.u32 %v11852_v40, 16  ;;  %v3850_v4 = vshll.u32 %v11852_v40, 16 }
 0x165   : > { %v3393_v37 = vrot.slane %v3391_v29, 1  ;;  %v3835_v18 = vor.u32 %v3834_v53, %v3831_v24  ;;  %v3693_v5 = vmul.bf16 %v15100_v6, %v14543_v32  ;;  %v3694_v25 = vmul.bf16 %v15102_v13, %v14551_v21  ;;  %v15124_v24 = vld [vmem:[#allocation2 + $0x4c] sm:$0xf]  ;;  %v15126_v32 = vld [vmem:[#allocation2 + $0x50] sm:$0xf] }
 0x166   : > { %12972 = vmatmul.mubr.msk.bf16.vlgmr.msra.gmra.mxu1 %vm18912_vm1, %v3827_v49  ;;  %v3840_v29 = vrot.slane %v3838_v31, 3  ;;  %v3843_v53 = vrot.slane %v3841_v12, 4  ;;  %v3849_v39 = vrot.slane %v3847_v14, 3  ;;  %v3852_v52 = vrot.slane %v3850_v4, 4  ;;  %v15140_v4 = vld [vmem:[#allocation2 + $0x58] sm:$0xf] }
 0x167   : > { %v3394_v19 = vsel %vm3262_vm9, %v3389_v11, %v3393_v37  ;;  %13040 = vmatpush3.bf16.msra.mxu1 %v13721_v42  ;;  %v3836_v54 = vsel %vm2027_vm8, %v3826_v57, %v3835_v18  ;;  %v11853_v40 = vcombine.low %v3693_v5, %v3694_v25  ;;  %v3695_v12 = vmul.bf16 %v15109_v9, %v14618_v16  ;;  %v15137_v11 = vld [vmem:[%s18678_s3 + $0x78] sm:$0xff]   ;;  %v15142_v37 = vpop.f32.mrf.mxu0 }
 0x168   : > { %12964 = vmatmul.mubr.msk.bf16.gmra.mxu0 %vm18912_vm1, %v3394_v19  ;;  %12975 = vmatprep.mubr.msk.bf16.mxu1 %vm18912_vm1, %v3836_v54  ;;  %v3696_v14 = vmul.bf16 %v15111_v55, %v14622_v27  ;;  %19032 = vst [vmem:[#allocation101_spill] sm:$0xff] %v15137_v11  ;;  %v3844_v57 = vor.u32 %v3843_v53, %v3840_v29  ;;  %19033 = vst [vmem:[#allocation102_spill] sm:$0xff] %v15142_v37  ;;  %v15148_v54 = vld [vmem:[#allocation2 + $0x54] sm:$0xf] }
 0x169   : > { %13007 = vmatprep.mubr.msk.bf16.mxu0 %vm18912_vm1, %v11886_v44  ;;  %v3856_v49 = vshrl.u32 %v11853_v40, 16  ;;  %v3859_v31 = vshll.u32 %v11853_v40, 16  ;;  %13041 = vmatprep.subr.bf16.mxu1 %v13604_v26  ;;  %v3853_v5 = vor.u32 %v3852_v52, %v3849_v39  ;;  %v3697_v19 = vmul.bf16 %v15124_v24, %v14633_v2  ;;  %v15156_v52 = vld [vmem:[#allocation2 + $0x60] sm:$0xf]  ;;  %v19034_v2 = vld [vmem:[#allocation50_spill] sm:$0xff] }
 0x16a   : > { %v11854_v25 = vcombine.low %v3695_v12, %v3696_v14  ;;  %v3698_v42 = vmul.bf16 %v15126_v32, %v14649_v59  ;;  %v11887_v44 = vcombine.low %v15031_v0, %v15037_v8  ;;  %v11888_v29 = vcombine.low %v15002_v3, %v15056_v23  ;;  %v15162_v8 = vpop.f32.mrf.mxu0  ;;  %v15201_v59 = vld [vmem:[#allocation2 + $0x70] sm:$0xf] }
 0x16b   : > { %13042 = vmatpush3.bf16.msra.mxu1 %v13604_v26  ;;  %v3700_v39 = vmul.bf16 %v15140_v4, %v14712_v17  ;;  %v3845_v12 = vsel %vm2027_vm8, %v3835_v18, %v3844_v57  ;;  %v3858_v14 = vrot.slane %v3856_v49, 3  ;;  %v3861_v7 = vrot.slane %v3859_v31, 4  ;;  %19035 = vst [vmem:[#allocation103_spill] sm:$0xff] %v15162_v8  ;;  %v15174_v31 = vld [vmem:[#allocation2 + $0x68] sm:$0xf] }
 0x16c   : > { %v3865_v53 = vshrl.u32 %v11854_v25, 16  ;;  %v3868_v40 = vshll.u32 %v11854_v25, 16  ;;  %v11855_v37 = vcombine.low %v3697_v19, %v3698_v42  ;;  %13111 = vmatprep.subr.bf16.mxu1 %v15137_v11  ;;  %v3699_v0 = vmul.bf16 %v15148_v54, %v19034_v2  ;;  %v15166_v25 = vld [vmem:[#allocation2 + $0x5c] sm:$0xf]  ;;  %v13607_v19 = vld [vmem:[%s18678_s3 + $0x60] sm:$0xff]   ;;  %v19038_v2 = vld [vmem:[#allocation62_spill] sm:$0xff] }
 0x16d   : > { %v3854_v3 = vsel %vm2027_vm8, %v3844_v57, %v3853_v5  ;;  %v3702_v49 = vmul.bf16 %v15156_v52, %v14730_v61  ;;  %v15192_v17 = vld [vmem:[%s18678_s3 + $0x88] sm:$0xff]  }
 0x16e   : > { %12976 = vmatmul.mubr.msk.bf16.gmra.mxu1 %vm18912_vm1, %v3845_v12  ;;  %v3867_v23 = vrot.slane %v3865_v53, 3  ;;  %v3870_v26 = vrot.slane %v3868_v40, 4  ;;  %v11856_v18 = vcombine.low %v3699_v0, %v3700_v39  ;;  %v3874_v42 = vshrl.u32 %v11855_v37, 16  ;;  %v15177_v53 = vld [vmem:[#allocation2 + $0x64] sm:$0xf]  ;;  %v13722_v40 = vld [vmem:[%s18678_s3 + $0x68] sm:$0xff]  }
 0x16f   : > { %12979 = vmatprep.mubr.msk.bf16.mxu1 %vm18912_vm1, %v3854_v3  ;;  %v3877_v57 = vshll.u32 %v11855_v37, 16  ;;  %v3862_v12 = vor.u32 %v3861_v7, %v3858_v14  ;;  %v19036_v39 = vld [vmem:[#allocation52_spill] sm:$0xff]  ;;  %v15185_v3 = vpop.f32.mrf.mxu0  ;;  %v3704_v37 = vmul.bf16 %v15174_v31, %v19038_v2  ;;  %19039 = vst [vmem:[#allocation105_spill] sm:$0xff] %v15192_v17  ;;  %v11889_v14 = vcombine.low %v15066_v36, %v15070_v56 }
 0x170   : > { %13008 = vmatmul.mubr.msk.bf16.vlgmr.msra.gmra.mxu0 %vm18912_vm1, %v11887_v44  ;;  %v3701_v0 = vmul.bf16 %v15166_v25, %v19036_v39  ;;  %19037 = vst [vmem:[#allocation104_spill] sm:$0xff] %v15185_v3  ;;  %v3871_v8 = vor.u32 %v3870_v26, %v3867_v23  ;;  %v3883_v61 = vshrl.u32 %v11856_v18, 16  ;;  %v3886_v44 = vshll.u32 %v11856_v18, 16  ;;  %v15207_v36 = vld [vmem:[#allocation2 + $0x78] sm:$0xf] }
 0x171   : > { %13076 = vmatpush3.bf16.msra.mxu0 %v13722_v40  ;;  %13011 = vmatprep.mubr.msk.bf16.mxu0 %vm18912_vm1, %v11888_v29  ;;  %v19040_v29 = vld [vmem:[#allocation60_spill] sm:$0xff]  ;;  %v3876_v3 = vrot.slane %v3874_v42, 3  ;;  %v3879_v23 = vrot.slane %v3877_v57, 4  ;;  %v3863_v26 = vsel %vm2027_vm8, %v3853_v5, %v3862_v12  ;;  %v11890_v18 = vcombine.low %v15072_v35, %v15077_v41  ;;  %v15203_v11 = vpop.f32.mrf.mxu0  ;;  %v15211_v41 = vld [vmem:[#allocation2 + $0x6c] sm:$0xf] }
 0x172   : > { %13077 = vmatprep.subr.bf16.mxu0 %v13607_v19  ;;  %v11857_v40 = vcombine.low %v3701_v0, %v3702_v49  ;;  %v3703_v7 = vmul.bf16 %v15177_v53, %v19040_v29  ;;  %19041 = vst [vmem:[#allocation106_spill] sm:$0xff] %v15203_v11  ;;  %v3872_v49 = vsel %vm2027_vm8, %v3862_v12, %v3871_v8  ;;  %v3885_v0 = vrot.slane %v3883_v61, 3  ;;  %v15216_v57 = vld [vmem:[#allocation2 + $0x74] sm:$0xf]  ;;  %v15218_v61 = vld [vmem:[#allocation2 + $0x80] sm:$0xf] }
 0x173   : > { %v3888_v29 = vrot.slane %v3886_v44, 4  ;;  %v3880_v5 = vor.u32 %v3879_v23, %v3876_v3  ;;  %v11891_v3 = vcombine.low %v15079_v20, %v15100_v6  ;;  %v15234_v11 = vld [vmem:[#allocation2 + $0x88] sm:$0xf] }
 0x174   : > { %v11858_v2 = vcombine.low %v3703_v7, %v3704_v37  ;;  %v3892_v35 = vshrl.u32 %v11857_v40, 16  ;;  %v3895_v56 = vshll.u32 %v11857_v40, 16  ;;  %v3708_v37 = vmul.bf16 %v15207_v36, %v14894_v50  ;;  %v15223_v40 = vld [vmem:[#allocation2 + $0x7c] sm:$0xf] }
 0x175   : > { %13078 = vmatpush3.bf16.msra.mxu0 %v13607_v19  ;;  %v19042_v19 = vld [vmem:[#allocation65_spill] sm:$0xff]  ;;  %v619_v7 = vld [vmem:[%s14047_s22 + $0xf8] sm:$0xff]  ;;  %v3889_v23 = vor.u32 %v3888_v29, %v3885_v0  ;;  %v3707_v50 = vmul.bf16 %v15216_v57, %v14889_v1  ;;  %v3709_v6 = vmul.bf16 %v15223_v40, %v14898_v10 }
 0x176   : > { %12980 = vmatmul.mubr.msk.bf16.gmra.mxu1 %vm18912_vm1, %v3863_v26  ;;  %13147 = vmatprep.subr.bf16.mxu0 %v15192_v17  ;;  %v3706_v42 = vmul.bf16 %v15201_v59, %v19042_v19  ;;  %v3901_v12 = vshrl.u32 %v11858_v2, 16  ;;  %v3904_v44 = vshll.u32 %v11858_v2, 16  ;;  %v15226_v26 = vpop.f32.mrf.mxu0  ;;  %v3894_v2 = vrot.slane %v3892_v35, 3 }
 0x177   : > { %12983 = vmatprep.mubr.msk.bf16.mxu1 %vm18912_vm1, %v3872_v49  ;;  %19043 = vst [vmem:[#allocation107_spill] sm:$0xff] %v15226_v26  ;;  %v19044_v49 = vld [vmem:[#allocation61_spill] sm:$0xff]  ;;  %v3897_v19 = vrot.slane %v3895_v56, 4  ;;  %v3710_v26 = vmul.bf16 %v15218_v61, %v14909_v28  ;;  %v3881_v17 = vsel %vm2027_vm8, %v3871_v8, %v3880_v5  ;;  %v11860_v35 = vcombine.low %v3707_v50, %v3708_v37  ;;  %v4546_v37 = vld [vmem:[#allocation2 + $0x14] sm:$0xf] }
 0x178   : > { %13012 = vmatmul.mubr.msk.bf16.gmra.mxu0 %vm18912_vm1, %v11889_v14  ;;  %v11892_v14 = vcombine.low %v15102_v13, %v15109_v9  ;;  %v15243_v13 = vld [vmem:[#allocation2 + $0x84] sm:$0xf]  ;;  %v667_v9 = vadd.f32 %v15028_v34, %v619_v7  ;;  %v3903_v29 = vrot.slane %v3901_v12, 3  ;;  %v3906_v0 = vrot.slane %v3904_v44, 4  ;;  %v15248_v1 = vpop.f32.mrf.mxu0 }
 0x179   : > { %13015 = vmatprep.mubr.msk.bf16.mxu0 %vm18912_vm1, %v11890_v18  ;;  %v3705_v18 = vmul.bf16 %v15211_v41, %v19044_v49  ;;  %v3712_v56 = vmul.bf16 %v15234_v11, %v14987_v15  ;;  %19045 = vst [vmem:[#allocation108_spill] sm:$0xff] %v15248_v1  ;;  %v3890_v8 = vsel %vm2027_vm8, %v3880_v5, %v3889_v23 }
 0x17a   : > { %v3711_v28 = vmul.bf16 %v15243_v13, %v14976_v47  ;;  %v3898_v34 = vor.u32 %v3897_v19, %v3894_v2  ;;  %v15258_v44 = vor.u32 %v3906_v0, %v3903_v29  ;;  %v15260_v7 = vpop.f32.mrf.mxu0  ;;  %v11893_v19 = vcombine.low %v15111_v55, %v15124_v24  ;;  %v4548_v29 = vld [vmem:[#allocation2 + $0x1c] sm:$0xf]  ;;  %v15268_v0 = vld [vmem:[#allocation2 + $0x28] sm:$0xf]  ;;  %v15280_v47 = vld [vmem:[#allocation2 + $0x74] sm:$0xf] }
 0x17b   : > { %v11859_v20 = vcombine.low %v3705_v18, %v3706_v42  ;;  %v12494_v42 = vpack.c.bf16 %v667_v9, %v667_v9  ;;  %v11861_v18 = vcombine.low %v3709_v6, %v3710_v26  ;;  %19046 = vst [vmem:[#allocation109_spill] sm:$0xff] %v15260_v7  ;;  %v15262_v26 = vld [vmem:[#allocation2 + $0x24] sm:$0xf]  ;;  %v3922_v6 = vshll.u32 %v11860_v35, 16  ;;  %v4545_v9 = vld [vmem:[#allocation2 + $0x10] sm:$0xf] }
 0x17c   : > { %v11862_v5 = vcombine.low %v3711_v28, %v3712_v56  ;;  %v15270_v28 = vld [vmem:[#allocation2 + $0x64] sm:$0xf]  ;;  %v3899_v56 = vsel %vm2027_vm8, %v3889_v23, %v3898_v34  ;;  %v3908_v55 = vsel %vm2027_vm8, %v3898_v34, %v15258_v44  ;;  %v19049_v23 = vld [vmem:[#allocation18_spill] sm:$0xff]  ;;  %v5121_v34 = vmul.bf16 %v15262_v26, %v14383_v62 }
 0x17d   : > { %v3910_v50 = vshrl.u32 %v11859_v20, 16  ;;  %v3913_v12 = vshll.u32 %v11859_v20, 16  ;;  %827 = vst.msk [vmem:[#allocation2 + $0x8c] sm:$0xf] %vm620_vm0, %v12494_v42  ;;  %v3928_v2 = vshrl.u32 %v11861_v18, 16  ;;  %v3931_v20 = vshll.u32 %v11861_v18, 16  ;;  %v15278_v18 = vpop.f32.mrf.mxu0 }
 0x17e   : > { %12984 = vmatmul.mubr.msk.bf16.gmra.mxu1 %vm18912_vm1, %v3881_v17  ;;  %v3919_v17 = vshrl.u32 %v11860_v35, 16  ;;  %v19047_v35 = vld [vmem:[#allocation21_spill] sm:$0xff]  ;;  %v3937_v1 = vshrl.u32 %v11862_v5, 16  ;;  %19048 = vst [vmem:[#allocation110_spill] sm:$0xff] %v15278_v18  ;;  %v3924_v15 = vrot.slane %v3922_v6, 4 }
 0x17f   : > { %12987 = vmatprep.mubr.msk.bf16.mxu1 %vm18912_vm1, %v3890_v8  ;;  %v3912_v8 = vrot.slane %v3910_v50, 3  ;;  %v3915_v42 = vrot.slane %v3913_v12, 4  ;;  %v4579_v7 = vmul.bf16 %v4546_v37, %v19047_v35  ;;  %v4578_v50 = vmul.bf16 %v4545_v9, %v19049_v23  ;;  %v19050_v12 = vld [vmem:[#allocation22_spill] sm:$0xff]  ;;  %v19051_v37 = vld [vmem:[#allocation23_spill] sm:$0xff]  ;;  %v15311_v6 = vld [vmem:[#allocation2 + $0x20] sm:$0xf] }
 0x180   : > { %13016 = vmatmul.mubr.msk.bf16.gmra.mxu0 %vm18912_vm1, %v11891_v3  ;;  %v11894_v3 = vcombine.low %v15126_v32, %v15148_v54  ;;  %v3921_v24 = vrot.slane %v3919_v17, 3  ;;  %v3940_v32 = vshll.u32 %v11862_v5, 16  ;;  %v15276_v54 = vld [vmem:[#allocation2 + $0x18] sm:$0xf]  ;;  %v4581_v35 = vmul.bf16 %v4548_v29, %v19051_v37  ;;  %v5084_v18 = vld [vmem:[#allocation2 + $0x14] sm:$0x8] }
 0x181   : > { %13019 = vmatprep.mubr.msk.bf16.mxu0 %vm18912_vm1, %v11892_v14  ;;  %v4547_v14 = vld [vmem:[#allocation2 + $0x18] sm:$0xf]  ;;  %v3930_v17 = vrot.slane %v3928_v2, 3  ;;  %v3933_v5 = vrot.slane %v3931_v20, 4  ;;  %v15296_v9 = vcombine.low %v4578_v50, %v4579_v7  ;;  %v5118_v26 = vmul.bf16 %v15276_v54, %v14360_v38  ;;  %19053 = vst [vmem:[#allocation112_spill] sm:$0xff] %v15311_v6 }
 0x182   : > { %v4580_v10 = vmul.bf16 %v4547_v14, %v19050_v12  ;;  %v15298_v14 = vld [vmem:[#allocation2 + $0x1c] sm:$0xf]  ;;  %v3916_v2 = vor.u32 %v3915_v42, %v3912_v8  ;;  %v3939_v20 = vrot.slane %v3937_v1, 3  ;;  %v3942_v29 = vrot.slane %v3940_v32, 4 }
 0x183   : > { %v3925_v7 = vor.u32 %v3924_v15, %v3921_v24  ;;  %v5117_v62 = vmul.bf16 %v5084_v18, %v14335_v48  ;;  %v11896_v1 = vcombine.low %v15156_v52, %v15177_v53  ;;  %v3934_v8 = vor.u32 %v3933_v5, %v3930_v17  ;;  %v4549_v24 = vld [vmem:[#allocation2 + $0x20] sm:$0xf]  ;;  %v4550_v18 = vld [vmem:[#allocation2 + $0x24] sm:$0xf]  ;;  %v4551_v17 = vld [vmem:[#allocation2 + $0x28] sm:$0xf] }
 0x184   : > { %v15289_v16 = vld [vmem:[#allocation2 + $0x8c] sm:$0xf]  ;;  %v15309_v50 = vcombine.low %v4580_v10, %v4581_v35  ;;  %v5119_v42 = vmul.bf16 %v15298_v14, %v14367_v46  ;;  %v4702_v15 = vshll.u32 %v15296_v9, 16  ;;  %v15329_v52 = vor.u32 %v3942_v29, %v3939_v20  ;;  %v19055_v10 = vld [vmem:[#allocation24_spill] sm:$0xff]  ;;  %v19058_v48 = vld [vmem:[#allocation31_spill] sm:$0xff] }
 0x185   : > { %v15325_v35 = vcombine.low %v5117_v62, %v5118_v26  ;;  %v5120_v53 = vmul.bf16 %v15311_v6, %v14374_v51  ;;  %v4552_v5 = vld [vmem:[#allocation2 + $0x2c] sm:$0xf]  ;;  %v3926_v62 = vsel %vm2027_vm8, %v3916_v2, %v3925_v7  ;;  %v3935_v29 = vsel %vm2027_vm8, %v3925_v7, %v3934_v8 }
 0x186   : > { %12988 = vmatmul.mubr.msk.bf16.gmra.mxu1 %vm18912_vm1, %v3899_v56  ;;  %v5122_v56 = vmul.bf16 %v15268_v0, %v14387_v63  ;;  %v3713_v0 = vmul.bf16 %v15289_v16, %v14970_v30  ;;  %v4707_v20 = vshll.u32 %v15309_v50, 16  ;;  %v4582_v32 = vmul.bf16 %v4549_v24, %v19055_v10  ;;  %v19056_v63 = vld [vmem:[#allocation25_spill] sm:$0xff]  ;;  %v19057_v26 = vld [vmem:[#allocation30_spill] sm:$0xff]  ;;  %v15353_v24 = vld [vmem:[#allocation2 + $0x30] sm:$0xf] }
 0x187   : > { %12991 = vmatprep.mubr.msk.bf16.mxu1 %vm18912_vm1, %v3908_v55  ;;  %v15305_v55 = vpop.f32.mrf.mxu0  ;;  %v4583_v51 = vmul.bf16 %v4550_v18, %v19056_v63  ;;  %v4584_v46 = vmul.bf16 %v4551_v17, %v19057_v26  ;;  %19059 = vst [vmem:[#allocation114_spill] sm:$0xff] %v15353_v24  ;;  %v4711_v38 = vshrl.u32 %v15309_v50, 16  ;;  %v5242_v17 = vshll.u32 %v15325_v35, 16 }
 0x188   : > { %13020 = vmatmul.mubr.msk.bf16.gmra.mxu0 %vm18912_vm1, %v11893_v19  ;;  %19052 = vst [vmem:[#allocation111_spill] sm:$0xff] %v15305_v55  ;;  %v4554_v55 = vld [vmem:[#allocation2 + $0x34] sm:$0xf]  ;;  %v5124_v50 = vmul.bf16 %v15353_v24, %v14449_v60 }
 0x189   : > { %13023 = vmatprep.mubr.msk.bf16.mxu0 %vm18912_vm1, %v11894_v3  ;;  %v11895_v3 = vcombine.low %v15140_v4, %v15166_v25  ;;  %v3917_v4 = vsel %vm2027_vm8, %v15258_v44, %v3916_v2  ;;  %v11863_v25 = vcombine.low %v3713_v0, %v3713_v0  ;;  %v15333_v19 = vpop.f32.mrf.mxu0  ;;  %v11964_v0 = vcombine.low %v5119_v42, %v5120_v53 }
 0x18a   : > { %19054 = vst [vmem:[#allocation113_spill] sm:$0xff] %v15333_v19  ;;  %v4704_v2 = vrot.slane %v4702_v15, 1  ;;  %v4585_v44 = vmul.bf16 %v4552_v5, %v19058_v48  ;;  %v11965_v53 = vcombine.low %v5121_v34, %v5122_v56  ;;  %v4709_v15 = vrot.slane %v4707_v20, 1  ;;  %v15360_v5 = vld [vmem:[#allocation2 + $0x2c] sm:$0xf]  ;;  %v12901_v34 = vpop.f32.mrf.mxu1 }
 0x18b   : > { %v3946_v7 = vshrl.u32 %v11863_v25, 16  ;;  %v3949_v42 = vshll.u32 %v11863_v25, 16  ;;  %v15355_v18 = vpop.f32.mrf.mxu0  ;;  %v5250_v19 = vshll.u32 %v11964_v0, 16  ;;  %v15364_v25 = vcombine.low %v4582_v32, %v4583_v51  ;;  %v4553_v56 = vld [vmem:[#allocation2 + $0x30] sm:$0xf]  ;;  %v19061_v32 = vld [vmem:[#allocation56_spill] sm:$0xff] }
 0x18c   : > { %19060 = vst [vmem:[#allocation115_spill] sm:$0xff] %v15355_v18  ;;  %v5256_v26 = vshrl.u32 %v11965_v53, 16  ;;  %v5259_v63 = vshll.u32 %v11965_v53, 16  ;;  %v5123_v51 = vmul.bf16 %v15360_v5, %v14443_v43  ;;  %v2274_v24 = vpop.f32.mrf.mxu1  ;;  %v19066_v43 = vld [vmem:[#allocation39_spill] sm:$0xff] }
 0x18d   : > { %v3948_v20 = vrot.slane %v3946_v7, 3  ;;  %v3951_v48 = vrot.slane %v3949_v42, 4  ;;  %v4713_v7 = vor.u32 %v4711_v38, %v4709_v15  ;;  %v5252_v53 = vrot.slane %v5250_v19, 4 }
 0x18e   : > { %12992 = vmatmul.mubr.msk.bf16.gmra.mxu1 %vm18912_vm1, %v3917_v4  ;;  %v5239_v4 = vshrl.u32 %v15325_v35, 16  ;;  %v4555_v35 = vld [vmem:[#allocation2 + $0x38] sm:$0xf]  ;;  %v4715_v60 = vshll.u32 %v15364_v25, 16  ;;  %v19068_v38 = vcombine.low %v15201_v59, %v15216_v57 }
 0x18f   : > { %12995 = vmatprep.mubr.msk.bf16.mxu1 %vm18912_vm1, %v3926_v62  ;;  %v3944_v62 = vsel %vm2027_vm8, %v3934_v8, %v15329_v52  ;;  %v5247_v8 = vshrl.u32 %v11964_v0, 16  ;;  %v2283_v0 = vadd.f32 %v12901_v34, %v19061_v32  ;;  %v11966_v34 = vcombine.low %v5123_v51, %v5124_v50  ;;  %v19065_v32 = vld [vmem:[#allocation38_spill] sm:$0xff] }
 0x190   : > { %13024 = vmatmul.mubr.msk.bf16.gmra.mxu0 %vm18912_vm1, %v11895_v3  ;;  %v4700_v3 = vshrl.u32 %v15296_v9, 16  ;;  %v5241_v6 = vrot.slane %v5239_v4, 3  ;;  %v15366_v9 = vcombine.low %v4584_v46, %v4585_v44  ;;  %v12937_v10 = vpop.f32.mrf.mxu0  ;;  %v19063_v44 = vld [vmem:[#allocation33_spill] sm:$0xff]  ;;  %v3952_v19 = vor.u32 %v3951_v48, %v3948_v20  ;;  %v19069_v51 = vld [vmem:[#allocation58_spill] sm:$0xff] }
 0x191   : > { %13027 = vmatprep.mubr.msk.bf16.mxu0 %vm18912_vm1, %v11896_v1  ;;  %v4556_v1 = vld [vmem:[#allocation2 + $0x3c] sm:$0xf]  ;;  %v4587_v4 = vmul.bf16 %v4554_v55, %v19063_v44  ;;  %v5249_v42 = vrot.slane %v5247_v8, 3  ;;  %v15386_v44 = vld [vmem:[#allocation2 + $0x34] sm:$0xf]  ;;  %v5258_v50 = vrot.slane %v5256_v26, 3 }
 0x192   : > { %v4705_v18 = vor.u32 %v4704_v2, %v4700_v3  ;;  %v19062_v2 = vld [vmem:[#allocation32_spill] sm:$0xff]  ;;  %v4589_v55 = vmul.bf16 %v4556_v1, %v19066_v43  ;;  %v3489_v8 = vpop.f32.mrf.mxu0  ;;  %v5125_v48 = vmul.bf16 %v15386_v44, %v14458_v22  ;;  %v5268_v20 = vshll.u32 %v11966_v34, 16  ;;  %v19086_v22 = vld [vmem:[#allocation101_spill] sm:$0xff] }
 0x193   : > { %v4586_v46 = vmul.bf16 %v4553_v56, %v19062_v2  ;;  %v15376_v3 = vld [vmem:[#allocation2 + $0x38] sm:$0xf]  ;;  %v4588_v56 = vmul.bf16 %v4555_v35, %v19065_v32  ;;  %v15388_v2 = vadd.f32 %v12937_v10, %v2283_v0  ;;  %v5261_v35 = vrot.slane %v5259_v63, 4  ;;  %v15400_v0 = vld [vmem:[#allocation2 + $0x40] sm:$0xf]  ;;  %v12902_v63 = vpop.f32.mrf.mxu1 }
 0x194   : > { %v2275_v10 = vadd.f32 %v2274_v24, %v19069_v51  ;;  %19070 = vst [vmem:[#allocation58_spill] sm:$0xff] %v15400_v0  ;;  %v4710_v59 = vsel %vm3262_vm9, %v4705_v18, %v4709_v15  ;;  %v5253_v57 = vor.u32 %v5252_v53, %v5249_v42  ;;  %v3953_v24 = vsel %vm2027_vm8, %v15329_v52, %v3952_v19 }
 0x195   : > { %19067 = vst [vmem:[#allocation56_spill] sm:$0xff] %v15388_v2  ;;  %v15397_v1 = vcombine.low %v4586_v46, %v4587_v4  ;;  %v4719_v18 = vshrl.u32 %v15364_v25, 16  ;;  %v5262_v42 = vor.u32 %v5261_v35, %v5258_v50  ;;  %v19073_v25 = vcombine.low %v15207_v36, %v15223_v40  ;;  %v19098_v2 = vld [vmem:[#allocation54_spill] sm:$0xff] }
 0x196   : > { %12996 = vmatmul.mubr.msk.bf16.gmra.mxu1 %vm18912_vm1, %v3935_v29  ;;  %v19064_v29 = vcombine.low %v15174_v31, %v15211_v41  ;;  %v4723_v31 = vshll.u32 %v15366_v9, 16  ;;  %v5126_v41 = vmul.bf16 %v15376_v3, %v14472_v45  ;;  %v15407_v45 = vld [vmem:[#allocation2 + $0x3c] sm:$0xf]  ;;  %v15409_v26 = vadd.f32 %v3489_v8, %v2275_v10  ;;  %v4559_v8 = vld [vmem:[#allocation2 + $0x48] sm:$0xf] }
 0x197   : > { %12999 = vmatprep.mubr.msk.bf16.mxu1 %vm18912_vm1, %v3944_v62  ;;  %v5244_v62 = vrot.slane %v5242_v17, 4  ;;  %v5265_v17 = vshrl.u32 %v11966_v34, 16  ;;  %v4731_v53 = vshll.u32 %v15397_v1, 16  ;;  %v12938_v34 = vpop.f32.mrf.mxu0  ;;  %v5270_v35 = vrot.slane %v5268_v20, 4  ;;  %v4560_v10 = vld [vmem:[#allocation2 + $0x4c] sm:$0xf] }
 0x198   : > { %13028 = vmatmul.mubr.msk.bf16.gmra.mxu0 %vm18912_vm1, %v19064_v29  ;;  %v4717_v29 = vrot.slane %v4715_v60, 1  ;;  %19071 = vst [vmem:[#allocation116_spill] sm:$0xff] %v15409_v26  ;;  %v11967_v4 = vcombine.low %v5125_v48, %v5126_v41  ;;  %v5128_v60 = vmul.bf16 %v15400_v0, %v14537_v33  ;;  %v4725_v15 = vrot.slane %v4723_v31, 1  ;;  %v4558_v41 = vld [vmem:[#allocation2 + $0x44] sm:$0xf]  ;;  %v15462_v33 = vpop.f32.mrf.mxu1  ;;  %v19097_v26 = vld [vmem:[#allocation51_spill] sm:$0xff] }
 0x199   : > { %13031 = vmatprep.mubr.msk.bf16.mxu0 %vm18912_vm1, %v19068_v38  ;;  %v15405_v38 = vcombine.low %v4588_v56, %v4589_v55  ;;  %v5245_v46 = vor.u32 %v5244_v62, %v5241_v6  ;;  %v5127_v6 = vmul.bf16 %v15407_v45, %v14529_v58  ;;  %v19072_v55 = vld [vmem:[#allocation63_spill] sm:$0xff]  ;;  %v4557_v62 = vld [vmem:[#allocation2 + $0x40] sm:$0xf]  ;;  %v5267_v50 = vrot.slane %v5265_v17, 3  ;;  %19083 = vst [vmem:[#allocation120_spill] sm:$0xff] %v15462_v33  ;;  %v19085_v58 = vld [vmem:[#allocation42_spill] sm:$0xff]  ;;  %v15475_v33 = vpop.f32.mrf.mxu0 }
 0x19a   : > { %v4718_v52 = vsel %vm3262_vm9, %v4713_v7, %v4717_v29  ;;  %v2286_v19 = vadd.f32 %v12902_v63, %v19072_v55  ;;  %v4721_v31 = vor.u32 %v4719_v18, %v4717_v29  ;;  %v19074_v7 = vcombine.low %v15218_v61, %v15243_v13  ;;  %v19078_v61 = vld [vmem:[#allocation40_spill] sm:$0xff]  ;;  %v19079_v18 = vld [vmem:[#allocation41_spill] sm:$0xff]  ;;  %19087 = vst [vmem:[#allocation101_spill] sm:$0xff] %v15475_v33 }
 0x19b   : > { %v5254_v56 = vsel %vm2027_vm8, %v5245_v46, %v5253_v57  ;;  %v4739_v51 = vshll.u32 %v15405_v38, 16  ;;  %v5277_v48 = vshll.u32 %v11967_v4, 16  ;;  %v11968_v63 = vcombine.low %v5127_v6, %v5128_v60  ;;  %v15435_v46 = vld [vmem:[#allocation2 + $0x50] sm:$0xf]  ;;  %v4564_v33 = vld [vmem:[#allocation2 + $0x5c] sm:$0xf] }
 0x19c   : > { %19076 = vst [vmem:[#allocation117_spill] sm:$0xff] %v15435_v46  ;;  %v15437_v36 = vadd.f32 %v12938_v34, %v2286_v19  ;;  %v4726_v40 = vsel %vm3262_vm9, %v4721_v31, %v4725_v15  ;;  %v15441_v29 = vsel %vm2027_vm8, %v5253_v57, %v5262_v42  ;;  %v4727_v17 = vshrl.u32 %v15366_v9, 16  ;;  %v19081_v6 = vld [vmem:[#allocation47_spill] sm:$0xff]  ;;  %v15450_v34 = vld [vmem:[#allocation2 + $0x4c] sm:$0xf] }
 0x19d   : > { %v4733_v20 = vrot.slane %v4731_v53, 1  ;;  %v4590_v13 = vmul.bf16 %v4557_v62, %v19078_v61  ;;  %v4591_v55 = vmul.bf16 %v4558_v41, %v19079_v18  ;;  %19082 = vst [vmem:[#allocation119_spill] sm:$0xff] %v15450_v34  ;;  %v15452_v19 = vor.u32 %v5270_v35, %v5267_v50  ;;  %v13614_v62 = vld [vmem:[%s18678_s3 + $0x70] sm:$0xff]   ;;  %v19084_v35 = vld [vmem:[#allocation36_spill] sm:$0xff]  ;;  %v4566_v0 = vld [vmem:[#allocation2 + $0x64] sm:$0xf] }
 0x19e   : > { %13000 = vmatmul.mubr.msk.bf16.gmra.mxu1 %vm18912_vm1, %v3953_v24  ;;  %v15433_v24 = vld [vmem:[#allocation2 + $0x48] sm:$0xf]  ;;  %19077 = vst [vmem:[#allocation118_spill] sm:$0xff] %v15437_v36  ;;  %v4735_v57 = vshrl.u32 %v15397_v1, 16  ;;  %v5132_v53 = vmul.bf16 %v15435_v46, %v14622_v27  ;;  %v4741_v41 = vrot.slane %v4739_v51, 1  ;;  %v5279_v31 = vrot.slane %v5277_v48, 4 }
 0x19f   : > { %13043 = vmatprep.mubr.msk.bf16.mxu1 %vm18912_vm1, %v4710_v59  ;;  %v5274_v59 = vshrl.u32 %v11967_v4, 16  ;;  %19075 = vst [vmem:[#allocation63_spill] sm:$0xff] %v15433_v24  ;;  %v19080_v4 = vld [vmem:[#allocation46_spill] sm:$0xff]  ;;  %v5130_v9 = vmul.bf16 %v15433_v24, %v14551_v21  ;;  %v4729_v50 = vor.u32 %v4727_v17, %v4725_v15  ;;  %v5286_v1 = vshll.u32 %v11968_v63, 16  ;;  %v4562_v15 = vld [vmem:[#allocation2 + $0x54] sm:$0xf] }
 0x1a0   : > { %13032 = vmatmul.mubr.msk.bf16.gmra.mxu0 %vm18912_vm1, %v19073_v25  ;;  %v4592_v60 = vmul.bf16 %v4559_v8, %v19080_v4  ;;  %v4593_v25 = vmul.bf16 %v4560_v10, %v19081_v6  ;;  %v5283_v10 = vshrl.u32 %v11968_v63, 16  ;;  %v5131_v27 = vmul.bf16 %v15450_v34, %v19085_v58  ;;  %v19100_v24 = vld [vmem:[#allocation44_spill] sm:$0xff] }
 0x1a1   : > { %13035 = vmatprep.mubr.msk.bf16.mxu0 %vm18912_vm1, %v19074_v7  ;;  %v15448_v7 = vld [vmem:[#allocation2 + $0x44] sm:$0xf]  ;;  %v5276_v8 = vrot.slane %v5274_v59, 3  ;;  %v4737_v51 = vor.u32 %v4735_v57, %v4733_v20  ;;  %v15471_v59 = vcombine.low %v4590_v13, %v4591_v55  ;;  %v12905_v63 = vpop.f32.mrf.mxu1  ;;  %v19088_v17 = vcombine.low %v15234_v11, %v15289_v16  ;;  %v15484_v55 = vld [vmem:[#allocation2 + $0x58] sm:$0xf] }
 0x1a2   : > { %v5129_v21 = vmul.bf16 %v15448_v7, %v19084_v35  ;;  %v15473_v48 = vcombine.low %v4592_v60, %v4593_v25  ;;  %v11970_v13 = vcombine.low %v5131_v27, %v5132_v53  ;;  %19089 = vst [vmem:[#allocation121_spill] sm:$0xff] %v15484_v55  ;;  %v4734_v60 = vsel %vm3262_vm9, %v4729_v50, %v4733_v20  ;;  %v15491_v11 = vld [vmem:[#allocation2 + $0x54] sm:$0xf]  ;;  %v19092_v27 = vld [vmem:[#allocation48_spill] sm:$0xff]  ;;  %v19093_v53 = vld [vmem:[#allocation49_spill] sm:$0xff] }
 0x1a3   : > { %v4742_v25 = vsel %vm3262_vm9, %v4737_v51, %v4741_v41  ;;  %v15489_v58 = vor.u32 %v5279_v31, %v5276_v8  ;;  %v5285_v16 = vrot.slane %v5283_v10, 3  ;;  %19090 = vst [vmem:[#allocation122_spill] sm:$0xff] %v15491_v11  ;;  %v4595_v35 = vmul.bf16 %v4562_v15, %v19093_v53  ;;  %v19094_v31 = vld [vmem:[#allocation45_spill] sm:$0xff]  ;;  %v15503_v50 = vld [vmem:[#allocation2 + $0x5c] sm:$0xf]  ;;  %v19096_v51 = vld [vmem:[#allocation67_spill] sm:$0xff] }
 0x1a4   : > { %v11969_v57 = vcombine.low %v5129_v21, %v5130_v9  ;;  %v4747_v20 = vshll.u32 %v15471_v59, 16  ;;  %v4755_v8 = vshll.u32 %v15473_v48, 16  ;;  %v5134_v10 = vmul.bf16 %v15484_v55, %v19094_v31  ;;  %19095 = vst [vmem:[#allocation124_spill] sm:$0xff] %v15503_v50  ;;  %v19099_v53 = vld [vmem:[#allocation55_spill] sm:$0xff]  ;;  %v4565_v55 = vld [vmem:[#allocation2 + $0x60] sm:$0xf] }
 0x1a5   : > { %v2299_v36 = vadd.f32 %v12905_v63, %v19096_v51  ;;  %v5133_v34 = vmul.bf16 %v15491_v11, %v19100_v24  ;;  %v19102_v51 = vld [vmem:[#allocation50_spill] sm:$0xff] }
 0x1a6   : > { %13044 = vmatmul.mubr.msk.bf16.vlgmr.msra.gmra.mxu1 %vm18912_vm1, %v4718_v52  ;;  %v4561_v52 = vld [vmem:[#allocation2 + $0x50] sm:$0xf] }
 0x1a7   : > { %13112 = vmatpush3.bf16.msra.mxu1 %v19086_v22  ;;  %13047 = vmatprep.mubr.msk.bf16.mxu1 %vm18912_vm1, %v4726_v40  ;;  %v5272_v22 = vsel %vm2027_vm8, %v5262_v42, %v15452_v19  ;;  %v4743_v40 = vshrl.u32 %v15405_v38, 16  ;;  %v12941_v42 = vpop.f32.mrf.mxu0  ;;  %v5288_v38 = vrot.slane %v5286_v1, 4  ;;  %v4594_v9 = vmul.bf16 %v4561_v52, %v19092_v27  ;;  %v2290_v1 = vpop.f32.mrf.mxu1 }
 0x1a8   : > { %13036 = vmatmul.mubr.msk.bf16.gmra.mxu0 %vm18912_vm1, %v19088_v17  ;;  %13113 = vmatprep.subr.bf16.mxu1 %v13614_v62  ;;  %v15493_v17 = vld [vmem:[#allocation2 + $0x60] sm:$0xf]  ;;  %v5301_v52 = vshrl.u32 %v11970_v13, 16  ;;  %v4597_v27 = vmul.bf16 %v4564_v33, %v19099_v53  ;;  %v15512_v31 = vadd.f32 %v12941_v42, %v2299_v36  ;;  %v5281_v36 = vsel %vm2027_vm8, %v15452_v19, %v15489_v58 }
 0x1a9   : > { %13079 = vmatprep.mubr.msk.bf16.mxu0 %vm18912_vm1, %v5254_v56  ;;  %19091 = vst [vmem:[#allocation123_spill] sm:$0xff] %v15493_v17  ;;  %v15495_v21 = vor.u32 %v4743_v40, %v4741_v41  ;;  %v4563_v56 = vld [vmem:[#allocation2 + $0x58] sm:$0xf]  ;;  %v5292_v41 = vshrl.u32 %v11969_v57, 16  ;;  %v5295_v40 = vshll.u32 %v11969_v57, 16  ;;  %v5136_v15 = vmul.bf16 %v15493_v17, %v19097_v26  ;;  %v3505_v63 = vpop.f32.mrf.mxu0  ;;  %v19103_v17 = vld [vmem:[#allocation69_spill] sm:$0xff] }
 0x1aa   : > { %v4596_v46 = vmul.bf16 %v4563_v56, %v19098_v2  ;;  %19101 = vst [vmem:[#allocation67_spill] sm:$0xff] %v15512_v31  ;;  %v15515_v57 = vcombine.low %v4594_v9, %v4595_v35  ;;  %v5135_v26 = vmul.bf16 %v15503_v50, %v19102_v51  ;;  %v2291_v56 = vadd.f32 %v2290_v1, %v19103_v17  ;;  %v13615_v33 = vld [vmem:[%s18678_s3 + $0x80] sm:$0xff]   ;;  %v19105_v51 = vld [vmem:[#allocation59_spill] sm:$0xff] }
 0x1ab   : > { %13114 = vmatpush3.bf16.msra.mxu1 %v13614_v62  ;;  %v5304_v62 = vshll.u32 %v11970_v13, 16  ;;  %v4749_v42 = vrot.slane %v4747_v20, 1  ;;  %v4751_v13 = vshrl.u32 %v15471_v59, 16  ;;  %v11971_v35 = vcombine.low %v5133_v34, %v5134_v10  ;;  %v19104_v17 = vld [vmem:[#allocation57_spill] sm:$0xff]  ;;  %v4567_v34 = vld [vmem:[#allocation2 + $0x68] sm:$0xf]  ;;  %v12942_v10 = vpop.f32.mrf.mxu0 }
 0x1ac   : > { %v11972_v9 = vcombine.low %v5135_v26, %v5136_v15  ;;  %v4598_v1 = vmul.bf16 %v4565_v55, %v19104_v17  ;;  %v4599_v24 = vmul.bf16 %v4566_v0, %v19105_v51  ;;  %v15532_v31 = vadd.f32 %v3505_v63, %v2291_v56  ;;  %v19108_v55 = vld [vmem:[#allocation71_spill] sm:$0xff]  ;;  %v4568_v0 = vld [vmem:[#allocation2 + $0x6c] sm:$0xf] }
 0x1ad   : > { %v4757_v19 = vrot.slane %v4755_v8, 1  ;;  %v5294_v20 = vrot.slane %v5292_v41, 3  ;;  %v5297_v50 = vrot.slane %v5295_v40, 4  ;;  %v15536_v59 = vcombine.low %v4596_v46, %v4597_v27 }
 0x1ae   : > { %13048 = vmatmul.mubr.msk.bf16.gmra.mxu1 %vm18912_vm1, %v4734_v60  ;;  %v12906_v60 = vpop.f32.mrf.mxu1  ;;  %19106 = vst [vmem:[#allocation69_spill] sm:$0xff] %v15532_v31  ;;  %v5303_v11 = vrot.slane %v5301_v52, 3  ;;  %v4763_v26 = vshll.u32 %v15515_v57, 16  ;;  %v5289_v63 = vor.u32 %v5288_v38, %v5285_v16  ;;  %v4753_v56 = vor.u32 %v4751_v13, %v4749_v42  ;;  %v19110_v52 = vld [vmem:[#allocation66_spill] sm:$0xff] }
 0x1af   : > { %13051 = vmatprep.mubr.msk.bf16.mxu1 %vm18912_vm1, %v4742_v25  ;;  %v19107_v25 = vld [vmem:[#allocation105_spill] sm:$0xff]  ;;  %v2302_v15 = vadd.f32 %v12906_v60, %v19108_v55  ;;  %v5313_v31 = vshll.u32 %v11971_v35, 16  ;;  %v5322_v8 = vshll.u32 %v11972_v9, 16  ;;  %v15540_v41 = vcombine.low %v4598_v1, %v4599_v24  ;;  %v19111_v60 = vld [vmem:[#allocation68_spill] sm:$0xff] }
 0x1b0   : > { %13080 = vmatmul.mubr.msk.bf16.vlgmr.msra.gmra.mxu0 %vm18912_vm1, %v15441_v29  ;;  %v5306_v29 = vrot.slane %v5304_v62, 4  ;;  %v4750_v27 = vsel %vm3262_vm9, %v15495_v21, %v4749_v42  ;;  %v4771_v40 = vshll.u32 %v15536_v59, 16  ;;  %v4600_v62 = vmul.bf16 %v4567_v34, %v19110_v52  ;;  %v4569_v34 = vld [vmem:[#allocation2 + $0x70] sm:$0xf] }
 0x1b1   : > { %13083 = vmatprep.mubr.msk.bf16.mxu0 %vm18912_vm1, %v5272_v22  ;;  %13148 = vmatpush3.bf16.msra.mxu0 %v19107_v25  ;;  %v5310_v22 = vshrl.u32 %v11971_v35, 16  ;;  %v5319_v25 = vshrl.u32 %v11972_v9, 16  ;;  %v15542_v46 = vadd.f32 %v12942_v10, %v2302_v15  ;;  %v4601_v55 = vmul.bf16 %v4568_v0, %v19111_v60  ;;  %v15551_v35 = vld [vmem:[#allocation2 + $0x68] sm:$0xf]  ;;  %v15553_v9 = vld [vmem:[#allocation2 + $0x70] sm:$0xf] }
 0x1b2   : > { %13149 = vmatprep.subr.bf16.mxu0 %v13615_v33  ;;  %v4758_v16 = vsel %vm3262_vm9, %v4753_v56, %v4757_v19  ;;  %v5298_v38 = vor.u32 %v5297_v50, %v5294_v20  ;;  %v5307_v13 = vor.u32 %v5306_v29, %v5303_v11  ;;  %v4765_v24 = vrot.slane %v4763_v26, 1  ;;  %19112 = vst [vmem:[#allocation71_spill] sm:$0xff] %v15551_v35  ;;  %v15562_v29 = vpop.f32.mrf.mxu1  ;;  %v4570_v26 = vld [vmem:[#allocation2 + $0x74] sm:$0xf]  ;;  %v15569_v56 = vld [vmem:[#allocation2 + $0x6c] sm:$0xf] }
 0x1b3   : > { %19109 = vst [vmem:[#allocation105_spill] sm:$0xff] %v15542_v46  ;;  %19113 = vst [vmem:[#allocation125_spill] sm:$0xff] %v15553_v9  ;;  %v5290_v21 = vsel %vm2027_vm8, %v15489_v58, %v5289_v63  ;;  %v4759_v42 = vshrl.u32 %v15473_v48, 16  ;;  %v5312_v1 = vrot.slane %v5310_v22, 3  ;;  %v4767_v50 = vshrl.u32 %v15515_v57, 16  ;;  %v19115_v48 = vld [vmem:[#allocation53_spill] sm:$0xff] }
 0x1b4   : > { %v5321_v11 = vrot.slane %v5319_v25, 3  ;;  %v5324_v20 = vrot.slane %v5322_v8, 4  ;;  %v4779_v10 = vshll.u32 %v15540_v41, 16  ;;  %19114 = vst [vmem:[#allocation126_spill] sm:$0xff] %v15562_v29  ;;  %v4773_v15 = vrot.slane %v4771_v40, 1  ;;  %19116 = vst [vmem:[#allocation127_spill] sm:$0xff] %v15569_v56 }
 0x1b5   : > { %13150 = vmatpush3.bf16.msra.mxu0 %v13615_v33  ;;  %v5315_v33 = vrot.slane %v5313_v31, 4  ;;  %v4761_v58 = vor.u32 %v4759_v42, %v4757_v19  ;;  %v15565_v0 = vcombine.low %v4600_v62, %v4601_v55  ;;  %v5138_v31 = vmul.bf16 %v15551_v35, %v19115_v48  ;;  %v19117_v25 = vld [vmem:[#allocation62_spill] sm:$0xff]  ;;  %v19119_v55 = vld [vmem:[#allocation72_spill] sm:$0xff]  ;;  %v15583_v35 = vpop.f32.mrf.mxu0 }
 0x1b6   : > { %13052 = vmatmul.mubr.msk.bf16.gmra.mxu1 %vm18912_vm1, %v4750_v27  ;;  %v5299_v57 = vsel %vm2027_vm8, %v5289_v63, %v5298_v38  ;;  %v4769_v22 = vor.u32 %v4767_v50, %v4765_v24  ;;  %v5140_v8 = vmul.bf16 %v15553_v9, %v19117_v25  ;;  %v4775_v19 = vshrl.u32 %v15536_v59, 16  ;;  %v19118_v40 = vld [vmem:[#allocation70_spill] sm:$0xff]  ;;  %v4571_v42 = vld [vmem:[#allocation2 + $0x78] sm:$0xf]  ;;  %v4572_v48 = vld [vmem:[#allocation2 + $0x7c] sm:$0xf] }
 0x1b7   : > { %13055 = vmatprep.mubr.msk.bf16.mxu1 %vm18912_vm1, %v4758_v16  ;;  %v5316_v16 = vor.u32 %v5315_v33, %v5312_v1  ;;  %v4602_v62 = vmul.bf16 %v4569_v34, %v19118_v40  ;;  %v4766_v29 = vsel %vm3262_vm9, %v4761_v58, %v4765_v24  ;;  %v15579_v46 = vor.u32 %v5324_v20, %v5321_v11  ;;  %v15585_v25 = vld [vmem:[#allocation2 + $0x78] sm:$0xf]  ;;  %v15592_v24 = vld [vmem:[#allocation2 + $0x80] sm:$0xf] }
 0x1b8   : > { %13084 = vmatmul.mubr.msk.bf16.gmra.mxu0 %vm18912_vm1, %v5281_v36  ;;  %v5308_v36 = vsel %vm2027_vm8, %v5298_v38, %v5307_v13  ;;  %v4781_v63 = vrot.slane %v4779_v10, 1  ;;  %v19120_v38 = vld [vmem:[#allocation60_spill] sm:$0xff]  ;;  %19121 = vst [vmem:[#allocation128_spill] sm:$0xff] %v15583_v35  ;;  %19122 = vst [vmem:[#allocation129_spill] sm:$0xff] %v15585_v25  ;;  %v4774_v59 = vsel %vm3262_vm9, %v4769_v22, %v4773_v15  ;;  %v4787_v33 = vshll.u32 %v15565_v0, 16  ;;  %v19127_v9 = vld [vmem:[#allocation77_spill] sm:$0xff] }
 0x1b9   : > { %13087 = vmatprep.mubr.msk.bf16.mxu0 %vm18912_vm1, %v5290_v21  ;;  %v12909_v27 = vpop.f32.mrf.mxu1  ;;  %v4603_v21 = vmul.bf16 %v4570_v26, %v19119_v55  ;;  %v5139_v50 = vmul.bf16 %v15569_v56, %v19120_v38  ;;  %v4777_v1 = vor.u32 %v4775_v19, %v4773_v15  ;;  %v19123_v34 = vmul.bf16 %v15270_v28, %v19036_v39  ;;  %v19125_v10 = vld [vmem:[#allocation80_spill] sm:$0xff]  ;;  %v19126_v38 = vld [vmem:[#allocation81_spill] sm:$0xff] }
 0x1ba   : > { %19124 = vst [vmem:[#allocation130_spill] sm:$0xff] %v15592_v24  ;;  %v4604_v58 = vmul.bf16 %v4571_v42, %v19125_v10  ;;  %v4605_v35 = vmul.bf16 %v4572_v48, %v19126_v38  ;;  %v2315_v55 = vadd.f32 %v12909_v27, %v19127_v9  ;;  %v5317_v15 = vsel %vm2027_vm8, %v5307_v13, %v5316_v16  ;;  %v19128_v19 = vld [vmem:[#allocation65_spill] sm:$0xff]  ;;  %v19138_v10 = vld [vmem:[#allocation86_spill] sm:$0xff] }
 0x1bb   : > { %v11973_v26 = vcombine.low %v19123_v34, %v5138_v31  ;;  %v2306_v11 = vpop.f32.mrf.mxu1  ;;  %v11974_v20 = vcombine.low %v5139_v50, %v5140_v8  ;;  %v4783_v28 = vshrl.u32 %v15540_v41, 16  ;;  %v15601_v31 = vcombine.low %v4602_v62, %v4603_v21  ;;  %v19130_v8 = vld [vmem:[#allocation75_spill] sm:$0xff]  ;;  %v4573_v41 = vld [vmem:[#allocation2 + $0x80] sm:$0xf]  ;;  %v4574_v39 = vld [vmem:[#allocation2 + $0x84] sm:$0xf] }
 0x1bc   : > { %v5142_v34 = vmul.bf16 %v15585_v25, %v19128_v19  ;;  %v5326_v48 = vsel %vm2027_vm8, %v5316_v16, %v15579_v46  ;;  %v4782_v9 = vsel %vm3262_vm9, %v4777_v1, %v4781_v63  ;;  %v5144_v27 = vmul.bf16 %v15592_v24, %v19130_v8  ;;  %v19133_v1 = vld [vmem:[#allocation74_spill] sm:$0xff] }
 0x1bd   : > { %v12945_v22 = vpop.f32.mrf.mxu0  ;;  %v4789_v21 = vrot.slane %v4787_v33, 1  ;;  %v5328_v42 = vshrl.u32 %v11973_v26, 16  ;;  %v5331_v50 = vshll.u32 %v11973_v26, 16  ;;  %v4785_v25 = vor.u32 %v4783_v28, %v4781_v63  ;;  %v4575_v26 = vld [vmem:[#allocation2 + $0x88] sm:$0xf] }
 0x1be   : > { %13056 = vmatmul.mubr.msk.bf16.gmra.mxu1 %vm18912_vm1, %v4766_v29  ;;  %v15605_v29 = vld [vmem:[#allocation2 + $0x7c] sm:$0xf]  ;;  %v15613_v13 = vadd.f32 %v12945_v22, %v2315_v55  ;;  %v5337_v16 = vshrl.u32 %v11974_v20, 16  ;;  %v15617_v38 = vcombine.low %v4604_v58, %v4605_v35  ;;  %v5340_v55 = vshll.u32 %v11974_v20, 16  ;;  %v19136_v63 = vld [vmem:[#allocation82_spill] sm:$0xff] }
 0x1bf   : > { %13059 = vmatprep.mubr.msk.bf16.mxu1 %vm18912_vm1, %v4774_v59  ;;  %19129 = vst [vmem:[#allocation77_spill] sm:$0xff] %v15605_v29  ;;  %v3521_v62 = vpop.f32.mrf.mxu0  ;;  %v19132_v59 = vld [vmem:[#allocation79_spill] sm:$0xff]  ;;  %v5143_v8 = vmul.bf16 %v15605_v29, %v19133_v1  ;;  %v4795_v22 = vshll.u32 %v15601_v31, 16  ;;  %v19137_v35 = vld [vmem:[#allocation84_spill] sm:$0xff]  ;;  %v4607_v40 = vmul.bf16 %v4574_v39, %v19138_v10  ;;  %v4790_v20 = vsel %vm3262_vm9, %v4785_v25, %v4789_v21 }
 0x1c0   : > { %13088 = vmatmul.mubr.msk.bf16.gmra.mxu0 %vm18912_vm1, %v5299_v57  ;;  %19131 = vst [vmem:[#allocation131_spill] sm:$0xff] %v15613_v13  ;;  %v2307_v19 = vadd.f32 %v2306_v11, %v19132_v59  ;;  %v12910_v57 = vpop.f32.mrf.mxu1  ;;  %v4576_v11 = vld [vmem:[#allocation2 + $0x8c] sm:$0xf]  ;;  %v4606_v58 = vmul.bf16 %v4573_v41, %v19137_v35  ;;  %v5330_v1 = vrot.slane %v5328_v42, 3  ;;  %v5333_v29 = vrot.slane %v5331_v50, 4 }
 0x1c1   : > { %13091 = vmatprep.mubr.msk.bf16.mxu0 %vm18912_vm1, %v5308_v36  ;;  %v19134_v36 = vmul.bf16 %v15280_v47, %v19044_v49  ;;  %v12946_v59 = vpop.f32.mrf.mxu0  ;;  %v11976_v24 = vcombine.low %v5143_v8, %v5144_v27  ;;  %v2318_v28 = vadd.f32 %v12910_v57, %v19136_v63  ;;  %v4791_v56 = vshrl.u32 %v15565_v0, 16  ;;  %v15632_v47 = vld [vmem:[#allocation2 + $0x84] sm:$0xf]  ;;  %v19141_v27 = vld [vmem:[#allocation92_spill] sm:$0xff]  ;;  %v15638_v57 = vld [vmem:[#allocation2 + $0x88] sm:$0xf] }
 0x1c2   : > { %v15625_v13 = vadd.f32 %v3521_v62, %v2307_v19  ;;  %19139 = vst [vmem:[#allocation82_spill] sm:$0xff] %v15632_v47  ;;  %v4803_v19 = vshll.u32 %v15617_v38, 16  ;;  %v4609_v62 = vmul.bf16 %v4576_v11, %v19141_v27  ;;  %v5339_v39 = vrot.slane %v5337_v16, 3  ;;  %v15644_v49 = vld [vmem:[#allocation2 + $0x90] sm:$0xf] }
 0x1c3   : > { %v11975_v33 = vcombine.low %v19134_v36, %v5142_v34  ;;  %v19140_v34 = vld [vmem:[#allocation91_spill] sm:$0xff]  ;;  %v15640_v41 = vadd.f32 %v12946_v59, %v2318_v28  ;;  %v5342_v25 = vrot.slane %v5340_v55, 4  ;;  %v4797_v42 = vrot.slane %v4795_v22, 1  ;;  %v19144_v28 = vld [vmem:[#allocation78_spill] sm:$0xff] }
 0x1c4   : > { %19135 = vst [vmem:[#allocation79_spill] sm:$0xff] %v15625_v13  ;;  %v4608_v8 = vmul.bf16 %v4575_v26, %v19140_v34  ;;  %v5358_v36 = vshll.u32 %v11976_v24, 16  ;;  %v11938_v63 = vcombine.low %v4606_v58, %v4607_v40  ;;  %v19143_v26 = vld [vmem:[#allocation76_spill] sm:$0xff]  ;;  %v4799_v59 = vshrl.u32 %v15601_v31, 16  ;;  %v4577_v27 = vld [vmem:[#allocation2 + $0x90] sm:$0x1] }
 0x1c5   : > { %19142 = vst [vmem:[#allocation132_spill] sm:$0xff] %v15640_v41  ;;  %v5346_v0 = vshrl.u32 %v11975_v33, 16  ;;  %v5349_v50 = vshll.u32 %v11975_v33, 16  ;;  %v5145_v11 = vmul.bf16 %v15632_v47, %v19143_v26  ;;  %v5146_v16 = vmul.bf16 %v15638_v57, %v19144_v28  ;;  %v15654_v33 = vld [vmem:[#allocation2 + $0x8c] sm:$0xf] }
 0x1c6   : > { %13060 = vmatmul.mubr.msk.bf16.gmra.mxu1 %vm18912_vm1, %v4782_v9  ;;  %v5355_v9 = vshrl.u32 %v11976_v24, 16  ;;  %v5334_v55 = vor.u32 %v5333_v29, %v5330_v1  ;;  %v4793_v22 = vor.u32 %v4791_v56, %v4789_v21  ;;  %v5343_v40 = vor.u32 %v5342_v25, %v5339_v39  ;;  %v19145_v41 = vld [vmem:[#allocation90_spill] sm:$0xff]  ;;  %v19146_v56 = vld [vmem:[#allocation88_spill] sm:$0xff]  ;;  %v19147_v25 = vld [vmem:[#allocation97_spill] sm:$0xff] }
 0x1c7   : > { %13063 = vmatprep.mubr.msk.bf16.mxu1 %vm18912_vm1, %v4790_v20  ;;  %v4805_v20 = vrot.slane %v4803_v19, 1  ;;  %v4801_v24 = vor.u32 %v4799_v59, %v4797_v42  ;;  %v5348_v58 = vrot.slane %v5346_v0, 3  ;;  %v5148_v26 = vmul.bf16 %v15644_v49, %v19145_v41 }
 0x1c8   : > { %13092 = vmatmul.mubr.msk.bf16.gmra.mxu0 %vm18912_vm1, %v5317_v15  ;;  %v15652_v15 = vcombine.low %v4608_v8, %v4609_v62  ;;  %v5351_v13 = vrot.slane %v5349_v50, 4  ;;  %v5360_v47 = vrot.slane %v5358_v36, 4  ;;  %v4811_v31 = vshll.u32 %v11938_v63, 16  ;;  %v15664_v8 = vld [vmem:[#allocation2 + $0x94] sm:$0xf] }
 0x1c9   : > { %13095 = vmatprep.mubr.msk.bf16.mxu0 %vm18912_vm1, %v5326_v48  ;;  %v5357_v48 = vrot.slane %v5355_v9, 3  ;;  %v4798_v28 = vsel %vm3262_vm9, %v4793_v22, %v4797_v42  ;;  %v11977_v29 = vcombine.low %v5145_v11, %v5146_v16  ;;  %v5147_v21 = vmul.bf16 %v15654_v33, %v19146_v56  ;;  %v15674_v11 = vpop.f32.mrf.mxu1 }
 0x1ca   : > { %v4806_v1 = vsel %vm3262_vm9, %v4801_v24, %v4805_v20  ;;  %v4819_v19 = vshll.u32 %v15652_v15, 16  ;;  %v5335_v62 = vsel %vm2027_vm8, %v15579_v46, %v5334_v55  ;;  %v4610_v42 = vmul.bf16 %v4577_v27, %v19147_v25  ;;  %19148 = vst [vmem:[#allocation133_spill] sm:$0xff] %v15674_v11 }
 0x1cb   : > { %v11978_v39 = vcombine.low %v5147_v21, %v5148_v26  ;;  %v5344_v0 = vsel %vm2027_vm8, %v5334_v55, %v5343_v40  ;;  %v5352_v50 = vor.u32 %v5351_v13, %v5348_v58  ;;  %v15672_v9 = vor.u32 %v5360_v47, %v5357_v48  ;;  %v5982_v58 = vld [vmem:[#allocation2 + $0x1c] sm:$0xf] }
 0x1cc   : > { %v4813_v36 = vrot.slane %v4811_v31, 1  ;;  %v4807_v59 = vshrl.u32 %v15617_v38, 16  ;;  %v5364_v46 = vshrl.u32 %v11977_v29, 16  ;;  %v5149_v26 = vmul.bf16 %v15664_v8, %v14970_v30  ;;  %v5981_v38 = vld [vmem:[#allocation2 + $0x18] sm:$0xf] }
 0x1cd   : > { %v4821_v27 = vrot.slane %v4819_v19, 1  ;;  %v5367_v16 = vshll.u32 %v11977_v29, 16  ;;  %v5373_v55 = vshrl.u32 %v11978_v39, 16  ;;  %v5376_v13 = vshll.u32 %v11978_v39, 16  ;;  %v5983_v19 = vld [vmem:[#allocation2 + $0x20] sm:$0xf] }
 0x1ce   : > { %13064 = vmatmul.mubr.msk.bf16.gmra.mxu1 %vm18912_vm1, %v4798_v28  ;;  %v4815_v28 = vshrl.u32 %v11938_v63, 16  ;;  %v4809_v24 = vor.u32 %v4807_v59, %v4805_v20  ;;  %v11940_v47 = vcombine.low %v4610_v42, %v4610_v42  ;;  %v5353_v48 = vsel %vm2027_vm8, %v5343_v40, %v5352_v50  ;;  %v15684_v63 = vpop.f32.mrf.mxu0  ;;  %v5984_v39 = vld [vmem:[#allocation2 + $0x24] sm:$0xf] }
 0x1cf   : > { %13067 = vmatprep.mubr.msk.bf16.mxu1 %vm18912_vm1, %v4806_v1  ;;  %v5362_v31 = vsel %vm2027_vm8, %v5352_v50, %v15672_v9  ;;  %19149 = vst [vmem:[#allocation134_spill] sm:$0xff] %v15684_v63  ;;  %v4823_v29 = vshrl.u32 %v15652_v15, 16  ;;  %v11979_v20 = vcombine.low %v5149_v26, %v5149_v26  ;;  %v5369_v42 = vrot.slane %v5367_v16, 4  ;;  %v19150_v59 = vld [vmem:[#allocation21_spill] sm:$0xff] }
 0x1d0   : > { %13096 = vmatmul.mubr.msk.bf16.gmra.mxu0 %vm18912_vm1, %v5335_v62  ;;  %v4817_v21 = vor.u32 %v4815_v28, %v4813_v36  ;;  %v4814_v62 = vsel %vm3262_vm9, %v4809_v24, %v4813_v36  ;;  %v6015_v50 = vmul.bf16 %v5982_v58, %v19150_v59  ;;  %v19151_v28 = vld [vmem:[#allocation85_spill] sm:$0xff]  ;;  %v5375_v36 = vrot.slane %v5373_v55, 3 }
 0x1d1   : > { %13099 = vmatprep.mubr.msk.bf16.mxu0 %vm18912_vm1, %v5344_v0  ;;  %v12913_v22 = vpop.f32.mrf.mxu1  ;;  %v5366_v0 = vrot.slane %v5364_v46, 3  ;;  %v5378_v46 = vrot.slane %v5376_v13, 4  ;;  %v4827_v24 = vshll.u32 %v11940_v47, 16  ;;  %v6014_v41 = vmul.bf16 %v5981_v38, %v19049_v23  ;;  %v19152_v16 = vld [vmem:[#allocation89_spill] sm:$0xff]  ;;  %v5985_v13 = vld [vmem:[#allocation2 + $0x28] sm:$0xf] }
 0x1d2   : > { %v4822_v40 = vsel %vm3262_vm9, %v4817_v21, %v4821_v27  ;;  %v2331_v30 = vadd.f32 %v12913_v22, %v19151_v28  ;;  %v6017_v21 = vmul.bf16 %v5984_v39, %v19051_v37  ;;  %v4825_v22 = vor.u32 %v4823_v29, %v4821_v27  ;;  %v19153_v38 = vld [vmem:[#allocation93_spill] sm:$0xff]  ;;  %v19154_v29 = vld [vmem:[#allocation24_spill] sm:$0xff] }
 0x1d3   : > { %v2322_v1 = vpop.f32.mrf.mxu1  ;;  %v5370_v47 = vor.u32 %v5369_v42, %v5366_v0  ;;  %v4829_v11 = vrot.slane %v4827_v24, 1  ;;  %v5379_v39 = vor.u32 %v5378_v46, %v5375_v36  ;;  %v5987_v0 = vld [vmem:[#allocation2 + $0x30] sm:$0xf]  ;;  %v6018_v42 = vmul.bf16 %v5985_v13, %v19154_v29  ;;  %v19156_v46 = vld [vmem:[#allocation30_spill] sm:$0xff] }
 0x1d4   : > { %v2323_v56 = vadd.f32 %v2322_v1, %v19152_v16  ;;  %v12002_v1 = vcombine.low %v15276_v54, %v15298_v14  ;;  %v13723_v16 = vld [vmem:[#allocation2 + $0x24] sm:$0xf] }
 0x1d5   : > { %v12914_v15 = vpop.f32.mrf.mxu1  ;;  %v4830_v27 = vsel %vm3262_vm9, %v4825_v22, %v4829_v11  ;;  %v5380_v11 = vsel %vm2027_vm8, %v5370_v47, %v5379_v39  ;;  %v19158_v22 = vld [vmem:[#allocation112_spill] sm:$0xff] }
 0x1d6   : > { %13068 = vmatmul.mubr.msk.bf16.gmra.mxu1 %vm18912_vm1, %v4814_v62  ;;  %v12949_v26 = vpop.f32.mrf.mxu0  ;;  %v6016_v62 = vmul.bf16 %v5983_v19, %v19050_v12  ;;  %v2334_v28 = vadd.f32 %v12914_v15, %v19153_v38  ;;  %v5382_v19 = vshrl.u32 %v11979_v20, 16  ;;  %v5385_v12 = vshll.u32 %v11979_v20, 16 }
 0x1d7   : > { %13071 = vmatprep.mubr.msk.bf16.mxu1 %vm18912_vm1, %v4822_v40  ;;  %v15697_v58 = vadd.f32 %v12949_v26, %v2331_v30  ;;  %v12040_v40 = vcombine.low %v6014_v41, %v6015_v50  ;;  %v5988_v41 = vld [vmem:[#allocation2 + $0x34] sm:$0xf]  ;;  %v5371_v20 = vsel %vm2027_vm8, %v15672_v9, %v5370_v47  ;;  %v6020_v15 = vmul.bf16 %v5987_v0, %v19156_v46  ;;  %v5992_v0 = vld [vmem:[#allocation2 + $0x44] sm:$0xf] }
 0x1d8   : > { %13100 = vmatmul.mubr.msk.bf16.gmra.mxu0 %vm18912_vm1, %v5353_v48  ;;  %v3537_v55 = vpop.f32.mrf.mxu0  ;;  %v5986_v48 = vld [vmem:[#allocation2 + $0x2c] sm:$0xf]  ;;  %v12041_v26 = vcombine.low %v6016_v62, %v6017_v21  ;;  %v5384_v54 = vrot.slane %v5382_v19, 3  ;;  %v5387_v14 = vrot.slane %v5385_v12, 4  ;;  %v19157_v62 = vld [vmem:[#allocation31_spill] sm:$0xff] }
 0x1d9   : > { %13103 = vmatprep.mubr.msk.bf16.mxu0 %vm18912_vm1, %v5362_v31  ;;  %v15701_v63 = vadd.f32 %v3537_v55, %v2323_v56  ;;  %v19155_v56 = vld [vmem:[#allocation25_spill] sm:$0xff]  ;;  %v6138_v24 = vshll.u32 %v12040_v40, 16  ;;  %v6021_v21 = vmul.bf16 %v5988_v41, %v19157_v62  ;;  %v12003_v55 = vcombine.low %v19158_v22, %v13723_v16  ;;  %v13724_v12 = vld [vmem:[#allocation2 + $0x28] sm:$0xf]  ;;  %v5990_v19 = vld [vmem:[#allocation2 + $0x3c] sm:$0xf] }
 0x1da   : > { %v12950_v30 = vpop.f32.mrf.mxu0  ;;  %v6019_v50 = vmul.bf16 %v5986_v48, %v19155_v56  ;;  %v6143_v36 = vshll.u32 %v12041_v26, 16  ;;  %v5388_v38 = vor.u32 %v5387_v14, %v5384_v54  ;;  %v5989_v48 = vld [vmem:[#allocation2 + $0x38] sm:$0xf]  ;;  %v19161_v22 = vld [vmem:[#allocation114_spill] sm:$0xff] }
 0x1db   : > { %v15705_v31 = vadd.f32 %v12950_v30, %v2334_v28  ;;  %v6140_v13 = vrot.slane %v6138_v24, 1  ;;  %v12004_v28 = vcombine.low %v13724_v12, %v15360_v5  ;;  %v15721_v30 = vcombine.low %v6020_v15, %v6021_v21  ;;  %v19159_v24 = vld [vmem:[#allocation32_spill] sm:$0xff] }
 0x1dc   : > { %v12042_v9 = vcombine.low %v6018_v42, %v6019_v50  ;;  %v6145_v47 = vrot.slane %v6143_v36, 1  ;;  %v6022_v42 = vmul.bf16 %v5989_v48, %v19159_v24  ;;  %v19160_v50 = vld [vmem:[#allocation33_spill] sm:$0xff]  ;;  %v5389_v5 = vsel %vm2027_vm8, %v5379_v39, %v5388_v38  ;;  %v5994_v48 = vld [vmem:[#allocation2 + $0x4c] sm:$0xf] }
 0x1dd   : > { %v6023_v54 = vmul.bf16 %v5990_v19, %v19160_v50  ;;  %v6159_v14 = vshll.u32 %v15721_v30, 16  ;;  %v6025_v15 = vmul.bf16 %v5992_v0, %v19066_v43  ;;  %v6147_v38 = vshrl.u32 %v12041_v26, 16  ;;  %v5996_v43 = vld [vmem:[#allocation2 + $0x54] sm:$0xf] }
 0x1de   : > { %13072 = vmatmul.mubr.msk.bf16.gmra.mxu1 %vm18912_vm1, %v4830_v27  ;;  %v5991_v27 = vld [vmem:[#allocation2 + $0x40] sm:$0xf]  ;;  %v12006_v12 = vcombine.low %v15376_v3, %v15407_v45  ;;  %v6155_v19 = vshrl.u32 %v12042_v9, 16  ;;  %v6027_v3 = vmul.bf16 %v5994_v48, %v19079_v18 }
 0x1df   : > { %13115 = vmatprep.mubr.msk.bf16.mxu1 %vm18912_vm1, %v12002_v1  ;;  %v6136_v1 = vshrl.u32 %v12040_v40, 16  ;;  %v6024_v36 = vmul.bf16 %v5991_v27, %v19065_v32  ;;  %v12044_v39 = vcombine.low %v6022_v42, %v6023_v54  ;;  %v15740_v27 = vpop.f32.mrf.mxu0 }
 0x1e0   : > { %13104 = vmatmul.mubr.msk.bf16.gmra.mxu0 %vm18912_vm1, %v5371_v20  ;;  %v15724_v20 = vpop.f32.mrf.mxu1 }
 0x1e1   : > { %13107 = vmatprep.mubr.msk.bf16.mxu0 %vm18912_vm1, %v5380_v11  ;;  %v6141_v41 = vor.u32 %v6140_v13, %v6136_v1  ;;  %v6151_v11 = vshll.u32 %v12042_v9, 16  ;;  %v6161_v1 = vrot.slane %v6159_v14, 1  ;;  %v15742_v0 = vcombine.low %v6024_v36, %v6025_v15  ;;  %v19163_v14 = vld [vmem:[#allocation96_spill] sm:$0xff] }
 0x1e2   : > { %v6167_v26 = vshll.u32 %v12044_v39, 16 }
 0x1e3   : > { %v6146_v40 = vsel %vm3262_vm9, %v6141_v41, %v6145_v47  ;;  %v6153_v16 = vrot.slane %v6151_v11, 1  ;;  %v6149_v41 = vor.u32 %v6147_v38, %v6145_v47  ;;  %v6029_v38 = vmul.bf16 %v5996_v43, %v19081_v6  ;;  %v5997_v43 = vld [vmem:[#allocation2 + $0x58] sm:$0xf] }
 0x1e4   : > { %v6169_v48 = vrot.slane %v6167_v26, 1  ;;  %v6000_v26 = vld [vmem:[#allocation2 + $0x64] sm:$0xf] }
 0x1e5   : > { %v6154_v9 = vsel %vm3262_vm9, %v6149_v41, %v6153_v16 }
 0x1e6   : > { %13116 = vmatmul.mubr.msk.bf16.vlgmr.msra.gmra.mxu1 %vm18912_vm1, %v12003_v55  ;;  %v12005_v55 = vcombine.low %v19161_v22, %v15386_v44  ;;  %v6157_v44 = vor.u32 %v6155_v19, %v6153_v16  ;;  %v19164_v16 = vld [vmem:[#allocation98_spill] sm:$0xff] }
 0x1e7   : > { %13119 = vmatprep.mubr.msk.bf16.mxu1 %vm18912_vm1, %v12004_v28  ;;  %v5993_v28 = vld [vmem:[#allocation2 + $0x48] sm:$0xf] }
 0x1e8   : > { %13108 = vmatmul.mubr.msk.bf16.gmra.mxu0 %vm18912_vm1, %v5389_v5  ;;  %v12917_v21 = vpop.f32.mrf.mxu1  ;;  %v19162_v5 = vld [vmem:[#allocation95_spill] sm:$0xff]  ;;  %v6026_v45 = vmul.bf16 %v5993_v28, %v19078_v61  ;;  %v6162_v47 = vsel %vm3262_vm9, %v6157_v44, %v6161_v1 }
 0x1e9   : > { %13151 = vmatprep.mubr.msk.bf16.mxu0 %vm18912_vm1, %v6146_v40  ;;  %v2347_v11 = vadd.f32 %v12917_v21, %v19162_v5  ;;  %v5995_v40 = vld [vmem:[#allocation2 + $0x50] sm:$0xf]  ;;  %v6175_v21 = vshll.u32 %v15742_v0, 16 }
 0x1ea   : > { %v2338_v13 = vpop.f32.mrf.mxu1  ;;  %v12046_v41 = vcombine.low %v6026_v45, %v6027_v3  ;;  %v19168_v45 = vld [vmem:[#allocation48_spill] sm:$0xff] }
 0x1eb   : > { %v2339_v36 = vadd.f32 %v2338_v13, %v19163_v14  ;;  %v5998_v14 = vld [vmem:[#allocation2 + $0x5c] sm:$0xf]  ;;  %v6177_v6 = vrot.slane %v6175_v21, 1  ;;  %v6030_v3 = vmul.bf16 %v5997_v43, %v19168_v45 }
 0x1ec   : > { %v12918_v42 = vpop.f32.mrf.mxu1 }
 0x1ed   : > { %v2350_v28 = vadd.f32 %v12918_v42, %v19164_v16 }
 0x1ee   : > { %13120 = vmatmul.mubr.msk.bf16.gmra.mxu1 %vm18912_vm1, %v12005_v55  ;;  %v12953_v54 = vpop.f32.mrf.mxu0  ;;  %v6028_v55 = vmul.bf16 %v5995_v40, %v19080_v4  ;;  %v19167_v40 = vld [vmem:[#allocation63_spill] sm:$0xff] }
 0x1ef   : > { %v15750_v15 = vadd.f32 %v12953_v54, %v2347_v11  ;;  %13123 = vmatprep.mubr.msk.bf16.mxu1 %vm18912_vm1, %v12006_v12  ;;  %v19165_v12 = vld [vmem:[#allocation58_spill] sm:$0xff]  ;;  %v6163_v11 = vshrl.u32 %v15721_v30, 16  ;;  %v19166_v54 = vld [vmem:[#allocation119_spill] sm:$0xff]  ;;  %v19169_v30 = vld [vmem:[#allocation49_spill] sm:$0xff] }
 0x1f0   : > { %13152 = vmatmul.mubr.msk.bf16.vlgmr.msra.gmra.mxu0 %vm18912_vm1, %v6154_v9  ;;  %v3553_v22 = vpop.f32.mrf.mxu0  ;;  %v12007_v19 = vcombine.low %v19165_v12, %v15448_v7  ;;  %v12008_v9 = vcombine.low %v19167_v40, %v19166_v54  ;;  %v12047_v42 = vcombine.low %v6028_v55, %v6029_v38  ;;  %v6183_v7 = vshll.u32 %v12046_v41, 16  ;;  %v19172_v40 = vld [vmem:[#allocation124_spill] sm:$0xff] }
 0x1f1   : > { %13155 = vmatprep.mubr.msk.bf16.mxu0 %vm18912_vm1, %v6162_v47  ;;  %v15760_v13 = vadd.f32 %v3553_v22, %v2339_v36  ;;  %v6171_v47 = vshrl.u32 %v12044_v39, 16  ;;  %v6165_v36 = vor.u32 %v6163_v11, %v6161_v1  ;;  %v5999_v22 = vld [vmem:[#allocation2 + $0x60] sm:$0xf]  ;;  %v6033_v55 = vmul.bf16 %v6000_v26, %v19099_v53  ;;  %v6003_v26 = vld [vmem:[#allocation2 + $0x70] sm:$0xf] }
 0x1f2   : > { %v12954_v5 = vpop.f32.mrf.mxu0  ;;  %v6191_v21 = vshll.u32 %v12047_v42, 16  ;;  %v6032_v1 = vmul.bf16 %v5999_v22, %v19098_v2  ;;  %v6185_v38 = vrot.slane %v6183_v7, 1  ;;  %v6004_v53 = vld [vmem:[#allocation2 + $0x74] sm:$0xf] }
 0x1f3   : > { %v15765_v44 = vadd.f32 %v12954_v5, %v2350_v28  ;;  %v6173_v16 = vor.u32 %v6171_v47, %v6169_v48  ;;  %v6031_v28 = vmul.bf16 %v5998_v14, %v19169_v30  ;;  %v6170_v12 = vsel %vm3262_vm9, %v6165_v36, %v6169_v48  ;;  %v19171_v5 = vld [vmem:[#allocation117_spill] sm:$0xff]  ;;  %v6001_v14 = vld [vmem:[#allocation2 + $0x68] sm:$0xf]  ;;  %v6002_v47 = vld [vmem:[#allocation2 + $0x6c] sm:$0xf] }
 0x1f4   : > { %v6179_v48 = vshrl.u32 %v15742_v0, 16  ;;  %v6187_v36 = vshrl.u32 %v12046_v41, 16  ;;  %v6034_v0 = vmul.bf16 %v6001_v14, %v19104_v17  ;;  %v19175_v14 = vld [vmem:[#allocation127_spill] sm:$0xff]  ;;  %v6008_v17 = vld [vmem:[#allocation2 + $0x84] sm:$0xf] }
 0x1f5   : > { %v6178_v39 = vsel %vm3262_vm9, %v6173_v16, %v6177_v6  ;;  %v12048_v54 = vcombine.low %v6030_v3, %v6031_v28  ;;  %v6193_v16 = vrot.slane %v6191_v21, 1  ;;  %v6035_v28 = vmul.bf16 %v6002_v47, %v19105_v51  ;;  %v19176_v47 = vld [vmem:[#allocation71_spill] sm:$0xff] }
 0x1f6   : > { %13124 = vmatmul.mubr.msk.bf16.gmra.mxu1 %vm18912_vm1, %v12007_v19  ;;  %v19170_v19 = vld [vmem:[#allocation122_spill] sm:$0xff]  ;;  %v6181_v22 = vor.u32 %v6179_v48, %v6177_v6  ;;  %v6189_v7 = vor.u32 %v6187_v36, %v6185_v38  ;;  %v13725_v48 = vld [vmem:[#allocation2 + $0x64] sm:$0xf]  ;;  %v12012_v36 = vcombine.low %v19176_v47, %v19175_v14  ;;  %v19179_v14 = vld [vmem:[#allocation72_spill] sm:$0xff] }
 0x1f7   : > { %13127 = vmatprep.mubr.msk.bf16.mxu1 %vm18912_vm1, %v12008_v9  ;;  %v12009_v11 = vcombine.low %v19171_v5, %v19170_v19  ;;  %v19173_v9 = vld [vmem:[#allocation121_spill] sm:$0xff]  ;;  %v6199_v3 = vshll.u32 %v12048_v54, 16  ;;  %v6203_v51 = vshrl.u32 %v12048_v54, 16 }
 0x1f8   : > { %13156 = vmatmul.mubr.msk.bf16.gmra.mxu0 %vm18912_vm1, %v6170_v12  ;;  %v12010_v43 = vcombine.low %v19173_v9, %v19172_v40  ;;  %v15784_v12 = vcombine.low %v6032_v1, %v6033_v55  ;;  %v6186_v19 = vsel %vm3262_vm9, %v6181_v22, %v6185_v38  ;;  %v6194_v6 = vsel %vm3262_vm9, %v6189_v7, %v6193_v16  ;;  %v19174_v40 = vld [vmem:[#allocation123_spill] sm:$0xff]  ;;  %v6005_v22 = vld [vmem:[#allocation2 + $0x78] sm:$0xf]  ;;  %v6006_v7 = vld [vmem:[#allocation2 + $0x7c] sm:$0xf] }
 0x1f9   : > { %13159 = vmatprep.mubr.msk.bf16.mxu0 %vm18912_vm1, %v6178_v39  ;;  %v15786_v39 = vpop.f32.mrf.mxu1  ;;  %v6036_v1 = vmul.bf16 %v6003_v26, %v19110_v52  ;;  %v6037_v55 = vmul.bf16 %v6004_v53, %v19111_v60  ;;  %v6201_v5 = vrot.slane %v6199_v3, 1  ;;  %v12011_v38 = vcombine.low %v19174_v40, %v13725_v48  ;;  %v6007_v60 = vld [vmem:[#allocation2 + $0x80] sm:$0xf] }
 0x1fa   : > { %v6207_v41 = vshll.u32 %v15784_v12, 16  ;;  %v12050_v9 = vcombine.low %v6034_v0, %v6035_v28  ;;  %v19178_v28 = vld [vmem:[#allocation70_spill] sm:$0xff]  ;;  %v6039_v47 = vmul.bf16 %v6006_v7, %v19179_v14 }
 0x1fb   : > { %v15804_v52 = vcombine.low %v6036_v1, %v6037_v55  ;;  %v6205_v2 = vor.u32 %v6203_v51, %v6201_v5  ;;  %v6038_v40 = vmul.bf16 %v6005_v22, %v19178_v28  ;;  %v19182_v22 = vld [vmem:[#allocation81_spill] sm:$0xff] }
 0x1fc   : > { %v6209_v26 = vrot.slane %v6207_v41, 1  ;;  %v19180_v41 = vld [vmem:[#allocation102_spill] sm:$0xff]  ;;  %v19185_v28 = vld [vmem:[#allocation77_spill] sm:$0xff] }
 0x1fe   : > { %13128 = vmatmul.mubr.msk.bf16.gmra.mxu1 %vm18912_vm1, %v12009_v11  ;;  %v6210_v51 = vsel %vm3262_vm9, %v6205_v2, %v6209_v26  ;;  %v6211_v2 = vshrl.u32 %v15784_v12, 16 }
 0x1ff   : > { %13131 = vmatprep.mubr.msk.bf16.mxu1 %vm18912_vm1, %v12010_v43  ;;  %v12921_v21 = vpop.f32.mrf.mxu1  ;;  %v6195_v43 = vshrl.u32 %v12047_v42, 16  ;;  %v6215_v42 = vshll.u32 %v12050_v9, 16 }
 0x200   : > { %13160 = vmatmul.mubr.msk.bf16.gmra.mxu0 %vm18912_vm1, %v6186_v19  ;;  %v15802_v19 = vpop.f32.mrf.mxu0 }
 0x201   : > { %13163 = vmatprep.mubr.msk.bf16.mxu0 %vm18912_vm1, %v6194_v6  ;;  %v2354_v11 = vpop.f32.mrf.mxu1  ;;  %v6197_v53 = vor.u32 %v6195_v43, %v6193_v16  ;;  %v19177_v6 = vld [vmem:[#allocation100_spill] sm:$0xff] }
 0x202   : > { %v2363_v3 = vadd.f32 %v12921_v21, %v19177_v6  ;;  %v2355_v1 = vadd.f32 %v2354_v11, %v19180_v41  ;;  %v6223_v21 = vshll.u32 %v15804_v52, 16  ;;  %v6041_v6 = vmul.bf16 %v6008_v17, %v19182_v22  ;;  %v6009_v17 = vld [vmem:[#allocation2 + $0x88] sm:$0xf]  ;;  %v6010_v22 = vld [vmem:[#allocation2 + $0x8c] sm:$0xf] }
 0x203   : > { %v12922_v48 = vpop.f32.mrf.mxu1  ;;  %v6202_v54 = vsel %vm3262_vm9, %v6197_v53, %v6201_v5  ;;  %v19183_v5 = vld [vmem:[#allocation103_spill] sm:$0xff]  ;;  %v6217_v53 = vrot.slane %v6215_v42, 1  ;;  %v12052_v41 = vcombine.low %v6038_v40, %v6039_v47  ;;  %v6042_v47 = vmul.bf16 %v6009_v17, %v19137_v35 }
 0x204   : > { %v2366_v7 = vadd.f32 %v12922_v48, %v19183_v5  ;;  %v6225_v45 = vrot.slane %v6223_v21, 1  ;;  %v6012_v42 = vld [vmem:[#allocation2 + $0x94] sm:$0xf]  ;;  %v13627_v5 = vld [vmem:[%s18679_s4 + $0x18] sm:$0xff]  }
 0x205   : > { %v6231_v12 = vshll.u32 %v12052_v41, 16  ;;  %13183 = vmatprep.subr.bf16.mxu1 %v13627_v5 }
 0x206   : > { %v12957_v0 = vpop.f32.mrf.mxu0  ;;  %13132 = vmatmul.mubr.msk.bf16.gmra.mxu1 %vm18912_vm1, %v12011_v38  ;;  %v19181_v38 = vld [vmem:[#allocation80_spill] sm:$0xff] }
 0x207   : > { %v15812_v55 = vadd.f32 %v12957_v0, %v2363_v3  ;;  %13135 = vmatprep.mubr.msk.bf16.mxu1 %vm18912_vm1, %v12012_v36  ;;  %v6040_v43 = vmul.bf16 %v6007_v60, %v19181_v38  ;;  %v13726_v36 = vld [vmem:[#allocation2 + $0x74] sm:$0xf]  ;;  %v19184_v0 = vld [vmem:[#allocation125_spill] sm:$0xff]  ;;  %13184 = vmatpush3.bf16.msra.mxu1 %v13627_v5 }
 0x208   : > { %13164 = vmatmul.mubr.msk.bf16.gmra.mxu0 %vm18912_vm1, %v6202_v54  ;;  %v3569_v16 = vpop.f32.mrf.mxu0  ;;  %v12013_v54 = vcombine.low %v19184_v0, %v13726_v36  ;;  %v19186_v60 = vld [vmem:[#allocation129_spill] sm:$0xff]  ;;  %v19188_v36 = vld [vmem:[#allocation82_spill] sm:$0xff] }
 0x209   : > { %13167 = vmatprep.mubr.msk.bf16.mxu0 %vm18912_vm1, %v6210_v51  ;;  %v15822_v11 = vadd.f32 %v3569_v16, %v2355_v1  ;;  %v12014_v38 = vcombine.low %v19186_v60, %v19185_v28  ;;  %v6219_v51 = vshrl.u32 %v12050_v9, 16  ;;  %v12053_v48 = vcombine.low %v6040_v43, %v6041_v6  ;;  %v6011_v16 = vld [vmem:[#allocation2 + $0x90] sm:$0xf]  ;;  %v19187_v43 = vld [vmem:[#allocation92_spill] sm:$0xff] }
 0x20a   : > { %v12958_v3 = vpop.f32.mrf.mxu0  ;;  %v6213_v1 = vor.u32 %v6211_v2, %v6209_v26  ;;  %v6043_v28 = vmul.bf16 %v6010_v22, %v19138_v10  ;;  %v6044_v21 = vmul.bf16 %v6011_v16, %v19140_v34  ;;  %v6045_v6 = vmul.bf16 %v6012_v42, %v19187_v43  ;;  %v19202_v43 = vld [vmem:[#allocation131_spill] sm:$0xff] }
 0x20b   : > { %v15826_v14 = vadd.f32 %v12958_v3, %v2366_v7  ;;  %v6221_v40 = vor.u32 %v6219_v51, %v6217_v53  ;;  %v6239_v26 = vshll.u32 %v12053_v48, 16  ;;  %v15843_v3 = vpop.f32.mrf.mxu1  ;;  %v6233_v22 = vrot.slane %v6231_v12, 1 }
 0x20c   : > { %v6218_v7 = vsel %vm3262_vm9, %v6213_v1, %v6217_v53  ;;  %v19189_v53 = vld [vmem:[#allocation130_spill] sm:$0xff]  ;;  %v12016_v2 = vcombine.low %v15638_v57, %v15654_v33  ;;  %v6235_v60 = vshrl.u32 %v12052_v41, 16  ;;  %v12055_v1 = vcombine.low %v6044_v21, %v6045_v6  ;;  %v15850_v42 = vpop.f32.mrf.mxu0  ;;  %v19191_v33 = vld [vmem:[#allocation107_spill] sm:$0xff] }
 0x20d   : > { %v6226_v9 = vsel %vm3262_vm9, %v6221_v40, %v6225_v45  ;;  %v12015_v0 = vcombine.low %v19189_v53, %v19188_v36  ;;  %v6241_v17 = vrot.slane %v6239_v26, 1  ;;  %v19190_v40 = vld [vmem:[#allocation106_spill] sm:$0xff]  ;;  %v19192_v53 = vld [vmem:[#allocation108_spill] sm:$0xff] }
 0x20e   : > { %13136 = vmatmul.mubr.msk.bf16.gmra.mxu1 %vm18912_vm1, %v12013_v54  ;;  %v6227_v54 = vshrl.u32 %v15804_v52, 16  ;;  %v6237_v5 = vor.u32 %v6235_v60, %v6233_v22  ;;  %v6255_v21 = vshll.u32 %v12055_v1, 16  ;;  %v6243_v60 = vshrl.u32 %v12053_v48, 16 }
 0x20f   : > { %13139 = vmatprep.mubr.msk.bf16.mxu1 %vm18912_vm1, %v12014_v38  ;;  %v12054_v38 = vcombine.low %v6042_v47, %v6043_v28  ;;  %v6013_v47 = vld [vmem:[#allocation2 + $0x98] sm:$0x1]  ;;  %v6259_v48 = vshrl.u32 %v12055_v1, 16 }
 0x210   : > { %13168 = vmatmul.mubr.msk.bf16.gmra.mxu0 %vm18912_vm1, %v6218_v7  ;;  %v6229_v16 = vor.u32 %v6227_v54, %v6225_v45  ;;  %v6242_v57 = vsel %vm3262_vm9, %v6237_v5, %v6241_v17  ;;  %v6046_v36 = vmul.bf16 %v6013_v47, %v19147_v25 }
 0x211   : > { %13171 = vmatprep.mubr.msk.bf16.mxu0 %vm18912_vm1, %v6226_v9  ;;  %v6247_v9 = vshll.u32 %v12054_v38, 16  ;;  %v6251_v5 = vshrl.u32 %v12054_v38, 16 }
 0x212   : > { %v6234_v52 = vsel %vm3262_vm9, %v6229_v16, %v6233_v22 }
 0x213   : > { %v6249_v54 = vrot.slane %v6247_v9, 1 }
 0x214   : > { %v12925_v51 = vpop.f32.mrf.mxu1 }
 0x215   : > { %v2379_v7 = vadd.f32 %v12925_v51, %v19190_v40  ;;  %v6257_v40 = vrot.slane %v6255_v21, 1 }
 0x216   : > { %v2370_v12 = vpop.f32.mrf.mxu1  ;;  %13140 = vmatmul.mubr.msk.bf16.gmra.mxu1 %vm18912_vm1, %v12015_v0 }
 0x217   : > { %v12961_v28 = vpop.f32.mrf.mxu0  ;;  %13143 = vmatprep.mubr.msk.bf16.mxu1 %vm18912_vm1, %v12016_v2  ;;  %v2371_v45 = vadd.f32 %v2370_v12, %v19191_v33  ;;  %v12017_v2 = vcombine.low %v15644_v49, %v15664_v8  ;;  %v6245_v12 = vor.u32 %v6243_v60, %v6241_v17  ;;  %v6261_v33 = vor.u32 %v6259_v48, %v6257_v40  ;;  %v19193_v17 = vld [vmem:[#allocation110_spill] sm:$0xff] }
 0x218   : > { %13172 = vmatmul.mubr.msk.bf16.gmra.mxu0 %vm18912_vm1, %v6234_v52  ;;  %v12926_v41 = vpop.f32.mrf.mxu1  ;;  %v15859_v26 = vadd.f32 %v12961_v28, %v2379_v7  ;;  %v12056_v52 = vcombine.low %v6046_v36, %v6046_v36  ;;  %v6253_v28 = vor.u32 %v6251_v5, %v6249_v54  ;;  %v19198_v48 = vld [vmem:[#allocation118_spill] sm:$0xff] }
 0x219   : > { %13175 = vmatprep.mubr.msk.bf16.mxu0 %vm18912_vm1, %v6242_v57  ;;  %v3585_v6 = vpop.f32.mrf.mxu0  ;;  %v2382_v22 = vadd.f32 %v12926_v41, %v19192_v53  ;;  %v6250_v57 = vsel %vm3262_vm9, %v6245_v12, %v6249_v54 }
 0x21a   : > { %v15864_v0 = vadd.f32 %v3585_v6, %v2371_v45  ;;  %v15868_v16 = vpop.f32.mrf.mxu1  ;;  %v6258_v49 = vsel %vm3262_vm9, %v6253_v28, %v6257_v40  ;;  %v6263_v38 = vshll.u32 %v12056_v52, 16  ;;  %v19196_v40 = vld [vmem:[#allocation113_spill] sm:$0xff]  ;;  %v19197_v52 = vld [vmem:[#allocation116_spill] sm:$0xff] }
 0x21b   : > { %v12962_v51 = vpop.f32.mrf.mxu0 }
 0x21c   : > { %v15870_v7 = vadd.f32 %v12962_v51, %v2382_v22  ;;  %v6265_v21 = vrot.slane %v6263_v38, 1  ;;  %v19194_v22 = vld [vmem:[#allocation111_spill] sm:$0xff] }
 0x21d   : > { %v15880_v6 = vpop.f32.mrf.mxu0 }
 0x21e   : > { %v12929_v47 = vpop.f32.mrf.mxu1  ;;  %13144 = vmatmul.mubr.msk.bf16.gmra.mxu1 %vm18912_vm1, %v12017_v2  ;;  %v6266_v53 = vsel %vm3262_vm9, %v6261_v33, %v6265_v21  ;;  %v19195_v2 = vld [vmem:[#allocation56_spill] sm:$0xff] }
 0x21f   : > { %v2395_v41 = vadd.f32 %v12929_v47, %v19193_v17 }
 0x220   : > { %13176 = vmatmul.mubr.msk.bf16.gmra.mxu0 %vm18912_vm1, %v6250_v57  ;;  %v2386_v8 = vpop.f32.mrf.mxu1 }
 0x221   : > { %13179 = vmatprep.mubr.msk.bf16.mxu0 %vm18912_vm1, %v6258_v49  ;;  %v2387_v54 = vadd.f32 %v2386_v8, %v19194_v22 }
 0x222   : > { %v12930_v9 = vpop.f32.mrf.mxu1 }
 0x223   : > { %v2398_v12 = vadd.f32 %v12930_v9, %v19196_v40 }
 0x224   : > { %v15877_v45 = vpop.f32.mrf.mxu1 }
 0x226   : > { %v12973_v36 = vpop.f32.mrf.mxu1 }
 0x227   : > { %v4177_v60 = vadd.f32 %v12973_v36, %v19195_v2  ;;  %v19199_v36 = vld [vmem:[#allocation67_spill] sm:$0xff] }
 0x228   : > { %v12965_v1 = vpop.f32.mrf.mxu0  ;;  %13180 = vmatmul.mubr.msk.bf16.gmra.mxu0 %vm18912_vm1, %v6266_v53  ;;  %v4048_v51 = vpop.f32.mrf.mxu1 }
 0x229   : > { %v15886_v5 = vadd.f32 %v12965_v1, %v2395_v41  ;;  %v4175_v28 = vadd.f32 %v4048_v51, %v19197_v52  ;;  %v13628_v41 = vld [vmem:[%s18679_s4 + $0x10] sm:$0xff]   ;;  %v19200_v1 = vld [vmem:[#allocation69_spill] sm:$0xff] }
 0x22a   : > { %v3601_v47 = vpop.f32.mrf.mxu0  ;;  %v12974_v57 = vpop.f32.mrf.mxu1  ;;  %13185 = vmatprep.subr.bf16.mxu1 %v13628_v41 }
 0x22b   : > { %v15890_v49 = vadd.f32 %v3601_v47, %v2387_v54  ;;  %v4178_v38 = vadd.f32 %v12974_v57, %v19198_v48  ;;  %13186 = vmatpush3.bf16.msra.mxu1 %v13628_v41  ;;  %v19201_v47 = vld [vmem:[#allocation105_spill] sm:$0xff] }
 0x22c   : > { %v12966_v33 = vpop.f32.mrf.mxu0  ;;  %v15893_v8 = vpop.f32.mrf.mxu1 }
 0x22d   : > { %v15895_v17 = vadd.f32 %v12966_v33, %v2398_v12 }
 0x22e   : > { %v15900_v21 = vpop.f32.mrf.mxu0  ;;  %v12977_v9 = vpop.f32.mrf.mxu1 }
 0x22f   : > { %v4181_v53 = vadd.f32 %v12977_v9, %v19199_v36 }
 0x230   : > { %v13009_v22 = vpop.f32.mrf.mxu0  ;;  %v4064_v54 = vpop.f32.mrf.mxu1 }
 0x231   : > { %v15903_v2 = vadd.f32 %v13009_v22, %v4177_v60  ;;  %v4179_v51 = vadd.f32 %v4064_v54, %v19200_v1  ;;  %v19204_v54 = vld [vmem:[#allocation79_spill] sm:$0xff] }
 0x232   : > { %v4386_v40 = vpop.f32.mrf.mxu0  ;;  %v12978_v12 = vpop.f32.mrf.mxu1 }
 0x233   : > { %v15906_v52 = vadd.f32 %v4386_v40, %v4175_v28  ;;  %v4182_v57 = vadd.f32 %v12978_v12, %v19201_v47  ;;  %v19206_v12 = vld [vmem:[#allocation132_spill] sm:$0xff] }
 0x234   : > { %v13010_v48 = vpop.f32.mrf.mxu0  ;;  %v15909_v33 = vpop.f32.mrf.mxu1 }
 0x235   : > { %v15911_v25 = vadd.f32 %v13010_v48, %v4178_v38 }
 0x236   : > { %v15913_v9 = vpop.f32.mrf.mxu0  ;;  %v12981_v36 = vpop.f32.mrf.mxu1 }
 0x237   : > { %v4185_v41 = vadd.f32 %v12981_v36, %v19202_v43 }
 0x238   : > { %v13013_v60 = vpop.f32.mrf.mxu0  ;;  %v4080_v22 = vpop.f32.mrf.mxu1 }
 0x239   : > { %v15916_v34 = vadd.f32 %v13013_v60, %v4181_v53  ;;  %v4183_v1 = vadd.f32 %v4080_v22, %v19204_v54 }
 0x23a   : > { %v4402_v28 = vpop.f32.mrf.mxu0  ;;  %v12982_v40 = vpop.f32.mrf.mxu1 }
 0x23b   : > { %19203 = vst [vmem:[#allocation85_spill] sm:$0xff] %v15916_v34  ;;  %v15919_v10 = vadd.f32 %v4402_v28, %v4179_v51  ;;  %v4186_v47 = vadd.f32 %v12982_v40, %v19206_v12 }
 0x23c   : > { %v13014_v35 = vpop.f32.mrf.mxu0  ;;  %v15922_v38 = vpop.f32.mrf.mxu1 }
 0x23d   : > { %19205 = vst [vmem:[#allocation89_spill] sm:$0xff] %v15919_v10  ;;  %v15924_v48 = vadd.f32 %v13014_v35, %v4182_v57 }
 0x23e   : > { %v15926_v30 = vpop.f32.mrf.mxu0  ;;  %v12985_v43 = vpop.f32.mrf.mxu1 }
 0x23f   : > { %19207 = vst [vmem:[#allocation93_spill] sm:$0xff] %v15924_v48  ;;  %v4189_v36 = vadd.f32 %v12985_v43, %v15697_v58 }
 0x240   : > { %v13017_v53 = vpop.f32.mrf.mxu0  ;;  %v4096_v60 = vpop.f32.mrf.mxu1 }
 0x241   : > { %v15929_v4 = vadd.f32 %v13017_v53, %v4185_v41  ;;  %v4187_v22 = vadd.f32 %v4096_v60, %v15701_v63 }
 0x242   : > { %v4418_v51 = vpop.f32.mrf.mxu0  ;;  %v12986_v54 = vpop.f32.mrf.mxu1 }
 0x243   : > { %19208 = vst [vmem:[#allocation112_spill] sm:$0xff] %v15929_v4  ;;  %v15932_v28 = vadd.f32 %v4418_v51, %v4183_v1  ;;  %v4190_v40 = vadd.f32 %v12986_v54, %v15705_v31 }
 0x244   : > { %v13018_v12 = vpop.f32.mrf.mxu0  ;;  %v15935_v35 = vpop.f32.mrf.mxu1 }
 0x245   : > { %19209 = vst [vmem:[#allocation114_spill] sm:$0xff] %v15932_v28  ;;  %v15937_v57 = vadd.f32 %v13018_v12, %v4186_v47 }
 0x246   : > { %v15939_v18 = vpop.f32.mrf.mxu0  ;;  %v12989_v58 = vpop.f32.mrf.mxu1 }
 0x247   : > { %19210 = vst [vmem:[#allocation95_spill] sm:$0xff] %v15937_v57  ;;  %v4193_v43 = vadd.f32 %v12989_v58, %v15750_v15 }
 0x248   : > { %v13021_v41 = vpop.f32.mrf.mxu0  ;;  %v4112_v53 = vpop.f32.mrf.mxu1 }
 0x249   : > { %v15942_v61 = vadd.f32 %v13021_v41, %v4189_v36  ;;  %v4191_v63 = vadd.f32 %v4112_v53, %v15760_v13 }
 0x24a   : > { %v4434_v1 = vpop.f32.mrf.mxu0  ;;  %v12990_v60 = vpop.f32.mrf.mxu1 }
 0x24b   : > { %19211 = vst [vmem:[#allocation96_spill] sm:$0xff] %v15942_v61  ;;  %v15945_v51 = vadd.f32 %v4434_v1, %v4187_v22  ;;  %v4194_v31 = vadd.f32 %v12990_v60, %v15765_v44 }
 0x24c   : > { %v13022_v54 = vpop.f32.mrf.mxu0  ;;  %v15948_v47 = vpop.f32.mrf.mxu1 }
 0x24d   : > { %19212 = vst [vmem:[#allocation98_spill] sm:$0xff] %v15945_v51  ;;  %v15950_v12 = vadd.f32 %v13022_v54, %v4190_v40 }
 0x24e   : > { %v15952_v32 = vpop.f32.mrf.mxu0  ;;  %v12993_v15 = vpop.f32.mrf.mxu1 }
 0x24f   : > { %19213 = vst [vmem:[#allocation58_spill] sm:$0xff] %v15950_v12  ;;  %v4197_v58 = vadd.f32 %v12993_v15, %v15812_v55 }
 0x250   : > { %v13025_v36 = vpop.f32.mrf.mxu0  ;;  %v4128_v41 = vpop.f32.mrf.mxu1 }
 0x251   : > { %v15955_v50 = vadd.f32 %v13025_v36, %v4193_v43  ;;  %v4195_v13 = vadd.f32 %v4128_v41, %v15822_v11  ;;  %v13629_v11 = vld [vmem:[%s18679_s4 + $0x8] sm:$0xff]  }
 0x252   : > { %v4450_v22 = vpop.f32.mrf.mxu0  ;;  %v12994_v53 = vpop.f32.mrf.mxu1  ;;  %v15973_v41 = vld [vmem:[#allocation3 + $0xc] sm:$0xf]  ;;  %13219 = vmatprep.subr.bf16.mxu0 %v13629_v11 }
 0x253   : > { %v15958_v1 = vadd.f32 %v4450_v22, %v4191_v63  ;;  %v4198_v44 = vadd.f32 %v12994_v53, %v15826_v14  ;;  %v15971_v63 = vld [vmem:[#allocation3 + $0x8] sm:$0xf]  ;;  %13220 = vmatpush3.bf16.msra.mxu0 %v13629_v11 }
 0x254   : > { %v13026_v60 = vpop.f32.mrf.mxu0  ;;  %v15961_v40 = vpop.f32.mrf.mxu1  ;;  %v12113_v22 = vcombine.low %v15971_v63, %v15973_v41 }
 0x255   : > { %v15963_v54 = vadd.f32 %v13026_v60, %v4194_v31 }
 0x256   : > { %v15965_v24 = vpop.f32.mrf.mxu0  ;;  %v12997_v55 = vpop.f32.mrf.mxu1  ;;  %13187 = vmatprep.mubr.msk.bf16.mxu1 %vm18912_vm1, %v12113_v22 }
 0x257   : > { %v4201_v15 = vadd.f32 %v12997_v55, %v15859_v26  ;;  %v15983_v26 = vld [vmem:[%s18679_s4 + $0x28] sm:$0xff]  }
 0x258   : > { %v13029_v43 = vpop.f32.mrf.mxu0  ;;  %v4144_v36 = vpop.f32.mrf.mxu1  ;;  %19214 = vst [vmem:[#allocation119_spill] sm:$0xff] %v15983_v26  ;;  %13255 = vmatprep.subr.bf16.mxu1 %v15983_v26 }
 0x259   : > { %v15975_v14 = vadd.f32 %v13029_v43, %v4197_v58  ;;  %v4199_v31 = vadd.f32 %v4144_v36, %v15864_v0 }
 0x25a   : > { %v4466_v53 = vpop.f32.mrf.mxu0  ;;  %v12998_v60 = vpop.f32.mrf.mxu1 }
 0x25b   : > { %v15985_v55 = vadd.f32 %v4466_v53, %v4195_v13  ;;  %v4202_v62 = vadd.f32 %v12998_v60, %v15870_v7 }
 0x25c   : > { %v13030_v58 = vpop.f32.mrf.mxu0  ;;  %v15989_v0 = vpop.f32.mrf.mxu1 }
 0x25d   : > { %v15992_v43 = vadd.f32 %v13030_v58, %v4198_v44 }
 0x25e   : > { %v15994_v36 = vpop.f32.mrf.mxu0  ;;  %v13001_v46 = vpop.f32.mrf.mxu1 }
 0x25f   : > { %v4205_v56 = vadd.f32 %v13001_v46, %v15886_v5  ;;  %v13634_v46 = vld [vmem:[%s18679_s4] sm:$0xff]  }
 0x260   : > { %v13033_v29 = vpop.f32.mrf.mxu0  ;;  %v4160_v13 = vpop.f32.mrf.mxu1  ;;  %13221 = vmatprep.subr.bf16.mxu0 %v13634_v46 }
 0x261   : > { %v15997_v53 = vadd.f32 %v13033_v29, %v4201_v15  ;;  %v4203_v7 = vadd.f32 %v4160_v13, %v15890_v49  ;;  %13222 = vmatpush3.bf16.msra.mxu0 %v13634_v46 }
 0x262   : > { %v4482_v11 = vpop.f32.mrf.mxu0  ;;  %v13002_v22 = vpop.f32.mrf.mxu1 }
 0x263   : > { %v16000_v60 = vadd.f32 %v4482_v11, %v4199_v31  ;;  %v4206_v37 = vadd.f32 %v13002_v22, %v15895_v17 }
 0x264   : > { %v13034_v26 = vpop.f32.mrf.mxu0  ;;  %v16003_v44 = vpop.f32.mrf.mxu1 }
 0x265   : > { %v16005_v58 = vadd.f32 %v13034_v26, %v4202_v62 }
 0x266   : > { %v16010_v5 = vpop.f32.mrf.mxu0  ;;  %v16012_v29 = vpop.f32.mrf.mxu1 }
 0x268   : > { %v13037_v49 = vpop.f32.mrf.mxu0  ;;  %v16014_v15 = vpop.f32.mrf.mxu1 }
 0x269   : > { %v16016_v31 = vadd.f32 %v13037_v49, %v4205_v56 }
 0x26a   : > { %v4498_v17 = vpop.f32.mrf.mxu0  ;;  %v16018_v13 = vpop.f32.mrf.mxu1 }
 0x26b   : > { %v16020_v62 = vadd.f32 %v4498_v17, %v4203_v7 }
 0x26c   : > { %v13038_v26 = vpop.f32.mrf.mxu0  ;;  %v16022_v11 = vpop.f32.mrf.mxu1 }
 0x26d   : > { %v16024_v22 = vadd.f32 %v13038_v26, %v4206_v37 }
 0x26e   : > { %v16026_v12 = vpop.f32.mrf.mxu0  ;;  %v16028_v51 = vpop.f32.mrf.mxu1 }
 0x26f   : > { %19215 = vst [vmem:[#allocation63_spill] sm:$0xff] %v16026_v12  ;;  %19216 = vst [vmem:[#allocation122_spill] sm:$0xff] %v16028_v51 }
 0x270   : > { %v16030_v61 = vpop.f32.mrf.mxu0  ;;  %v16032_v57 = vpop.f32.mrf.mxu1 }
 0x271   : > { %19217 = vst [vmem:[#allocation117_spill] sm:$0xff] %v16030_v61  ;;  %19218 = vst [vmem:[#allocation124_spill] sm:$0xff] %v16032_v57 }
 0x272   : > { %v16034_v56 = vpop.f32.mrf.mxu0  ;;  %v16036_v46 = vpop.f32.mrf.mxu1 }
 0x273   : > { %19219 = vst [vmem:[#allocation121_spill] sm:$0xff] %v16034_v56  ;;  %19220 = vst [vmem:[#allocation123_spill] sm:$0xff] %v16036_v46 }
 0x274   : > { %v16038_v49 = vpop.f32.mrf.mxu0  ;;  %v16040_v7 = vpop.f32.mrf.mxu1 }
 0x275   : > { %19221 = vst [vmem:[#allocation127_spill] sm:$0xff] %v16038_v49  ;;  %19222 = vst [vmem:[#allocation71_spill] sm:$0xff] %v16040_v7 }
 0x276   : > { %v16042_v17 = vpop.f32.mrf.mxu0  ;;  %v16044_v37 = vpop.f32.mrf.mxu1 }
 0x277   : > { %19223 = vst [vmem:[#allocation100_spill] sm:$0xff] %v16042_v17  ;;  %19224 = vst [vmem:[#allocation102_spill] sm:$0xff] %v16044_v37 }
 0x278   : > { %v16046_v26 = vpop.f32.mrf.mxu0  ;;  %v16048_v28 = vpop.f32.mrf.mxu1 }
 0x279   : > { %19225 = vst [vmem:[#allocation103_spill] sm:$0xff] %v16046_v26  ;;  %19226 = vst [vmem:[#allocation125_spill] sm:$0xff] %v16048_v28 }
 0x27a   : > { %v16050_v4 = vpop.f32.mrf.mxu0  ;;  %v16052_v48 = vpop.f32.mrf.mxu1 }
 0x27b   : > { %19227 = vst [vmem:[#allocation77_spill] sm:$0xff] %v16050_v4  ;;  %19228 = vst [vmem:[#allocation129_spill] sm:$0xff] %v16052_v48 }
 0x27c   : > { %v16054_v61 = vpop.f32.mrf.mxu0  ;;  %v16056_v56 = vpop.f32.mrf.mxu1 }
 0x27d   : > { %19229 = vst [vmem:[#allocation82_spill] sm:$0xff] %v16054_v61  ;;  %19230 = vst [vmem:[#allocation130_spill] sm:$0xff] %v16056_v56 }
 0x27e   : > { %v16058_v46 = vpop.f32.mrf.mxu0  ;;  %v16060_v49 = vpop.f32.mrf.mxu1 }
 0x27f   : > { %19231 = vst [vmem:[#allocation106_spill] sm:$0xff] %v16058_v46  ;;  %19232 = vst [vmem:[#allocation107_spill] sm:$0xff] %v16060_v49 }
 0x280   : > { %v16062_v7 = vpop.f32.mrf.mxu0  ;;  %v16064_v17 = vpop.f32.mrf.mxu1 }
 0x281   : > { %19233 = vst [vmem:[#allocation108_spill] sm:$0xff] %v16062_v7  ;;  %19234 = vst [vmem:[#allocation110_spill] sm:$0xff] %v16064_v17 }
 0x282   : > { %v16066_v37 = vpop.f32.mrf.mxu0  ;;  %v16068_v26 = vpop.f32.mrf.mxu1 }
 0x283   : > { %19235 = vst [vmem:[#allocation111_spill] sm:$0xff] %v16066_v37  ;;  %19236 = vst [vmem:[#allocation56_spill] sm:$0xff] %v16068_v26 }
 0x284   : > { %v16070_v28 = vpop.f32.mrf.mxu0  ;;  %v16072_v4 = vpop.f32.mrf.mxu1 }
 0x285   : > { %19237 = vst [vmem:[#allocation113_spill] sm:$0xff] %v16070_v28  ;;  %19238 = vst [vmem:[#allocation116_spill] sm:$0xff] %v16072_v4 }
 0x286   : > { %v16074_v48 = vpop.f32.mrf.mxu0  ;;  %v13061_v61 = vpop.f32.mrf.mxu1 }
 0x287   : > { %19239 = vst [vmem:[#allocation118_spill] sm:$0xff] %v16074_v48  ;;  %v5070_v56 = vadd.f32 %v13061_v61, %v15955_v50 }
 0x288   : > { %v16077_v46 = vpop.f32.mrf.mxu0  ;;  %v4989_v49 = vpop.f32.mrf.mxu1 }
 0x289   : > { %19240 = vst [vmem:[#allocation67_spill] sm:$0xff] %v16077_v46  ;;  %v5068_v7 = vadd.f32 %v4989_v49, %v15958_v1 }
 0x28a   : > { %v16080_v12 = vpop.f32.mrf.mxu0  ;;  %v13062_v17 = vpop.f32.mrf.mxu1 }
 0x28b   : > { %19241 = vst [vmem:[#allocation69_spill] sm:$0xff] %v16080_v12  ;;  %v5071_v37 = vadd.f32 %v13062_v17, %v15963_v54 }
 0x28c   : > { %v16083_v26 = vpop.f32.mrf.mxu0  ;;  %v16085_v28 = vpop.f32.mrf.mxu1 }
 0x28d   : > { %19242 = vst [vmem:[#allocation105_spill] sm:$0xff] %v16083_v26  ;;  %19243 = vst [vmem:[#allocation131_spill] sm:$0xff] %v16085_v28 }
 0x28e   : > { %v16087_v4 = vpop.f32.mrf.mxu0  ;;  %v13065_v48 = vpop.f32.mrf.mxu1 }
 0x28f   : > { %19244 = vst [vmem:[#allocation79_spill] sm:$0xff] %v16087_v4  ;;  %v5074_v57 = vadd.f32 %v13065_v48, %v15975_v14  ;;  %v6863_v4 = vld [vmem:[#allocation3 + $0x4] sm:$0x8]  ;;  %v19250_v14 = vld [vmem:[#allocation15_spill] sm:$0xff] }
 0x290   : > { %v13097_v61 = vpop.f32.mrf.mxu0  ;;  %v5005_v50 = vpop.f32.mrf.mxu1 }
 0x291   : > { %v16090_v46 = vadd.f32 %v13097_v61, %v5070_v56  ;;  %v5072_v1 = vadd.f32 %v5005_v50, %v15985_v55  ;;  %v6897_v56 = vmul.bf16 %v15971_v63, %v19250_v14  ;;  %v7696_v61 = vld [vmem:[#allocation3 + $0xc] sm:$0xf]  ;;  %v19255_v14 = vld [vmem:[#allocation120_spill] sm:$0xff] }
 0x292   : > { %v5548_v49 = vpop.f32.mrf.mxu0  ;;  %v13066_v12 = vpop.f32.mrf.mxu1 }
 0x293   : > { %19245 = vst [vmem:[#allocation132_spill] sm:$0xff] %v16090_v46  ;;  %v16093_v10 = vadd.f32 %v5548_v49, %v5068_v7  ;;  %v5075_v54 = vadd.f32 %v13066_v12, %v15992_v43  ;;  %v19251_v49 = vld [vmem:[#allocation14_spill] sm:$0xff] }
 0x294   : > { %v13098_v17 = vpop.f32.mrf.mxu0  ;;  %v16096_v26 = vpop.f32.mrf.mxu1  ;;  %v7695_v12 = vld [vmem:[#allocation3 + $0x8] sm:$0xf] }
 0x295   : > { %19246 = vst [vmem:[#allocation135_spill] sm:$0xff] %v16093_v10  ;;  %19247 = vst [vmem:[#allocation136_spill] sm:$0xff] %v16096_v26  ;;  %v16098_v28 = vadd.f32 %v13098_v17, %v5071_v37  ;;  %v6896_v10 = vmul.bf16 %v6863_v4, %v19251_v49  ;;  %v7729_v17 = vmul.bf16 %v7696_v61, %v19150_v59  ;;  %v19259_v61 = vld [vmem:[#allocation133_spill] sm:$0xff] }
 0x296   : > { %v16100_v51 = vpop.f32.mrf.mxu0  ;;  %v13069_v48 = vpop.f32.mrf.mxu1 }
 0x297   : > { %19248 = vst [vmem:[#allocation137_spill] sm:$0xff] %v16098_v28  ;;  %19249 = vst [vmem:[#allocation138_spill] sm:$0xff] %v16100_v51  ;;  %v5078_v55 = vadd.f32 %v13069_v48, %v15997_v53  ;;  %v12147_v51 = vcombine.low %v6896_v10, %v6897_v56  ;;  %v7728_v53 = vmul.bf16 %v7695_v12, %v19049_v23  ;;  %v19254_v48 = vld [vmem:[#allocation64_spill] sm:$0xff]  ;;  %v19262_v23 = vld [vmem:[#allocation101_spill] sm:$0xff] }
 0x298   : > { %v13101_v50 = vpop.f32.mrf.mxu0  ;;  %v5021_v7 = vpop.f32.mrf.mxu1  ;;  %v2278_v34 = vadd.f32 %v19255_v14, %v19254_v48 }
 0x299   : > { %v16106_v43 = vadd.f32 %v13101_v50, %v5074_v57  ;;  %v5076_v37 = vadd.f32 %v5021_v7, %v16000_v60  ;;  %v19256_v57 = vld [vmem:[#allocation73_spill] sm:$0xff]  ;;  %v19257_v50 = vld [vmem:[#allocation126_spill] sm:$0xff]  ;;  %v19258_v7 = vld [vmem:[#allocation83_spill] sm:$0xff]  ;;  %v16124_v10 = vcombine.low %v7728_v53, %v7729_v17  ;;  %v7323_v12 = vshrl.u32 %v12147_v51, 16 }
 0x29a   : > { %v5564_v28 = vpop.f32.mrf.mxu0  ;;  %v13070_v46 = vpop.f32.mrf.mxu1  ;;  %v2294_v60 = vadd.f32 %v19257_v50, %v19256_v57  ;;  %v2310_v59 = vadd.f32 %v19259_v61, %v19258_v7  ;;  %v7326_v48 = vshll.u32 %v12147_v51, 16  ;;  %v3617_v57 = vadd.f32 %v19262_v23, %v2278_v34  ;;  %v19263_v50 = vld [vmem:[#allocation128_spill] sm:$0xff]  ;;  %v19264_v17 = vld [vmem:[#allocation134_spill] sm:$0xff]  ;;  %v19266_v51 = vld [vmem:[#allocation115_spill] sm:$0xff] }
 0x29b   : > { %19252 = vst [vmem:[#allocation139_spill] sm:$0xff] %v16106_v43  ;;  %v16110_v26 = vadd.f32 %v5564_v28, %v5072_v1  ;;  %v5079_v63 = vadd.f32 %v13070_v46, %v16005_v58  ;;  %v19260_v28 = vld [vmem:[#allocation94_spill] sm:$0xff]  ;;  %v19261_v46 = vld [vmem:[#allocation99_spill] sm:$0xff]  ;;  %v19265_v61 = vld [vmem:[#allocation16_spill] sm:$0xff]  ;;  %v2390_v23 = vadd.f32 %v15877_v45, %v19266_v51 }
 0x29c   : > { %v13102_v4 = vpop.f32.mrf.mxu0  ;;  %v16116_v49 = vpop.f32.mrf.mxu1  ;;  %v2326_v58 = vadd.f32 %v15724_v20, %v19260_v28  ;;  %v2342_v1 = vadd.f32 %v15786_v39, %v19261_v46  ;;  %v3625_v53 = vadd.f32 %v19264_v17, %v2310_v59  ;;  %v6898_v28 = vmul.bf16 %v15973_v41, %v19265_v61  ;;  %v19267_v46 = vld [vmem:[#allocation104_spill] sm:$0xff] }
 0x29d   : > { %19253 = vst [vmem:[#allocation140_spill] sm:$0xff] %v16110_v26  ;;  %v16122_v43 = vadd.f32 %v13102_v4, %v5075_v54  ;;  %v3621_v26 = vadd.f32 %v19263_v50, %v2294_v60  ;;  %v7852_v60 = vshll.u32 %v16124_v10, 16  ;;  %v2358_v59 = vadd.f32 %v15843_v3, %v19267_v46  ;;  %v19273_v46 = vld [vmem:[#allocation124_spill] sm:$0xff] }
 0x29e   : > { %v16130_v14 = vpop.f32.mrf.mxu0  ;;  %v13073_v56 = vpop.f32.mrf.mxu1  ;;  %v3629_v20 = vadd.f32 %v15740_v27, %v2326_v58  ;;  %v3633_v4 = vadd.f32 %v15802_v19, %v2342_v1  ;;  %v19268_v27 = vld [vmem:[#allocation109_spill] sm:$0xff]  ;;  %v16154_v50 = vrot.slane %v7326_v48, 4  ;;  %v4176_v45 = vadd.f32 %v15893_v8, %v3617_v57 }
 0x29f   : > { %v5082_v54 = vadd.f32 %v13073_v56, %v16016_v31  ;;  %v2374_v19 = vadd.f32 %v15868_v16, %v19268_v27  ;;  %v16152_v56 = vrot.slane %v7323_v12, 3  ;;  %v4180_v16 = vadd.f32 %v15909_v33, %v3621_v26 }
 0x2a0   : > { %v13105_v39 = vpop.f32.mrf.mxu0  ;;  %v5037_v7 = vpop.f32.mrf.mxu1  ;;  %v3645_v8 = vadd.f32 %v15900_v21, %v2390_v23  ;;  %v16178_v26 = vrot.slane %v7852_v60, 1  ;;  %v4514_v21 = vadd.f32 %v15913_v9, %v4176_v45  ;;  %v16196_v9 = vld [vmem:[%s18679_s4 + $0x38] sm:$0xff]   ;;  %v19272_v60 = vld [vmem:[#allocation89_spill] sm:$0xff] }
 0x2a1   : > { %v16144_v34 = vadd.f32 %v13105_v39, %v5078_v55  ;;  %v5080_v31 = vadd.f32 %v5037_v7, %v16020_v62  ;;  %v3637_v39 = vadd.f32 %v15850_v42, %v2358_v59  ;;  %v3641_v3 = vadd.f32 %v15880_v6, %v2374_v19  ;;  %13291 = vmatprep.subr.bf16.mxu0 %v16196_v9 }
 0x2a2   : > { %v5580_v58 = vpop.f32.mrf.mxu0  ;;  %v13074_v1 = vpop.f32.mrf.mxu1  ;;  %v4184_v7 = vadd.f32 %v15922_v38, %v3625_v53  ;;  %v7329_v38 = vor.u32 %v16154_v50, %v16152_v56  ;;  %v5052_v53 = vadd.f32 %v16014_v15, %v15906_v52  ;;  %v19271_v15 = vld [vmem:[#allocation122_spill] sm:$0xff]  ;;  %v5056_v59 = vadd.f32 %v19273_v46, %v19272_v60  ;;  %v19286_v60 = vld [vmem:[#allocation103_spill] sm:$0xff] }
 0x2a3   : > { %v16157_v55 = vadd.f32 %v5580_v58, %v5076_v37  ;;  %v5083_v62 = vadd.f32 %v13074_v1, %v16024_v22  ;;  %v4188_v37 = vadd.f32 %v15935_v35, %v3629_v20  ;;  %v4192_v22 = vadd.f32 %v15948_v47, %v3633_v4  ;;  %v19275_v58 = vld [vmem:[#allocation117_spill] sm:$0xff]  ;;  %v19277_v1 = vld [vmem:[#allocation123_spill] sm:$0xff] }
 0x2a4   : > { %v13106_v12 = vpop.f32.mrf.mxu0  ;;  %v16165_v48 = vpop.f32.mrf.mxu1  ;;  %v4196_v42 = vadd.f32 %v15961_v40, %v3637_v39  ;;  %v4200_v6 = vadd.f32 %v15989_v0, %v3641_v3  ;;  %v4204_v35 = vadd.f32 %v16003_v44, %v3645_v8  ;;  %v5054_v47 = vadd.f32 %v16012_v29, %v15903_v2  ;;  %v19279_v3 = vld [vmem:[#allocation127_spill] sm:$0xff]  ;;  %v19281_v8 = vld [vmem:[#allocation112_spill] sm:$0xff] }
 0x2a5   : > { %v16170_v57 = vadd.f32 %v13106_v12, %v5079_v63  ;;  %v16185_v63 = vstv %s16135_s23  ;;  %v4518_v40 = vadd.f32 %v15926_v30, %v4180_v16  ;;  %v4522_v0 = vadd.f32 %v15939_v18, %v4184_v7  ;;  %v19280_v7 = vld [vmem:[#allocation71_spill] sm:$0xff]  ;;  %s18581_s23 = scalar_lea.hbm %s18691_s16, %s12527_s29 }
 0x2a6   : > { %v16174_v51 = vpop.f32.mrf.mxu0  ;;  %v13117_v33 = vpop.f32.mrf.mxu1  ;;  %19269 = vst [vmem:[#allocation64_spill] sm:$0xff] %v16185_v63  ;;  %v5055_v20 = vadd.f32 %v16018_v13, %v15911_v25  ;;  %v4526_v2 = vadd.f32 %v15952_v32, %v4188_v37  ;;  %v4530_v44 = vadd.f32 %v15965_v24, %v4192_v22  ;;  %v5053_v30 = vadd.f32 %v16022_v11, %v4514_v21  ;;  %v19270_v25 = vld [vmem:[#allocation85_spill] sm:$0xff]  ;;  %v19274_v32 = vld [vmem:[#allocation63_spill] sm:$0xff]  ;;  %v19282_v37 = vld [vmem:[#allocation102_spill] sm:$0xff] }
 0x2a7   : > { %v4534_v52 = vadd.f32 %v15994_v36, %v4196_v42  ;;  %v4538_v29 = vadd.f32 %v16010_v5, %v4200_v6  ;;  %v5058_v13 = vadd.f32 %v19271_v15, %v19270_v25  ;;  %v4542_v24 = vadd.f32 %v19274_v32, %v4204_v35  ;;  %v19278_v5 = vld [vmem:[#allocation121_spill] sm:$0xff]  ;;  %v19283_v21 = vld [vmem:[#allocation100_spill] sm:$0xff] }
 0x2a8   : > { %v13109_v4 = vpop.f32.mrf.mxu0  ;;  %v5822_v23 = vpop.f32.mrf.mxu1  ;;  %v5613_v11 = vadd.f32 %v19275_v58, %v5054_v47  ;;  %v5611_v39 = vadd.f32 %v19278_v5, %v5052_v53  ;;  %v5614_v16 = vadd.f32 %v19279_v3, %v5055_v20  ;;  %v5057_v12 = vadd.f32 %v19280_v7, %v4518_v40  ;;  %v19285_v47 = vld [vmem:[#allocation125_spill] sm:$0xff]  ;;  %v19288_v20 = vld [vmem:[#allocation95_spill] sm:$0xff]  ;;  %v19290_v58 = vld [vmem:[#allocation130_spill] sm:$0xff] }
 0x2a9   : > { %v16201_v18 = vadd.f32 %v13109_v4, %v5082_v54  ;;  %v19276_v54 = vld [vmem:[#allocation93_spill] sm:$0xff]  ;;  %v5062_v22 = vadd.f32 %v19282_v37, %v19281_v8  ;;  %v5612_v35 = vadd.f32 %v19283_v21, %v5053_v30  ;;  %v19284_v4 = vld [vmem:[#allocation114_spill] sm:$0xff]  ;;  %v5617_v46 = vadd.f32 %v19286_v60, %v5058_v13  ;;  %v19292_v30 = vld [vmem:[#allocation96_spill] sm:$0xff] }
 0x2aa   : > { %v5596_v27 = vpop.f32.mrf.mxu0  ;;  %v13118_v19 = vpop.f32.mrf.mxu1  ;;  %v5059_v45 = vadd.f32 %v19277_v1, %v19276_v54  ;;  %v5060_v25 = vadd.f32 %v19285_v47, %v19284_v4  ;;  %v19287_v53 = vld [vmem:[#allocation77_spill] sm:$0xff]  ;;  %v5061_v54 = vadd.f32 %v19290_v58, %v4522_v0  ;;  %v19291_v3 = vld [vmem:[#allocation82_spill] sm:$0xff]  ;;  %v19293_v8 = vld [vmem:[#allocation107_spill] sm:$0xff] }
 0x2ab   : > { %v16214_v36 = vadd.f32 %v5596_v27, %v5080_v31  ;;  %v5951_v31 = vadd.f32 %v13117_v33, %v5613_v11  ;;  %v5615_v27 = vadd.f32 %v19287_v53, %v5056_v59  ;;  %v19289_v32 = vld [vmem:[#allocation129_spill] sm:$0xff]  ;;  %v5066_v37 = vadd.f32 %v19293_v8, %v19292_v30  ;;  %v19294_v21 = vld [vmem:[#allocation98_spill] sm:$0xff]  ;;  %v19297_v4 = vld [vmem:[#allocation108_spill] sm:$0xff] }
 0x2ac   : > { %v13110_v42 = vpop.f32.mrf.mxu0  ;;  %v5825_v6 = vpop.f32.mrf.mxu1  ;;  %v5063_v40 = vadd.f32 %v19289_v32, %v19288_v20  ;;  %v5618_v7 = vadd.f32 %v19291_v3, %v5059_v45  ;;  %v5949_v33 = vadd.f32 %v5822_v23, %v5611_v39  ;;  %v19296_v11 = vld [vmem:[#allocation106_spill] sm:$0xff]  ;;  %v5621_v59 = vadd.f32 %v19297_v4, %v5062_v22  ;;  %v19299_v60 = vld [vmem:[#allocation56_spill] sm:$0xff]  ;;  %v16244_v45 = vld [vmem:[%s18681_s6] ss:$0 sm:$0xff] }
 0x2ad   : > { %v16224_v15 = vadd.f32 %v13110_v42, %v5083_v62  ;;  %v19295_v62 = vld [vmem:[#allocation110_spill] sm:$0xff]  ;;  %v5616_v13 = vadd.f32 %v19296_v11, %v5057_v12  ;;  %v19300_v20 = vld [vmem:[#allocation116_spill] sm:$0xff]  ;;  %v19301_v3 = vld [vmem:[#allocation111_spill] sm:$0xff]  ;;  %v5952_v12 = vadd.f32 %v13118_v19, %v5614_v16 }
 0x2ae   : > { %v5599_v1 = vpop.f32.mrf.mxu0  ;;  %v13121_v5 = vpop.f32.mrf.mxu1  ;;  %v5064_v42 = vadd.f32 %v19295_v62, %v19294_v21  ;;  %v19298_v47 = vld [vmem:[#allocation58_spill] sm:$0xff]  ;;  %v5065_v0 = vadd.f32 %v19300_v20, %v4526_v2  ;;  %v5619_v30 = vadd.f32 %v19301_v3, %v5060_v25  ;;  %v19302_v8 = vld [vmem:[#allocation131_spill] sm:$0xff]  ;;  %v19303_v21 = vld [vmem:[#allocation113_spill] sm:$0xff] }
 0x2af   : > { %v5067_v53 = vadd.f32 %v19299_v60, %v19298_v47  ;;  %v5069_v23 = vadd.f32 %v19302_v8, %v4530_v44  ;;  %v5622_v22 = vadd.f32 %v19303_v21, %v5063_v40  ;;  %v19304_v62 = vld [vmem:[#allocation118_spill] sm:$0xff]  ;;  %v19305_v4 = vld [vmem:[#allocation136_spill] sm:$0xff]  ;;  %v5077_v47 = vadd.f32 %v16116_v49, %v4538_v29  ;;  %v16257_v60 = vld [vmem:[%s18682_s7] ss:$0 sm:$0xff] }
 0x2b0   : > { %v13153_v32 = vpop.f32.mrf.mxu0  ;;  %v5838_v58 = vpop.f32.mrf.mxu1  ;;  %v16250_v11 = vadd.f32 %v19304_v62, %v5061_v54  ;;  %v5073_v2 = vadd.f32 %v19305_v4, %v4534_v52  ;;  %v19306_v3 = vld [vmem:[#allocation67_spill] sm:$0xff]  ;;  %v19307_v19 = vld [vmem:[#allocation69_spill] sm:$0xff]  ;;  %v5950_v21 = vadd.f32 %v5825_v6, %v5612_v35  ;;  %v19310_v4 = vld [vmem:[#allocation138_spill] sm:$0xff] }
 0x2b1   : > { %v6490_v39 = vadd.f32 %v13153_v32, %v5951_v31  ;;  %v16260_v44 = vadd.f32 %v19306_v3, %v5066_v37  ;;  %v16263_v16 = vadd.f32 %v19307_v19, %v5064_v42  ;;  %v19308_v54 = vld [vmem:[#allocation105_spill] sm:$0xff]  ;;  %v19309_v49 = vld [vmem:[#allocation79_spill] sm:$0xff]  ;;  %v5081_v32 = vadd.f32 %v16165_v48, %v4542_v24 }
 0x2b2   : > { %v6361_v20 = vpop.f32.mrf.mxu0  ;;  %v13122_v25 = vpop.f32.mrf.mxu1  ;;  %v16267_v52 = vadd.f32 %v19308_v54, %v5067_v53  ;;  %v16270_v29 = vadd.f32 %v19309_v49, %v5065_v0  ;;  %v16274_v37 = vadd.f32 %v19310_v4, %v5069_v23  ;;  %v16282_v53 = vadd.f32 %v16174_v51, %v5077_v47 }
 0x2b3   : > { %v6529_v31 = vmul.f32 %v16244_v45, %v6490_v39  ;;  %v6488_v40 = vadd.f32 %v6361_v20, %v5949_v33  ;;  %v16279_v33 = vadd.f32 %v16130_v14, %v5073_v2  ;;  %v5955_v20 = vadd.f32 %v13121_v5, %v5617_v46 }
 0x2b4   : > { %v13154_v8 = vpop.f32.mrf.mxu0  ;;  %v5841_v62 = vpop.f32.mrf.mxu1  ;;  %v5953_v48 = vadd.f32 %v5838_v58, %v5615_v27  ;;  %v16287_v19 = vadd.f32 %v5599_v1, %v5081_v32  ;;  %v5956_v14 = vadd.f32 %v13122_v25, %v5618_v7 }
 0x2b5   : > { %v6568_v42 = vadd.f32 %v16257_v60, %v6529_v31  ;;  %v6527_v3 = vmul.f32 %v16244_v45, %v6488_v40  ;;  %v6491_v39 = vadd.f32 %v13154_v8, %v5952_v12  ;;  %v5954_v2 = vadd.f32 %v5841_v62, %v5616_v13 }
 0x2b6   : > { %v6364_v0 = vpop.f32.mrf.mxu0  ;;  %v13125_v24 = vpop.f32.mrf.mxu1 }
 0x2b7   : > { %vm6600_vm10 = vcmp.ge.f32.partialorder %v6568_v42, 0.0  ;;  %v6633_v6 = vmul.f32 %v16185_v63, %v6568_v42  ;;  %v6566_v35 = vadd.f32 %v16257_v60, %v6527_v3  ;;  %v6530_v23 = vmul.f32 %v16244_v45, %v6491_v39 }
 0x2b8   : > { %v6489_v12 = vadd.f32 %v6364_v0, %v5950_v21  ;;  %v13157_v31 = vpop.f32.mrf.mxu0  ;;  %v5854_v40 = vpop.f32.mrf.mxu1  ;;  %v5959_v49 = vadd.f32 %v13125_v24, %v5621_v59 }
 0x2b9   : > { %v6665_v51 = vsel %vm6600_vm10, %v6568_v42, %v6633_v6  ;;  %vm6598_vm11 = vcmp.ge.f32.partialorder %v6566_v35, 0.0  ;;  %v6631_v46 = vmul.f32 %v16185_v63, %v6566_v35  ;;  %v6569_v27 = vadd.f32 %v16257_v60, %v6530_v23 }
 0x2ba   : > { %v12497_v5 = vpack.c.bf16 %v6665_v51, %v6665_v51  ;;  %v6528_v58 = vmul.f32 %v16244_v45, %v6489_v12  ;;  %v6494_v47 = vadd.f32 %v13157_v31, %v5955_v20  ;;  %v6377_v54 = vpop.f32.mrf.mxu0  ;;  %v13126_v8 = vpop.f32.mrf.mxu1  ;;  %v5957_v4 = vadd.f32 %v5854_v40, %v5619_v30 }
 0x2bb   : > { %v6663_v1 = vsel %vm6598_vm11, %v6566_v35, %v6631_v46  ;;  %vm6601_vm12 = vcmp.ge.f32.partialorder %v6569_v27, 0.0  ;;  %v6634_v32 = vmul.f32 %v16185_v63, %v6569_v27  ;;  %v6492_v7 = vadd.f32 %v6377_v54, %v5953_v48 }
 0x2bc   : > { %6833 = vst.msk [vmem:[#allocation3 + $0x18] sm:$0xf] %vm620_vm0, %v12497_v5  ;;  %v12495_v13 = vpack.c.bf16 %v6663_v1, %v6663_v1  ;;  %v6567_v25 = vadd.f32 %v16257_v60, %v6528_v58  ;;  %v6533_v21 = vmul.f32 %v16244_v45, %v6494_v47  ;;  %v13158_v62 = vpop.f32.mrf.mxu0  ;;  %v5857_v42 = vpop.f32.mrf.mxu1  ;;  %v5960_v0 = vadd.f32 %v13126_v8, %v5622_v22 }
 0x2bd   : > { %v6666_v3 = vsel %vm6601_vm12, %v6569_v27, %v6634_v32  ;;  %v6531_v39 = vmul.f32 %v16244_v45, %v6492_v7  ;;  %v6495_v59 = vadd.f32 %v13158_v62, %v5956_v14  ;;  %v5958_v31 = vadd.f32 %v5857_v42, %v16250_v11 }
 0x2be   : > { %6831 = vst.msk [vmem:[#allocation3 + $0x10] sm:$0xf] %vm620_vm0, %v12495_v13  ;;  %v12498_v20 = vpack.c.bf16 %v6666_v3, %v6666_v3  ;;  %vm6599_vm13 = vcmp.ge.f32.partialorder %v6567_v25, 0.0  ;;  %v6632_v48 = vmul.f32 %v16185_v63, %v6567_v25  ;;  %v6572_v24 = vadd.f32 %v16257_v60, %v6533_v21  ;;  %v6380_v6 = vpop.f32.mrf.mxu0  ;;  %v13129_v35 = vpop.f32.mrf.mxu1 }
 0x2bf   : > { %v6570_v23 = vadd.f32 %v16257_v60, %v6531_v39  ;;  %v6534_v30 = vmul.f32 %v16244_v45, %v6495_v59  ;;  %v6493_v12 = vadd.f32 %v6380_v6, %v5954_v2  ;;  %v5963_v51 = vadd.f32 %v13129_v35, %v16260_v44 }
 0x2c0   : > { %6834 = vst.msk [vmem:[#allocation3 + $0x1c] sm:$0xf] %vm620_vm0, %v12498_v20  ;;  %v6664_v22 = vsel %vm6599_vm13, %v6567_v25, %v6632_v48  ;;  %vm6604_vm14 = vcmp.ge.f32.partialorder %v6572_v24, 0.0  ;;  %v6637_v14 = vmul.f32 %v16185_v63, %v6572_v24  ;;  %v13161_v40 = vpop.f32.mrf.mxu0  ;;  %v5870_v46 = vpop.f32.mrf.mxu1 }
 0x2c1   : > { %v12496_v27 = vpack.c.bf16 %v6664_v22, %v6664_v22  ;;  %vm6602_vm15 = vcmp.ge.f32.partialorder %v6570_v23, 0.0  ;;  %v6635_v5 = vmul.f32 %v16185_v63, %v6570_v23  ;;  %v6573_v58 = vadd.f32 %v16257_v60, %v6534_v30 }
 0x2c2   : > { %v6669_v47 = vsel %vm6604_vm14, %v6572_v24, %v6637_v14  ;;  %v6532_v2 = vmul.f32 %v16244_v45, %v6493_v12  ;;  %v6498_v11 = vadd.f32 %v13161_v40, %v5959_v49  ;;  %v6393_v54 = vpop.f32.mrf.mxu0  ;;  %v5961_v8 = vadd.f32 %v5870_v46, %v16263_v16  ;;  %v13130_v1 = vpop.f32.mrf.mxu1 }
 0x2c3   : > { %6832 = vst.msk [vmem:[#allocation3 + $0x14] sm:$0xf] %vm620_vm0, %v12496_v27  ;;  %v12501_v32 = vpack.c.bf16 %v6669_v47, %v6669_v47  ;;  %v6667_v7 = vsel %vm6602_vm15, %v6570_v23, %v6635_v5  ;;  %vm6605_vm2 = vcmp.ge.f32.partialorder %v6573_v58, 0.0  ;;  %v6638_v44 = vmul.f32 %v16185_v63, %v6573_v58  ;;  %v16319_v48 = vld [vmem:[#allocation3 + $0x18] sm:$0xf] }
 0x2c4   : > { %v12499_v13 = vpack.c.bf16 %v6667_v7, %v6667_v7  ;;  %v6571_v25 = vadd.f32 %v16257_v60, %v6532_v2  ;;  %v6537_v21 = vmul.f32 %v16244_v45, %v6498_v11  ;;  %v6496_v62 = vadd.f32 %v6393_v54, %v5957_v4  ;;  %v13162_v42 = vpop.f32.mrf.mxu0  ;;  %v5873_v3 = vpop.f32.mrf.mxu1  ;;  %v19312_v27 = vld [vmem:[#allocation20_spill] sm:$0xff] }
 0x2c5   : > { %6837 = vst.msk [vmem:[#allocation3 + $0x28] sm:$0xf] %vm620_vm0, %v12501_v32  ;;  %v6670_v49 = vsel %vm6605_vm2, %v6573_v58, %v6638_v44  ;;  %v6499_v16 = vadd.f32 %v13162_v42, %v5960_v0  ;;  %v5964_v39 = vadd.f32 %v13130_v1, %v16267_v52  ;;  %v6866_v59 = vld [vmem:[#allocation3 + $0x10] sm:$0xf]  ;;  %v16317_v20 = vadd.f32 %v5873_v3, %v16270_v29  ;;  %v19311_v29 = vld [vmem:[#allocation17_spill] sm:$0xff] }
 0x2c6   : > { %6835 = vst.msk [vmem:[#allocation3 + $0x20] sm:$0xf] %vm620_vm0, %v12499_v13  ;;  %v12502_v24 = vpack.c.bf16 %v6670_v49, %v6670_v49  ;;  %vm6603_vm3 = vcmp.ge.f32.partialorder %v6571_v25, 0.0  ;;  %v6636_v4 = vmul.f32 %v16185_v63, %v6571_v25  ;;  %v6576_v6 = vadd.f32 %v16257_v60, %v6537_v21  ;;  %v6396_v35 = vpop.f32.mrf.mxu0  ;;  %v16324_v23 = vpop.f32.mrf.mxu1  ;;  %v19313_v13 = vld [vmem:[#allocation26_spill] sm:$0xff]  ;;  %v7699_v17 = vld [vmem:[#allocation3 + $0x18] sm:$0xf] }
 0x2c7   : > { %v6535_v0 = vmul.f32 %v16244_v45, %v6496_v62  ;;  %v6538_v52 = vmul.f32 %v16244_v45, %v6499_v16  ;;  %v6497_v30 = vadd.f32 %v6396_v35, %v5958_v31  ;;  %v6899_v12 = vmul.bf16 %v6866_v59, %v19311_v29  ;;  %v16329_v22 = vld [vmem:[#allocation3 + $0x1c] sm:$0xf] }
 0x2c8   : > { %6838 = vst.msk [vmem:[#allocation3 + $0x2c] sm:$0xf] %vm620_vm0, %v12502_v24  ;;  %v6668_v14 = vsel %vm6603_vm3, %v6571_v25, %v6636_v4  ;;  %vm6608_vm4 = vcmp.ge.f32.partialorder %v6576_v6, 0.0  ;;  %v6641_v40 = vmul.f32 %v16185_v63, %v6576_v6  ;;  %v13165_v46 = vpop.f32.mrf.mxu0  ;;  %v6901_v5 = vmul.bf16 %v16319_v48, %v19312_v27  ;;  %v16335_v58 = vpop.f32.mrf.mxu1 }
 0x2c9   : > { %v12500_v47 = vpack.c.bf16 %v6668_v14, %v6668_v14  ;;  %v6574_v2 = vadd.f32 %v16257_v60, %v6535_v0  ;;  %v6577_v31 = vadd.f32 %v16257_v60, %v6538_v52  ;;  %v6536_v11 = vmul.f32 %v16244_v45, %v6497_v30  ;;  %v19314_v0 = vld [vmem:[#allocation19_spill] sm:$0xff]  ;;  %v13638_v30 = vld [vmem:[%s18679_s4 + $0x20] sm:$0xff]  }
 0x2ca   : > { %v6673_v54 = vsel %vm6608_vm4, %v6576_v6, %v6641_v40  ;;  %v6502_v1 = vadd.f32 %v13165_v46, %v5963_v51  ;;  %v6409_v32 = vpop.f32.mrf.mxu0  ;;  %v6867_v7 = vld [vmem:[#allocation3 + $0x14] sm:$0xf]  ;;  %v16343_v44 = vcombine.low %v6898_v28, %v6899_v12  ;;  %v6902_v25 = vmul.bf16 %v16329_v22, %v19313_v13  ;;  %v16347_v21 = vpop.f32.mrf.mxu1 }
 0x2cb   : > { %6836 = vst.msk [vmem:[#allocation3 + $0x24] sm:$0xf] %vm620_vm0, %v12500_v47  ;;  %v12505_v62 = vpack.c.bf16 %v6673_v54, %v6673_v54  ;;  %vm6606_vm5 = vcmp.ge.f32.partialorder %v6574_v2, 0.0  ;;  %v6639_v42 = vmul.f32 %v16185_v63, %v6574_v2  ;;  %vm6609_vm6 = vcmp.ge.f32.partialorder %v6577_v31, 0.0  ;;  %v19316_v54 = vld [vmem:[#allocation27_spill] sm:$0xff] }
 0x2cc   : > { %v6642_v51 = vmul.f32 %v16185_v63, %v6577_v31  ;;  %v6575_v3 = vadd.f32 %v16257_v60, %v6536_v11  ;;  %v6541_v41 = vmul.f32 %v16244_v45, %v6502_v1  ;;  %v6500_v28 = vadd.f32 %v6409_v32, %v5961_v8  ;;  %v13166_v49 = vpop.f32.mrf.mxu0  ;;  %v16354_v16 = vpop.f32.mrf.mxu1  ;;  %v19315_v11 = vld [vmem:[#allocation119_spill] sm:$0xff] }
 0x2cd   : > { %6841 = vst.msk [vmem:[#allocation3 + $0x38] sm:$0xf] %vm620_vm0, %v12505_v62  ;;  %v6671_v24 = vsel %vm6606_vm5, %v6574_v2, %v6639_v42  ;;  %v6503_v4 = vadd.f32 %v13166_v49, %v5964_v39  ;;  %v12114_v6 = vcombine.low %v6866_v59, %v6867_v7  ;;  %v16357_v35 = vld [vmem:[#allocation3 + $0x20] sm:$0xf]  ;;  %v6900_v52 = vmul.bf16 %v6867_v7, %v19314_v0 }
 0x2ce   : > { %v12503_v12 = vpack.c.bf16 %v6671_v24, %v6671_v24  ;;  %v6674_v14 = vsel %vm6609_vm6, %v6577_v31, %v6642_v51  ;;  %vm6607_vm7 = vcmp.ge.f32.partialorder %v6575_v3, 0.0  ;;  %v6640_v8 = vmul.f32 %v16185_v63, %v6575_v3  ;;  %v6412_v40 = vpop.f32.mrf.mxu0  ;;  %v16375_v62 = vpop.f32.mrf.mxu1 }
 0x2cf   : > { %v12506_v46 = vpack.c.bf16 %v6674_v14, %v6674_v14  ;;  %v6580_v47 = vadd.f32 %v16257_v60, %v6541_v41  ;;  %v6539_v39 = vmul.f32 %v16244_v45, %v6500_v28  ;;  %v6542_v59 = vmul.f32 %v16244_v45, %v6503_v4  ;;  %13188 = vmatmul.mubr.msk.bf16.vlgmr.msra.gmra.mxu1 %vm18912_vm1, %v12114_v6  ;;  %v19317_v6 = vld [vmem:[#allocation132_spill] sm:$0xff] }
 0x2d0   : > { %6839 = vst.msk [vmem:[#allocation3 + $0x30] sm:$0xf] %vm620_vm0, %v12503_v12  ;;  %v6672_v2 = vsel %vm6607_vm7, %v6575_v3, %v6640_v8  ;;  %13256 = vmatpush3.bf16.msra.mxu1 %v19315_v11  ;;  %v6501_v31 = vadd.f32 %v6412_v40, %v16317_v20  ;;  %v6903_v1 = vmul.bf16 %v16357_v35, %v19316_v54  ;;  %v13169_v7 = vpop.f32.mrf.mxu0  ;;  %v16383_v20 = vld [vmem:[%s18679_s4 + $0x48] sm:$0xff]  }
 0x2d1   : > { %v12115_v32 = vcombine.low %v16319_v48, %v16329_v22  ;;  %6842 = vst.msk [vmem:[#allocation3 + $0x3c] sm:$0xf] %vm620_vm0, %v12506_v46  ;;  %v12504_v42 = vpack.c.bf16 %v6672_v2, %v6672_v2  ;;  %vm6612_vm10 = vcmp.ge.f32.partialorder %v6580_v47, 0.0  ;;  %v6645_v51 = vmul.f32 %v16185_v63, %v6580_v47  ;;  %13257 = vmatprep.subr.bf16.mxu1 %v13638_v30 }
 0x2d2   : > { %v6578_v3 = vadd.f32 %v16257_v60, %v6539_v39  ;;  %v6581_v41 = vadd.f32 %v16257_v60, %v6542_v59  ;;  %v6540_v48 = vmul.f32 %v16244_v45, %v6501_v31  ;;  %v12149_v22 = vcombine.low %v6900_v52, %v6901_v5  ;;  %v6425_v49 = vpop.f32.mrf.mxu0  ;;  %v16396_v5 = vpop.f32.mrf.mxu1 }
 0x2d3   : > { %13191 = vmatprep.mubr.msk.bf16.mxu1 %vm18912_vm1, %v12115_v32  ;;  %v16388_v28 = vcombine.low %v6902_v25, %v6903_v1  ;;  %6840 = vst.msk [vmem:[#allocation3 + $0x34] sm:$0xf] %vm620_vm0, %v12504_v42  ;;  %v6677_v24 = vsel %vm6612_vm10, %v6580_v47, %v6645_v51  ;;  %v5967_v12 = vadd.f32 %v16324_v23, %v19317_v6  ;;  %v19318_v51 = vld [vmem:[#allocation135_spill] sm:$0xff] }
 0x2d4   : > { %vm6610_vm11 = vcmp.ge.f32.partialorder %v6578_v3, 0.0  ;;  %v6643_v4 = vmul.f32 %v16185_v63, %v6578_v3  ;;  %v12509_v14 = vpack.c.bf16 %v6677_v24, %v6677_v24  ;;  %vm6613_vm12 = vcmp.ge.f32.partialorder %v6581_v41, 0.0  ;;  %v13170_v46 = vpop.f32.mrf.mxu0  ;;  %13258 = vmatpush3.bf16.msra.mxu1 %v13638_v30  ;;  %v16409_v24 = vpop.f32.mrf.mxu1 }
 0x2d5   : > { %v6646_v8 = vmul.f32 %v16185_v63, %v6581_v41  ;;  %v6579_v40 = vadd.f32 %v16257_v60, %v6540_v48  ;;  %v7340_v52 = vshrl.u32 %v12149_v22, 16  ;;  %v7343_v39 = vshll.u32 %v12149_v22, 16  ;;  %13327 = vmatprep.subr.bf16.mxu1 %v16383_v20 }
 0x2d6   : > { %v6675_v25 = vsel %vm6610_vm11, %v6578_v3, %v6643_v4  ;;  %v6506_v47 = vadd.f32 %v13169_v7, %v5967_v12  ;;  %6845 = vst.msk [vmem:[#allocation3 + $0x48] sm:$0xf] %vm620_vm0, %v12509_v14  ;;  %v6428_v11 = vpop.f32.mrf.mxu0  ;;  %v5965_v7 = vadd.f32 %v16335_v58, %v19318_v51  ;;  %v7331_v3 = vshrl.u32 %v16343_v44, 16  ;;  %v19319_v14 = vld [vmem:[#allocation137_spill] sm:$0xff] }
 0x2d7   : > { %v12507_v59 = vpack.c.bf16 %v6675_v25, %v6675_v25  ;;  %v6678_v23 = vsel %vm6613_vm12, %v6581_v41, %v6646_v8  ;;  %vm6611_vm13 = vcmp.ge.f32.partialorder %v6579_v40, 0.0  ;;  %v6644_v2 = vmul.f32 %v16185_v63, %v6579_v40  ;;  %v6871_v41 = vld [vmem:[#allocation3 + $0x24] sm:$0xf] }
 0x2d8   : > { %v12510_v31 = vpack.c.bf16 %v6678_v23, %v6678_v23  ;;  %v7342_v1 = vrot.slane %v7340_v52, 3  ;;  %v7345_v32 = vrot.slane %v7343_v39, 4  ;;  %v6545_v42 = vmul.f32 %v16244_v45, %v6506_v47  ;;  %v16407_v22 = vpop.f32.mrf.mxu0  ;;  %v6872_v52 = vld [vmem:[#allocation3 + $0x28] sm:$0xf]  ;;  %v6873_v39 = vld [vmem:[#allocation3 + $0x2c] sm:$0xf] }
 0x2d9   : > { %6843 = vst.msk [vmem:[#allocation3 + $0x40] sm:$0xf] %vm620_vm0, %v12507_v59  ;;  %v6676_v30 = vsel %vm6611_vm13, %v6579_v40, %v6644_v2  ;;  %v7334_v48 = vshll.u32 %v16343_v44, 16  ;;  %v5968_v8 = vadd.f32 %v16347_v21, %v19319_v14  ;;  %v6504_v58 = vadd.f32 %v6425_v49, %v5965_v7  ;;  %v19321_v7 = vld [vmem:[#allocation29_spill] sm:$0xff] }
 0x2da   : > { %6846 = vst.msk [vmem:[#allocation3 + $0x4c] sm:$0xf] %vm620_vm0, %v12510_v31  ;;  %v12508_v4 = vpack.c.bf16 %v6676_v30, %v6676_v30  ;;  %v16412_v6 = vor.u32 %v7345_v32, %v7342_v1  ;;  %v6584_v12 = vadd.f32 %v16257_v60, %v6545_v42  ;;  %v7333_v40 = vrot.slane %v7331_v3, 3  ;;  %v6441_v47 = vpop.f32.mrf.mxu0  ;;  %v16423_v1 = vld [vmem:[#allocation3 + $0x30] sm:$0xf]  ;;  %v19320_v32 = vld [vmem:[#allocation28_spill] sm:$0xff] }
 0x2db   : > { %v7336_v25 = vrot.slane %v7334_v48, 4  ;;  %v5966_v44 = vadd.f32 %v16354_v16, %v16274_v37  ;;  %v6507_v23 = vadd.f32 %v13170_v46, %v5968_v8  ;;  %v12116_v2 = vcombine.low %v16357_v35, %v6871_v41  ;;  %v5905_v16 = vpop.f32.mrf.mxu1  ;;  %v19322_v3 = vld [vmem:[#allocation34_spill] sm:$0xff]  ;;  %v19323_v8 = vld [vmem:[#allocation35_spill] sm:$0xff] }
 0x2dc   : > { %6844 = vst.msk [vmem:[#allocation3 + $0x44] sm:$0xf] %vm620_vm0, %v12508_v4  ;;  %vm6616_vm14 = vcmp.ge.f32.partialorder %v6584_v12, 0.0  ;;  %v6649_v59 = vmul.f32 %v16185_v63, %v6584_v12  ;;  %v6543_v31 = vmul.f32 %v16244_v45, %v6504_v58  ;;  %v6904_v42 = vmul.bf16 %v6871_v41, %v19320_v32  ;;  %v16426_v37 = vpop.f32.mrf.mxu0 }
 0x2dd   : > { %v7337_v21 = vor.u32 %v7336_v25, %v7333_v40  ;;  %v6505_v49 = vadd.f32 %v6428_v11, %v5966_v44  ;;  %v6546_v51 = vmul.f32 %v16244_v45, %v6507_v23  ;;  %13192 = vmatmul.mubr.msk.bf16.gmra.mxu1 %vm18912_vm1, %v12116_v2  ;;  %v6905_v46 = vmul.bf16 %v6872_v52, %v19321_v7  ;;  %v13648_v44 = vld [vmem:[%s18679_s4 + $0x30] sm:$0xff]  }
 0x2de   : > { %v6681_v30 = vsel %vm6616_vm14, %v6584_v12, %v6649_v59  ;;  %v6906_v35 = vmul.bf16 %v6873_v39, %v19322_v3  ;;  %v6582_v4 = vadd.f32 %v16257_v60, %v6543_v31  ;;  %v6444_v14 = vpop.f32.mrf.mxu0  ;;  %v6907_v58 = vmul.bf16 %v16423_v1, %v19323_v8  ;;  %v16452_v59 = vpop.f32.mrf.mxu1  ;;  %v19324_v23 = vld [vmem:[#allocation139_spill] sm:$0xff] }
 0x2df   : > { %v12513_v48 = vpack.c.bf16 %v6681_v30, %v6681_v30  ;;  %v7338_v11 = vsel %vm2027_vm8, %v7329_v38, %v7337_v21  ;;  %v6544_v41 = vmul.f32 %v16244_v45, %v6505_v49  ;;  %v6585_v12 = vadd.f32 %v16257_v60, %v6546_v51 }
 0x2e0   : > { %13223 = vmatprep.mubr.msk.bf16.mxu0 %vm18912_vm1, %v7338_v11  ;;  %v12117_v40 = vcombine.low %v6872_v52, %v6873_v39  ;;  %v16442_v25 = vcombine.low %v6904_v42, %v6905_v46  ;;  %vm6614_vm15 = vcmp.ge.f32.partialorder %v6582_v4, 0.0  ;;  %v6647_v56 = vmul.f32 %v16185_v63, %v6582_v4  ;;  %v19325_v42 = vld [vmem:[#allocation140_spill] sm:$0xff]  ;;  %v16464_v30 = vpop.f32.mrf.mxu0  ;;  %v6875_v11 = vld [vmem:[#allocation3 + $0x34] sm:$0xf] }
 0x2e1   : > { %6849 = vst.msk [vmem:[#allocation3 + $0x58] sm:$0xf] %vm620_vm0, %v12513_v48  ;;  %v6583_v50 = vadd.f32 %v16257_v60, %v6544_v41  ;;  %v7347_v38 = vsel %vm2027_vm8, %v7337_v21, %v16412_v6  ;;  %vm6617_vm2 = vcmp.ge.f32.partialorder %v6585_v12, 0.0  ;;  %v6650_v52 = vmul.f32 %v16185_v63, %v6585_v12 }
 0x2e2   : > { %13195 = vmatprep.mubr.msk.bf16.mxu1 %vm18912_vm1, %v12117_v40  ;;  %v16456_v39 = vcombine.low %v6906_v35, %v6907_v58  ;;  %13224 = vmatmul.mubr.msk.bf16.vlgmr.msra.gmra.mxu0 %vm18912_vm1, %v7347_v38  ;;  %v5971_v2 = vadd.f32 %v16375_v62, %v19324_v23  ;;  %v6679_v31 = vsel %vm6614_vm15, %v6582_v4, %v6647_v56  ;;  %v7349_v48 = vshrl.u32 %v16388_v28, 16  ;;  %v6876_v40 = vld [vmem:[#allocation3 + $0x38] sm:$0xf]  ;;  %v5918_v56 = vpop.f32.mrf.mxu1  ;;  %v16478_v23 = vld [vmem:[#allocation3 + $0x40] sm:$0xf] }
 0x2e3   : > { %vm6615_vm3 = vcmp.ge.f32.partialorder %v6583_v50, 0.0  ;;  %v6648_v49 = vmul.f32 %v16185_v63, %v6583_v50  ;;  %v5969_v21 = vadd.f32 %v16396_v5, %v19325_v42  ;;  %13292 = vmatpush3.bf16.msra.mxu0 %v16196_v9  ;;  %v12511_v51 = vpack.c.bf16 %v6679_v31, %v6679_v31  ;;  %v19327_v42 = vld [vmem:[#allocation37_spill] sm:$0xff] }
 0x2e4   : > { %v6682_v46 = vsel %vm6617_vm2, %v6585_v12, %v6650_v52  ;;  %v6510_v35 = vadd.f32 %v16407_v22, %v5971_v2  ;;  %13293 = vmatprep.subr.bf16.mxu0 %v13648_v44  ;;  %v7352_v58 = vshll.u32 %v16388_v28, 16  ;;  %v7351_v38 = vrot.slane %v7349_v48, 3  ;;  %v6877_v12 = vld [vmem:[#allocation3 + $0x3c] sm:$0xf]  ;;  %v6457_v2 = vpop.f32.mrf.mxu0 }
 0x2e5   : > { %v12514_v62 = vpack.c.bf16 %v6682_v46, %v6682_v46  ;;  %v6680_v4 = vsel %vm6615_vm3, %v6583_v50, %v6648_v49  ;;  %v6508_v41 = vadd.f32 %v6441_v47, %v5969_v21  ;;  %6847 = vst.msk [vmem:[#allocation3 + $0x50] sm:$0xf] %vm620_vm0, %v12511_v51  ;;  %v5972_v22 = vadd.f32 %v16409_v24, %v16122_v43  ;;  %v19326_v24 = vld [vmem:[#allocation36_spill] sm:$0xff] }
 0x2e6   : > { %v12512_v5 = vpack.c.bf16 %v6680_v4, %v6680_v4  ;;  %v6549_v9 = vmul.f32 %v16244_v45, %v6510_v35  ;;  %v7354_v50 = vrot.slane %v7352_v58, 4  ;;  %v5970_v47 = vadd.f32 %v5905_v16, %v16279_v33  ;;  %v16493_v35 = vld [vmem:[%s18679_s4 + $0x58] sm:$0xff]   ;;  %v13178_v58 = vpop.f32.mrf.mxu0 }
 0x2e7   : > { %6850 = vst.msk [vmem:[#allocation3 + $0x5c] sm:$0xf] %vm620_vm0, %v12514_v62  ;;  %v6547_v52 = vmul.f32 %v16244_v45, %v6508_v41  ;;  %v12118_v28 = vcombine.low %v16423_v1, %v6875_v11  ;;  %13294 = vmatpush3.bf16.msra.mxu0 %v13648_v44  ;;  %v6511_v43 = vadd.f32 %v16426_v37, %v5972_v22  ;;  %v19328_v1 = vld [vmem:[#allocation42_spill] sm:$0xff]  ;;  %v13142_v44 = vpop.f32.mrf.mxu1 }
 0x2e8   : > { %6848 = vst.msk [vmem:[#allocation3 + $0x54] sm:$0xf] %vm620_vm0, %v12512_v5  ;;  %v6588_v31 = vadd.f32 %v16257_v60, %v6549_v9  ;;  %v6908_v49 = vmul.bf16 %v6875_v11, %v19326_v24  ;;  %v6909_v21 = vmul.bf16 %v6876_v40, %v19327_v42  ;;  %v16486_v46 = vor.u32 %v7354_v50, %v7351_v38  ;;  %v19329_v11 = vld [vmem:[#allocation43_spill] sm:$0xff] }
 0x2e9   : > { %v6586_v51 = vadd.f32 %v16257_v60, %v6547_v52  ;;  %13196 = vmatmul.mubr.msk.bf16.gmra.mxu1 %vm18912_vm1, %v12118_v28  ;;  %v6509_v33 = vadd.f32 %v6444_v14, %v5970_v47  ;;  %v6910_v16 = vmul.bf16 %v6877_v12, %v19328_v1  ;;  %v6550_v48 = vmul.f32 %v16244_v45, %v6511_v43 }
 0x2ea   : > { %vm6620_vm4 = vcmp.ge.f32.partialorder %v6588_v31, 0.0  ;;  %v6653_v37 = vmul.f32 %v16185_v63, %v6588_v31  ;;  %v6911_v62 = vmul.bf16 %v16478_v23, %v19329_v11  ;;  %v7356_v14 = vsel %vm2027_vm8, %v16412_v6, %v16486_v46  ;;  %13363 = vmatprep.subr.bf16.mxu0 %v16493_v35  ;;  %v5921_v6 = vpop.f32.mrf.mxu1 }
 0x2eb   : > { %vm6618_vm5 = vcmp.ge.f32.partialorder %v6586_v51, 0.0  ;;  %v6651_v4 = vmul.f32 %v16185_v63, %v6586_v51  ;;  %v6548_v41 = vmul.f32 %v16244_v45, %v6509_v33  ;;  %13227 = vmatprep.mubr.msk.bf16.mxu0 %vm18912_vm1, %v7356_v14  ;;  %v6589_v9 = vadd.f32 %v16257_v60, %v6550_v48 }
 0x2ec   : > { %v6685_v5 = vsel %vm6620_vm4, %v6588_v31, %v6653_v37  ;;  %v12119_v38 = vcombine.low %v6876_v40, %v6877_v12  ;;  %v16507_v22 = vcombine.low %v6908_v49, %v6909_v21  ;;  %v16510_v28 = vcombine.low %v6910_v16, %v6911_v62  ;;  %v6460_v21 = vpop.f32.mrf.mxu0 }
 0x2ed   : > { %v12517_v52 = vpack.c.bf16 %v6685_v5, %v6685_v5  ;;  %v6683_v50 = vsel %vm6618_vm5, %v6586_v51, %v6651_v4  ;;  %v6587_v47 = vadd.f32 %v16257_v60, %v6548_v41  ;;  %vm6621_vm6 = vcmp.ge.f32.partialorder %v6589_v9, 0.0  ;;  %v6879_v5 = vld [vmem:[#allocation3 + $0x44] sm:$0xf] }
 0x2ee   : > { %v12515_v43 = vpack.c.bf16 %v6683_v50, %v6683_v50  ;;  %v6654_v33 = vmul.f32 %v16185_v63, %v6589_v9  ;;  %13199 = vmatprep.mubr.msk.bf16.mxu1 %vm18912_vm1, %v12119_v38  ;;  %v7358_v31 = vshrl.u32 %v16442_v25, 16  ;;  %v7361_v12 = vshll.u32 %v16442_v25, 16  ;;  %v16524_v38 = vpop.f32.mrf.mxu1 }
 0x2ef   : > { %6853 = vst.msk [vmem:[#allocation3 + $0x68] sm:$0xf] %vm620_vm0, %v12517_v52  ;;  %vm6619_vm7 = vcmp.ge.f32.partialorder %v6587_v47, 0.0  ;;  %v6652_v40 = vmul.f32 %v16185_v63, %v6587_v47  ;;  %v5975_v49 = vadd.f32 %v16452_v59, %v16144_v34  ;;  %v5973_v37 = vadd.f32 %v5918_v56, %v16157_v55 }
 0x2f0   : > { %6851 = vst.msk [vmem:[#allocation3 + $0x60] sm:$0xf] %vm620_vm0, %v12515_v43  ;;  %v6686_v51 = vsel %vm6621_vm6, %v6589_v9, %v6654_v33  ;;  %v7360_v16 = vrot.slane %v7358_v31, 3  ;;  %v7367_v48 = vshrl.u32 %v16456_v39, 16  ;;  %v7363_v14 = vrot.slane %v7361_v12, 4  ;;  %v13181_v43 = vpop.f32.mrf.mxu0  ;;  %v19330_v31 = vld [vmem:[#allocation44_spill] sm:$0xff] }
 0x2f1   : > { %v12518_v62 = vpack.c.bf16 %v6686_v51, %v6686_v51  ;;  %v6684_v4 = vsel %vm6619_vm7, %v6587_v47, %v6652_v40  ;;  %v6514_v41 = vadd.f32 %v16464_v30, %v5975_v49  ;;  %v6512_v52 = vadd.f32 %v6457_v2, %v5973_v37  ;;  %v6880_v47 = vld [vmem:[#allocation3 + $0x48] sm:$0xf] }
 0x2f2   : > { %v12516_v25 = vpack.c.bf16 %v6684_v4, %v6684_v4  ;;  %v7369_v34 = vrot.slane %v7367_v48, 3  ;;  %v7370_v59 = vshll.u32 %v16456_v39, 16  ;;  %v7364_v9 = vor.u32 %v7363_v14, %v7360_v16  ;;  %v19331_v16 = vld [vmem:[#allocation45_spill] sm:$0xff] }
 0x2f3   : > { %6854 = vst.msk [vmem:[#allocation3 + $0x6c] sm:$0xf] %vm620_vm0, %v12518_v62  ;;  %v6553_v55 = vmul.f32 %v16244_v45, %v6514_v41  ;;  %v5976_v56 = vadd.f32 %v13142_v44, %v16170_v57  ;;  %v5974_v50 = vadd.f32 %v5921_v6, %v16282_v53  ;;  %v6551_v30 = vmul.f32 %v16244_v45, %v6512_v52  ;;  %v6881_v44 = vld [vmem:[#allocation3 + $0x4c] sm:$0xf]  ;;  %v5934_v53 = vpop.f32.mrf.mxu1  ;;  %v6473_v62 = vpop.f32.mrf.mxu0 }
 0x2f4   : > { %6852 = vst.msk [vmem:[#allocation3 + $0x64] sm:$0xf] %vm620_vm0, %v12516_v25  ;;  %v7372_v33 = vrot.slane %v7370_v59, 4  ;;  %v12120_v2 = vcombine.low %v16478_v23, %v6879_v5  ;;  %v6912_v39 = vmul.bf16 %v6879_v5, %v19330_v31  ;;  %v7365_v40 = vsel %vm2027_vm8, %v16486_v46, %v7364_v9  ;;  %v16543_v23 = vld [vmem:[#allocation3 + $0x50] sm:$0xf]  ;;  %v19332_v41 = vld [vmem:[#allocation50_spill] sm:$0xff] }
 0x2f5   : > { %v6592_v12 = vadd.f32 %v16257_v60, %v6553_v55  ;;  %v6515_v49 = vadd.f32 %v13178_v58, %v5976_v56  ;;  %v6513_v57 = vadd.f32 %v6460_v21, %v5974_v50  ;;  %13228 = vmatmul.mubr.msk.bf16.gmra.mxu0 %vm18912_vm1, %v7365_v40  ;;  %v6590_v6 = vadd.f32 %v16257_v60, %v6551_v30  ;;  %v19333_v59 = vld [vmem:[#allocation51_spill] sm:$0xff]  ;;  %v13146_v56 = vpop.f32.mrf.mxu1 }
 0x2f6   : > { %v16540_v51 = vor.u32 %v7372_v33, %v7369_v34  ;;  %13200 = vmatmul.mubr.msk.bf16.gmra.mxu1 %vm18912_vm1, %v12120_v2  ;;  %v6913_v37 = vmul.bf16 %v6880_v47, %v19331_v16  ;;  %v7376_v46 = vshrl.u32 %v16507_v22, 16  ;;  %v6914_v5 = vmul.bf16 %v6881_v44, %v19332_v41 }
 0x2f7   : > { %vm6624_vm10 = vcmp.ge.f32.partialorder %v6592_v12, 0.0  ;;  %v6657_v58 = vmul.f32 %v16185_v63, %v6592_v12  ;;  %v6554_v21 = vmul.f32 %v16244_v45, %v6515_v49  ;;  %v6552_v48 = vmul.f32 %v16244_v45, %v6513_v57 }
 0x2f8   : > { %vm6622_vm11 = vcmp.ge.f32.partialorder %v6590_v6, 0.0  ;;  %v6655_v4 = vmul.f32 %v16185_v63, %v6590_v6  ;;  %v7374_v14 = vsel %vm2027_vm8, %v7364_v9, %v16540_v51  ;;  %v6915_v55 = vmul.bf16 %v16543_v23, %v19333_v59 }
 0x2f9   : > { %v6689_v25 = vsel %vm6624_vm10, %v6592_v12, %v6657_v58  ;;  %13231 = vmatprep.mubr.msk.bf16.mxu0 %vm18912_vm1, %v7374_v14  ;;  %v6593_v52 = vadd.f32 %v16257_v60, %v6554_v21  ;;  %v6591_v34 = vadd.f32 %v16257_v60, %v6552_v48  ;;  %v12121_v33 = vcombine.low %v6880_v47, %v6881_v44  ;;  %v13182_v12 = vpop.f32.mrf.mxu0  ;;  %v5937_v21 = vpop.f32.mrf.mxu1 }
 0x2fa   : > { %v12521_v50 = vpack.c.bf16 %v6689_v25, %v6689_v25  ;;  %v6687_v30 = vsel %vm6622_vm11, %v6590_v6, %v6655_v4  ;;  %v16559_v2 = vcombine.low %v6912_v39, %v6913_v37  ;;  %v16565_v57 = vcombine.low %v6914_v5, %v6915_v55  ;;  %v6883_v25 = vld [vmem:[#allocation3 + $0x54] sm:$0xf] }
 0x2fb   : > { %v12519_v40 = vpack.c.bf16 %v6687_v30, %v6687_v30  ;;  %vm6625_vm12 = vcmp.ge.f32.partialorder %v6593_v52, 0.0  ;;  %v6658_v9 = vmul.f32 %v16185_v63, %v6593_v52  ;;  %vm6623_vm13 = vcmp.ge.f32.partialorder %v6591_v34, 0.0  ;;  %13203 = vmatprep.mubr.msk.bf16.mxu1 %vm18912_vm1, %v12121_v33  ;;  %v6476_v30 = vpop.f32.mrf.mxu0  ;;  %v19334_v33 = vld [vmem:[#allocation52_spill] sm:$0xff] }
 0x2fc   : > { %6857 = vst.msk [vmem:[#allocation3 + $0x78] sm:$0xf] %vm620_vm0, %v12521_v50  ;;  %v6656_v49 = vmul.f32 %v16185_v63, %v6591_v34  ;;  %v7378_v58 = vrot.slane %v7376_v46, 3  ;;  %v7379_v6 = vshll.u32 %v16507_v22, 16  ;;  %v5979_v39 = vadd.f32 %v16524_v38, %v16201_v18 }
 0x2fd   : > { %6855 = vst.msk [vmem:[#allocation3 + $0x70] sm:$0xf] %vm620_vm0, %v12519_v40  ;;  %v6690_v47 = vsel %vm6625_vm12, %v6593_v52, %v6658_v9  ;;  %v5977_v44 = vadd.f32 %v5934_v53, %v16214_v36  ;;  %v7385_v37 = vshrl.u32 %v16510_v28, 16  ;;  %v7388_v5 = vshll.u32 %v16510_v28, 16  ;;  %v6884_v53 = vld [vmem:[#allocation3 + $0x58] sm:$0xf] }
 0x2fe   : > { %v12522_v48 = vpack.c.bf16 %v6690_v47, %v6690_v47  ;;  %v6688_v4 = vsel %vm6623_vm13, %v6591_v34, %v6656_v49  ;;  %v7381_v14 = vrot.slane %v7379_v6, 4  ;;  %v6518_v55 = vadd.f32 %v13181_v43, %v5979_v39  ;;  %v6886_v6 = vld [vmem:[#allocation3 + $0x60] sm:$0xf] }
 0x2ff   : > { %v12520_v46 = vpack.c.bf16 %v6688_v4, %v6688_v4  ;;  %v6516_v22 = vadd.f32 %v6473_v62, %v5977_v44  ;;  %v7387_v50 = vrot.slane %v7385_v37, 3  ;;  %v7390_v18 = vrot.slane %v7388_v5, 4  ;;  %v6885_v62 = vld [vmem:[#allocation3 + $0x5c] sm:$0xf] }
 0x300   : > { %6858 = vst.msk [vmem:[#allocation3 + $0x7c] sm:$0xf] %vm620_vm0, %v12522_v48  ;;  %v7382_v52 = vor.u32 %v7381_v14, %v7378_v58  ;;  %v5980_v36 = vadd.f32 %v13146_v56, %v16224_v15  ;;  %v5978_v38 = vadd.f32 %v5937_v21, %v16287_v19  ;;  %v6557_v34 = vmul.f32 %v16244_v45, %v6518_v55  ;;  %v19336_v37 = vld [vmem:[#allocation60_spill] sm:$0xff] }
 0x301   : > { %6856 = vst.msk [vmem:[#allocation3 + $0x74] sm:$0xf] %vm620_vm0, %v12520_v46  ;;  %v6555_v28 = vmul.f32 %v16244_v45, %v6516_v22  ;;  %v12122_v43 = vcombine.low %v16543_v23, %v6883_v25  ;;  %v6916_v40 = vmul.bf16 %v6883_v25, %v19334_v33  ;;  %v16584_v49 = vor.u32 %v7390_v18, %v7387_v50  ;;  %v19335_v23 = vld [vmem:[#allocation53_spill] sm:$0xff]  ;;  %v19337_v25 = vld [vmem:[#allocation62_spill] sm:$0xff] }
 0x302   : > { %v7383_v9 = vsel %vm2027_vm8, %v16540_v51, %v7382_v52  ;;  %v6519_v15 = vadd.f32 %v13182_v12, %v5980_v36  ;;  %v6517_v56 = vadd.f32 %v6476_v30, %v5978_v38  ;;  %v6596_v19 = vadd.f32 %v16257_v60, %v6557_v34 }
 0x303   : > { %13232 = vmatmul.mubr.msk.bf16.gmra.mxu0 %vm18912_vm1, %v7383_v9  ;;  %v6594_v58 = vadd.f32 %v16257_v60, %v6555_v28  ;;  %13204 = vmatmul.mubr.msk.bf16.gmra.mxu1 %vm18912_vm1, %v12122_v43  ;;  %v6917_v47 = vmul.bf16 %v6884_v53, %v19335_v23  ;;  %v7394_v39 = vshrl.u32 %v16559_v2, 16  ;;  %v7392_v51 = vsel %vm2027_vm8, %v7382_v52, %v16584_v49  ;;  %v6887_v52 = vld [vmem:[#allocation3 + $0x64] sm:$0xf]  ;;  %v6888_v43 = vld [vmem:[#allocation3 + $0x68] sm:$0xf] }
 0x304   : > { %v6558_v44 = vmul.f32 %v16244_v45, %v6519_v15  ;;  %v6556_v12 = vmul.f32 %v16244_v45, %v6517_v56  ;;  %v6918_v21 = vmul.bf16 %v6885_v62, %v19336_v37  ;;  %vm6628_vm14 = vcmp.ge.f32.partialorder %v6596_v19, 0.0  ;;  %13235 = vmatprep.mubr.msk.bf16.mxu0 %vm18912_vm1, %v7392_v51  ;;  %v6889_v15 = vld [vmem:[#allocation3 + $0x6c] sm:$0xf]  ;;  %v6890_v56 = vld [vmem:[#allocation3 + $0x70] sm:$0xf] }
 0x305   : > { %v6661_v48 = vmul.f32 %v16185_v63, %v6596_v19  ;;  %vm6626_vm15 = vcmp.ge.f32.partialorder %v6594_v58, 0.0  ;;  %v6659_v4 = vmul.f32 %v16185_v63, %v6594_v58  ;;  %v6919_v46 = vmul.bf16 %v6886_v6, %v19337_v25 }
 0x306   : > { %v6597_v14 = vadd.f32 %v16257_v60, %v6558_v44  ;;  %v6595_v5 = vadd.f32 %v16257_v60, %v6556_v12  ;;  %v12123_v55 = vcombine.low %v6884_v53, %v6885_v62  ;;  %v12157_v45 = vcombine.low %v6916_v40, %v6917_v47 }
 0x307   : > { %v6693_v22 = vsel %vm6628_vm14, %v6596_v19, %v6661_v48  ;;  %v6691_v50 = vsel %vm6626_vm15, %v6594_v58, %v6659_v4  ;;  %v7396_v30 = vrot.slane %v7394_v39, 3  ;;  %v12158_v28 = vcombine.low %v6918_v21, %v6919_v46  ;;  %v19338_v39 = vld [vmem:[#allocation61_spill] sm:$0xff] }
 0x308   : > { %v12525_v18 = vpack.c.bf16 %v6693_v22, %v6693_v22  ;;  %v12523_v36 = vpack.c.bf16 %v6691_v50, %v6691_v50  ;;  %vm6629_vm2 = vcmp.ge.f32.partialorder %v6597_v14, 0.0  ;;  %v6662_v38 = vmul.f32 %v16185_v63, %v6597_v14  ;;  %13207 = vmatprep.mubr.msk.bf16.mxu1 %vm18912_vm1, %v12123_v55  ;;  %v19339_v21 = vld [vmem:[#allocation65_spill] sm:$0xff]  ;;  %v6891_v22 = vld [vmem:[#allocation3 + $0x74] sm:$0xf] }
 0x309   : > { %vm6627_vm3 = vcmp.ge.f32.partialorder %v6595_v5, 0.0  ;;  %v6660_v34 = vmul.f32 %v16185_v63, %v6595_v5  ;;  %v7397_v60 = vshll.u32 %v16559_v2, 16  ;;  %v7403_v62 = vshrl.u32 %v16565_v57, 16  ;;  %v7700_v63 = vld [vmem:[#allocation3 + $0x1c] sm:$0xf] }
 0x30a   : > { %6861 = vst.msk [vmem:[#allocation3 + $0x88] sm:$0xf] %vm620_vm0, %v12525_v18  ;;  %6859 = vst.msk [vmem:[#allocation3 + $0x80] sm:$0xf] %vm620_vm0, %v12523_v36  ;;  %v6694_v53 = vsel %vm6629_vm2, %v6597_v14, %v6662_v38  ;;  %v7406_v40 = vshll.u32 %v16565_v57, 16  ;;  %v12124_v9 = vcombine.low %v6886_v6, %v6887_v52  ;;  %v6920_v51 = vmul.bf16 %v6887_v52, %v19338_v39  ;;  %v19340_v14 = vld [vmem:[#allocation74_spill] sm:$0xff] }
 0x30b   : > { %v12526_v19 = vpack.c.bf16 %v6694_v53, %v6694_v53  ;;  %v6692_v58 = vsel %vm6627_vm3, %v6595_v5, %v6660_v34  ;;  %v7399_v47 = vrot.slane %v7397_v60, 4  ;;  %v7405_v2 = vrot.slane %v7403_v62, 3  ;;  %v19341_v6 = vld [vmem:[#allocation75_spill] sm:$0xff]  ;;  %v6892_v36 = vld [vmem:[#allocation3 + $0x78] sm:$0xf] }
 0x30c   : > { %v12524_v44 = vpack.c.bf16 %v6692_v58, %v6692_v58  ;;  %v7408_v12 = vrot.slane %v7406_v40, 4  ;;  %13208 = vmatmul.mubr.msk.bf16.gmra.mxu1 %vm18912_vm1, %v12124_v9  ;;  %v6921_v48 = vmul.bf16 %v6888_v43, %v19339_v21  ;;  %v6922_v57 = vmul.bf16 %v6889_v15, %v19340_v14  ;;  %v6893_v53 = vld [vmem:[#allocation3 + $0x7c] sm:$0xf] }
 0x30d   : > { %6862 = vst.msk [vmem:[#allocation3 + $0x8c] sm:$0xf] %vm620_vm0, %v12526_v19  ;;  %v7400_v4 = vor.u32 %v7399_v47, %v7396_v30  ;;  %v6923_v46 = vmul.bf16 %v6890_v56, %v19341_v6  ;;  %v12125_v55 = vcombine.low %v6888_v43, %v6889_v15  ;;  %v7412_v52 = vshrl.u32 %v12157_v45, 16  ;;  %v19342_v58 = vld [vmem:[#allocation76_spill] sm:$0xff]  ;;  %v19343_v47 = vld [vmem:[#allocation78_spill] sm:$0xff] }
 0x30e   : > { %6860 = vst.msk [vmem:[#allocation3 + $0x84] sm:$0xf] %vm620_vm0, %v12524_v44  ;;  %v7409_v5 = vor.u32 %v7408_v12, %v7405_v2  ;;  %v12159_v50 = vcombine.low %v6920_v51, %v6921_v48  ;;  %v7415_v18 = vshll.u32 %v12157_v45, 16  ;;  %v7421_v30 = vshrl.u32 %v12158_v28, 16  ;;  %v19344_v2 = vld [vmem:[#allocation88_spill] sm:$0xff]  ;;  %v19345_v12 = vld [vmem:[#allocation90_spill] sm:$0xff] }
 0x30f   : > { %v7401_v38 = vsel %vm2027_vm8, %v16584_v49, %v7400_v4  ;;  %13211 = vmatprep.mubr.msk.bf16.mxu1 %vm18912_vm1, %v12125_v55  ;;  %v12160_v34 = vcombine.low %v6922_v57, %v6923_v46  ;;  %v7424_v60 = vshll.u32 %v12158_v28, 16  ;;  %v7414_v62 = vrot.slane %v7412_v52, 3 }
 0x310   : > { %13236 = vmatmul.mubr.msk.bf16.gmra.mxu0 %vm18912_vm1, %v7401_v38  ;;  %v7410_v43 = vsel %vm2027_vm8, %v7400_v4, %v7409_v5  ;;  %v7417_v40 = vrot.slane %v7415_v18, 4  ;;  %v12126_v9 = vcombine.low %v6890_v56, %v6891_v22  ;;  %v7423_v45 = vrot.slane %v7421_v30, 3 }
 0x311   : > { %13239 = vmatprep.mubr.msk.bf16.mxu0 %vm18912_vm1, %v7410_v43  ;;  %v7426_v15 = vrot.slane %v7424_v60, 4  ;;  %v6894_v19 = vld [vmem:[#allocation3 + $0x80] sm:$0xf]  ;;  %v6924_v49 = vmul.bf16 %v6891_v22, %v19342_v58  ;;  %v6925_v51 = vmul.bf16 %v6892_v36, %v19343_v47  ;;  %v6926_v28 = vmul.bf16 %v6893_v53, %v19344_v2  ;;  %v7697_v22 = vld [vmem:[#allocation3 + $0x10] sm:$0xf] }
 0x312   : > { %v7418_v44 = vor.u32 %v7417_v40, %v7414_v62  ;;  %v6927_v48 = vmul.bf16 %v6894_v19, %v19345_v12  ;;  %v12127_v57 = vcombine.low %v6892_v36, %v6893_v53  ;;  %v7430_v55 = vshrl.u32 %v12159_v50, 16  ;;  %v7698_v60 = vld [vmem:[#allocation3 + $0x14] sm:$0xf] }
 0x313   : > { %v7427_v46 = vor.u32 %v7426_v15, %v7423_v45  ;;  %v12161_v4 = vcombine.low %v6924_v49, %v6925_v51  ;;  %v7433_v52 = vshll.u32 %v12159_v50, 16  ;;  %v7439_v38 = vshrl.u32 %v12160_v34, 16  ;;  %v19346_v50 = vld [vmem:[#allocation87_spill] sm:$0xff] }
 0x314   : > { %v7419_v56 = vsel %vm2027_vm8, %v7409_v5, %v7418_v44  ;;  %13212 = vmatmul.mubr.msk.bf16.gmra.mxu1 %vm18912_vm1, %v12126_v9  ;;  %v12162_v18 = vcombine.low %v6926_v28, %v6927_v48  ;;  %v7442_v30 = vshll.u32 %v12160_v34, 16  ;;  %v7432_v62 = vrot.slane %v7430_v55, 3  ;;  %v19347_v48 = vld [vmem:[#allocation22_spill] sm:$0xff]  ;;  %v19348_v55 = vld [vmem:[#allocation23_spill] sm:$0xff] }
 0x315   : > { %v7428_v43 = vsel %vm2027_vm8, %v7418_v44, %v7427_v46  ;;  %13215 = vmatprep.mubr.msk.bf16.mxu1 %vm18912_vm1, %v12127_v57  ;;  %v7435_v40 = vrot.slane %v7433_v52, 4  ;;  %v6895_v36 = vld [vmem:[#allocation3 + $0x84] sm:$0xf]  ;;  %v7448_v53 = vshrl.u32 %v12161_v4, 16  ;;  %v7441_v45 = vrot.slane %v7439_v38, 3 }
 0x316   : > { %v7444_v15 = vrot.slane %v7442_v30, 4  ;;  %v6928_v49 = vmul.bf16 %v6895_v36, %v19346_v50  ;;  %v12128_v5 = vcombine.low %v6894_v19, %v6895_v36  ;;  %v7451_v28 = vshll.u32 %v12161_v4, 16 }
 0x317   : > { %v7436_v51 = vor.u32 %v7435_v40, %v7432_v62  ;;  %v7450_v9 = vrot.slane %v7448_v53, 3  ;;  %v7730_v34 = vmul.bf16 %v7697_v22, %v19347_v48  ;;  %v7731_v52 = vmul.bf16 %v7698_v60, %v19348_v55  ;;  %v19350_v22 = vld [vmem:[#allocation24_spill] sm:$0xff]  ;;  %v19351_v53 = vld [vmem:[#allocation25_spill] sm:$0xff] }
 0x318   : > { %13240 = vmatmul.mubr.msk.bf16.gmra.mxu0 %vm18912_vm1, %v7419_v56  ;;  %v7445_v44 = vor.u32 %v7444_v15, %v7441_v45  ;;  %v12163_v57 = vcombine.low %v6928_v49, %v6928_v49  ;;  %v7457_v12 = vshrl.u32 %v12162_v18, 16  ;;  %v7453_v38 = vrot.slane %v7451_v28, 4  ;;  %v7701_v56 = vld [vmem:[#allocation3 + $0x20] sm:$0xf]  ;;  %v8234_v45 = vld [vmem:[#allocation3 + $0xc] sm:$0x8] }
 0x319   : > { %13243 = vmatprep.mubr.msk.bf16.mxu0 %vm18912_vm1, %v7428_v43  ;;  %v19349_v30 = vshrl.u32 %v16124_v10, 16  ;;  %v7460_v62 = vshll.u32 %v12162_v18, 16  ;;  %v12187_v4 = vcombine.low %v7730_v34, %v7731_v52  ;;  %v7732_v36 = vmul.bf16 %v7699_v17, %v19350_v22  ;;  %v7702_v43 = vld [vmem:[#allocation3 + $0x24] sm:$0xf]  ;;  %v16647_v17 = vld [vmem:[#allocation3 + $0x14] sm:$0xf] }
 0x31a   : > { %v7459_v40 = vrot.slane %v7457_v12, 3  ;;  %v7733_v48 = vmul.bf16 %v7700_v63, %v19351_v53  ;;  %v7437_v15 = vsel %vm2027_vm8, %v7427_v46, %v7436_v51  ;;  %v7466_v49 = vshrl.u32 %v12163_v57, 16  ;;  %v16645_v12 = vld [vmem:[#allocation3 + $0x10] sm:$0xf]  ;;  %v19352_v22 = vld [vmem:[#allocation30_spill] sm:$0xff] }
 0x31b   : > { %v7855_v19 = vor.u32 %v16178_v26, %v19349_v30  ;;  %v7462_v60 = vrot.slane %v7460_v62, 4  ;;  %v7469_v55 = vshll.u32 %v12163_v57, 16  ;;  %v7446_v28 = vsel %vm2027_vm8, %v7436_v51, %v7445_v44  ;;  %v19353_v53 = vld [vmem:[#allocation31_spill] sm:$0xff]  ;;  %v16651_v51 = vld [vmem:[#allocation3 + $0x18] sm:$0xf] }
 0x31c   : > { %13216 = vmatmul.mubr.msk.bf16.gmra.mxu1 %vm18912_vm1, %v12128_v5  ;;  %v7454_v10 = vor.u32 %v7453_v38, %v7450_v9  ;;  %v7857_v26 = vshll.u32 %v12187_v4, 16  ;;  %v12188_v18 = vcombine.low %v7732_v36, %v7733_v48  ;;  %v7861_v63 = vshrl.u32 %v12187_v4, 16  ;;  %v16653_v9 = vld [vmem:[#allocation3 + $0x1c] sm:$0xf]  ;;  %v19354_v48 = vld [vmem:[#allocation14_spill] sm:$0xff]  ;;  %v19355_v36 = vld [vmem:[#allocation15_spill] sm:$0xff] }
 0x31d   : > { %v7463_v34 = vor.u32 %v7462_v60, %v7459_v40  ;;  %v7468_v52 = vrot.slane %v7466_v49, 3  ;;  %v7471_v30 = vrot.slane %v7469_v55, 4  ;;  %v7734_v57 = vmul.bf16 %v7701_v56, %v19352_v22  ;;  %v16662_v49 = vld [vmem:[#allocation3 + $0x20] sm:$0xf] }
 0x31e   : > { %v7859_v46 = vrot.slane %v7857_v26, 1  ;;  %v7865_v62 = vshll.u32 %v12188_v18, 16  ;;  %v7735_v50 = vmul.bf16 %v7702_v43, %v19353_v53  ;;  %v8267_v38 = vmul.bf16 %v8234_v45, %v19354_v48 }
 0x31f   : > { %v7472_v5 = vor.u32 %v7471_v30, %v7468_v52  ;;  %v8268_v2 = vmul.bf16 %v16645_v12, %v19355_v36  ;;  %v8269_v4 = vmul.bf16 %v16647_v17, %v19265_v61  ;;  %v7455_v43 = vsel %vm2027_vm8, %v7445_v44, %v7454_v10  ;;  %v7704_v30 = vld [vmem:[#allocation3 + $0x2c] sm:$0xf]  ;;  %v13649_v44 = vld [vmem:[%s18679_s4 + $0x40] sm:$0xff]  }
 0x320   : > { %13244 = vmatmul.mubr.msk.bf16.gmra.mxu0 %vm18912_vm1, %v7437_v15  ;;  %v7860_v55 = vsel %vm3262_vm9, %v7855_v19, %v7859_v46  ;;  %v7863_v40 = vor.u32 %v7861_v63, %v7859_v46  ;;  %v7867_v56 = vrot.slane %v7865_v62, 1  ;;  %v12189_v60 = vcombine.low %v7734_v57, %v7735_v50  ;;  %v7703_v15 = vld [vmem:[#allocation3 + $0x28] sm:$0xf]  ;;  %v7705_v57 = vld [vmem:[#allocation3 + $0x30] sm:$0xf]  ;;  %v19357_v36 = vld [vmem:[#allocation33_spill] sm:$0xff] }
 0x321   : > { %13247 = vmatprep.mubr.msk.bf16.mxu0 %vm18912_vm1, %v7446_v28  ;;  %13259 = vmatprep.mubr.msk.bf16.mxu1 %vm18912_vm1, %v7860_v55  ;;  %v7464_v45 = vsel %vm2027_vm8, %v7454_v10, %v7463_v34  ;;  %v7869_v26 = vshrl.u32 %v12188_v18, 16  ;;  %v8270_v52 = vmul.bf16 %v16651_v51, %v19311_v29  ;;  %v16672_v50 = vsel %vm2027_vm8, %v7463_v34, %v7472_v5  ;;  %v19356_v5 = vld [vmem:[#allocation32_spill] sm:$0xff] }
 0x322   : > { %v7868_v19 = vsel %vm3262_vm9, %v7863_v40, %v7867_v56  ;;  %v7873_v63 = vshll.u32 %v12189_v60, 16  ;;  %v8271_v28 = vmul.bf16 %v16653_v9, %v19314_v0  ;;  %v8272_v18 = vmul.bf16 %v16662_v49, %v19312_v27  ;;  %v7706_v0 = vld [vmem:[#allocation3 + $0x34] sm:$0xf] }
 0x323   : > { %v7871_v10 = vor.u32 %v7869_v26, %v7867_v56  ;;  %v12225_v46 = vcombine.low %v8267_v38, %v8268_v2  ;;  %v12226_v62 = vcombine.low %v8269_v4, %v8270_v52  ;;  %v7877_v34 = vshrl.u32 %v12189_v60, 16  ;;  %v19358_v4 = vld [vmem:[#allocation38_spill] sm:$0xff] }
 0x324   : > { %13260 = vmatmul.mubr.msk.bf16.vlgmr.msra.gmra.mxu1 %vm18912_vm1, %v7868_v19  ;;  %v7875_v55 = vrot.slane %v7873_v63, 1  ;;  %v7736_v40 = vmul.bf16 %v7703_v15, %v19356_v5  ;;  %v7737_v61 = vmul.bf16 %v7704_v30, %v19357_v36  ;;  %v12227_v48 = vcombine.low %v8271_v28, %v8272_v18  ;;  %v16687_v19 = vld [vmem:[#allocation3 + $0x24] sm:$0xf]  ;;  %v16692_v60 = vld [vmem:[%s18679_s4 + $0x68] sm:$0xff]   ;;  %v19359_v63 = vld [vmem:[#allocation39_spill] sm:$0xff] }
 0x325   : > { %13328 = vmatpush3.bf16.msra.mxu1 %v16383_v20  ;;  %v8389_v29 = vshrl.u32 %v12225_v46, 16  ;;  %v8392_v56 = vshll.u32 %v12225_v46, 16  ;;  %v8397_v26 = vshrl.u32 %v12226_v62, 16  ;;  %v8400_v2 = vshll.u32 %v12226_v62, 16  ;;  %v16712_v5 = vld [vmem:[#allocation3 + $0x30] sm:$0xf] }
 0x326   : > { %v7876_v27 = vsel %vm3262_vm9, %v7871_v10, %v7875_v55  ;;  %v12190_v38 = vcombine.low %v7736_v40, %v7737_v61  ;;  %v7738_v52 = vmul.bf16 %v7705_v57, %v19358_v4  ;;  %13329 = vmatprep.subr.bf16.mxu1 %v13649_v44  ;;  %v7739_v28 = vmul.bf16 %v7706_v0, %v19359_v63  ;;  %v16696_v10 = vld [vmem:[#allocation3 + $0x28] sm:$0xf]  ;;  %v19362_v63 = vld [vmem:[#allocation41_spill] sm:$0xff]  ;;  %v19364_v36 = vld [vmem:[#allocation47_spill] sm:$0xff] }
 0x327   : > { %13263 = vmatprep.mubr.msk.bf16.mxu1 %vm18912_vm1, %v7876_v27  ;;  %v8391_v20 = vrot.slane %v8389_v29, 3  ;;  %v8394_v15 = vrot.slane %v8392_v56, 4  ;;  %v8399_v30 = vrot.slane %v8397_v26, 3  ;;  %19360 = vst [vmem:[#allocation120_spill] sm:$0xff] %v16696_v10  ;;  %v7879_v61 = vor.u32 %v7877_v34, %v7875_v55  ;;  %v7707_v27 = vld [vmem:[#allocation3 + $0x38] sm:$0xf] }
 0x328   : > { %13248 = vmatmul.mubr.msk.bf16.gmra.mxu0 %vm18912_vm1, %v7455_v43  ;;  %v8402_v18 = vrot.slane %v8400_v2, 4  ;;  %v7881_v46 = vshll.u32 %v12190_v38, 16  ;;  %v8406_v62 = vshrl.u32 %v12227_v48, 16  ;;  %v12191_v40 = vcombine.low %v7738_v52, %v7739_v28  ;;  %v7708_v55 = vld [vmem:[#allocation3 + $0x3c] sm:$0xf] }
 0x329   : > { %13251 = vmatprep.mubr.msk.bf16.mxu0 %vm18912_vm1, %v7464_v45  ;;  %v8395_v57 = vor.u32 %v8394_v15, %v8391_v20  ;;  %v8409_v4 = vshll.u32 %v12227_v48, 16  ;;  %v8273_v29 = vmul.bf16 %v16687_v19, %v19313_v13  ;;  %13330 = vmatpush3.bf16.msra.mxu1 %v13649_v44  ;;  %v8274_v43 = vmul.bf16 %v16696_v10, %v19316_v54  ;;  %v7709_v34 = vld [vmem:[#allocation3 + $0x40] sm:$0xf]  ;;  %v7710_v48 = vld [vmem:[#allocation3 + $0x44] sm:$0xf]  ;;  %v19363_v10 = vld [vmem:[#allocation46_spill] sm:$0xff] }
 0x32a   : > { %v8403_v56 = vor.u32 %v8402_v18, %v8399_v30  ;;  %v7883_v0 = vrot.slane %v7881_v46, 1  ;;  %v8408_v26 = vrot.slane %v8406_v62, 3  ;;  %13399 = vmatprep.subr.bf16.mxu1 %v16692_v60  ;;  %v7885_v2 = vshrl.u32 %v12190_v38, 16  ;;  %v19361_v30 = vld [vmem:[#allocation40_spill] sm:$0xff]  ;;  %v16708_v46 = vld [vmem:[#allocation3 + $0x2c] sm:$0xf] }
 0x32b   : > { %v7889_v45 = vshll.u32 %v12191_v40, 16  ;;  %v7893_v20 = vshrl.u32 %v12191_v40, 16  ;;  %v8411_v52 = vrot.slane %v8409_v4, 4  ;;  %v12228_v44 = vcombine.low %v8273_v29, %v8274_v43  ;;  %v16716_v29 = vld [vmem:[#allocation3 + $0x34] sm:$0xf] }
 0x32c   : > { %v8404_v15 = vsel %vm2027_vm8, %v8395_v57, %v8403_v56  ;;  %v7884_v28 = vsel %vm3262_vm9, %v7879_v61, %v7883_v0  ;;  %v7740_v18 = vmul.bf16 %v7707_v27, %v19361_v30  ;;  %v7887_v62 = vor.u32 %v7885_v2, %v7883_v0  ;;  %v16718_v27 = vld [vmem:[#allocation3 + $0x38] sm:$0xf]  ;;  %v16736_v30 = vld [vmem:[#allocation3 + $0x3c] sm:$0xf] }
 0x32d   : > { %13264 = vmatmul.mubr.msk.bf16.gmra.mxu1 %vm18912_vm1, %v7884_v28  ;;  %v7891_v13 = vrot.slane %v7889_v45, 1  ;;  %v8412_v54 = vor.u32 %v8411_v52, %v8408_v26  ;;  %v7741_v38 = vmul.bf16 %v7708_v55, %v19362_v63  ;;  %v8415_v4 = vshrl.u32 %v12228_v44, 16  ;;  %19365 = vst [vmem:[#allocation73_spill] sm:$0xff] %v16718_v27  ;;  %v7712_v52 = vld [vmem:[#allocation3 + $0x4c] sm:$0xf] }
 0x32e   : > { %v8418_v40 = vshll.u32 %v12228_v44, 16  ;;  %v7742_v57 = vmul.bf16 %v7709_v34, %v19363_v10  ;;  %v7743_v61 = vmul.bf16 %v7710_v48, %v19364_v36  ;;  %v8275_v26 = vmul.bf16 %v16708_v46, %v19320_v32  ;;  %v7711_v44 = vld [vmem:[#allocation3 + $0x48] sm:$0xf]  ;;  %v19367_v10 = vld [vmem:[#allocation48_spill] sm:$0xff] }
 0x32f   : > { %v7892_v43 = vsel %vm3262_vm9, %v7887_v62, %v7891_v13  ;;  %v7895_v28 = vor.u32 %v7893_v20, %v7891_v13  ;;  %v12192_v0 = vcombine.low %v7740_v18, %v7741_v38  ;;  %v8417_v55 = vrot.slane %v8415_v4, 3 }
 0x330   : > { %13252 = vmatmul.mubr.msk.bf16.gmra.mxu0 %vm18912_vm1, %v16672_v50  ;;  %13267 = vmatprep.mubr.msk.bf16.mxu1 %vm18912_vm1, %v7892_v43  ;;  %v8420_v34 = vrot.slane %v8418_v40, 4  ;;  %v12193_v2 = vcombine.low %v7742_v57, %v7743_v61  ;;  %v8276_v45 = vmul.bf16 %v16712_v5, %v19321_v7  ;;  %v8413_v13 = vsel %vm2027_vm8, %v8403_v56, %v8412_v54  ;;  %v19366_v43 = vld [vmem:[#allocation49_spill] sm:$0xff] }
 0x331   : > { %13295 = vmatprep.mubr.msk.bf16.mxu0 %vm18912_vm1, %v8404_v15  ;;  %v7897_v20 = vshll.u32 %v12192_v0, 16  ;;  %v8277_v48 = vmul.bf16 %v16716_v29, %v19322_v3  ;;  %v8278_v50 = vmul.bf16 %v16718_v27, %v19323_v8  ;;  %v7901_v62 = vshrl.u32 %v12192_v0, 16  ;;  %v7713_v0 = vld [vmem:[#allocation3 + $0x50] sm:$0xf] }
 0x332   : > { %v8421_v18 = vor.u32 %v8420_v34, %v8417_v55  ;;  %v7905_v38 = vshll.u32 %v12193_v2, 16  ;;  %v12229_v4 = vcombine.low %v8275_v26, %v8276_v45  ;;  %v7909_v57 = vshrl.u32 %v12193_v2, 16  ;;  %v7714_v34 = vld [vmem:[#allocation3 + $0x54] sm:$0xf] }
 0x333   : > { %v7899_v40 = vrot.slane %v7897_v20, 1  ;;  %v12230_v61 = vcombine.low %v8277_v48, %v8278_v50  ;;  %v7745_v7 = vmul.bf16 %v7712_v52, %v19366_v43  ;;  %v7744_v36 = vmul.bf16 %v7711_v44, %v19367_v10  ;;  %v16741_v20 = vld [vmem:[#allocation3 + $0x40] sm:$0xf]  ;;  %v16743_v48 = vld [vmem:[#allocation3 + $0x44] sm:$0xf] }
 0x334   : > { %v7907_v15 = vrot.slane %v7905_v38, 1  ;;  %v8424_v32 = vshrl.u32 %v12229_v4, 16  ;;  %v8427_v56 = vshll.u32 %v12229_v4, 16  ;;  %v8422_v26 = vsel %vm2027_vm8, %v8412_v54, %v8421_v18  ;;  %v16746_v38 = vld [vmem:[#allocation3 + $0x48] sm:$0xf]  ;;  %v13654_v54 = vld [vmem:[%s18679_s4 + $0x50] sm:$0xff]  }
 0x335   : > { %v7900_v3 = vsel %vm3262_vm9, %v7895_v28, %v7899_v40  ;;  %v7903_v8 = vor.u32 %v7901_v62, %v7899_v40  ;;  %v8433_v27 = vshrl.u32 %v12230_v61, 16  ;;  %v8436_v55 = vshll.u32 %v12230_v61, 16  ;;  %19368 = vst [vmem:[#allocation126_spill] sm:$0xff] %v16746_v38  ;;  %v19370_v4 = vld [vmem:[#allocation55_spill] sm:$0xff] }
 0x336   : > { %13268 = vmatmul.mubr.msk.bf16.gmra.mxu1 %vm18912_vm1, %v7900_v3  ;;  %v8426_v2 = vrot.slane %v8424_v32, 3  ;;  %v8429_v45 = vrot.slane %v8427_v56, 4  ;;  %v12194_v52 = vcombine.low %v7744_v36, %v7745_v7  ;;  %v7911_v44 = vor.u32 %v7909_v57, %v7907_v15  ;;  %v19369_v3 = vld [vmem:[#allocation54_spill] sm:$0xff]  ;;  %v7716_v57 = vld [vmem:[#allocation3 + $0x5c] sm:$0xf] }
 0x337   : > { %v7908_v50 = vsel %vm3262_vm9, %v7903_v8, %v7907_v15  ;;  %v8435_v28 = vrot.slane %v8433_v27, 3  ;;  %v8438_v62 = vrot.slane %v8436_v55, 4  ;;  %v7746_v36 = vmul.bf16 %v7713_v0, %v19369_v3  ;;  %v7715_v8 = vld [vmem:[#allocation3 + $0x58] sm:$0xf] }
 0x338   : > { %13296 = vmatmul.mubr.msk.bf16.vlgmr.msra.gmra.mxu0 %vm18912_vm1, %v8413_v13  ;;  %13271 = vmatprep.mubr.msk.bf16.mxu1 %vm18912_vm1, %v7908_v50  ;;  %v8430_v32 = vor.u32 %v8429_v45, %v8426_v2  ;;  %v7913_v7 = vshll.u32 %v12194_v52, 16  ;;  %v7747_v40 = vmul.bf16 %v7714_v34, %v19370_v4  ;;  %v8279_v61 = vmul.bf16 %v16736_v30, %v19326_v24  ;;  %v19371_v45 = vld [vmem:[#allocation57_spill] sm:$0xff]  ;;  %v19374_v3 = vld [vmem:[#allocation68_spill] sm:$0xff] }
 0x339   : > { %13299 = vmatprep.mubr.msk.bf16.mxu0 %vm18912_vm1, %v8422_v26  ;;  %v8439_v27 = vor.u32 %v8438_v62, %v8435_v28  ;;  %v8280_v15 = vmul.bf16 %v16741_v20, %v19327_v42  ;;  %v8281_v13 = vmul.bf16 %v16743_v48, %v19328_v1  ;;  %v7917_v2 = vshrl.u32 %v12194_v52, 16  ;;  %13364 = vmatpush3.bf16.msra.mxu0 %v16493_v35  ;;  %v19372_v28 = vld [vmem:[#allocation59_spill] sm:$0xff]  ;;  %v7717_v24 = vld [vmem:[#allocation3 + $0x60] sm:$0xf]  ;;  %v7718_v42 = vld [vmem:[#allocation3 + $0x64] sm:$0xf] }
 0x33a   : > { %v8431_v56 = vsel %vm2027_vm8, %v8421_v18, %v8430_v32  ;;  %v7915_v55 = vrot.slane %v7913_v7, 1  ;;  %v12195_v0 = vcombine.low %v7746_v36, %v7747_v40  ;;  %v8282_v26 = vmul.bf16 %v16746_v38, %v19329_v11  ;;  %13365 = vmatprep.subr.bf16.mxu0 %v13654_v54  ;;  %v16771_v18 = vld [vmem:[%s18679_s4 + $0x78] sm:$0xff]   ;;  %v16775_v1 = vld [vmem:[#allocation3 + $0x4c] sm:$0xf] }
 0x33b   : > { %v12231_v34 = vcombine.low %v8279_v61, %v8280_v15  ;;  %v7748_v50 = vmul.bf16 %v7715_v8, %v19371_v45  ;;  %v7749_v62 = vmul.bf16 %v7716_v57, %v19372_v28  ;;  %v8440_v52 = vsel %vm2027_vm8, %v8430_v32, %v8439_v27  ;;  %v19373_v45 = vld [vmem:[#allocation66_spill] sm:$0xff] }
 0x33c   : > { %v7916_v35 = vsel %vm3262_vm9, %v7911_v44, %v7915_v55  ;;  %v7919_v7 = vor.u32 %v7917_v2, %v7915_v55  ;;  %v7921_v36 = vshll.u32 %v12195_v0, 16  ;;  %v12232_v15 = vcombine.low %v8281_v13, %v8282_v26  ;;  %v16780_v2 = vld [vmem:[#allocation3 + $0x50] sm:$0xf] }
 0x33d   : > { %v8442_v40 = vshrl.u32 %v12231_v34, 16  ;;  %v8445_v61 = vshll.u32 %v12231_v34, 16  ;;  %v12196_v8 = vcombine.low %v7748_v50, %v7749_v62  ;;  %v7925_v11 = vshrl.u32 %v12195_v0, 16  ;;  %13366 = vmatpush3.bf16.msra.mxu0 %v13654_v54  ;;  %v16787_v0 = vld [vmem:[#allocation3 + $0x54] sm:$0xf] }
 0x33e   : > { %13272 = vmatmul.mubr.msk.bf16.gmra.mxu1 %vm18912_vm1, %v7916_v35  ;;  %v7923_v57 = vrot.slane %v7921_v36, 1  ;;  %v7750_v28 = vmul.bf16 %v7717_v24, %v19373_v45  ;;  %v7751_v4 = vmul.bf16 %v7718_v42, %v19374_v3  ;;  %v8451_v44 = vshrl.u32 %v12232_v15, 16  ;;  %13435 = vmatprep.subr.bf16.mxu0 %v16771_v18  ;;  %v16789_v42 = vld [vmem:[#allocation3 + $0x58] sm:$0xf]  ;;  %v16836_v3 = vld [vmem:[#allocation3 + $0x70] sm:$0xf] }
 0x33f   : > { %v8444_v32 = vrot.slane %v8442_v40, 3  ;;  %v8447_v38 = vrot.slane %v8445_v61, 4  ;;  %v8454_v55 = vshll.u32 %v12232_v15, 16  ;;  %v7929_v34 = vshll.u32 %v12196_v8, 16 }
 0x340   : > { %13300 = vmatmul.mubr.msk.bf16.gmra.mxu0 %vm18912_vm1, %v8431_v56  ;;  %v7924_v13 = vsel %vm3262_vm9, %v7919_v7, %v7923_v57  ;;  %v12197_v26 = vcombine.low %v7750_v28, %v7751_v4  ;;  %v8283_v24 = vmul.bf16 %v16775_v1, %v19330_v31  ;;  %v7927_v54 = vor.u32 %v7925_v11, %v7923_v57  ;;  %v7719_v56 = vld [vmem:[#allocation3 + $0x68] sm:$0xf]  ;;  %v7720_v28 = vld [vmem:[#allocation3 + $0x6c] sm:$0xf] }
 0x341   : > { %13303 = vmatprep.mubr.msk.bf16.mxu0 %vm18912_vm1, %v8440_v52  ;;  %13275 = vmatprep.mubr.msk.bf16.mxu1 %vm18912_vm1, %v7924_v13  ;;  %v8448_v50 = vor.u32 %v8447_v38, %v8444_v32  ;;  %v8453_v62 = vrot.slane %v8451_v44, 3  ;;  %v8456_v35 = vrot.slane %v8454_v55, 4  ;;  %v7931_v36 = vrot.slane %v7929_v34, 1  ;;  %v19375_v55 = vld [vmem:[#allocation70_spill] sm:$0xff]  ;;  %v19376_v34 = vld [vmem:[#allocation72_spill] sm:$0xff] }
 0x342   : > { %v7933_v7 = vshrl.u32 %v12196_v8, 16  ;;  %v7937_v40 = vshll.u32 %v12197_v26, 16  ;;  %v8284_v4 = vmul.bf16 %v16780_v2, %v19331_v16  ;;  %v7941_v15 = vshrl.u32 %v12197_v26, 16  ;;  %v7722_v26 = vld [vmem:[#allocation3 + $0x74] sm:$0xf] }
 0x343   : > { %v8457_v61 = vor.u32 %v8456_v35, %v8453_v62  ;;  %v8285_v31 = vmul.bf16 %v16787_v0, %v19332_v41  ;;  %v8286_v11 = vmul.bf16 %v16789_v42, %v19333_v59  ;;  %v8449_v38 = vsel %vm2027_vm8, %v8439_v27, %v8448_v50  ;;  %v7721_v62 = vld [vmem:[#allocation3 + $0x70] sm:$0xf] }
 0x344   : > { %v7935_v52 = vor.u32 %v7933_v7, %v7931_v36  ;;  %v7939_v57 = vrot.slane %v7937_v40, 1  ;;  %v12233_v32 = vcombine.low %v8283_v24, %v8284_v4  ;;  %v7932_v8 = vsel %vm3262_vm9, %v7927_v54, %v7931_v36  ;;  %v16806_v7 = vld [vmem:[#allocation3 + $0x5c] sm:$0xf]  ;;  %v16809_v36 = vld [vmem:[#allocation3 + $0x60] sm:$0xf] }
 0x345   : > { %v12234_v44 = vcombine.low %v8285_v31, %v8286_v11  ;;  %v7752_v13 = vmul.bf16 %v7719_v56, %v19375_v55  ;;  %v7753_v16 = vmul.bf16 %v7720_v28, %v19376_v34  ;;  %v8458_v35 = vsel %vm2027_vm8, %v8448_v50, %v8457_v61  ;;  %v16811_v40 = vld [vmem:[#allocation3 + $0x64] sm:$0xf]  ;;  %v19377_v28 = vld [vmem:[#allocation80_spill] sm:$0xff] }
 0x346   : > { %13276 = vmatmul.mubr.msk.bf16.gmra.mxu1 %vm18912_vm1, %v7932_v8  ;;  %v7940_v41 = vsel %vm3262_vm9, %v7935_v52, %v7939_v57  ;;  %v8460_v59 = vshrl.u32 %v12233_v32, 16  ;;  %v8463_v27 = vshll.u32 %v12233_v32, 16  ;;  %v7943_v24 = vor.u32 %v7941_v15, %v7939_v57  ;;  %v19378_v52 = vld [vmem:[#allocation81_spill] sm:$0xff]  ;;  %v16816_v8 = vld [vmem:[#allocation3 + $0x68] sm:$0xf] }
 0x347   : > { %13279 = vmatprep.mubr.msk.bf16.mxu1 %vm18912_vm1, %v7940_v41  ;;  %v8469_v31 = vshrl.u32 %v12234_v44, 16  ;;  %v8472_v54 = vshll.u32 %v12234_v44, 16  ;;  %v12198_v56 = vcombine.low %v7752_v13, %v7753_v16  ;;  %v7754_v11 = vmul.bf16 %v7721_v62, %v19377_v28  ;;  %19379 = vst [vmem:[#allocation83_spill] sm:$0xff] %v16816_v8  ;;  %v7723_v44 = vld [vmem:[#allocation3 + $0x78] sm:$0xf] }
 0x348   : > { %13304 = vmatmul.mubr.msk.bf16.gmra.mxu0 %vm18912_vm1, %v8449_v38  ;;  %v8462_v50 = vrot.slane %v8460_v59, 3  ;;  %v8465_v4 = vrot.slane %v8463_v27, 4  ;;  %v7755_v32 = vmul.bf16 %v7722_v26, %v19378_v52  ;;  %v8287_v16 = vmul.bf16 %v16806_v7, %v19334_v33  ;;  %v19380_v52 = vld [vmem:[#allocation84_spill] sm:$0xff] }
 0x349   : > { %13307 = vmatprep.mubr.msk.bf16.mxu0 %vm18912_vm1, %v8458_v35  ;;  %v8471_v41 = vrot.slane %v8469_v31, 3  ;;  %v8474_v15 = vrot.slane %v8472_v54, 4  ;;  %v7945_v57 = vshll.u32 %v12198_v56, 16  ;;  %v8288_v59 = vmul.bf16 %v16809_v36, %v19335_v23  ;;  %v7724_v31 = vld [vmem:[#allocation3 + $0x7c] sm:$0xf] }
 0x34a   : > { %v8466_v13 = vor.u32 %v8465_v4, %v8462_v50  ;;  %v12199_v55 = vcombine.low %v7754_v11, %v7755_v32  ;;  %v8289_v38 = vmul.bf16 %v16811_v40, %v19336_v37  ;;  %v7949_v27 = vshrl.u32 %v12198_v56, 16  ;;  %v7725_v4 = vld [vmem:[#allocation3 + $0x80] sm:$0xf]  ;;  %v7726_v11 = vld [vmem:[#allocation3 + $0x84] sm:$0xf] }
 0x34b   : > { %v8475_v62 = vor.u32 %v8474_v15, %v8471_v41  ;;  %v7947_v26 = vrot.slane %v7945_v57, 1  ;;  %v8290_v35 = vmul.bf16 %v16816_v8, %v19337_v25  ;;  %v12235_v33 = vcombine.low %v8287_v16, %v8288_v59  ;;  %v19381_v57 = vld [vmem:[#allocation86_spill] sm:$0xff]  ;;  %v19382_v59 = vld [vmem:[#allocation91_spill] sm:$0xff] }
 0x34c   : > { %v8467_v54 = vsel %vm2027_vm8, %v8457_v61, %v8466_v13  ;;  %v7953_v28 = vshll.u32 %v12199_v55, 16  ;;  %v7756_v50 = vmul.bf16 %v7723_v44, %v19380_v52  ;;  %v7957_v34 = vshrl.u32 %v12199_v55, 16  ;;  %v16832_v8 = vld [vmem:[#allocation3 + $0x6c] sm:$0xf]  ;;  %v19383_v52 = vld [vmem:[#allocation92_spill] sm:$0xff] }
 0x34d   : > { %v7948_v32 = vsel %vm3262_vm9, %v7943_v24, %v7947_v26  ;;  %v7951_v23 = vor.u32 %v7949_v27, %v7947_v26  ;;  %v12236_v37 = vcombine.low %v8289_v38, %v8290_v35  ;;  %v8478_v41 = vshrl.u32 %v12235_v33, 16  ;;  %v16838_v24 = vld [vmem:[#allocation3 + $0x74] sm:$0xf] }
 0x34e   : > { %13280 = vmatmul.mubr.msk.bf16.gmra.mxu1 %vm18912_vm1, %v7948_v32  ;;  %v7955_v56 = vrot.slane %v7953_v28, 1  ;;  %v8481_v15 = vshll.u32 %v12235_v33, 16  ;;  %v7757_v25 = vmul.bf16 %v7724_v31, %v19381_v57  ;;  %v7758_v44 = vmul.bf16 %v7725_v4, %v19382_v59  ;;  %v16845_v31 = vld [vmem:[#allocation3 + $0x78] sm:$0xf]  ;;  %v9134_v59 = vld [vmem:[#allocation3 + $0x1c] sm:$0xf] }
 0x34f   : > { %v8487_v61 = vshrl.u32 %v12236_v37, 16  ;;  %v8490_v16 = vshll.u32 %v12236_v37, 16  ;;  %v7759_v45 = vmul.bf16 %v7726_v11, %v19383_v52  ;;  %v8476_v55 = vsel %vm2027_vm8, %v8466_v13, %v8475_v62  ;;  %v7727_v11 = vld [vmem:[#allocation3 + $0x88] sm:$0x1] }
 0x350   : > { %13308 = vmatmul.mubr.msk.bf16.gmra.mxu0 %vm18912_vm1, %v8467_v54  ;;  %v7956_v33 = vsel %vm3262_vm9, %v7951_v23, %v7955_v56  ;;  %v8480_v28 = vrot.slane %v8478_v41, 3  ;;  %v8483_v38 = vrot.slane %v8481_v15, 4  ;;  %v12200_v27 = vcombine.low %v7756_v50, %v7757_v25 }
 0x351   : > { %13311 = vmatprep.mubr.msk.bf16.mxu0 %vm18912_vm1, %v8476_v55  ;;  %13283 = vmatprep.mubr.msk.bf16.mxu1 %vm18912_vm1, %v7956_v33  ;;  %v8489_v37 = vrot.slane %v8487_v61, 3  ;;  %v8492_v26 = vrot.slane %v8490_v16, 4  ;;  %v12201_v35 = vcombine.low %v7758_v44, %v7759_v45  ;;  %v8291_v54 = vmul.bf16 %v16832_v8, %v19338_v39  ;;  %v16856_v44 = vld [vmem:[#allocation3 + $0x7c] sm:$0xf] }
 0x352   : > { %v8484_v4 = vor.u32 %v8483_v38, %v8480_v28  ;;  %v8292_v13 = vmul.bf16 %v16836_v3, %v19339_v21  ;;  %v8293_v23 = vmul.bf16 %v16838_v24, %v19340_v14  ;;  %v7959_v32 = vor.u32 %v7957_v34, %v7955_v56  ;;  %v19384_v38 = vld [vmem:[#allocation97_spill] sm:$0xff] }
 0x353   : > { %v8493_v41 = vor.u32 %v8492_v26, %v8489_v37  ;;  %v7961_v15 = vshll.u32 %v12200_v27, 16  ;;  %v7969_v61 = vshll.u32 %v12201_v35, 16  ;;  %v7965_v45 = vshrl.u32 %v12200_v27, 16  ;;  %v16860_v26 = vld [vmem:[#allocation3 + $0x80] sm:$0xf] }
 0x354   : > { %v8485_v25 = vsel %vm2027_vm8, %v8475_v62, %v8484_v4  ;;  %v12237_v50 = vcombine.low %v8291_v54, %v8292_v13  ;;  %v8294_v16 = vmul.bf16 %v16845_v31, %v19341_v6  ;;  %v7973_v28 = vshrl.u32 %v12201_v35, 16  ;;  %v16865_v6 = vld [vmem:[#allocation3 + $0x84] sm:$0xf] }
 0x355   : > { %v7963_v55 = vrot.slane %v7961_v15, 1  ;;  %v7971_v33 = vrot.slane %v7969_v61, 1  ;;  %v7760_v21 = vmul.bf16 %v7727_v11, %v19384_v38  ;;  %v8494_v14 = vsel %vm2027_vm8, %v8484_v4, %v8493_v41 }
 0x356   : > { %v8496_v34 = vshrl.u32 %v12237_v50, 16  ;;  %v8499_v56 = vshll.u32 %v12237_v50, 16  ;;  %v12238_v37 = vcombine.low %v8293_v23, %v8294_v16  ;;  %v8295_v13 = vmul.bf16 %v16856_v44, %v19342_v58  ;;  %v16869_v23 = vld [vmem:[#allocation3 + $0x88] sm:$0xf] }
 0x357   : > { %v7964_v62 = vsel %vm3262_vm9, %v7959_v32, %v7963_v55  ;;  %v7967_v27 = vor.u32 %v7965_v45, %v7963_v55  ;;  %v12202_v54 = vcombine.low %v7760_v21, %v7760_v21  ;;  %v7975_v21 = vor.u32 %v7973_v28, %v7971_v33  ;;  %v19385_v55 = vld [vmem:[#allocation88_spill] sm:$0xff] }
 0x358   : > { %13312 = vmatmul.mubr.msk.bf16.gmra.mxu0 %vm18912_vm1, %v8485_v25  ;;  %13284 = vmatmul.mubr.msk.bf16.gmra.mxu1 %vm18912_vm1, %v7964_v62  ;;  %v8498_v35 = vrot.slane %v8496_v34, 3  ;;  %v8501_v4 = vrot.slane %v8499_v56, 4  ;;  %v8505_v11 = vshrl.u32 %v12238_v37, 16  ;;  %v8508_v15 = vshll.u32 %v12238_v37, 16  ;;  %v16878_v56 = vld [vmem:[#allocation3 + $0x8c] sm:$0xf] }
 0x359   : > { %13315 = vmatprep.mubr.msk.bf16.mxu0 %vm18912_vm1, %v8494_v14  ;;  %v7972_v32 = vsel %vm3262_vm9, %v7967_v27, %v7971_v33  ;;  %v7977_v61 = vshll.u32 %v12202_v54, 16  ;;  %v8296_v45 = vmul.bf16 %v16860_v26, %v19343_v47  ;;  %v8297_v34 = vmul.bf16 %v16865_v6, %v19385_v55  ;;  %v19386_v62 = vld [vmem:[#allocation90_spill] sm:$0xff]  ;;  %v9131_v27 = vld [vmem:[#allocation3 + $0x10] sm:$0xf]  ;;  %v9132_v33 = vld [vmem:[#allocation3 + $0x14] sm:$0xf] }
 0x35a   : > { %13287 = vmatprep.mubr.msk.bf16.mxu1 %vm18912_vm1, %v7972_v32  ;;  %v8502_v25 = vor.u32 %v8501_v4, %v8498_v35  ;;  %v8507_v50 = vrot.slane %v8505_v11, 3  ;;  %v8510_v16 = vrot.slane %v8508_v15, 4  ;;  %v8298_v14 = vmul.bf16 %v16869_v23, %v19386_v62  ;;  %v19387_v11 = vld [vmem:[#allocation87_spill] sm:$0xff]  ;;  %v19389_v62 = vld [vmem:[#allocation21_spill] sm:$0xff] }
 0x35b   : > { %v12239_v37 = vcombine.low %v8295_v13, %v8296_v45  ;;  %v7979_v54 = vrot.slane %v7977_v61, 1  ;;  %v12264_v47 = vcombine.low %v16645_v12, %v16647_v17  ;;  %v8299_v15 = vmul.bf16 %v16878_v56, %v19387_v11  ;;  %v19388_v45 = vld [vmem:[#allocation18_spill] sm:$0xff] }
 0x35c   : > { %v8511_v28 = vor.u32 %v8510_v16, %v8507_v50  ;;  %v12240_v4 = vcombine.low %v8297_v34, %v8298_v14  ;;  %v8503_v55 = vsel %vm2027_vm8, %v8493_v41, %v8502_v25  ;;  %v9164_v58 = vmul.bf16 %v9131_v27, %v19388_v45  ;;  %v19390_v14 = vld [vmem:[#allocation23_spill] sm:$0xff] }
 0x35d   : > { %v8514_v32 = vshrl.u32 %v12239_v37, 16  ;;  %v8517_v35 = vshll.u32 %v12239_v37, 16  ;;  %v7980_v13 = vsel %vm3262_vm9, %v7975_v21, %v7979_v54  ;;  %v9165_v39 = vmul.bf16 %v9132_v33, %v19389_v62  ;;  %v9133_v37 = vld [vmem:[#allocation3 + $0x18] sm:$0xf]  ;;  %v9136_v33 = vld [vmem:[#allocation3 + $0x24] sm:$0xf] }
 0x35e   : > { %v8523_v61 = vshrl.u32 %v12240_v4, 16  ;;  %v8526_v16 = vshll.u32 %v12240_v4, 16  ;;  %v8512_v12 = vsel %vm2027_vm8, %v8502_v25, %v8511_v28  ;;  %v12241_v34 = vcombine.low %v8299_v15, %v8299_v15 }
 0x35f   : > { %v8516_v38 = vrot.slane %v8514_v32, 3  ;;  %v8519_v50 = vrot.slane %v8517_v35, 4  ;;  %v12302_v17 = vcombine.low %v9164_v58, %v9165_v39  ;;  %v9167_v27 = vmul.bf16 %v9134_v59, %v19390_v14  ;;  %v9135_v32 = vld [vmem:[#allocation3 + $0x20] sm:$0xf] }
 0x360   : > { %13316 = vmatmul.mubr.msk.bf16.gmra.mxu0 %vm18912_vm1, %v8503_v55  ;;  %13288 = vmatmul.mubr.msk.bf16.gmra.mxu1 %vm18912_vm1, %v7980_v13  ;;  %v8525_v41 = vrot.slane %v8523_v61, 3  ;;  %v8528_v21 = vrot.slane %v8526_v16, 4  ;;  %v19391_v55 = vld [vmem:[#allocation22_spill] sm:$0xff]  ;;  %v8532_v45 = vshrl.u32 %v12241_v34, 16  ;;  %v8535_v13 = vshll.u32 %v12241_v34, 16  ;;  %v19392_v39 = vld [vmem:[#allocation25_spill] sm:$0xff] }
 0x361   : > { %13319 = vmatprep.mubr.msk.bf16.mxu0 %vm18912_vm1, %v8512_v12  ;;  %13331 = vmatprep.mubr.msk.bf16.mxu1 %vm18912_vm1, %v12264_v47  ;;  %v8520_v54 = vor.u32 %v8519_v50, %v8516_v38  ;;  %v9166_v4 = vmul.bf16 %v9133_v37, %v19391_v55  ;;  %v9288_v25 = vshll.u32 %v12302_v17, 16  ;;  %v9169_v58 = vmul.bf16 %v9136_v33, %v19392_v39  ;;  %v19393_v16 = vld [vmem:[#allocation24_spill] sm:$0xff]  ;;  %v13661_v59 = vld [vmem:[%s18679_s4 + $0x60] sm:$0xff]   ;;  %v9138_v50 = vld [vmem:[#allocation3 + $0x2c] sm:$0xf] }
 0x362   : > { %v8529_v35 = vor.u32 %v8528_v21, %v8525_v41  ;;  %v12265_v47 = vcombine.low %v16651_v51, %v16653_v9  ;;  %v9168_v15 = vmul.bf16 %v9135_v32, %v19393_v16  ;;  %v12266_v41 = vcombine.low %v16662_v49, %v16687_v19  ;;  %v9137_v37 = vld [vmem:[#allocation3 + $0x28] sm:$0xf]  ;;  %v9139_v19 = vld [vmem:[#allocation3 + $0x30] sm:$0xf] }
 0x363   : > { %v12303_v61 = vcombine.low %v9166_v4, %v9167_v27  ;;  %v8521_v38 = vsel %vm2027_vm8, %v8511_v28, %v8520_v54  ;;  %v9290_v51 = vrot.slane %v9288_v25, 1  ;;  %v8534_v21 = vrot.slane %v8532_v45, 3  ;;  %v9140_v28 = vld [vmem:[#allocation3 + $0x34] sm:$0xf]  ;;  %v16917_v49 = vld [vmem:[%s18679_s4 + $0x88] sm:$0xff]   ;;  %v19394_v45 = vld [vmem:[#allocation33_spill] sm:$0xff] }
 0x364   : > { %v8530_v12 = vsel %vm2027_vm8, %v8520_v54, %v8529_v35  ;;  %v12304_v9 = vcombine.low %v9168_v15, %v9169_v58  ;;  %v8537_v34 = vrot.slane %v8535_v13, 4  ;;  %v9286_v27 = vshrl.u32 %v12302_v17, 16  ;;  %v19395_v17 = vld [vmem:[#allocation120_spill] sm:$0xff] }
 0x365   : > { %v9293_v33 = vshll.u32 %v12303_v61, 16  ;;  %v9171_v54 = vmul.bf16 %v9138_v50, %v19353_v53  ;;  %v9173_v25 = vmul.bf16 %v9140_v28, %v19394_v45  ;;  %vm13824_vm0 = vmmov 0  }
 0x366   : > { %v9291_v32 = vor.u32 %v9290_v51, %v9286_v27  ;;  %v9301_v4 = vshll.u32 %v12304_v9, 16  ;;  %v8538_v13 = vor.u32 %v8537_v34, %v8534_v21  ;;  %v9142_v51 = vld [vmem:[#allocation3 + $0x3c] sm:$0xf]  ;;  %v9305_v28 = vshrl.u32 %v12304_v9, 16  ;;  %v19397_v27 = vld [vmem:[#allocation39_spill] sm:$0xff] }
 0x367   : > { %v9295_v58 = vrot.slane %v9293_v33, 1  ;;  %v9175_v33 = vmul.bf16 %v9142_v51, %v19397_v27  ;;  %v9146_v51 = vld [vmem:[#allocation3 + $0x4c] sm:$0xf] }
 0x368   : > { %13320 = vmatmul.mubr.msk.bf16.gmra.mxu0 %vm18912_vm1, %v8521_v38  ;;  %13332 = vmatmul.mubr.msk.bf16.vlgmr.msra.gmra.mxu1 %vm18912_vm1, %v12265_v47  ;;  %v12267_v47 = vcombine.low %v19395_v17, %v16708_v46  ;;  %v19396_v38 = vld [vmem:[#allocation32_spill] sm:$0xff]  ;;  %v19399_v17 = vld [vmem:[#allocation73_spill] sm:$0xff] }
 0x369   : > { %13323 = vmatprep.mubr.msk.bf16.mxu0 %vm18912_vm1, %v8530_v12  ;;  %13400 = vmatpush3.bf16.msra.mxu1 %v16692_v60  ;;  %v9170_v60 = vmul.bf16 %v9137_v37, %v19352_v22  ;;  %v9172_v50 = vmul.bf16 %v9139_v19, %v19396_v38  ;;  %v8539_v12 = vsel %vm2027_vm8, %v8529_v35, %v8538_v13  ;;  %v9141_v46 = vld [vmem:[#allocation3 + $0x38] sm:$0xf]  ;;  %v9144_v37 = vld [vmem:[#allocation3 + $0x44] sm:$0xf] }
 0x36a   : > { %13335 = vmatprep.mubr.msk.bf16.mxu1 %vm18912_vm1, %v12266_v41  ;;  %13401 = vmatprep.subr.bf16.mxu1 %v13661_v59  ;;  %v12268_v41 = vcombine.low %v16712_v5, %v16716_v29  ;;  %v9296_v21 = vsel %vm3262_vm9, %v9291_v32, %v9295_v58  ;;  %v9297_v5 = vshrl.u32 %v12303_v61, 16  ;;  %v9143_v29 = vld [vmem:[#allocation3 + $0x40] sm:$0xf]  ;;  %v9177_v13 = vmul.bf16 %v9144_v37, %v19362_v63  ;;  %v9148_v37 = vld [vmem:[#allocation3 + $0x54] sm:$0xf] }
 0x36b   : > { %v12305_v15 = vcombine.low %v9170_v60, %v9171_v54  ;;  %v12306_v34 = vcombine.low %v9172_v50, %v9173_v25  ;;  %v19398_v60 = vld [vmem:[#allocation38_spill] sm:$0xff]  ;;  %v12270_v61 = vcombine.low %v16741_v20, %v16743_v48 }
 0x36c   : > { %v9174_v32 = vmul.bf16 %v9141_v46, %v19398_v60 }
 0x36d   : > { %13402 = vmatpush3.bf16.msra.mxu1 %v13661_v59  ;;  %v9303_v59 = vrot.slane %v9301_v4, 1  ;;  %v9309_v35 = vshll.u32 %v12305_v15, 16  ;;  %v9317_v19 = vshll.u32 %v12306_v34, 16  ;;  %v9299_v4 = vor.u32 %v9297_v5, %v9295_v58 }
 0x36e   : > { %13471 = vmatprep.subr.bf16.mxu1 %v16917_v49  ;;  %v12307_v50 = vcombine.low %v9174_v32, %v9175_v33  ;;  %v9321_v20 = vshrl.u32 %v12306_v34, 16  ;;  %v9147_v33 = vld [vmem:[#allocation3 + $0x50] sm:$0xf]  ;;  %v9313_v5 = vshrl.u32 %v12305_v15, 16  ;;  %v19402_v32 = vld [vmem:[#allocation46_spill] sm:$0xff]  ;;  %v12272_v15 = vcombine.low %v16780_v2, %v16787_v0 }
 0x36f   : > { %v9307_v54 = vor.u32 %v9305_v28, %v9303_v59  ;;  %v9311_v25 = vrot.slane %v9309_v35, 1  ;;  %v9304_v9 = vsel %vm3262_vm9, %v9299_v4, %v9303_v59  ;;  %v9145_v59 = vld [vmem:[#allocation3 + $0x48] sm:$0xf]  ;;  %v19401_v28 = vld [vmem:[#allocation47_spill] sm:$0xff] }
 0x370   : > { %13324 = vmatmul.mubr.msk.bf16.gmra.mxu0 %vm18912_vm1, %v8539_v12  ;;  %13336 = vmatmul.mubr.msk.bf16.gmra.mxu1 %vm18912_vm1, %v12267_v47  ;;  %v12269_v47 = vcombine.low %v19399_v17, %v16736_v30  ;;  %v19400_v12 = vld [vmem:[#allocation40_spill] sm:$0xff]  ;;  %v9319_v30 = vrot.slane %v9317_v19, 1  ;;  %v9325_v48 = vshll.u32 %v12307_v50, 16  ;;  %v9179_v35 = vmul.bf16 %v9146_v51, %v19401_v28  ;;  %v19403_v34 = vld [vmem:[#allocation126_spill] sm:$0xff] }
 0x371   : > { %13367 = vmatprep.mubr.msk.bf16.mxu0 %vm18912_vm1, %v9296_v21  ;;  %13339 = vmatprep.mubr.msk.bf16.mxu1 %vm18912_vm1, %v12268_v41  ;;  %v9176_v41 = vmul.bf16 %v9143_v29, %v19400_v12  ;;  %v13673_v21 = vld [vmem:[%s18679_s4 + $0x70] sm:$0xff]   ;;  %v9312_v58 = vsel %vm3262_vm9, %v9307_v54, %v9311_v25  ;;  %v9181_v29 = vmul.bf16 %v9148_v37, %v19366_v43  ;;  %v9149_v37 = vld [vmem:[#allocation3 + $0x58] sm:$0xf]  ;;  %v9329_v2 = vshrl.u32 %v12307_v50, 16  ;;  %v19428_v28 = vld [vmem:[#allocation34_spill] sm:$0xff] }
 0x372   : > { %v9323_v54 = vor.u32 %v9321_v20, %v9319_v30  ;;  %v9315_v4 = vor.u32 %v9313_v5, %v9311_v25  ;;  %v9180_v17 = vmul.bf16 %v9147_v33, %v19367_v10  ;;  %v19406_v5 = vld [vmem:[#allocation59_spill] sm:$0xff]  ;;  %v12274_v50 = vcombine.low %v16809_v36, %v16811_v40  ;;  %v16983_v36 = vld [vmem:[#allocation3 + $0x20] sm:$0xf] }
 0x373   : > { %v12308_v46 = vcombine.low %v9176_v41, %v9177_v13  ;;  %v9178_v13 = vmul.bf16 %v9145_v59, %v19402_v32  ;;  %v12271_v41 = vcombine.low %v19403_v34, %v16775_v1  ;;  %v9152_v59 = vld [vmem:[#allocation3 + $0x64] sm:$0xf]  ;;  %v19404_v1 = vld [vmem:[#allocation55_spill] sm:$0xff] }
 0x374   : > { %v12310_v51 = vcombine.low %v9180_v17, %v9181_v29  ;;  %v9185_v29 = vmul.bf16 %v9152_v59, %v19406_v5  ;;  %v19425_v10 = vld [vmem:[#allocation91_spill] sm:$0xff] }
 0x375   : > { %v9333_v19 = vshll.u32 %v12308_v46, 16  ;;  %v9163_v43 = vld [vmem:[#allocation3 + $0x90] sm:$0x1] }
 0x376   : > { %v9349_v0 = vshll.u32 %v12310_v51, 16 }
 0x377   : > { %v9335_v25 = vrot.slane %v9333_v19, 1 }
 0x378   : > { %13368 = vmatmul.mubr.msk.bf16.vlgmr.msra.gmra.mxu0 %vm18912_vm1, %v9304_v9  ;;  %13340 = vmatmul.mubr.msk.bf16.gmra.mxu1 %vm18912_vm1, %v12269_v47  ;;  %v9327_v47 = vrot.slane %v9325_v48, 1  ;;  %v12309_v9 = vcombine.low %v9178_v13, %v9179_v35  ;;  %v9151_v48 = vld [vmem:[#allocation3 + $0x60] sm:$0xf]  ;;  %v19405_v35 = vld [vmem:[#allocation54_spill] sm:$0xff] }
 0x379   : > { %13371 = vmatprep.mubr.msk.bf16.mxu0 %vm18912_vm1, %v9312_v58  ;;  %13343 = vmatprep.mubr.msk.bf16.mxu1 %vm18912_vm1, %v12270_v61  ;;  %v9150_v61 = vld [vmem:[#allocation3 + $0x5c] sm:$0xf]  ;;  %v9182_v33 = vmul.bf16 %v9149_v37, %v19405_v35  ;;  %v9156_v37 = vld [vmem:[#allocation3 + $0x74] sm:$0xf] }
 0x37a   : > { %13436 = vmatpush3.bf16.msra.mxu0 %v16771_v18  ;;  %v9320_v18 = vsel %vm3262_vm9, %v9315_v4, %v9319_v30  ;;  %v9328_v58 = vsel %vm3262_vm9, %v9323_v54, %v9327_v47  ;;  %v9337_v30 = vshrl.u32 %v12308_v46, 16  ;;  %v9341_v20 = vshll.u32 %v12309_v9, 16  ;;  %v19407_v4 = vld [vmem:[#allocation57_spill] sm:$0xff] }
 0x37b   : > { %13437 = vmatprep.subr.bf16.mxu0 %v13673_v21  ;;  %v9331_v13 = vor.u32 %v9329_v2, %v9327_v47  ;;  %v9184_v17 = vmul.bf16 %v9151_v48, %v19407_v4  ;;  %v9345_v40 = vshrl.u32 %v12309_v9, 16  ;;  %v19409_v48 = vld [vmem:[#allocation66_spill] sm:$0xff]  ;;  %v9158_v9 = vld [vmem:[#allocation3 + $0x7c] sm:$0xf] }
 0x37c   : > { %v9339_v54 = vor.u32 %v9337_v30, %v9335_v25  ;;  %v9343_v34 = vrot.slane %v9341_v20, 1 }
 0x37d   : > { %v9336_v46 = vsel %vm3262_vm9, %v9331_v13, %v9335_v25  ;;  %v19408_v25 = vld [vmem:[#allocation68_spill] sm:$0xff]  ;;  %v19411_v13 = vld [vmem:[#allocation17_spill] sm:$0xff] }
 0x37e   : > { %13438 = vmatpush3.bf16.msra.mxu0 %v13673_v21  ;;  %v9183_v21 = vmul.bf16 %v9150_v61, %v19404_v1  ;;  %v9154_v61 = vld [vmem:[#allocation3 + $0x6c] sm:$0xf]  ;;  %v9344_v47 = vsel %vm3262_vm9, %v9339_v54, %v9343_v34  ;;  %v16987_v54 = vld [vmem:[#allocation3 + $0x1c] sm:$0xf] }
 0x37f   : > { %v9187_v59 = vmul.bf16 %v9154_v61, %v19408_v25  ;;  %v19412_v61 = vld [vmem:[#allocation70_spill] sm:$0xff] }
 0x380   : > { %13372 = vmatmul.mubr.msk.bf16.gmra.mxu0 %vm18912_vm1, %v9320_v18  ;;  %13344 = vmatmul.mubr.msk.bf16.gmra.mxu1 %vm18912_vm1, %v12271_v41  ;;  %v16968_v19 = vcombine.low %v9182_v33, %v9183_v21  ;;  %v12273_v41 = vcombine.low %v16789_v42, %v16806_v7  ;;  %v9351_v18 = vrot.slane %v9349_v0, 1  ;;  %v9353_v42 = vshrl.u32 %v12310_v51, 16  ;;  %v9155_v21 = vld [vmem:[#allocation3 + $0x70] sm:$0xf]  ;;  %v19410_v0 = vld [vmem:[#allocation72_spill] sm:$0xff] }
 0x381   : > { %13375 = vmatprep.mubr.msk.bf16.mxu0 %vm18912_vm1, %v9328_v58  ;;  %13347 = vmatprep.mubr.msk.bf16.mxu1 %vm18912_vm1, %v12272_v15  ;;  %v12312_v15 = vcombine.low %v9184_v17, %v9185_v29  ;;  %v9153_v58 = vld [vmem:[#allocation3 + $0x68] sm:$0xf]  ;;  %v9189_v33 = vmul.bf16 %v9156_v37, %v19410_v0  ;;  %v9670_v29 = vld [vmem:[#allocation3 + $0x14] sm:$0x8]  ;;  %v9706_v51 = vmul.bf16 %v16983_v36, %v19411_v13  ;;  %v17000_v0 = vld [vmem:[#allocation3 + $0x24] sm:$0xf] }
 0x382   : > { %v9357_v7 = vshll.u32 %v16968_v19, 16  ;;  %v9355_v30 = vor.u32 %v9353_v42, %v9351_v18  ;;  %v9186_v2 = vmul.bf16 %v9153_v58, %v19409_v48  ;;  %v9347_v17 = vor.u32 %v9345_v40, %v9343_v34  ;;  %v19413_v42 = vld [vmem:[#allocation83_spill] sm:$0xff]  ;;  %v19414_v48 = vld [vmem:[#allocation14_spill] sm:$0xff]  ;;  %v19415_v13 = vld [vmem:[#allocation16_spill] sm:$0xff] }
 0x383   : > { %v9365_v20 = vshll.u32 %v12312_v15, 16  ;;  %v12275_v58 = vcombine.low %v19413_v42, %v16832_v8  ;;  %v12276_v37 = vcombine.low %v16836_v3, %v16838_v24  ;;  %v9703_v25 = vmul.bf16 %v9670_v29, %v19414_v48  ;;  %v19416_v3 = vld [vmem:[#allocation81_spill] sm:$0xff]  ;;  %v17012_v24 = vld [vmem:[#allocation3 + $0x28] sm:$0xf]  ;;  %v19417_v48 = vld [vmem:[#allocation15_spill] sm:$0xff] }
 0x384   : > { %v9705_v34 = vmul.bf16 %v16987_v54, %v19415_v13  ;;  %v9191_v8 = vmul.bf16 %v9158_v9, %v19416_v3  ;;  %v12277_v9 = vcombine.low %v16845_v31, %v16856_v44  ;;  %v9159_v3 = vld [vmem:[#allocation3 + $0x80] sm:$0xf] }
 0x385   : > { %v9367_v40 = vrot.slane %v9365_v20, 1 }
 0x386   : > { %v12342_v42 = vcombine.low %v9705_v34, %v9706_v51  ;;  %v12278_v51 = vcombine.low %v16860_v26, %v16865_v6  ;;  %v17039_v26 = vld [vmem:[#allocation3 + $0x2c] sm:$0xf] }
 0x388   : > { %13376 = vmatmul.mubr.msk.bf16.gmra.mxu0 %vm18912_vm1, %v9336_v46  ;;  %13348 = vmatmul.mubr.msk.bf16.gmra.mxu1 %vm18912_vm1, %v12273_v41  ;;  %v9359_v41 = vrot.slane %v9357_v7, 1  ;;  %v16991_v46 = vcombine.low %v9186_v2, %v9187_v59  ;;  %v9352_v7 = vsel %vm3262_vm9, %v9347_v17, %v9351_v18  ;;  %v9157_v2 = vld [vmem:[#allocation3 + $0x78] sm:$0xf]  ;;  %v9361_v18 = vshrl.u32 %v16968_v19, 16  ;;  %v19418_v17 = vld [vmem:[#allocation19_spill] sm:$0xff] }
 0x389   : > { %13379 = vmatprep.mubr.msk.bf16.mxu0 %vm18912_vm1, %v9344_v47  ;;  %13351 = vmatprep.mubr.msk.bf16.mxu1 %vm18912_vm1, %v12274_v50  ;;  %v9188_v50 = vmul.bf16 %v9155_v21, %v19412_v61  ;;  %v16994_v47 = vld [vmem:[#allocation3 + $0x18] sm:$0xf]  ;;  %v9833_v6 = vshrl.u32 %v12342_v42, 16  ;;  %v9836_v44 = vshll.u32 %v12342_v42, 16 }
 0x38a   : > { %v9360_v59 = vsel %vm3262_vm9, %v9355_v30, %v9359_v41  ;;  %v9704_v29 = vmul.bf16 %v16994_v47, %v19417_v48  ;;  %v9369_v30 = vshrl.u32 %v12312_v15, 16  ;;  %v9373_v20 = vshll.u32 %v16991_v46, 16  ;;  %v19420_v61 = vld [vmem:[#allocation20_spill] sm:$0xff] }
 0x38b   : > { %v17007_v21 = vcombine.low %v9188_v50, %v9189_v33  ;;  %v9160_v33 = vld [vmem:[#allocation3 + $0x84] sm:$0xf]  ;;  %v9707_v50 = vmul.bf16 %v17000_v0, %v19418_v17  ;;  %v9363_v15 = vor.u32 %v9361_v18, %v9359_v41  ;;  %v9708_v17 = vmul.bf16 %v17012_v24, %v19420_v61  ;;  %v19421_v41 = vld [vmem:[#allocation27_spill] sm:$0xff] }
 0x38c   : > { %v12341_v19 = vcombine.low %v9703_v25, %v9704_v29  ;;  %v9193_v31 = vmul.bf16 %v9160_v33, %v19381_v57  ;;  %v9375_v25 = vrot.slane %v9373_v20, 1  ;;  %v9161_v57 = vld [vmem:[#allocation3 + $0x88] sm:$0xf] }
 0x38d   : > { %v9381_v48 = vshll.u32 %v17007_v21, 16  ;;  %v12343_v29 = vcombine.low %v9707_v50, %v9708_v17  ;;  %v9368_v42 = vsel %vm3262_vm9, %v9363_v15, %v9367_v40  ;;  %v17052_v17 = vld [vmem:[#allocation3 + $0x34] sm:$0xf]  ;;  %v12279_v15 = vcombine.low %v16869_v23, %v16878_v56 }
 0x38e   : > { %v9825_v61 = vshrl.u32 %v12341_v19, 16  ;;  %v9194_v23 = vmul.bf16 %v9161_v57, %v19425_v10  ;;  %v19426_v56 = vld [vmem:[#allocation35_spill] sm:$0xff] }
 0x38f   : > { %v17016_v13 = vpop.f32.mrf.mxu1  ;;  %v9383_v20 = vrot.slane %v9381_v48, 1  ;;  %v9842_v48 = vshrl.u32 %v12343_v29, 16 }
 0x390   : > { %13380 = vmatmul.mubr.msk.bf16.gmra.mxu0 %vm18912_vm1, %v9352_v7  ;;  %13352 = vmatmul.mubr.msk.bf16.gmra.mxu1 %vm18912_vm1, %v12275_v58  ;;  %v19419_v58 = vld [vmem:[#allocation80_spill] sm:$0xff]  ;;  %v17029_v7 = vld [vmem:[#allocation3 + $0x30] sm:$0xf] }
 0x391   : > { %13383 = vmatprep.mubr.msk.bf16.mxu0 %vm18912_vm1, %v9360_v59  ;;  %13355 = vmatprep.mubr.msk.bf16.mxu1 %vm18912_vm1, %v12276_v37  ;;  %v9190_v34 = vmul.bf16 %v9157_v2, %v19419_v58  ;;  %v17031_v59 = vpop.f32.mrf.mxu1  ;;  %v9371_v37 = vor.u32 %v9369_v30, %v9367_v40  ;;  %v9377_v2 = vshrl.u32 %v16991_v46, 16  ;;  %v9710_v18 = vmul.bf16 %v17029_v7, %v19421_v41  ;;  %v19422_v58 = vld [vmem:[#allocation84_spill] sm:$0xff]  ;;  %v19423_v46 = vld [vmem:[#allocation26_spill] sm:$0xff]  ;;  %v17059_v40 = vld [vmem:[#allocation3 + $0x40] sm:$0xf] }
 0x392   : > { %v9385_v30 = vshrl.u32 %v17007_v21, 16  ;;  %v9192_v5 = vmul.bf16 %v9159_v3, %v19422_v58  ;;  %v9709_v50 = vmul.bf16 %v17039_v26, %v19423_v46  ;;  %v9838_v41 = vrot.slane %v9836_v44, 4  ;;  %v19424_v44 = vld [vmem:[#allocation28_spill] sm:$0xff] }
 0x393   : > { %v17036_v4 = vcombine.low %v9190_v34, %v9191_v8  ;;  %v9828_v8 = vshll.u32 %v12341_v19, 16  ;;  %v9162_v34 = vld [vmem:[#allocation3 + $0x8c] sm:$0xf]  ;;  %v17046_v35 = vpop.f32.mrf.mxu1  ;;  %v9376_v33 = vsel %vm3262_vm9, %v9371_v37, %v9375_v25  ;;  %v9835_v19 = vrot.slane %v9833_v6, 3 }
 0x394   : > { %v17057_v3 = vcombine.low %v9192_v5, %v9193_v31  ;;  %v9195_v37 = vmul.bf16 %v9162_v34, %v19383_v52  ;;  %v9827_v46 = vrot.slane %v9825_v61, 3  ;;  %v9845_v31 = vshll.u32 %v12343_v29, 16 }
 0x395   : > { %v9389_v21 = vshll.u32 %v17036_v4, 16  ;;  %v9830_v5 = vrot.slane %v9828_v8, 4  ;;  %v17068_v6 = vpop.f32.mrf.mxu1  ;;  %v9711_v58 = vmul.bf16 %v17052_v17, %v19424_v44  ;;  %v9387_v1 = vor.u32 %v9385_v30, %v9383_v20  ;;  %v19427_v8 = vld [vmem:[#allocation29_spill] sm:$0xff] }
 0x396   : > { %v9714_v34 = vmul.bf16 %v17059_v40, %v19426_v56  ;;  %v9839_v61 = vor.u32 %v9838_v41, %v9835_v19  ;;  %v17080_v52 = vcombine.low %v9194_v23, %v9195_v37  ;;  %v9844_v57 = vrot.slane %v9842_v48, 3 }
 0x397   : > { %v9847_v30 = vrot.slane %v9845_v31, 4  ;;  %v9393_v19 = vshrl.u32 %v17036_v4, 16  ;;  %v17095_v31 = vld [vmem:[#allocation3 + $0x44] sm:$0xf] }
 0x398   : > { %13384 = vmatmul.mubr.msk.bf16.gmra.mxu0 %vm18912_vm1, %v9368_v42  ;;  %13356 = vmatmul.mubr.msk.bf16.gmra.mxu1 %vm18912_vm1, %v12277_v9  ;;  %v12344_v42 = vcombine.low %v9709_v50, %v9710_v18  ;;  %v17066_v9 = vld [vmem:[#allocation3 + $0x38] sm:$0xf]  ;;  %v9391_v18 = vrot.slane %v9389_v21, 1  ;;  %v9397_v50 = vshll.u32 %v17057_v3, 16  ;;  %v9405_v4 = vshll.u32 %v17080_v52, 16 }
 0x399   : > { %13387 = vmatprep.mubr.msk.bf16.mxu0 %vm18912_vm1, %v9376_v33  ;;  %13359 = vmatprep.mubr.msk.bf16.mxu1 %vm18912_vm1, %v12278_v51  ;;  %v17072_v33 = vld [vmem:[#allocation3 + $0x3c] sm:$0xf]  ;;  %v9379_v51 = vor.u32 %v9377_v2, %v9375_v25  ;;  %v9712_v29 = vmul.bf16 %v17066_v9, %v19427_v8  ;;  %v9831_v2 = vor.u32 %v9830_v5, %v9827_v46  ;;  %v19429_v46 = vld [vmem:[#allocation97_spill] sm:$0xff] }
 0x39a   : > { %v9851_v44 = vshrl.u32 %v12344_v42, 16  ;;  %v9854_v32 = vshll.u32 %v12344_v42, 16  ;;  %v9713_v25 = vmul.bf16 %v17072_v33, %v19428_v28  ;;  %v9392_v37 = vsel %vm3262_vm9, %v9387_v1, %v9391_v18 }
 0x39b   : > { %v12345_v21 = vcombine.low %v9711_v58, %v9712_v29  ;;  %v9384_v56 = vsel %vm3262_vm9, %v9379_v51, %v9383_v20  ;;  %v9399_v42 = vrot.slane %v9397_v50, 1  ;;  %v9840_v28 = vsel %vm2027_vm8, %v9831_v2, %v9839_v61  ;;  %v17100_v51 = vld [vmem:[#allocation3 + $0x50] sm:$0xf]  ;;  %v17105_v29 = vld [vmem:[#allocation3 + $0x48] sm:$0xf] }
 0x39c   : > { %v12346_v41 = vcombine.low %v9713_v25, %v9714_v34  ;;  %v9196_v48 = vmul.bf16 %v9163_v43, %v19429_v46  ;;  %v9395_v58 = vor.u32 %v9393_v19, %v9391_v18  ;;  %v9853_v20 = vrot.slane %v9851_v44, 3  ;;  %v17112_v44 = vld [vmem:[#allocation3 + $0x4c] sm:$0xf]  ;;  %v19432_v19 = vld [vmem:[#allocation43_spill] sm:$0xff] }
 0x39d   : > { %v17084_v10 = vpop.f32.mrf.mxu1  ;;  %v9856_v1 = vrot.slane %v9854_v32, 4  ;;  %v9848_v23 = vor.u32 %v9847_v30, %v9844_v57  ;;  %v9860_v34 = vshrl.u32 %v12345_v21, 16  ;;  %v9863_v43 = vshll.u32 %v12345_v21, 16 }
 0x39e   : > { %v9869_v25 = vshrl.u32 %v12346_v41, 16  ;;  %v9872_v2 = vshll.u32 %v12346_v41, 16  ;;  %v12318_v30 = vcombine.low %v9196_v48, %v9196_v48  ;;  %v19434_v41 = vld [vmem:[#allocation37_spill] sm:$0xff]  ;;  %v19435_v48 = vld [vmem:[#allocation42_spill] sm:$0xff] }
 0x39f   : > { %v17093_v5 = vpop.f32.mrf.mxu1  ;;  %v9857_v46 = vor.u32 %v9856_v1, %v9853_v20  ;;  %v9849_v12 = vsel %vm2027_vm8, %v9839_v61, %v9848_v23  ;;  %v9862_v63 = vrot.slane %v9860_v34, 3  ;;  %v9409_v34 = vshrl.u32 %v17080_v52, 16 }
 0x3a0   : > { %13388 = vmatmul.mubr.msk.bf16.gmra.mxu0 %vm18912_vm1, %v9384_v56  ;;  %13360 = vmatmul.mubr.msk.bf16.gmra.mxu1 %vm18912_vm1, %v12279_v15  ;;  %v9401_v15 = vshrl.u32 %v17057_v3, 16  ;;  %v19431_v56 = vld [vmem:[#allocation36_spill] sm:$0xff]  ;;  %v9400_v3 = vsel %vm3262_vm9, %v9395_v58, %v9399_v42  ;;  %v9865_v58 = vrot.slane %v9863_v43, 4  ;;  %v9871_v20 = vrot.slane %v9869_v25, 3 }
 0x3a1   : > { %13391 = vmatprep.mubr.msk.bf16.mxu0 %vm18912_vm1, %v9392_v37  ;;  %13403 = vmatprep.mubr.msk.bf16.mxu1 %vm18912_vm1, %v9840_v28  ;;  %v17103_v8 = vpop.f32.mrf.mxu1  ;;  %v9715_v32 = vmul.bf16 %v17095_v31, %v19431_v56  ;;  %v9718_v37 = vmul.bf16 %v17100_v51, %v19432_v19  ;;  %v9407_v28 = vrot.slane %v9405_v4, 1  ;;  %v9716_v56 = vmul.bf16 %v17105_v29, %v19434_v41  ;;  %v13679_v4 = vld [vmem:[%s18679_s4 + $0x80] sm:$0xff]   ;;  %v17133_v19 = vld [vmem:[#allocation3 + $0x54] sm:$0xf] }
 0x3a2   : > { %v13225_v50 = vpop.f32.mrf.mxu0  ;;  %v9403_v57 = vor.u32 %v9401_v15, %v9399_v42  ;;  %v9717_v15 = vmul.bf16 %v17112_v44, %v19435_v48  ;;  %v9413_v25 = vshll.u32 %v12318_v30, 16 }
 0x3a3   : > { %v17108_v18 = vadd.f32 %v13225_v50, %v17016_v13  ;;  %v17120_v50 = vpop.f32.mrf.mxu1  ;;  %v9411_v52 = vor.u32 %v9409_v34, %v9407_v28 }
 0x3a4   : > { %v7568_v21 = vpop.f32.mrf.mxu0  ;;  %v9408_v61 = vsel %vm3262_vm9, %v9403_v57, %v9407_v28  ;;  %v12348_v41 = vcombine.low %v9717_v15, %v9718_v37  ;;  %v17149_v57 = vld [vmem:[#allocation3 + $0x60] sm:$0xf]  ;;  %v19440_v28 = vld [vmem:[#allocation51_spill] sm:$0xff] }
 0x3a5   : > { %19430 = vst [vmem:[#allocation133_spill] sm:$0xff] %v17108_v18  ;;  %v17118_v13 = vadd.f32 %v7568_v21, %v17031_v59  ;;  %v9874_v59 = vrot.slane %v9872_v2, 4  ;;  %v12347_v21 = vcombine.low %v9715_v32, %v9716_v56  ;;  %v9722_v34 = vmul.bf16 %v17149_v57, %v19440_v28  ;;  %v17173_v28 = vld [vmem:[#allocation3 + $0x64] sm:$0xf]  ;;  %v17208_v18 = vld [vmem:[#allocation3 + $0x74] sm:$0xf] }
 0x3a6   : > { %v13226_v42 = vpop.f32.mrf.mxu0  ;;  %v9887_v48 = vshrl.u32 %v12348_v41, 16  ;;  %v9890_v15 = vshll.u32 %v12348_v41, 16 }
 0x3a7   : > { %19433 = vst [vmem:[#allocation94_spill] sm:$0xff] %v17118_v13  ;;  %v17131_v1 = vadd.f32 %v13226_v42, %v17046_v35  ;;  %v9858_v35 = vsel %vm2027_vm8, %v9848_v23, %v9857_v46  ;;  %v9875_v30 = vor.u32 %v9874_v59, %v9871_v20  ;;  %v9878_v56 = vshrl.u32 %v12347_v21, 16  ;;  %v19441_v59 = vld [vmem:[#allocation50_spill] sm:$0xff] }
 0x3a8   : > { %13392 = vmatmul.mubr.msk.bf16.gmra.mxu0 %vm18912_vm1, %v9400_v3  ;;  %13404 = vmatmul.mubr.msk.bf16.vlgmr.msra.gmra.mxu1 %vm18912_vm1, %v9849_v12  ;;  %v7571_v43 = vpop.f32.mrf.mxu0  ;;  %v17147_v3 = vld [vmem:[#allocation3 + $0x58] sm:$0xf]  ;;  %v9881_v23 = vshll.u32 %v12347_v21, 16 }
 0x3a9   : > { %19436 = vst [vmem:[#allocation99_spill] sm:$0xff] %v17131_v1  ;;  %13395 = vmatprep.mubr.msk.bf16.mxu0 %vm18912_vm1, %v9408_v61  ;;  %13472 = vmatpush3.bf16.msra.mxu1 %v16917_v49  ;;  %v17143_v2 = vadd.f32 %v7571_v43, %v17068_v6  ;;  %v17145_v32 = vpop.f32.mrf.mxu1  ;;  %v19438_v12 = vld [vmem:[#allocation44_spill] sm:$0xff]  ;;  %v9866_v49 = vor.u32 %v9865_v58, %v9862_v63  ;;  %v19439_v61 = vld [vmem:[#allocation45_spill] sm:$0xff] }
 0x3aa   : > { %13407 = vmatprep.mubr.msk.bf16.mxu1 %vm18912_vm1, %v9858_v35  ;;  %v9719_v37 = vmul.bf16 %v17133_v19, %v19438_v12  ;;  %13473 = vmatprep.subr.bf16.mxu1 %v13679_v4  ;;  %v17156_v6 = vld [vmem:[#allocation3 + $0x5c] sm:$0xf]  ;;  %v9720_v43 = vmul.bf16 %v17147_v3, %v19439_v61  ;;  %v9415_v35 = vrot.slane %v9413_v25, 1  ;;  %v12380_v63 = vcombine.low %v16994_v47, %v16987_v54 }
 0x3ab   : > { %19437 = vst [vmem:[#allocation101_spill] sm:$0xff] %v17143_v2  ;;  %v17154_v42 = vpop.f32.mrf.mxu1  ;;  %v9721_v21 = vmul.bf16 %v17156_v6, %v19441_v59  ;;  %v9867_v41 = vsel %vm2027_vm8, %v9857_v46, %v9866_v49  ;;  %v9880_v2 = vrot.slane %v9878_v56, 3  ;;  %v9883_v61 = vrot.slane %v9881_v23, 4  ;;  %v17181_v23 = vld [vmem:[#allocation3 + $0x68] sm:$0xf] }
 0x3ac   : > { %v12349_v20 = vcombine.low %v9719_v37, %v9720_v43  ;;  %v9416_v12 = vsel %vm3262_vm9, %v9411_v52, %v9415_v35  ;;  %v9889_v25 = vrot.slane %v9887_v48, 3  ;;  %v9892_v54 = vrot.slane %v9890_v15, 4  ;;  %v17177_v52 = vld [vmem:[#allocation3 + $0x70] sm:$0xf]  ;;  %v19442_v35 = vld [vmem:[#allocation52_spill] sm:$0xff] }
 0x3ad   : > { %13474 = vmatpush3.bf16.msra.mxu1 %v13679_v4  ;;  %v17164_v58 = vpop.f32.mrf.mxu1  ;;  %v9876_v4 = vsel %vm2027_vm8, %v9866_v49, %v9875_v30  ;;  %v12350_v47 = vcombine.low %v9721_v21, %v9722_v34  ;;  %v9884_v43 = vor.u32 %v9883_v61, %v9880_v2  ;;  %v9723_v49 = vmul.bf16 %v17173_v28, %v19442_v35  ;;  %v17185_v48 = vld [vmem:[#allocation3 + $0x6c] sm:$0xf]  ;;  %v19445_v35 = vld [vmem:[#allocation60_spill] sm:$0xff] }
 0x3ae   : > { %v9896_v37 = vshrl.u32 %v12349_v20, 16  ;;  %v9899_v56 = vshll.u32 %v12349_v20, 16  ;;  %v9893_v15 = vor.u32 %v9892_v54, %v9889_v25  ;;  %v12381_v20 = vcombine.low %v16983_v36, %v17000_v0 }
 0x3af   : > { %v17179_v46 = vpop.f32.mrf.mxu1  ;;  %v9905_v34 = vshrl.u32 %v12350_v47, 16  ;;  %v9908_v59 = vshll.u32 %v12350_v47, 16  ;;  %v9725_v13 = vmul.bf16 %v17185_v48, %v19445_v35  ;;  %v12382_v25 = vcombine.low %v17012_v24, %v17039_v26  ;;  %v17215_v24 = vld [vmem:[#allocation3 + $0x80] sm:$0xf] }
 0x3b0   : > { %13396 = vmatmul.mubr.msk.bf16.gmra.mxu0 %vm18912_vm1, %v9416_v12  ;;  %13408 = vmatmul.mubr.msk.bf16.gmra.mxu1 %vm18912_vm1, %v9867_v41  ;;  %v19444_v12 = vld [vmem:[#allocation53_spill] sm:$0xff]  ;;  %v9898_v2 = vrot.slane %v9896_v37, 3  ;;  %v9901_v61 = vrot.slane %v9899_v56, 4  ;;  %v9885_v54 = vsel %vm2027_vm8, %v9875_v30, %v9884_v43  ;;  %v9894_v36 = vsel %vm2027_vm8, %v9884_v43, %v9893_v15  ;;  %v17217_v43 = vld [vmem:[#allocation3 + $0x78] sm:$0xf] }
 0x3b1   : > { %13439 = vmatprep.mubr.msk.bf16.mxu0 %vm18912_vm1, %v12380_v63  ;;  %13411 = vmatprep.mubr.msk.bf16.mxu1 %vm18912_vm1, %v9876_v4  ;;  %v19443_v63 = vld [vmem:[#allocation62_spill] sm:$0xff]  ;;  %v9724_v41 = vmul.bf16 %v17181_v23, %v19444_v12  ;;  %v9907_v37 = vrot.slane %v9905_v34, 3  ;;  %v9910_v56 = vrot.slane %v9908_v59, 4 }
 0x3b2   : > { %v9726_v21 = vmul.bf16 %v17177_v52, %v19443_v63  ;;  %v9902_v30 = vor.u32 %v9901_v61, %v9898_v2 }
 0x3b3   : > { %v12351_v63 = vcombine.low %v9723_v49, %v9724_v41 }
 0x3b4   : > { %v12352_v35 = vcombine.low %v9725_v13, %v9726_v21  ;;  %v19448_v21 = vld [vmem:[#allocation61_spill] sm:$0xff] }
 0x3b5   : > { %v13229_v4 = vpop.f32.mrf.mxu0  ;;  %v9914_v13 = vshrl.u32 %v12351_v63, 16  ;;  %v9917_v59 = vshll.u32 %v12351_v63, 16  ;;  %v9727_v41 = vmul.bf16 %v17208_v18, %v19448_v21  ;;  %v12383_v63 = vcombine.low %v17029_v7, %v17052_v17  ;;  %v19452_v21 = vld [vmem:[#allocation74_spill] sm:$0xff] }
 0x3b6   : > { %v17193_v1 = vpop.f32.mrf.mxu1  ;;  %v17201_v47 = vadd.f32 %v13229_v4, %v17084_v10  ;;  %v9911_v4 = vor.u32 %v9910_v56, %v9907_v37  ;;  %v9903_v56 = vsel %vm2027_vm8, %v9893_v15, %v9902_v30  ;;  %v17253_v15 = vld [vmem:[#allocation3 + $0x90] sm:$0xf] }
 0x3b7   : > { %v7584_v0 = vpop.f32.mrf.mxu0 }
 0x3b8   : > { %13440 = vmatmul.mubr.msk.bf16.vlgmr.msra.gmra.mxu0 %vm18912_vm1, %v12381_v20  ;;  %13412 = vmatmul.mubr.msk.bf16.gmra.mxu1 %vm18912_vm1, %v9885_v54  ;;  %v17206_v12 = vpop.f32.mrf.mxu1  ;;  %v17213_v10 = vadd.f32 %v7584_v0, %v17093_v5  ;;  %v17226_v20 = vld [vmem:[#allocation3 + $0x7c] sm:$0xf]  ;;  %v9926_v54 = vshll.u32 %v12352_v35, 16 }
 0x3b9   : > { %13443 = vmatprep.mubr.msk.bf16.mxu0 %vm18912_vm1, %v12382_v25  ;;  %13415 = vmatprep.mubr.msk.bf16.mxu1 %vm18912_vm1, %v9894_v36  ;;  %v13230_v26 = vpop.f32.mrf.mxu0  ;;  %v9923_v25 = vshrl.u32 %v12352_v35, 16  ;;  %v19449_v36 = vld [vmem:[#allocation75_spill] sm:$0xff]  ;;  %v9729_v37 = vmul.bf16 %v17226_v20, %v19452_v21 }
 0x3ba   : > { %19446 = vst [vmem:[#allocation128_spill] sm:$0xff] %v17213_v10  ;;  %v17220_v49 = vadd.f32 %v13230_v26, %v17103_v8  ;;  %v17222_v34 = vpop.f32.mrf.mxu1  ;;  %v9730_v2 = vmul.bf16 %v17215_v24, %v19449_v36  ;;  %v19451_v8 = vld [vmem:[#allocation65_spill] sm:$0xff]  ;;  %v12384_v26 = vcombine.low %v17066_v9, %v17072_v33  ;;  %v9916_v36 = vrot.slane %v9914_v13, 3  ;;  %v17251_v33 = vld [vmem:[#allocation3 + $0x88] sm:$0xf] }
 0x3bb   : > { %v7587_v5 = vpop.f32.mrf.mxu0  ;;  %v9728_v0 = vmul.bf16 %v17217_v43, %v19451_v8  ;;  %v9925_v7 = vrot.slane %v9923_v25, 3  ;;  %v9928_v17 = vrot.slane %v9926_v54, 4  ;;  %v17247_v9 = vld [vmem:[#allocation3 + $0x84] sm:$0xf]  ;;  %v17259_v54 = vld [vmem:[#allocation3 + $0x8c] sm:$0xf] }
 0x3bc   : > { %19447 = vst [vmem:[#allocation134_spill] sm:$0xff] %v17220_v49  ;;  %v17231_v61 = vadd.f32 %v7587_v5, %v17120_v50  ;;  %v17242_v35 = vpop.f32.mrf.mxu1  ;;  %v9919_v49 = vrot.slane %v9917_v59, 4  ;;  %v9912_v5 = vsel %vm2027_vm8, %v9902_v30, %v9911_v4  ;;  %v12354_v8 = vcombine.low %v9729_v37, %v9730_v2  ;;  %v19453_v30 = vld [vmem:[#allocation76_spill] sm:$0xff] }
 0x3bd   : > { %v12353_v50 = vcombine.low %v9727_v41, %v9728_v0  ;;  %v9731_v25 = vmul.bf16 %v17247_v9, %v19453_v30  ;;  %v12386_v30 = vcombine.low %v17105_v29, %v17112_v44 }
 0x3be   : > { %19450 = vst [vmem:[#allocation115_spill] sm:$0xff] %v17231_v61  ;;  %v9920_v41 = vor.u32 %v9919_v49, %v9916_v36  ;;  %v9941_v21 = vshrl.u32 %v12354_v8, 16  ;;  %v9944_v37 = vshll.u32 %v12354_v8, 16  ;;  %v19456_v61 = vld [vmem:[#allocation78_spill] sm:$0xff] }
 0x3bf   : > { %v9932_v0 = vshrl.u32 %v12353_v50, 16  ;;  %v9732_v10 = vmul.bf16 %v17251_v33, %v19456_v61  ;;  %v19457_v49 = vld [vmem:[#allocation90_spill] sm:$0xff] }
 0x3c0   : > { %13444 = vmatmul.mubr.msk.bf16.gmra.mxu0 %vm18912_vm1, %v12383_v63  ;;  %13416 = vmatmul.mubr.msk.bf16.gmra.mxu1 %vm18912_vm1, %v9903_v56  ;;  %v9935_v63 = vshll.u32 %v12353_v50, 16  ;;  %v9734_v36 = vmul.bf16 %v17253_v15, %v19457_v49  ;;  %v12385_v50 = vcombine.low %v17059_v40, %v17095_v31  ;;  %v9943_v29 = vrot.slane %v9941_v21, 3 }
 0x3c1   : > { %13447 = vmatprep.mubr.msk.bf16.mxu0 %vm18912_vm1, %v12384_v26  ;;  %13419 = vmatprep.mubr.msk.bf16.mxu1 %vm18912_vm1, %v9912_v5  ;;  %v9929_v26 = vor.u32 %v9928_v17, %v9925_v7  ;;  %v19458_v7 = vld [vmem:[#allocation88_spill] sm:$0xff]  ;;  %v9934_v61 = vrot.slane %v9932_v0, 3  ;;  %v12355_v49 = vcombine.low %v9731_v25, %v9732_v10  ;;  %v9946_v44 = vrot.slane %v9944_v37, 4 }
 0x3c2   : > { %v9733_v17 = vmul.bf16 %v17259_v54, %v19458_v7  ;;  %v10570_v7 = vld [vmem:[#allocation3 + $0x24] sm:$0xf] }
 0x3c3   : > { %v13233_v13 = vpop.f32.mrf.mxu0  ;;  %v17255_v59 = vpop.f32.mrf.mxu1  ;;  %v9930_v31 = vsel %vm2027_vm8, %v9920_v41, %v9929_v26  ;;  %v9950_v25 = vshrl.u32 %v12355_v49, 16  ;;  %v9947_v21 = vor.u32 %v9946_v44, %v9943_v29  ;;  %v10569_v29 = vld [vmem:[#allocation3 + $0x20] sm:$0xf]  ;;  %v19459_v44 = vld [vmem:[#allocation18_spill] sm:$0xff] }
 0x3c4   : > { %v17262_v2 = vadd.f32 %v13233_v13, %v17145_v32  ;;  %v9921_v13 = vsel %vm2027_vm8, %v9911_v4, %v9920_v41  ;;  %v12356_v0 = vcombine.low %v9733_v17, %v9734_v36 }
 0x3c5   : > { %v7600_v56 = vpop.f32.mrf.mxu0  ;;  %v17264_v5 = vpop.f32.mrf.mxu1 }
 0x3c6   : > { %19454 = vst [vmem:[#allocation104_spill] sm:$0xff] %v17262_v2  ;;  %19455 = vst [vmem:[#allocation109_spill] sm:$0xff] %v17264_v5  ;;  %v17275_v32 = vadd.f32 %v7600_v56, %v17154_v42  ;;  %v9937_v2 = vrot.slane %v9935_v63, 4  ;;  %v17295_v63 = vld [vmem:[#allocation3 + $0x94] sm:$0xf]  ;;  %v9953_v56 = vshll.u32 %v12355_v49, 16 }
 0x3c7   : > { %v13234_v8 = vpop.f32.mrf.mxu0  ;;  %v17280_v5 = vpop.f32.mrf.mxu1  ;;  %v9735_v37 = vmul.bf16 %v17295_v63, %v19387_v11  ;;  %v9959_v36 = vshrl.u32 %v12356_v0, 16  ;;  %v9962_v17 = vshll.u32 %v12356_v0, 16  ;;  %v9952_v49 = vrot.slane %v9950_v25, 3 }
 0x3c8   : > { %13448 = vmatmul.mubr.msk.bf16.gmra.mxu0 %vm18912_vm1, %v12385_v50  ;;  %v17284_v40 = vadd.f32 %v13234_v8, %v17164_v58  ;;  %13420 = vmatmul.mubr.msk.bf16.gmra.mxu1 %vm18912_vm1, %v9921_v13  ;;  %v9938_v58 = vor.u32 %v9937_v2, %v9934_v61  ;;  %v10568_v50 = vld [vmem:[#allocation3 + $0x1c] sm:$0xf]  ;;  %v12387_v8 = vcombine.low %v17100_v51, %v17133_v19 }
 0x3c9   : > { %13451 = vmatprep.mubr.msk.bf16.mxu0 %vm18912_vm1, %v12386_v30  ;;  %v7603_v42 = vpop.f32.mrf.mxu0  ;;  %13423 = vmatprep.mubr.msk.bf16.mxu1 %vm18912_vm1, %v9930_v31  ;;  %v17290_v4 = vpop.f32.mrf.mxu1  ;;  %v10567_v30 = vld [vmem:[#allocation3 + $0x18] sm:$0xf]  ;;  %v10601_v2 = vmul.bf16 %v10568_v50, %v19389_v62  ;;  %v12388_v13 = vcombine.low %v17147_v3, %v17156_v6  ;;  %v9955_v31 = vrot.slane %v9953_v56, 4  ;;  %v10603_v62 = vmul.bf16 %v10570_v7, %v19390_v14  ;;  %v10572_v7 = vld [vmem:[#allocation3 + $0x2c] sm:$0xf] }
 0x3ca   : > { %v17293_v10 = vadd.f32 %v7603_v42, %v17179_v46  ;;  %v9939_v61 = vsel %vm2027_vm8, %v9929_v26, %v9938_v58  ;;  %v9948_v51 = vsel %vm2027_vm8, %v9938_v58, %v9947_v21  ;;  %v10600_v42 = vmul.bf16 %v10567_v30, %v19459_v44 }
 0x3cb   : > { %v12357_v6 = vcombine.low %v9735_v37, %v9735_v37  ;;  %v9961_v25 = vrot.slane %v9959_v36, 3  ;;  %v9964_v56 = vrot.slane %v9962_v17, 4  ;;  %v10602_v58 = vmul.bf16 %v10569_v29, %v19391_v55  ;;  %v10571_v36 = vld [vmem:[#allocation3 + $0x28] sm:$0xf]  ;;  %v10574_v17 = vld [vmem:[#allocation3 + $0x34] sm:$0xf] }
 0x3cc   : > { %v17297_v41 = vpop.f32.mrf.mxu1  ;;  %v12418_v50 = vcombine.low %v10600_v42, %v10601_v2  ;;  %v9956_v14 = vor.u32 %v9955_v31, %v9952_v49  ;;  %v12389_v55 = vcombine.low %v17149_v57, %v17173_v28  ;;  %v10605_v31 = vmul.bf16 %v10572_v7, %v19392_v39  ;;  %v10573_v42 = vld [vmem:[#allocation3 + $0x30] sm:$0xf] }
 0x3ce   : > { %v17303_v46 = vpop.f32.mrf.mxu1  ;;  %v10724_v49 = vshll.u32 %v12418_v50, 16  ;;  %v9957_v44 = vsel %vm2027_vm8, %v9947_v21, %v9956_v14 }
 0x3d0   : > { %v13237_v11 = vpop.f32.mrf.mxu0  ;;  %13452 = vmatmul.mubr.msk.bf16.gmra.mxu0 %vm18912_vm1, %v12387_v8  ;;  %13424 = vmatmul.mubr.msk.bf16.gmra.mxu1 %vm18912_vm1, %v9939_v61  ;;  %v17312_v19 = vpop.f32.mrf.mxu1  ;;  %v9968_v61 = vshrl.u32 %v12357_v6, 16 }
 0x3d1   : > { %v17317_v3 = vadd.f32 %v13237_v11, %v17193_v1  ;;  %13455 = vmatprep.mubr.msk.bf16.mxu0 %vm18912_vm1, %v12388_v13  ;;  %13427 = vmatprep.mubr.msk.bf16.mxu1 %vm18912_vm1, %v9948_v51  ;;  %v17329_v13 = vcombine.low %v10602_v58, %v10603_v62  ;;  %v9971_v11 = vshll.u32 %v12357_v6, 16  ;;  %v10607_v6 = vmul.bf16 %v10574_v17, %v19353_v53 }
 0x3d2   : > { %v7616_v26 = vpop.f32.mrf.mxu0  ;;  %v17321_v0 = vpop.f32.mrf.mxu1 }
 0x3d3   : > { %v17325_v30 = vadd.f32 %v7616_v26, %v17206_v12  ;;  %v9965_v12 = vor.u32 %v9964_v56, %v9961_v25  ;;  %v10729_v39 = vshll.u32 %v17329_v13, 16  ;;  %v9973_v21 = vrot.slane %v9971_v11, 4  ;;  %v10575_v11 = vld [vmem:[#allocation3 + $0x38] sm:$0xf] }
 0x3d4   : > { %v13238_v1 = vpop.f32.mrf.mxu0  ;;  %v17327_v8 = vpop.f32.mrf.mxu1  ;;  %v10726_v56 = vrot.slane %v10724_v49, 1  ;;  %v12391_v49 = vcombine.low %v17177_v52, %v17208_v18 }
 0x3d5   : > { %v17332_v37 = vadd.f32 %v13238_v1, %v17222_v34  ;;  %v12390_v34 = vcombine.low %v17181_v23, %v17185_v48  ;;  %v9966_v57 = vsel %vm2027_vm8, %v9956_v14, %v9965_v12  ;;  %v9970_v48 = vrot.slane %v9968_v61, 3 }
 0x3d6   : > { %v7619_v51 = vpop.f32.mrf.mxu0  ;;  %v17336_v2 = vpop.f32.mrf.mxu1  ;;  %v10606_v14 = vmul.bf16 %v10573_v42, %v19352_v22  ;;  %v10731_v1 = vrot.slane %v10729_v39, 1 }
 0x3d7   : > { %v17340_v29 = vadd.f32 %v7619_v51, %v17242_v35  ;;  %v10604_v35 = vmul.bf16 %v10571_v36, %v19393_v16  ;;  %v10576_v16 = vld [vmem:[#allocation3 + $0x3c] sm:$0xf]  ;;  %v9974_v61 = vor.u32 %v9973_v21, %v9970_v48  ;;  %v10578_v51 = vld [vmem:[#allocation3 + $0x44] sm:$0xf] }
 0x3d8   : > { %v13241_v62 = vpop.f32.mrf.mxu0  ;;  %13456 = vmatmul.mubr.msk.bf16.gmra.mxu0 %vm18912_vm1, %v12389_v55  ;;  %13428 = vmatmul.mubr.msk.bf16.gmra.mxu1 %vm18912_vm1, %v9957_v44  ;;  %v17348_v28 = vpop.f32.mrf.mxu1  ;;  %v17365_v36 = vcombine.low %v10606_v14, %v10607_v6  ;;  %v10609_v44 = vmul.bf16 %v10576_v16, %v19394_v45  ;;  %v10611_v39 = vmul.bf16 %v10578_v51, %v19397_v27  ;;  %v10579_v51 = vld [vmem:[#allocation3 + $0x48] sm:$0xf] }
 0x3d9   : > { %v17354_v23 = vadd.f32 %v13241_v62, %v17255_v59  ;;  %13459 = vmatprep.mubr.msk.bf16.mxu0 %vm18912_vm1, %v12390_v34  ;;  %13431 = vmatprep.mubr.msk.bf16.mxu1 %vm18912_vm1, %v9966_v57  ;;  %v12420_v58 = vcombine.low %v10604_v35, %v10605_v31  ;;  %v10722_v59 = vshrl.u32 %v12418_v50, 16  ;;  %v9975_v42 = vsel %vm2027_vm8, %v9965_v12, %v9974_v61  ;;  %v10577_v62 = vld [vmem:[#allocation3 + $0x40] sm:$0xf] }
 0x3da   : > { %v17358_v26 = vpop.f32.mrf.mxu0  ;;  %v17360_v25 = vpop.f32.mrf.mxu1  ;;  %v10745_v45 = vshll.u32 %v17365_v36, 16  ;;  %v10610_v21 = vmul.bf16 %v10577_v62, %v19398_v60  ;;  %v19460_v61 = vld [vmem:[#allocation133_spill] sm:$0xff] }
 0x3db   : > { %v10727_v31 = vor.u32 %v10726_v56, %v10722_v59  ;;  %v10737_v34 = vshll.u32 %v12420_v58, 16  ;;  %v10580_v56 = vld [vmem:[#allocation3 + $0x4c] sm:$0xf]  ;;  %v10741_v16 = vshrl.u32 %v12420_v58, 16 }
 0x3dc   : > { %v13242_v7 = vpop.f32.mrf.mxu0  ;;  %v17363_v53 = vpop.f32.mrf.mxu1  ;;  %v17401_v59 = vcombine.low %v10610_v21, %v10611_v39  ;;  %v19464_v39 = vld [vmem:[#allocation47_spill] sm:$0xff] }
 0x3dd   : > { %v17368_v17 = vadd.f32 %v13242_v7, %v17280_v5  ;;  %v12392_v5 = vcombine.low %v17217_v43, %v17226_v20  ;;  %v10732_v18 = vsel %vm3262_vm9, %v10727_v31, %v10731_v1  ;;  %v10733_v20 = vshrl.u32 %v17329_v13, 16 }
 0x3de   : > { %v7635_v55 = vpop.f32.mrf.mxu0  ;;  %v17372_v22 = vpop.f32.mrf.mxu1  ;;  %v10739_v6 = vrot.slane %v10737_v34, 1  ;;  %v10747_v7 = vrot.slane %v10745_v45, 1  ;;  %v19461_v34 = vld [vmem:[#allocation41_spill] sm:$0xff]  ;;  %v19463_v45 = vld [vmem:[#allocation40_spill] sm:$0xff] }
 0x3df   : > { %v17376_v50 = vadd.f32 %v7635_v55, %v17290_v4  ;;  %v10608_v4 = vmul.bf16 %v10575_v11, %v19396_v38  ;;  %v10735_v27 = vor.u32 %v10733_v20, %v10731_v1  ;;  %v10582_v55 = vld [vmem:[#allocation3 + $0x54] sm:$0xf]  ;;  %v10613_v58 = vmul.bf16 %v10580_v56, %v19461_v34 }
 0x3e0   : > { %v13245_v57 = vpop.f32.mrf.mxu0  ;;  %13460 = vmatmul.mubr.msk.bf16.gmra.mxu0 %vm18912_vm1, %v12391_v49  ;;  %13432 = vmatmul.mubr.msk.bf16.gmra.mxu1 %vm18912_vm1, %v9975_v42  ;;  %v17384_v52 = vpop.f32.mrf.mxu1  ;;  %v10743_v1 = vor.u32 %v10741_v16, %v10739_v6  ;;  %v19462_v42 = vld [vmem:[#allocation94_spill] sm:$0xff]  ;;  %v10749_v20 = vshrl.u32 %v17365_v36, 16 }
 0x3e1   : > { %v17390_v43 = vadd.f32 %v13245_v57, %v17297_v41  ;;  %13463 = vmatprep.mubr.msk.bf16.mxu0 %vm18912_vm1, %v12392_v5  ;;  %13475 = vmatprep.mubr.msk.bf16.mxu1 %vm18912_vm1, %v10732_v18  ;;  %v12422_v48 = vcombine.low %v10608_v4, %v10609_v44  ;;  %v10740_v5 = vsel %vm3262_vm9, %v10735_v27, %v10739_v6  ;;  %v10581_v57 = vld [vmem:[#allocation3 + $0x50] sm:$0xf] }
 0x3e2   : > { %v7648_v12 = vpop.f32.mrf.mxu0  ;;  %v17395_v35 = vpop.f32.mrf.mxu1  ;;  %v10612_v4 = vmul.bf16 %v10579_v51, %v19463_v45  ;;  %v19467_v51 = vld [vmem:[#allocation101_spill] sm:$0xff] }
 0x3e3   : > { %v17399_v38 = vadd.f32 %v7648_v12, %v17303_v46  ;;  %v12393_v46 = vcombine.low %v17215_v24, %v17247_v9  ;;  %v10753_v31 = vshll.u32 %v12422_v48, 16  ;;  %v10748_v24 = vsel %vm3262_vm9, %v10743_v1, %v10747_v7  ;;  %v19465_v12 = vld [vmem:[#allocation99_spill] sm:$0xff] }
 0x3e4   : > { %v13246_v41 = vpop.f32.mrf.mxu0  ;;  %v13261_v14 = vpop.f32.mrf.mxu1  ;;  %v10757_v1 = vshrl.u32 %v12422_v48, 16 }
 0x3e5   : > { %v17404_v13 = vadd.f32 %v13246_v41, %v17312_v19  ;;  %v17407_v11 = vadd.f32 %v13261_v14, %v19460_v61  ;;  %v12394_v19 = vcombine.low %v17251_v33, %v17259_v54  ;;  %v10615_v33 = vmul.bf16 %v10582_v55, %v19464_v39  ;;  %v19466_v14 = vld [vmem:[#allocation46_spill] sm:$0xff] }
 0x3e6   : > { %v7651_v60 = vpop.f32.mrf.mxu0  ;;  %v8075_v49 = vpop.f32.mrf.mxu1  ;;  %v10755_v56 = vrot.slane %v10753_v31, 1  ;;  %v12424_v41 = vcombine.low %v10612_v4, %v10613_v58  ;;  %v10614_v16 = vmul.bf16 %v10581_v57, %v19466_v14  ;;  %v10583_v31 = vld [vmem:[#allocation3 + $0x58] sm:$0xf]  ;;  %v19472_v14 = vld [vmem:[#allocation134_spill] sm:$0xff] }
 0x3e7   : > { %v17413_v44 = vadd.f32 %v7651_v60, %v17321_v0  ;;  %v17419_v62 = vadd.f32 %v8075_v49, %v19462_v42  ;;  %v10761_v0 = vshll.u32 %v17401_v59, 16  ;;  %v10584_v60 = vld [vmem:[#allocation3 + $0x5c] sm:$0xf] }
 0x3e8   : > { %v13249_v18 = vpop.f32.mrf.mxu0  ;;  %13464 = vmatmul.mubr.msk.bf16.gmra.mxu0 %vm18912_vm1, %v12393_v46  ;;  %13476 = vmatmul.mubr.msk.bf16.vlgmr.msra.gmra.mxu1 %vm18912_vm1, %v10740_v5  ;;  %v13262_v9 = vpop.f32.mrf.mxu1  ;;  %v12395_v46 = vcombine.low %v17253_v15, %v17295_v63  ;;  %v17445_v34 = vcombine.low %v10614_v16, %v10615_v33  ;;  %v10759_v42 = vor.u32 %v10757_v1, %v10755_v56  ;;  %v10769_v57 = vshll.u32 %v12424_v41, 16  ;;  %v19470_v4 = vld [vmem:[#allocation128_spill] sm:$0xff] }
 0x3e9   : > { %v17428_v54 = vadd.f32 %v13249_v18, %v17327_v8  ;;  %13467 = vmatprep.mubr.msk.bf16.mxu0 %vm18912_vm1, %v12394_v19  ;;  %13479 = vmatprep.mubr.msk.bf16.mxu1 %vm18912_vm1, %v10748_v24  ;;  %v17434_v6 = vadd.f32 %v13262_v9, %v19465_v12  ;;  %v10751_v8 = vor.u32 %v10749_v20, %v10747_v7  ;;  %v10763_v49 = vrot.slane %v10761_v0, 1  ;;  %v19468_v18 = vld [vmem:[#allocation49_spill] sm:$0xff]  ;;  %v19469_v9 = vld [vmem:[#allocation48_spill] sm:$0xff] }
 0x3ea   : > { %v7664_v21 = vpop.f32.mrf.mxu0  ;;  %v8078_v27 = vpop.f32.mrf.mxu1  ;;  %v10617_v24 = vmul.bf16 %v10584_v60, %v19468_v18  ;;  %v10616_v0 = vmul.bf16 %v10583_v31, %v19469_v9  ;;  %v10777_v33 = vshll.u32 %v17445_v34, 16  ;;  %v19473_v60 = vld [vmem:[#allocation54_spill] sm:$0xff] }
 0x3eb   : > { %v17438_v61 = vadd.f32 %v7664_v21, %v17336_v2  ;;  %v17441_v55 = vadd.f32 %v8078_v27, %v19467_v51  ;;  %v10586_v2 = vld [vmem:[#allocation3 + $0x64] sm:$0xf]  ;;  %v10756_v63 = vsel %vm3262_vm9, %v10751_v8, %v10755_v56  ;;  %v10765_v21 = vshrl.u32 %v17401_v59, 16 }
 0x3ec   : > { %v13250_v36 = vpop.f32.mrf.mxu0  ;;  %v10771_v8 = vrot.slane %v10769_v57, 1  ;;  %v12426_v51 = vcombine.low %v10616_v0, %v10617_v24  ;;  %v10587_v57 = vld [vmem:[#allocation3 + $0x68] sm:$0xf]  ;;  %v10590_v24 = vld [vmem:[#allocation3 + $0x74] sm:$0xf] }
 0x3ed   : > { %v17448_v58 = vadd.f32 %v13250_v36, %v17348_v28  ;;  %v13265_v19 = vpop.f32.mrf.mxu1  ;;  %v10585_v28 = vld [vmem:[#allocation3 + $0x60] sm:$0xf]  ;;  %v10767_v1 = vor.u32 %v10765_v21, %v10763_v49 }
 0x3ee   : > { %v7667_v5 = vpop.f32.mrf.mxu0  ;;  %v17451_v7 = vadd.f32 %v13265_v19, %v17201_v47  ;;  %v10764_v47 = vsel %vm3262_vm9, %v10759_v42, %v10763_v49  ;;  %v10618_v36 = vmul.bf16 %v10585_v28, %v19473_v60  ;;  %v10779_v42 = vrot.slane %v10777_v33, 1  ;;  %v19475_v49 = vld [vmem:[#allocation59_spill] sm:$0xff] }
 0x3ef   : > { %v17455_v15 = vadd.f32 %v7667_v5, %v17360_v25  ;;  %v8091_v48 = vpop.f32.mrf.mxu1  ;;  %v19471_v25 = vld [vmem:[#allocation55_spill] sm:$0xff]  ;;  %v10773_v5 = vshrl.u32 %v12424_v41, 16  ;;  %v10785_v0 = vshll.u32 %v12426_v51, 16  ;;  %v10772_v41 = vsel %vm3262_vm9, %v10767_v1, %v10771_v8 }
 0x3f0   : > { %v13253_v45 = vpop.f32.mrf.mxu0  ;;  %13468 = vmatmul.mubr.msk.bf16.gmra.mxu0 %vm18912_vm1, %v12395_v46  ;;  %13480 = vmatmul.mubr.msk.bf16.gmra.mxu1 %vm18912_vm1, %v10756_v63  ;;  %v17463_v39 = vadd.f32 %v8091_v48, %v19470_v4  ;;  %v10619_v20 = vmul.bf16 %v10586_v2, %v19471_v25  ;;  %v19474_v2 = vld [vmem:[#allocation115_spill] sm:$0xff] }
 0x3f1   : > { %v17468_v12 = vadd.f32 %v13253_v45, %v17363_v53  ;;  %13483 = vmatprep.mubr.msk.bf16.mxu1 %vm18912_vm1, %v10764_v47  ;;  %v13266_v27 = vpop.f32.mrf.mxu1  ;;  %v10588_v53 = vld [vmem:[#allocation3 + $0x6c] sm:$0xf]  ;;  %v19476_v47 = vld [vmem:[#allocation104_spill] sm:$0xff]  ;;  %v10589_v33 = vld [vmem:[#allocation3 + $0x70] sm:$0xf] }
 0x3f2   : > { %v7680_v56 = vpop.f32.mrf.mxu0  ;;  %v17473_v16 = vadd.f32 %v13266_v27, %v19472_v14  ;;  %v17482_v18 = vcombine.low %v10618_v36, %v10619_v20  ;;  %v10621_v28 = vmul.bf16 %v10588_v53, %v19475_v49  ;;  %v19477_v27 = vld [vmem:[#allocation57_spill] sm:$0xff]  ;;  %v19478_v14 = vld [vmem:[#allocation68_spill] sm:$0xff]  ;;  %v10781_v36 = vshrl.u32 %v17445_v34, 16 }
 0x3f3   : > { %v17477_v46 = vadd.f32 %v7680_v56, %v17372_v22  ;;  %v8094_v31 = vpop.f32.mrf.mxu1  ;;  %v10775_v22 = vor.u32 %v10773_v5, %v10771_v8  ;;  %v10620_v56 = vmul.bf16 %v10587_v57, %v19477_v27  ;;  %v10623_v60 = vmul.bf16 %v10590_v24, %v19478_v14 }
 0x3f4   : > { %v13254_v19 = vpop.f32.mrf.mxu0  ;;  %v17480_v59 = vadd.f32 %v8094_v31, %v19474_v2  ;;  %v10793_v21 = vshll.u32 %v17482_v18, 16  ;;  %v10787_v53 = vrot.slane %v10785_v0, 1  ;;  %v19479_v2 = vld [vmem:[#allocation66_spill] sm:$0xff]  ;;  %v10783_v24 = vor.u32 %v10781_v36, %v10779_v42 }
 0x3f5   : > { %v17485_v63 = vadd.f32 %v13254_v19, %v17384_v52  ;;  %v10780_v52 = vsel %vm3262_vm9, %v10775_v22, %v10779_v42  ;;  %v12428_v19 = vcombine.low %v10620_v56, %v10621_v28  ;;  %v10622_v5 = vmul.bf16 %v10589_v33, %v19479_v2  ;;  %v10591_v28 = vld [vmem:[#allocation3 + $0x78] sm:$0xf]  ;;  %v10596_v2 = vld [vmem:[#allocation3 + $0x8c] sm:$0xf] }
 0x3f6   : > { %v7683_v48 = vpop.f32.mrf.mxu0  ;;  %v13269_v9 = vpop.f32.mrf.mxu1  ;;  %v10789_v22 = vshrl.u32 %v12426_v51, 16  ;;  %v10795_v49 = vrot.slane %v10793_v21, 1  ;;  %v10593_v21 = vld [vmem:[#allocation3 + $0x80] sm:$0xf] }
 0x3f7   : > { %v17489_v45 = vadd.f32 %v7683_v48, %v17395_v35  ;;  %v17492_v4 = vadd.f32 %v13269_v9, %v19476_v47  ;;  %v10592_v48 = vld [vmem:[#allocation3 + $0x7c] sm:$0xf] }
 0x3f8   : > { %v13297_v25 = vpop.f32.mrf.mxu0  ;;  %13484 = vmatmul.mubr.msk.bf16.gmra.mxu1 %vm18912_vm1, %v10772_v41  ;;  %v8107_v20 = vpop.f32.mrf.mxu1  ;;  %v10791_v33 = vor.u32 %v10789_v22, %v10787_v53 }
 0x3f9   : > { %v17501_v35 = vadd.f32 %v13297_v25, %v17407_v11  ;;  %13487 = vmatprep.mubr.msk.bf16.mxu1 %vm18912_vm1, %v10780_v52  ;;  %v17506_v8 = vadd.f32 %v8107_v20, %v17275_v32  ;;  %v17515_v32 = vcombine.low %v10622_v5, %v10623_v60  ;;  %v19480_v25 = vld [vmem:[#allocation72_spill] sm:$0xff]  ;;  %v19481_v60 = vld [vmem:[#allocation70_spill] sm:$0xff] }
 0x3fa   : > { %v8634_v1 = vpop.f32.mrf.mxu0  ;;  %v13270_v31 = vpop.f32.mrf.mxu1  ;;  %v10625_v52 = vmul.bf16 %v10592_v48, %v19480_v25  ;;  %v10624_v36 = vmul.bf16 %v10591_v28, %v19481_v60 }
 0x3fb   : > { %v17510_v57 = vadd.f32 %v8634_v1, %v17419_v62  ;;  %v17513_v11 = vadd.f32 %v13270_v31, %v17284_v40  ;;  %v10594_v62 = vld [vmem:[#allocation3 + $0x84] sm:$0xf]  ;;  %v10801_v40 = vshll.u32 %v12428_v19, 16  ;;  %v10809_v14 = vshll.u32 %v17515_v32, 16 }
 0x3fc   : > { %v13298_v34 = vpop.f32.mrf.mxu0  ;;  %v8110_v9 = vpop.f32.mrf.mxu1  ;;  %v19482_v1 = vld [vmem:[#allocation81_spill] sm:$0xff] }
 0x3fd   : > { %v17518_v47 = vadd.f32 %v13298_v34, %v17434_v6  ;;  %v17521_v0 = vadd.f32 %v8110_v9, %v17293_v10  ;;  %v10788_v6 = vsel %vm3262_vm9, %v10783_v24, %v10787_v53  ;;  %v10796_v10 = vsel %vm3262_vm9, %v10791_v33, %v10795_v49  ;;  %v19483_v9 = vld [vmem:[#allocation80_spill] sm:$0xff] }
 0x3fe   : > { %v8637_v41 = vpop.f32.mrf.mxu0  ;;  %v13273_v42 = vpop.f32.mrf.mxu1  ;;  %v10627_v31 = vmul.bf16 %v10594_v62, %v19482_v1  ;;  %v10803_v48 = vrot.slane %v10801_v40, 1  ;;  %v12430_v34 = vcombine.low %v10624_v36, %v10625_v52  ;;  %v10626_v22 = vmul.bf16 %v10593_v21, %v19483_v9  ;;  %v10597_v36 = vld [vmem:[#allocation3 + $0x90] sm:$0xf] }
 0x3ff   : > { %v17525_v20 = vadd.f32 %v8637_v41, %v17441_v55  ;;  %v17528_v51 = vadd.f32 %v13273_v42, %v17317_v3  ;;  %v10797_v3 = vshrl.u32 %v17482_v18, 16  ;;  %v10595_v18 = vld [vmem:[#allocation3 + $0x88] sm:$0xf]  ;;  %v10805_v33 = vshrl.u32 %v12428_v19, 16  ;;  %v19486_v9 = vld [vmem:[#allocation91_spill] sm:$0xff] }
 0x400   : > { %v13301_v27 = vpop.f32.mrf.mxu0  ;;  %13488 = vmatmul.mubr.msk.bf16.gmra.mxu1 %vm18912_vm1, %v10788_v6  ;;  %v8123_v56 = vpop.f32.mrf.mxu1  ;;  %v12431_v25 = vcombine.low %v10626_v22, %v10627_v31  ;;  %v19484_v6 = vld [vmem:[#allocation86_spill] sm:$0xff]  ;;  %v10630_v22 = vmul.bf16 %v10597_v36, %v19486_v9  ;;  %v10599_v36 = vld [vmem:[#allocation3 + $0x98] sm:$0x1] }
 0x401   : > { %v17537_v55 = vadd.f32 %v13301_v27, %v17451_v7  ;;  %13491 = vmatprep.mubr.msk.bf16.mxu1 %vm18912_vm1, %v10796_v10  ;;  %v17542_v53 = vadd.f32 %v8123_v56, %v17325_v30  ;;  %v10799_v62 = vor.u32 %v10797_v3, %v10795_v49  ;;  %v10811_v30 = vrot.slane %v10809_v14, 1 }
 0x402   : > { %v8650_v5 = vpop.f32.mrf.mxu0  ;;  %v13274_v24 = vpop.f32.mrf.mxu1  ;;  %v10629_v27 = vmul.bf16 %v10596_v2, %v19484_v6  ;;  %v10807_v49 = vor.u32 %v10805_v33, %v10803_v48  ;;  %v10817_v10 = vshll.u32 %v12430_v34, 16  ;;  %v10825_v3 = vshll.u32 %v12431_v25, 16 }
 0x403   : > { %v17546_v28 = vadd.f32 %v8650_v5, %v17463_v39  ;;  %v17549_v7 = vadd.f32 %v13274_v24, %v17332_v37  ;;  %v19485_v37 = vld [vmem:[#allocation84_spill] sm:$0xff]  ;;  %v10804_v14 = vsel %vm3262_vm9, %v10799_v62, %v10803_v48 }
 0x404   : > { %v13302_v41 = vpop.f32.mrf.mxu0  ;;  %v8126_v42 = vpop.f32.mrf.mxu1  ;;  %v10628_v56 = vmul.bf16 %v10595_v18, %v19485_v37  ;;  %v10819_v48 = vrot.slane %v10817_v10, 1  ;;  %v19487_v62 = vld [vmem:[#allocation92_spill] sm:$0xff] }
 0x405   : > { %v17553_v40 = vadd.f32 %v13302_v41, %v17473_v16  ;;  %v17556_v52 = vadd.f32 %v8126_v42, %v17340_v29  ;;  %v10598_v16 = vld [vmem:[#allocation3 + $0x94] sm:$0xf]  ;;  %v10812_v29 = vsel %vm3262_vm9, %v10807_v49, %v10811_v30 }
 0x406   : > { %v8653_v39 = vpop.f32.mrf.mxu0  ;;  %v13277_v21 = vpop.f32.mrf.mxu1  ;;  %v12432_v2 = vcombine.low %v10628_v56, %v10629_v27  ;;  %v10631_v18 = vmul.bf16 %v10598_v16, %v19487_v62  ;;  %v10821_v27 = vshrl.u32 %v12430_v34, 16 }
 0x407   : > { %v17560_v60 = vadd.f32 %v8653_v39, %v17480_v59  ;;  %v17563_v19 = vadd.f32 %v13277_v21, %v17354_v23  ;;  %v10813_v59 = vshrl.u32 %v17515_v32, 16  ;;  %v10827_v39 = vrot.slane %v10825_v3, 1  ;;  %v19488_v3 = vld [vmem:[#allocation97_spill] sm:$0xff] }
 0x408   : > { %v13305_v1 = vpop.f32.mrf.mxu0  ;;  %13492 = vmatmul.mubr.msk.bf16.gmra.mxu1 %vm18912_vm1, %v10804_v14  ;;  %v8139_v31 = vpop.f32.mrf.mxu1  ;;  %v10833_v32 = vshll.u32 %v12432_v2, 16  ;;  %v10823_v56 = vor.u32 %v10821_v27, %v10819_v48  ;;  %v12433_v14 = vcombine.low %v10630_v22, %v10631_v18 }
 0x409   : > { %v17569_v5 = vadd.f32 %v13305_v1, %v17492_v4  ;;  %13495 = vmatprep.mubr.msk.bf16.mxu1 %vm18912_vm1, %v10812_v29  ;;  %v10815_v42 = vor.u32 %v10813_v59, %v10811_v30  ;;  %v10829_v29 = vshrl.u32 %v12431_v25, 16  ;;  %v10632_v59 = vmul.bf16 %v10599_v36, %v19488_v3 }
 0x40a   : > { %v8666_v23 = vpop.f32.mrf.mxu0  ;;  %v13278_v24 = vpop.f32.mrf.mxu1  ;;  %v10835_v1 = vrot.slane %v10833_v32, 1  ;;  %v19489_v32 = vld [vmem:[#allocation109_spill] sm:$0xff] }
 0x40b   : > { %v17576_v41 = vadd.f32 %v8666_v23, %v17506_v8  ;;  %v8221_v33 = vadd.f32 %v13278_v24, %v17368_v17  ;;  %v10820_v30 = vsel %vm3262_vm9, %v10815_v42, %v10819_v48  ;;  %v10837_v24 = vshrl.u32 %v12432_v2, 16 }
 0x40c   : > { %v13306_v6 = vpop.f32.mrf.mxu0  ;;  %v8142_v4 = vpop.f32.mrf.mxu1  ;;  %v10841_v48 = vshll.u32 %v12433_v14, 16  ;;  %v10831_v22 = vor.u32 %v10829_v29, %v10827_v39  ;;  %v7633_v2 = vadd.f32 %v17358_v26, %v19489_v32 }
 0x40d   : > { %v17580_v21 = vadd.f32 %v13306_v6, %v17513_v11  ;;  %v8219_v49 = vadd.f32 %v8142_v4, %v17376_v50  ;;  %v10828_v11 = vsel %vm3262_vm9, %v10823_v56, %v10827_v39  ;;  %v10839_v42 = vor.u32 %v10837_v24, %v10835_v1 }
 0x40e   : > { %v8669_v10 = vpop.f32.mrf.mxu0  ;;  %v13281_v37 = vpop.f32.mrf.mxu1  ;;  %v12434_v6 = vcombine.low %v10632_v59, %v10632_v59  ;;  %v10843_v27 = vrot.slane %v10841_v48, 1  ;;  %v10836_v39 = vsel %vm3262_vm9, %v10831_v22, %v10835_v1  ;;  %v8218_v56 = vadd.f32 %v8139_v31, %v7633_v2 }
 0x40f   : > { %v17584_v8 = vadd.f32 %v8669_v10, %v17521_v0  ;;  %v8224_v17 = vadd.f32 %v13281_v37, %v17390_v43  ;;  %v10845_v37 = vshrl.u32 %v12433_v14, 16 }
 0x410   : > { %v13309_v34 = vpop.f32.mrf.mxu0  ;;  %13496 = vmatmul.mubr.msk.bf16.gmra.mxu1 %vm18912_vm1, %v10820_v30  ;;  %v8155_v16 = vpop.f32.mrf.mxu1  ;;  %v10849_v26 = vshll.u32 %v12434_v6, 16 }
 0x411   : > { %v17591_v50 = vadd.f32 %v13309_v34, %v17528_v51  ;;  %13499 = vmatprep.mubr.msk.bf16.mxu1 %vm18912_vm1, %v10828_v11  ;;  %v8222_v0 = vadd.f32 %v8155_v16, %v17399_v38  ;;  %v10847_v11 = vor.u32 %v10845_v37, %v10843_v27 }
 0x412   : > { %v8682_v43 = vpop.f32.mrf.mxu0  ;;  %v13282_v23 = vpop.f32.mrf.mxu1 }
 0x413   : > { %v17597_v9 = vadd.f32 %v8682_v43, %v17542_v53  ;;  %v8225_v62 = vadd.f32 %v13282_v23, %v17404_v13 }
 0x414   : > { %v13310_v18 = vpop.f32.mrf.mxu0  ;;  %v8158_v51 = vpop.f32.mrf.mxu1 }
 0x415   : > { %v17601_v25 = vadd.f32 %v13310_v18, %v17549_v7  ;;  %v8223_v38 = vadd.f32 %v8158_v51, %v17413_v44  ;;  %v10844_v7 = vsel %vm3262_vm9, %v10839_v42, %v10843_v27 }
 0x416   : > { %v8685_v4 = vpop.f32.mrf.mxu0 }
 0x417   : > { %v17607_v53 = vadd.f32 %v8685_v4, %v17556_v52 }
 0x418   : > { %v13313_v13 = vpop.f32.mrf.mxu0  ;;  %v13285_v10 = vpop.f32.mrf.mxu1  ;;  %13500 = vmatmul.mubr.msk.bf16.gmra.mxu1 %vm18912_vm1, %v10836_v39 }
 0x419   : > { %v17613_v44 = vadd.f32 %v13313_v13, %v17563_v19  ;;  %v8228_v36 = vadd.f32 %v13285_v10, %v17428_v54  ;;  %13503 = vmatprep.mubr.msk.bf16.mxu1 %vm18912_vm1, %v10844_v7  ;;  %v10851_v19 = vrot.slane %v10849_v26, 1 }
 0x41a   : > { %v8698_v52 = vpop.f32.mrf.mxu0  ;;  %v8171_v30 = vpop.f32.mrf.mxu1 }
 0x41b   : > { %v17617_v34 = vadd.f32 %v8698_v52, %v8218_v56  ;;  %v8226_v16 = vadd.f32 %v8171_v30, %v17438_v61  ;;  %v10852_v23 = vsel %vm3262_vm9, %v10847_v11, %v10851_v19  ;;  %vm11339_vm9 = vcmask 64512  }
 0x41c   : > { %v13314_v1 = vpop.f32.mrf.mxu0  ;;  %v13286_v29 = vpop.f32.mrf.mxu1 }
 0x41d   : > { %v17620_v3 = vadd.f32 %v13314_v1, %v8221_v33  ;;  %v8229_v31 = vadd.f32 %v13286_v29, %v17448_v58 }
 0x41e   : > { %v8701_v14 = vpop.f32.mrf.mxu0  ;;  %v8174_v59 = vpop.f32.mrf.mxu1 }
 0x41f   : > { %v17623_v54 = vadd.f32 %v8701_v14, %v8219_v49  ;;  %v8227_v43 = vadd.f32 %v8174_v59, %v17455_v15 }
 0x420   : > { %v13317_v24 = vpop.f32.mrf.mxu0  ;;  %v13289_v48 = vpop.f32.mrf.mxu1  ;;  %13504 = vmatmul.mubr.msk.bf16.gmra.mxu1 %vm18912_vm1, %v10852_v23 }
 0x421   : > { %v17628_v61 = vadd.f32 %v13317_v24, %v8224_v17  ;;  %v8232_v33 = vadd.f32 %v13289_v48, %v17468_v12 }
 0x422   : > { %v8714_v22 = vpop.f32.mrf.mxu0  ;;  %v8187_v18 = vpop.f32.mrf.mxu1 }
 0x423   : > { %v17631_v58 = vadd.f32 %v8714_v22, %v8222_v0  ;;  %v8230_v51 = vadd.f32 %v8187_v18, %v17477_v46 }
 0x424   : > { %v13318_v49 = vpop.f32.mrf.mxu0  ;;  %v13290_v42 = vpop.f32.mrf.mxu1 }
 0x425   : > { %v17634_v6 = vadd.f32 %v13318_v49, %v8225_v62  ;;  %v8233_v15 = vadd.f32 %v13290_v42, %v17485_v63 }
 0x426   : > { %v8717_v4 = vpop.f32.mrf.mxu0  ;;  %v8190_v27 = vpop.f32.mrf.mxu1 }
 0x427   : > { %v17637_v32 = vadd.f32 %v8717_v4, %v8223_v38  ;;  %v8231_v17 = vadd.f32 %v8190_v27, %v17489_v45 }
 0x428   : > { %v13321_v2 = vpop.f32.mrf.mxu0  ;;  %v13333_v12 = vpop.f32.mrf.mxu1 }
 0x429   : > { %v17640_v39 = vadd.f32 %v13321_v2, %v8228_v36  ;;  %v9101_v0 = vadd.f32 %v13333_v12, %v17501_v35 }
 0x42a   : > { %v8730_v13 = vpop.f32.mrf.mxu0  ;;  %v8972_v46 = vpop.f32.mrf.mxu1 }
 0x42b   : > { %v17643_v10 = vadd.f32 %v8730_v13, %v8226_v16  ;;  %v9099_v62 = vadd.f32 %v8972_v46, %v17510_v57 }
 0x42c   : > { %v13322_v7 = vpop.f32.mrf.mxu0  ;;  %v13334_v63 = vpop.f32.mrf.mxu1 }
 0x42d   : > { %v17646_v37 = vadd.f32 %v13322_v7, %v8229_v31  ;;  %v9102_v38 = vadd.f32 %v13334_v63, %v17518_v47 }
 0x42e   : > { %v8733_v56 = vpop.f32.mrf.mxu0  ;;  %v8975_v45 = vpop.f32.mrf.mxu1 }
 0x42f   : > { %v17649_v26 = vadd.f32 %v8733_v56, %v8227_v43  ;;  %v17652_v36 = vadd.f32 %v8975_v45, %v17525_v20 }
 0x430   : > { %v13325_v35 = vpop.f32.mrf.mxu0  ;;  %v13337_v52 = vpop.f32.mrf.mxu1 }
 0x431   : > { %v17654_v30 = vadd.f32 %v13325_v35, %v8232_v33  ;;  %v9105_v11 = vadd.f32 %v13337_v52, %v17537_v55 }
 0x432   : > { %v8746_v57 = vpop.f32.mrf.mxu0  ;;  %v8988_v16 = vpop.f32.mrf.mxu1 }
 0x433   : > { %v17657_v1 = vadd.f32 %v8746_v57, %v8230_v51  ;;  %v17660_v29 = vadd.f32 %v8988_v16, %v17546_v28 }
 0x434   : > { %v13326_v47 = vpop.f32.mrf.mxu0  ;;  %v13338_v31 = vpop.f32.mrf.mxu1 }
 0x435   : > { %v17662_v19 = vadd.f32 %v13326_v47, %v8233_v15  ;;  %v9106_v20 = vadd.f32 %v13338_v31, %v17553_v40 }
 0x436   : > { %v8749_v14 = vpop.f32.mrf.mxu0  ;;  %v8991_v59 = vpop.f32.mrf.mxu1 }
 0x437   : > { %v17665_v43 = vadd.f32 %v8749_v14, %v8231_v17  ;;  %v17668_v23 = vadd.f32 %v8991_v59, %v17560_v60 }
 0x438   : > { %v13369_v55 = vpop.f32.mrf.mxu0  ;;  %v13341_v24 = vpop.f32.mrf.mxu1 }
 0x439   : > { %v17670_v48 = vadd.f32 %v13369_v55, %v9101_v0  ;;  %v9109_v28 = vadd.f32 %v13341_v24, %v17569_v5 }
 0x43a   : > { %v9511_v33 = vpop.f32.mrf.mxu0  ;;  %v9004_v22 = vpop.f32.mrf.mxu1 }
 0x43b   : > { %v17673_v18 = vadd.f32 %v9511_v33, %v9099_v62  ;;  %v17676_v51 = vadd.f32 %v9004_v22, %v17576_v41 }
 0x43c   : > { %v13370_v40 = vpop.f32.mrf.mxu0  ;;  %v13342_v49 = vpop.f32.mrf.mxu1 }
 0x43d   : > { %v17678_v42 = vadd.f32 %v13370_v40, %v9102_v38  ;;  %v9110_v60 = vadd.f32 %v13342_v49, %v17580_v21 }
 0x43e   : > { %v17681_v15 = vpop.f32.mrf.mxu0  ;;  %v9007_v4 = vpop.f32.mrf.mxu1 }
 0x43f   : > { %v17684_v27 = vadd.f32 %v9007_v4, %v17584_v8 }
 0x440   : > { %v13373_v5 = vpop.f32.mrf.mxu0  ;;  %v13345_v17 = vpop.f32.mrf.mxu1 }
 0x441   : > { %v17686_v2 = vadd.f32 %v13373_v5, %v9105_v11  ;;  %v9113_v12 = vadd.f32 %v13345_v17, %v17591_v50  ;;  %v18910_v11 = vmov 0.0  }
 0x442   : > { %v17689_v41 = vpop.f32.mrf.mxu0  ;;  %v9020_v0 = vpop.f32.mrf.mxu1  ;;  %13507 = vmatprep.subr.mxu0 %v18910_v11  ;;  %13518 = vmatprep.subr.mxu1 %v18910_v11 }
 0x443   : > { %v17692_v13 = vadd.f32 %v9020_v0, %v17597_v9 }
 0x444   : > { %v13374_v46 = vpop.f32.mrf.mxu0  ;;  %v13346_v21 = vpop.f32.mrf.mxu1 }
 0x445   : > { %v17694_v62 = vadd.f32 %v13374_v46, %v9106_v20  ;;  %v9114_v7 = vadd.f32 %v13346_v21, %v17601_v25 }
 0x446   : > { %v17697_v8 = vpop.f32.mrf.mxu0  ;;  %v9023_v63 = vpop.f32.mrf.mxu1 }
 0x447   : > { %v17700_v38 = vadd.f32 %v9023_v63, %v17607_v53 }
 0x448   : > { %v13377_v56 = vpop.f32.mrf.mxu0  ;;  %v13349_v50 = vpop.f32.mrf.mxu1 }
 0x449   : > { %v17702_v45 = vadd.f32 %v13377_v56, %v9109_v28  ;;  %v9117_v35 = vadd.f32 %v13349_v50, %v17613_v44  ;;  %v11257_v44 = vld [vmem:[%s18685_s10 + $0x18] sm:$0xff] }
 0x44a   : > { %v17705_v9 = vpop.f32.mrf.mxu0  ;;  %v9036_v52 = vpop.f32.mrf.mxu1  ;;  %13508 = vmatpush3.msra.mxu0 %v11257_v44 }
 0x44b   : > { %v17710_v25 = vadd.f32 %v9036_v52, %v17617_v34  ;;  %13509 = vmatprep.subr.mxu0 %v18910_v11 }
 0x44c   : > { %v13378_v57 = vpop.f32.mrf.mxu0  ;;  %v13350_v53 = vpop.f32.mrf.mxu1 }
 0x44d   : > { %v17712_v16 = vadd.f32 %v13378_v57, %v9110_v60  ;;  %v9118_v47 = vadd.f32 %v13350_v53, %v17620_v3 }
 0x44e   : > { %v17718_v31 = vpop.f32.mrf.mxu0  ;;  %v9039_v20 = vpop.f32.mrf.mxu1 }
 0x44f   : > { %v17721_v14 = vadd.f32 %v9039_v20, %v17623_v54 }
 0x450   : > { %v13381_v34 = vpop.f32.mrf.mxu0  ;;  %v13353_v59 = vpop.f32.mrf.mxu1 }
 0x451   : > { %v17724_v55 = vadd.f32 %v13381_v34, %v9113_v12  ;;  %v9121_v24 = vadd.f32 %v13353_v59, %v17628_v61 }
 0x452   : > { %v17727_v3 = vpop.f32.mrf.mxu0  ;;  %v9052_v28 = vpop.f32.mrf.mxu1 }
 0x453   : > { %v17730_v33 = vadd.f32 %v9052_v28, %v17631_v58 }
 0x454   : > { %v13382_v22 = vpop.f32.mrf.mxu0  ;;  %v13354_v40 = vpop.f32.mrf.mxu1 }
 0x455   : > { %19490 = vst [vmem:[#allocation85_spill] sm:$0xff] %v17730_v33  ;;  %v17732_v49 = vadd.f32 %v13382_v22, %v9114_v7  ;;  %v9122_v54 = vadd.f32 %v13354_v40, %v17634_v6 }
 0x456   : > { %v17735_v60 = vpop.f32.mrf.mxu0  ;;  %v9055_v4 = vpop.f32.mrf.mxu1 }
 0x457   : > { %v17738_v5 = vadd.f32 %v9055_v4, %v17637_v32  ;;  %v11256_v32 = vld [vmem:[%s18685_s10 + $0x10] sm:$0xff] }
 0x458   : > { %v13385_v17 = vpop.f32.mrf.mxu0  ;;  %v13357_v61 = vpop.f32.mrf.mxu1  ;;  %13510 = vmatpush3.msra.mxu0 %v11256_v32 }
 0x459   : > { %19491 = vst [vmem:[#allocation122_spill] sm:$0xff] %v17738_v5  ;;  %v17740_v12 = vadd.f32 %v13385_v17, %v9117_v35  ;;  %v9125_v0 = vadd.f32 %v13357_v61, %v17640_v39  ;;  %13511 = vmatprep.subr.mxu0 %v18910_v11 }
 0x45a   : > { %v17743_v58 = vpop.f32.mrf.mxu0  ;;  %v9068_v46 = vpop.f32.mrf.mxu1 }
 0x45b   : > { %v17746_v21 = vadd.f32 %v9068_v46, %v17643_v10 }
 0x45c   : > { %v13386_v7 = vpop.f32.mrf.mxu0  ;;  %v13358_v6 = vpop.f32.mrf.mxu1 }
 0x45d   : > { %19492 = vst [vmem:[#allocation89_spill] sm:$0xff] %v17746_v21  ;;  %v17748_v63 = vadd.f32 %v13386_v7, %v9118_v47  ;;  %v9126_v56 = vadd.f32 %v13358_v6, %v17646_v37 }
 0x45e   : > { %v17754_v50 = vpop.f32.mrf.mxu0  ;;  %v9071_v35 = vpop.f32.mrf.mxu1 }
 0x45f   : > { %v17757_v39 = vadd.f32 %v9071_v35, %v17649_v26 }
 0x460   : > { %v13389_v10 = vpop.f32.mrf.mxu0  ;;  %v13361_v52 = vpop.f32.mrf.mxu1 }
 0x461   : > { %19493 = vst [vmem:[#allocation124_spill] sm:$0xff] %v17757_v39  ;;  %v17760_v57 = vadd.f32 %v13389_v10, %v9121_v24  ;;  %v9129_v53 = vadd.f32 %v13361_v52, %v17654_v30 }
 0x462   : > { %v17763_v37 = vpop.f32.mrf.mxu0  ;;  %v9084_v47 = vpop.f32.mrf.mxu1 }
 0x463   : > { %19494 = vst [vmem:[#allocation63_spill] sm:$0xff] %v17763_v37  ;;  %v17766_v44 = vadd.f32 %v9084_v47, %v17657_v1 }
 0x464   : > { %v13390_v20 = vpop.f32.mrf.mxu0  ;;  %v13362_v34 = vpop.f32.mrf.mxu1 }
 0x465   : > { %19495 = vst [vmem:[#allocation117_spill] sm:$0xff] %v17766_v44  ;;  %v17768_v59 = vadd.f32 %v13390_v20, %v9122_v54  ;;  %v9130_v26 = vadd.f32 %v13362_v34, %v17662_v19 }
 0x466   : > { %v17771_v28 = vpop.f32.mrf.mxu0  ;;  %v9087_v22 = vpop.f32.mrf.mxu1 }
 0x467   : > { %19496 = vst [vmem:[#allocation93_spill] sm:$0xff] %v17771_v28  ;;  %v17774_v24 = vadd.f32 %v9087_v22, %v17665_v43 }
 0x468   : > { %v13393_v40 = vpop.f32.mrf.mxu0  ;;  %v13405_v30 = vpop.f32.mrf.mxu1 }
 0x469   : > { %19497 = vst [vmem:[#allocation123_spill] sm:$0xff] %v17774_v24  ;;  %v17776_v4 = vadd.f32 %v13393_v40, %v9125_v0  ;;  %v17779_v17 = vadd.f32 %v13405_v30, %v17670_v48  ;;  %v11255_v0 = vld [vmem:[%s18685_s10 + $0x8] sm:$0xff] }
 0x46a   : > { %v17781_v1 = vpop.f32.mrf.mxu0  ;;  %v10070_v61 = vpop.f32.mrf.mxu1  ;;  %13512 = vmatpush3.msra.mxu0 %v11255_v0 }
 0x46b   : > { %19498 = vst [vmem:[#allocation121_spill] sm:$0xff] %v17781_v1  ;;  %v17784_v54 = vadd.f32 %v10070_v61, %v17673_v18  ;;  %13513 = vmatprep.subr.mxu0 %v18910_v11 }
 0x46c   : > { %v13394_v19 = vpop.f32.mrf.mxu0  ;;  %v13406_v46 = vpop.f32.mrf.mxu1 }
 0x46d   : > { %v17786_v7 = vadd.f32 %v13394_v19, %v9126_v56  ;;  %v17789_v43 = vadd.f32 %v13406_v46, %v17678_v42 }
 0x46e   : > { %v17794_v6 = vpop.f32.mrf.mxu0  ;;  %v17796_v48 = vpop.f32.mrf.mxu1 }
 0x46f   : > { %19499 = vst [vmem:[#allocation127_spill] sm:$0xff] %v17794_v6 }
 0x470   : > { %v13397_v18 = vpop.f32.mrf.mxu0  ;;  %v13409_v32 = vpop.f32.mrf.mxu1 }
 0x471   : > { %v17799_v35 = vadd.f32 %v13397_v18, %v9129_v53  ;;  %v17802_v56 = vadd.f32 %v13409_v32, %v17686_v2 }
 0x472   : > { %v17804_v42 = vpop.f32.mrf.mxu0  ;;  %v17806_v10 = vpop.f32.mrf.mxu1 }
 0x473   : > { %19500 = vst [vmem:[#allocation71_spill] sm:$0xff] %v17804_v42 }
 0x474   : > { %v13398_v52 = vpop.f32.mrf.mxu0  ;;  %v13410_v47 = vpop.f32.mrf.mxu1 }
 0x475   : > { %v9669_v20 = vadd.f32 %v13398_v52, %v9130_v26  ;;  %v17809_v34 = vadd.f32 %v13410_v47, %v17694_v62 }
 0x476   : > { %v17811_v22 = vpop.f32.mrf.mxu0  ;;  %v17813_v40 = vpop.f32.mrf.mxu1 }
 0x477   : > { %19501 = vst [vmem:[#allocation112_spill] sm:$0xff] %v17811_v22 }
 0x478   : > { %v17815_v30 = vpop.f32.mrf.mxu0  ;;  %v13413_v53 = vpop.f32.mrf.mxu1 }
 0x479   : > { %v17818_v2 = vadd.f32 %v13413_v53, %v17702_v45  ;;  %v11254_v45 = vld [vmem:[%s18685_s10] sm:$0xff] }
 0x47a   : > { %v10408_v61 = vpop.f32.mrf.mxu0  ;;  %v17820_v19 = vpop.f32.mrf.mxu1  ;;  %13514 = vmatpush3.msra.mxu0 %v11254_v45 }
 0x47c   : > { %v17822_v46 = vpop.f32.mrf.mxu0  ;;  %v13414_v0 = vpop.f32.mrf.mxu1 }
 0x47d   : > { %v17825_v26 = vadd.f32 %v13414_v0, %v17712_v16  ;;  %v19502_v16 = vmov 0.0   ;;  %v11337_v0 = vld [vmem:[%s18687_s12] sm:$0xff] }
 0x47e   : > { %v17827_v62 = vpop.f32.mrf.mxu0  ;;  %v17829_v18 = vpop.f32.mrf.mxu1  ;;  %13515 = vmatprep.mubr.msk.f32.mxu0 %vm13824_vm0, %v19502_v16  ;;  %13520 = vmatprep.mubr.msk.f32.mxu1 %vm13824_vm0, %v19502_v16 }
 0x47f   : > { %13519 = vmatpush3.msra.mxu1 %v11337_v0 }
 0x480   : > { %v17831_v32 = vpop.f32.mrf.mxu0  ;;  %v13417_v52 = vpop.f32.mrf.mxu1 }
 0x481   : > { %v17834_v47 = vadd.f32 %v13417_v52, %v17724_v55 }
 0x482   : > { %v17839_v53 = vpop.f32.mrf.mxu0  ;;  %v17841_v11 = vpop.f32.mrf.mxu1 }
 0x484   : > { %v17848_v55 = vpop.f32.mrf.mxu0  ;;  %v13418_v52 = vpop.f32.mrf.mxu1 }
 0x485   : > { %v17851_v22 = vadd.f32 %v13418_v52, %v17732_v49 }
 0x486   : > { %v17853_v24 = vpop.f32.mrf.mxu0  ;;  %v17855_v42 = vpop.f32.mrf.mxu1 }
 0x488   : > { %v17857_v45 = vpop.f32.mrf.mxu0  ;;  %v13421_v44 = vpop.f32.mrf.mxu1 }
 0x489   : > { %v17860_v6 = vadd.f32 %v13421_v44, %v17740_v12 }
 0x48a   : > { %v17862_v39 = vpop.f32.mrf.mxu1  ;;  %v17864_v16 = vpop.f32.mrf.mxu0 }
 0x48b   : > { %19503 = vst [vmem:[#allocation102_spill] sm:$0xff] %v17860_v6 }
 0x48c   : > { %v13422_v1 = vpop.f32.mrf.mxu1  ;;  %v17871_v52 = vpop.f32.mrf.mxu0 }
 0x48d   : > { %v17867_v0 = vadd.f32 %v13422_v1, %v17748_v63 }
 0x48e   : > { %v17869_v49 = vpop.f32.mrf.mxu1  ;;  %v17878_v12 = vpop.f32.mrf.mxu0 }
 0x48f   : > { %19504 = vst [vmem:[#allocation100_spill] sm:$0xff] %v17867_v0  ;;  %19505 = vst [vmem:[#allocation114_spill] sm:$0xff] %v17869_v49 }
 0x490   : > { %v13425_v21 = vpop.f32.mrf.mxu1  ;;  %v17885_v63 = vpop.f32.mrf.mxu0 }
 0x491   : > { %v17874_v28 = vadd.f32 %v13425_v21, %v17760_v57 }
 0x492   : > { %v17876_v5 = vpop.f32.mrf.mxu1  ;;  %v17892_v21 = vpop.f32.mrf.mxu0 }
 0x493   : > { %19506 = vst [vmem:[#allocation125_spill] sm:$0xff] %v17874_v28  ;;  %19507 = vst [vmem:[#allocation103_spill] sm:$0xff] %v17876_v5 }
 0x494   : > { %v13426_v44 = vpop.f32.mrf.mxu1 }
 0x495   : > { %v17881_v37 = vadd.f32 %v13426_v44, %v17768_v59  ;;  %v17899_v59 = vpop.f32.mrf.mxu0 }
 0x496   : > { %v17883_v33 = vpop.f32.mrf.mxu1 }
 0x497   : > { %19508 = vst [vmem:[#allocation77_spill] sm:$0xff] %v17881_v37  ;;  %19509 = vst [vmem:[#allocation95_spill] sm:$0xff] %v17883_v33 }
 0x498   : > { %v13429_v1 = vpop.f32.mrf.mxu1 }
 0x499   : > { %v17888_v0 = vadd.f32 %v13429_v1, %v17776_v4  ;;  %v17906_v4 = vpop.f32.mrf.mxu0 }
 0x49a   : > { %v17890_v49 = vpop.f32.mrf.mxu1 }
 0x49b   : > { %19510 = vst [vmem:[#allocation129_spill] sm:$0xff] %v17888_v0  ;;  %19511 = vst [vmem:[#allocation130_spill] sm:$0xff] %v17890_v49  ;;  %v17912_v6 = vpop.f32.mrf.mxu0 }
 0x49c   : > { %v13430_v57 = vpop.f32.mrf.mxu1 }
 0x49d   : > { %v17895_v28 = vadd.f32 %v13430_v57, %v17786_v7  ;;  %v10535_v57 = vadd.f32 %v10408_v61, %v17784_v54  ;;  %v9642_v54 = vadd.f32 %v17689_v41, %v17660_v29  ;;  %v9643_v29 = vadd.f32 %v17697_v8, %v17668_v23 }
 0x49e   : > { %v17897_v5 = vpop.f32.mrf.mxu1 }
 0x49f   : > { %19512 = vst [vmem:[#allocation82_spill] sm:$0xff] %v17895_v28  ;;  %v9639_v28 = vadd.f32 %v17681_v15, %v17652_v36  ;;  %v17929_v36 = vld [vmem:[%s18683_s8] ss:$0 sm:$0xff]  ;;  %v10202_v23 = vadd.f32 %v17813_v40, %v9643_v29  ;;  %v9647_v29 = vadd.f32 %v17718_v31, %v17684_v27 }
 0x4a0   : > { %v13433_v44 = vpop.f32.mrf.mxu1 }
 0x4a1   : > { %v17902_v37 = vadd.f32 %v13433_v44, %v17799_v35  ;;  %v10537_v35 = vadd.f32 %v17815_v30, %v17779_v17 }
 0x4a2   : > { %v17904_v33 = vpop.f32.mrf.mxu1 }
 0x4a3   : > { %19513 = vst [vmem:[#allocation96_spill] sm:$0xff] %v17902_v37  ;;  %19514 = vst [vmem:[#allocation107_spill] sm:$0xff] %v17904_v33  ;;  %v17919_v37 = vpop.f32.mrf.mxu0 }
 0x4a4   : > { %v13434_v1 = vpop.f32.mrf.mxu1 }
 0x4a5   : > { %v17908_v0 = vadd.f32 %v13434_v1, %v9669_v20  ;;  %v10198_v20 = vadd.f32 %v17796_v48, %v9639_v28  ;;  %v10538_v1 = vadd.f32 %v17822_v46, %v17789_v43  ;;  %v10201_v28 = vadd.f32 %v17806_v10, %v9642_v54  ;;  %v17934_v48 = vpop.f32.mrf.mxu0 }
 0x4a6   : > { %v17910_v49 = vpop.f32.mrf.mxu1  ;;  %v10540_v54 = vadd.f32 %v17853_v24, %v10202_v23 }
 0x4a7   : > { %19515 = vst [vmem:[#allocation98_spill] sm:$0xff] %v17908_v0  ;;  %19516 = vst [vmem:[#allocation110_spill] sm:$0xff] %v17910_v49  ;;  %v10536_v15 = vadd.f32 %v17827_v62, %v10198_v20  ;;  %v10539_v41 = vadd.f32 %v17839_v53, %v10201_v28  ;;  %v17943_v62 = vld [vmem:[%s18684_s9] ss:$0 sm:$0xff]  ;;  %v17953_v8 = vpop.f32.mrf.mxu0 }
 0x4a8   : > { %v13477_v7 = vpop.f32.mrf.mxu1 }
 0x4a9   : > { %v11076_v0 = vadd.f32 %v13477_v7, %v10537_v35  ;;  %v10542_v35 = vadd.f32 %v17848_v55, %v17809_v34  ;;  %v17975_v28 = vpop.f32.mrf.mxu0 }
 0x4aa   : > { %v10947_v44 = vpop.f32.mrf.mxu1 }
 0x4ab   : > { %v11074_v33 = vadd.f32 %v10947_v44, %v10535_v57  ;;  %v11115_v43 = vmul.f32 %v17929_v36, %v11076_v0  ;;  %v17995_v27 = vpop.f32.mrf.mxu0 }
 0x4ac   : > { %v13478_v49 = vpop.f32.mrf.mxu1 }
 0x4ad   : > { %v11113_v17 = vmul.f32 %v17929_v36, %v11074_v33  ;;  %v11077_v30 = vadd.f32 %v13478_v49, %v10538_v1  ;;  %v10541_v33 = vadd.f32 %v17831_v32, %v17802_v56  ;;  %v17958_v44 = vadd.f32 %v17943_v62, %v11115_v43 }
 0x4ae   : > { %v10950_v61 = vpop.f32.mrf.mxu1  ;;  %v9646_v1 = vadd.f32 %v17705_v9, %v17676_v51 }
 0x4af   : > { %v11075_v46 = vadd.f32 %v10950_v61, %v10536_v15  ;;  %v17948_v10 = vadd.f32 %v17943_v62, %v11113_v17  ;;  %v11116_v0 = vmul.f32 %v17929_v36, %v11077_v30  ;;  %v11187_v9 = vsel %vm18912_vm1, %v17958_v44, 0.0 }
 0x4b0   : > { %v13481_v7 = vpop.f32.mrf.mxu1  ;;  %v10205_v61 = vadd.f32 %v17820_v19, %v9646_v1  ;;  %v10545_v19 = vadd.f32 %v17857_v45, %v17818_v2 }
 0x4b1   : > { %v11114_v49 = vmul.f32 %v17929_v36, %v11075_v46  ;;  %v11080_v32 = vadd.f32 %v13481_v7, %v10541_v33  ;;  %v11184_v15 = vsel %vm18912_vm1, %v17948_v10, 0.0  ;;  %v17970_v34 = vadd.f32 %v17943_v62, %v11116_v0 }
 0x4b2   : > { %v10963_v57 = vpop.f32.mrf.mxu1 }
 0x4b3   : > { %v11078_v53 = vadd.f32 %v10963_v57, %v10539_v41  ;;  %v17961_v56 = vadd.f32 %v17943_v62, %v11114_v49  ;;  %v11119_v24 = vmul.f32 %v17929_v36, %v11080_v32  ;;  %v10543_v41 = vadd.f32 %v17864_v16, %v10205_v61  ;;  %v18015_v61 = vpop.f32.mrf.mxu0 }
 0x4b4   : > { %v13482_v20 = vpop.f32.mrf.mxu1  ;;  %v11189_v0 = vsel %vm18912_vm1, %v17970_v34, 0.0 }
 0x4b5   : > { %v11117_v40 = vmul.f32 %v17929_v36, %v11078_v53  ;;  %v11185_v55 = vsel %vm18912_vm1, %v17961_v56, 0.0  ;;  %v11081_v17 = vadd.f32 %v13482_v20, %v10542_v35  ;;  %v10206_v53 = vadd.f32 %v17829_v18, %v9647_v29 }
 0x4b6   : > { %v10966_v30 = vpop.f32.mrf.mxu1  ;;  %v11186_v51 = vadd.f32 %v11185_v55, %v11184_v15  ;;  %v10546_v35 = vadd.f32 %v17871_v52, %v17825_v26  ;;  %v17998_v32 = vadd.f32 %v17943_v62, %v11119_v24  ;;  %v9650_v18 = vadd.f32 %v17727_v3, %v17692_v13 }
 0x4b7   : > { %v17981_v43 = vadd.f32 %v17943_v62, %v11117_v40  ;;  %v11079_v46 = vadd.f32 %v10966_v30, %v10540_v54  ;;  %v11120_v49 = vmul.f32 %v17929_v36, %v11081_v17  ;;  %v10544_v52 = vadd.f32 %v17878_v12, %v10206_v53 }
 0x4b8   : > { %v13485_v7 = vpop.f32.mrf.mxu1  ;;  %v11188_v33 = vadd.f32 %v11187_v9, %v11186_v51  ;;  %v10209_v30 = vadd.f32 %v17841_v11, %v9650_v18  ;;  %v11195_v13 = vsel %vm18912_vm1, %v17998_v32, 0.0  ;;  %v10549_v11 = vadd.f32 %v17885_v63, %v17834_v47 }
 0x4b9   : > { %v11118_v57 = vmul.f32 %v17929_v36, %v11079_v46  ;;  %v11191_v2 = vsel %vm18912_vm1, %v17981_v43, 0.0  ;;  %v11084_v20 = vadd.f32 %v13485_v7, %v10545_v19  ;;  %v18010_v40 = vadd.f32 %v17943_v62, %v11120_v49 }
 0x4ba   : > { %v10979_v23 = vpop.f32.mrf.mxu1  ;;  %v11190_v31 = vadd.f32 %v11189_v0, %v11188_v33  ;;  %v9651_v46 = vadd.f32 %v17735_v60, %v17700_v38  ;;  %v10547_v7 = vadd.f32 %v17892_v21, %v10209_v30  ;;  %v18035_v38 = vpop.f32.mrf.mxu0 }
 0x4bb   : > { %v11082_v16 = vadd.f32 %v10979_v23, %v10543_v41  ;;  %v18003_v45 = vadd.f32 %v17943_v62, %v11118_v57  ;;  %v11123_v3 = vmul.f32 %v17929_v36, %v11084_v20  ;;  %v11197_v41 = vsel %vm18912_vm1, %v18010_v40, 0.0 }
 0x4bc   : > { %v13486_v1 = vpop.f32.mrf.mxu1  ;;  %v11192_v54 = vadd.f32 %v11191_v2, %v11190_v31  ;;  %v10210_v49 = vadd.f32 %v17855_v42, %v9651_v46  ;;  %v10550_v57 = vadd.f32 %v17899_v59, %v17851_v22  ;;  %v9654_v42 = vadd.f32 %v17743_v58, %v17710_v25  ;;  %v19518_v46 = vld [vmem:[#allocation114_spill] sm:$0xff] }
 0x4bd   : > { %v11121_v26 = vmul.f32 %v17929_v36, %v11082_v16  ;;  %v11193_v15 = vsel %vm18912_vm1, %v18003_v45, 0.0  ;;  %v11085_v55 = vadd.f32 %v13486_v1, %v10546_v35  ;;  %v18038_v23 = vadd.f32 %v17943_v62, %v11123_v3 }
 0x4be   : > { %v10982_v17 = vpop.f32.mrf.mxu1  ;;  %v11194_v51 = vadd.f32 %v11193_v15, %v11192_v54  ;;  %v10548_v59 = vadd.f32 %v17906_v4, %v10210_v49  ;;  %v10213_v18 = vadd.f32 %v17862_v39, %v9654_v42  ;;  %v18055_v54 = vpop.f32.mrf.mxu0  ;;  %v19517_v39 = vld [vmem:[#allocation102_spill] sm:$0xff]  ;;  %v19520_v49 = vld [vmem:[#allocation85_spill] sm:$0xff] }
 0x4bf   : > { %v18021_v12 = vadd.f32 %v17943_v62, %v11121_v26  ;;  %v11083_v9 = vadd.f32 %v10982_v17, %v10544_v52  ;;  %v11124_v33 = vmul.f32 %v17929_v36, %v11085_v55  ;;  %v11203_v25 = vsel %vm18912_vm1, %v18038_v23, 0.0 }
 0x4c0   : > { %v13489_v24 = vpop.f32.mrf.mxu1  ;;  %v11196_v29 = vadd.f32 %v11195_v13, %v11194_v51  ;;  %v9655_v55 = vadd.f32 %v17754_v50, %v17721_v14  ;;  %v10551_v17 = vadd.f32 %v17919_v37, %v10213_v18  ;;  %v10553_v51 = vadd.f32 %v17912_v6, %v19517_v39  ;;  %v10504_v14 = vpop.f32.mrf.mxu0 }
 0x4c1   : > { %v11122_v19 = vmul.f32 %v17929_v36, %v11083_v9  ;;  %v11199_v47 = vsel %vm18912_vm1, %v18021_v12, 0.0  ;;  %v11088_v53 = vadd.f32 %v13489_v24, %v10549_v11  ;;  %v18050_v16 = vadd.f32 %v17943_v62, %v11124_v33 }
 0x4c2   : > { %v10995_v0 = vpop.f32.mrf.mxu1  ;;  %v11198_v60 = vadd.f32 %v11197_v41, %v11196_v29  ;;  %v19519_v29 = vld [vmem:[#allocation100_spill] sm:$0xff] }
 0x4c3   : > { %v11086_v21 = vadd.f32 %v10995_v0, %v10547_v7  ;;  %v18043_v63 = vadd.f32 %v17943_v62, %v11122_v19  ;;  %v11127_v58 = vmul.f32 %v17929_v36, %v11088_v53  ;;  %v11205_v13 = vsel %vm18912_vm1, %v18050_v16, 0.0 }
 0x4c4   : > { %v13490_v35 = vpop.f32.mrf.mxu1  ;;  %v11200_v31 = vadd.f32 %v11199_v47, %v11198_v60  ;;  %v10214_v7 = vadd.f32 %v19518_v46, %v9655_v55  ;;  %v10554_v11 = vadd.f32 %v17934_v48, %v19519_v29 }
 0x4c5   : > { %v11125_v22 = vmul.f32 %v17929_v36, %v11086_v21  ;;  %v11201_v2 = vsel %vm18912_vm1, %v18043_v63, 0.0  ;;  %v11089_v20 = vadd.f32 %v13490_v35, %v10550_v57  ;;  %v18076_v41 = vadd.f32 %v17943_v62, %v11127_v58  ;;  %v19521_v57 = vld [vmem:[#allocation63_spill] sm:$0xff]  ;;  %v19523_v58 = vld [vmem:[#allocation122_spill] sm:$0xff] }
 0x4c6   : > { %v10998_v1 = vpop.f32.mrf.mxu1  ;;  %v11202_v26 = vadd.f32 %v11201_v2, %v11200_v31  ;;  %v9658_v60 = vadd.f32 %v19521_v57, %v19520_v49  ;;  %v10552_v47 = vadd.f32 %v17953_v8, %v10214_v7  ;;  %v13466_v2 = vpop.f32.mrf.mxu0  ;;  %v19527_v7 = vld [vmem:[#allocation77_spill] sm:$0xff] }
 0x4c7   : > { %v18061_v4 = vadd.f32 %v17943_v62, %v11125_v22  ;;  %v11087_v52 = vadd.f32 %v10998_v1, %v10548_v59  ;;  %v11128_v3 = vmul.f32 %v17929_v36, %v11089_v20  ;;  %v19522_v22 = vld [vmem:[#allocation103_spill] sm:$0xff]  ;;  %v11211_v1 = vsel %vm18912_vm1, %v18076_v41, 0.0  ;;  %v19528_v49 = vld [vmem:[#allocation89_spill] sm:$0xff] }
 0x4c8   : > { %v13493_v15 = vpop.f32.mrf.mxu1  ;;  %v11204_v30 = vadd.f32 %v11203_v25, %v11202_v26  ;;  %v10217_v59 = vadd.f32 %v19522_v22, %v9658_v60  ;;  %v10558_v29 = vadd.f32 %v18015_v61, %v19527_v7  ;;  %v19529_v57 = vld [vmem:[#allocation121_spill] sm:$0xff]  ;;  %v19530_v22 = vld [vmem:[#allocation130_spill] sm:$0xff] }
 0x4c9   : > { %v11126_v9 = vmul.f32 %v17929_v36, %v11087_v52  ;;  %v11207_v6 = vsel %vm18912_vm1, %v18061_v4, 0.0  ;;  %v11092_v19 = vadd.f32 %v13493_v15, %v10553_v51  ;;  %v18088_v53 = vadd.f32 %v17943_v62, %v11128_v3  ;;  %v19524_v52 = vld [vmem:[#allocation93_spill] sm:$0xff]  ;;  %v19534_v7 = vld [vmem:[#allocation82_spill] sm:$0xff] }
 0x4ca   : > { %v11011_v24 = vpop.f32.mrf.mxu1  ;;  %v11206_v50 = vadd.f32 %v11205_v13, %v11204_v30  ;;  %v9659_v15 = vadd.f32 %v19524_v52, %v19523_v58  ;;  %v10555_v55 = vadd.f32 %v17995_v27, %v10217_v59  ;;  %v19525_v30 = vld [vmem:[#allocation125_spill] sm:$0xff]  ;;  %v9662_v60 = vadd.f32 %v19529_v57, %v19528_v49  ;;  %v19531_v52 = vld [vmem:[#allocation124_spill] sm:$0xff] }
 0x4cb   : > { %v11090_v37 = vadd.f32 %v11011_v24, %v10551_v17  ;;  %v18081_v33 = vadd.f32 %v17943_v62, %v11126_v9  ;;  %v11131_v18 = vmul.f32 %v17929_v36, %v11092_v19  ;;  %v10557_v39 = vadd.f32 %v17975_v28, %v19525_v30  ;;  %v19526_v24 = vld [vmem:[#allocation95_spill] sm:$0xff]  ;;  %v19535_v57 = vld [vmem:[#allocation117_spill] sm:$0xff] }
 0x4cc   : > { %v13494_v0 = vpop.f32.mrf.mxu1  ;;  %v11208_v21 = vadd.f32 %v11207_v6, %v11206_v50  ;;  %v11213_v51 = vsel %vm18912_vm1, %v18088_v53, 0.0  ;;  %v10218_v46 = vadd.f32 %v19526_v24, %v9659_v15  ;;  %v10221_v59 = vadd.f32 %v19530_v22, %v9662_v60  ;;  %v19532_v15 = vld [vmem:[#allocation127_spill] sm:$0xff] }
 0x4cd   : > { %v11129_v48 = vmul.f32 %v17929_v36, %v11090_v37  ;;  %v11209_v35 = vsel %vm18912_vm1, %v18081_v33, 0.0  ;;  %v11093_v42 = vadd.f32 %v13494_v0, %v10554_v11  ;;  %v10507_v11 = vpop.f32.mrf.mxu0  ;;  %v18112_v37 = vadd.f32 %v17943_v62, %v11131_v18  ;;  %v19536_v60 = vld [vmem:[#allocation71_spill] sm:$0xff] }
 0x4ce   : > { %v11014_v31 = vpop.f32.mrf.mxu1  ;;  %v11210_v20 = vadd.f32 %v11209_v35, %v11208_v21  ;;  %v19537_v22 = vld [vmem:[#allocation107_spill] sm:$0xff] }
 0x4cf   : > { %v18097_v26 = vadd.f32 %v17943_v62, %v11129_v48  ;;  %v11091_v8 = vadd.f32 %v11014_v31, %v10552_v47  ;;  %v11132_v13 = vmul.f32 %v17929_v36, %v11093_v42  ;;  %v10556_v48 = vadd.f32 %v18035_v38, %v10218_v46 }
 0x4d0   : > { %v13497_v25 = vpop.f32.mrf.mxu1  ;;  %v11212_v17 = vadd.f32 %v11211_v1, %v11210_v20  ;;  %v13469_v20 = vpop.f32.mrf.mxu0  ;;  %v11219_v18 = vsel %vm18912_vm1, %v18112_v37, 0.0 }
 0x4d1   : > { %v11130_v3 = vmul.f32 %v17929_v36, %v11091_v8  ;;  %v11215_v28 = vsel %vm18912_vm1, %v18097_v26, 0.0  ;;  %v11096_v19 = vadd.f32 %v13497_v25, %v10557_v39  ;;  %v18124_v47 = vadd.f32 %v17943_v62, %v11132_v13  ;;  %v19533_v39 = vld [vmem:[#allocation129_spill] sm:$0xff] }
 0x4d2   : > { %v11027_v9 = vpop.f32.mrf.mxu1  ;;  %v11214_v50 = vadd.f32 %v11213_v51, %v11212_v17  ;;  %v10559_v17 = vadd.f32 %v10504_v14, %v10221_v59  ;;  %v10561_v51 = vadd.f32 %v18055_v54, %v19533_v39 }
 0x4d3   : > { %v11094_v27 = vadd.f32 %v11027_v9, %v10555_v55  ;;  %v18117_v6 = vadd.f32 %v17943_v62, %v11130_v3  ;;  %v11135_v8 = vmul.f32 %v17929_v36, %v11096_v19  ;;  %v9663_v55 = vadd.f32 %v19532_v15, %v19531_v52  ;;  %v19538_v15 = vld [vmem:[#allocation123_spill] sm:$0xff] }
 0x4d4   : > { %v13498_v0 = vpop.f32.mrf.mxu1  ;;  %v11216_v21 = vadd.f32 %v11215_v28, %v11214_v50  ;;  %v11221_v13 = vsel %vm18912_vm1, %v18124_v47, 0.0  ;;  %v10520_v50 = vpop.f32.mrf.mxu0 }
 0x4d5   : > { %v11133_v61 = vmul.f32 %v17929_v36, %v11094_v27  ;;  %v11217_v35 = vsel %vm18912_vm1, %v18117_v6, 0.0  ;;  %v11097_v42 = vadd.f32 %v13498_v0, %v10558_v29  ;;  %v10222_v46 = vadd.f32 %v17897_v5, %v9663_v55  ;;  %v19539_v55 = vld [vmem:[#allocation112_spill] sm:$0xff] }
 0x4d6   : > { %v11030_v31 = vpop.f32.mrf.mxu1  ;;  %v11218_v1 = vadd.f32 %v11217_v35, %v11216_v21  ;;  %v10562_v29 = vadd.f32 %v13466_v2, %v19534_v7  ;;  %v18146_v14 = vadd.f32 %v17943_v62, %v11135_v8  ;;  %v9666_v21 = vadd.f32 %v19536_v60, %v19535_v57  ;;  %v19541_v7 = vld [vmem:[#allocation110_spill] sm:$0xff] }
 0x4d7   : > { %v18133_v25 = vadd.f32 %v17943_v62, %v11133_v61  ;;  %v11095_v38 = vadd.f32 %v11030_v31, %v10556_v48  ;;  %v11136_v3 = vmul.f32 %v17929_v36, %v11097_v42  ;;  %v10560_v61 = vadd.f32 %v10507_v11, %v10222_v46 }
 0x4d8   : > { %v13501_v58 = vpop.f32.mrf.mxu1  ;;  %v11220_v30 = vadd.f32 %v11219_v18, %v11218_v1  ;;  %v10225_v59 = vadd.f32 %v19537_v22, %v9666_v21  ;;  %v13470_v1 = vpop.f32.mrf.mxu0  ;;  %v11227_v8 = vsel %vm18912_vm1, %v18146_v14, 0.0 }
 0x4d9   : > { %v11134_v9 = vmul.f32 %v17929_v36, %v11095_v38  ;;  %v11223_v54 = vsel %vm18912_vm1, %v18133_v25, 0.0  ;;  %v11100_v0 = vadd.f32 %v13501_v58, %v10561_v51  ;;  %v18157_v48 = vadd.f32 %v17943_v62, %v11136_v3  ;;  %v19540_v51 = vld [vmem:[#allocation96_spill] sm:$0xff] }
 0x4da   : > { %v11043_v24 = vpop.f32.mrf.mxu1  ;;  %v11222_v27 = vadd.f32 %v11221_v13, %v11220_v30  ;;  %v10563_v30 = vadd.f32 %v10520_v50, %v10225_v59  ;;  %v10565_v13 = vadd.f32 %v13469_v20, %v19540_v51 }
 0x4db   : > { %v11098_v28 = vadd.f32 %v11043_v24, %v10559_v17  ;;  %v18151_v19 = vadd.f32 %v17943_v62, %v11134_v9  ;;  %v11139_v38 = vmul.f32 %v17929_v36, %v11100_v0  ;;  %v9667_v17 = vadd.f32 %v19539_v55, %v19538_v15 }
 0x4dc   : > { %v13502_v49 = vpop.f32.mrf.mxu1  ;;  %v11224_v5 = vadd.f32 %v11223_v54, %v11222_v27  ;;  %v11229_v3 = vsel %vm18912_vm1, %v18157_v48, 0.0  ;;  %v19542_v27 = vld [vmem:[#allocation98_spill] sm:$0xff]  ;;  %v10523_v54 = vpop.f32.mrf.mxu0 }
 0x4dd   : > { %v11137_v2 = vmul.f32 %v17929_v36, %v11098_v28  ;;  %v11225_v35 = vsel %vm18912_vm1, %v18151_v19, 0.0  ;;  %v11101_v42 = vadd.f32 %v13502_v49, %v10562_v29  ;;  %v10226_v29 = vadd.f32 %v19541_v7, %v9667_v17 }
 0x4de   : > { %v11046_v31 = vpop.f32.mrf.mxu1  ;;  %v11226_v18 = vadd.f32 %v11225_v35, %v11224_v5  ;;  %v10566_v28 = vadd.f32 %v13470_v1, %v19542_v27  ;;  %v18178_v50 = vadd.f32 %v17943_v62, %v11139_v38 }
 0x4df   : > { %v18166_v58 = vadd.f32 %v17943_v62, %v11137_v2  ;;  %v11099_v11 = vadd.f32 %v11046_v31, %v10560_v61  ;;  %v11140_v9 = vmul.f32 %v17929_v36, %v11101_v42  ;;  %v10564_v61 = vadd.f32 %v10523_v54, %v10226_v29 }
 0x4e0   : > { %v13505_v52 = vpop.f32.mrf.mxu1  ;;  %v11228_v39 = vadd.f32 %v11227_v8, %v11226_v18  ;;  %v11235_v1 = vsel %vm18912_vm1, %v18178_v50, 0.0 }
 0x4e1   : > { %v11138_v24 = vmul.f32 %v17929_v36, %v11099_v11  ;;  %v11231_v20 = vsel %vm18912_vm1, %v18166_v58, 0.0  ;;  %v11104_v60 = vadd.f32 %v13505_v52, %v10565_v13  ;;  %v18187_v35 = vadd.f32 %v17943_v62, %v11140_v9 }
 0x4e2   : > { %v11059_v46 = vpop.f32.mrf.mxu1  ;;  %v11230_v0 = vadd.f32 %v11229_v3, %v11228_v39 }
 0x4e3   : > { %v11102_v49 = vadd.f32 %v11059_v46, %v10563_v30  ;;  %v18183_v57 = vadd.f32 %v17943_v62, %v11138_v24  ;;  %v11143_v18 = vmul.f32 %v17929_v36, %v11104_v60  ;;  %v11237_v52 = vsel %vm18912_vm1, %v18187_v35, 0.0  ;;  %v11258_v60 = vld [vmem:[%s18686_s11] sm:$0x1] }
 0x4e4   : > { %v13506_v21 = vpop.f32.mrf.mxu1  ;;  %v11232_v5 = vadd.f32 %v11231_v20, %v11230_v0 }
 0x4e5   : > { %v11141_v2 = vmul.f32 %v17929_v36, %v11102_v49  ;;  %v11233_v42 = vsel %vm18912_vm1, %v18183_v57, 0.0  ;;  %v11105_v31 = vadd.f32 %v13506_v21, %v10566_v28  ;;  %v18202_v30 = vadd.f32 %v17943_v62, %v11143_v18 }
 0x4e6   : > { %v11062_v22 = vpop.f32.mrf.mxu1  ;;  %v11234_v59 = vadd.f32 %v11233_v42, %v11232_v5  ;;  %v11334_v5 = vstv %s11332_s17 }
 0x4e7   : > { %v18195_v8 = vadd.f32 %v17943_v62, %v11141_v2  ;;  %v11103_v38 = vadd.f32 %v11062_v22, %v10564_v61  ;;  %v11144_v15 = vmul.f32 %v17929_v36, %v11105_v31  ;;  %v11338_v22 = vld [vmem:[%s18688_s13] sm:$0x1] }
 0x4e8   : > { %v11236_v11 = vadd.f32 %v11235_v1, %v11234_v59 }
 0x4e9   : > { %v11142_v55 = vmul.f32 %v17929_v36, %v11103_v38  ;;  %v11239_v39 = vsel %vm18912_vm1, %v18195_v8, 0.0  ;;  %v18210_v3 = vadd.f32 %v17943_v62, %v11144_v15  ;;  %v11243_v36 = vsel %vm18912_vm1, %v18202_v30, 0.0 }
 0x4ea   : > { %v11238_v17 = vadd.f32 %v11237_v52, %v11236_v11 }
 0x4eb   : > { %v18207_v51 = vadd.f32 %v17943_v62, %v11142_v55  ;;  %v11245_v7 = vsel %vm18912_vm1, %v18210_v3, 0.0  ;;  %v19543_v55 = vld [vmem:[#allocation13_spill] sm:$0xff] }
 0x4ec   : > { %v11240_v13 = vadd.f32 %v11239_v39, %v11238_v17  ;;  %v11421_v17 = vsub.s32 0, %v19543_v55  ;;  %v13741_v55 = vld [vmem:[%s14047_s22 + $0x70] sm:$0xff] }
 0x4ed   : > { %v11241_v9 = vsel %vm18912_vm1, %v18207_v51, 0.0 }
 0x4ee   : > { %v11242_v24 = vadd.f32 %v11241_v9, %v11240_v13 }
 0x4f0   : > { %v11244_v46 = vadd.f32 %v11243_v36, %v11242_v24 }
 0x4f2   : > { %v11246_v29 = vadd.f32 %v11245_v7, %v11244_v46 }
 0x4f4   : > { %v11247_v27 = vrot.slane %v11246_v29, 4 }
 0x4f6   : > { %v11248_v28 = vadd.f32 %v11247_v27, %v11246_v29 }
 0x4f8   : > { %v11249_v54 = vrot.slane %v11248_v28, 2 }
 0x4fa   : > { %v11250_v0 = vadd.f32 %v11249_v54, %v11248_v28 }
 0x4fc   : > { %v11251_v49 = vrot.slane %v11250_v0, 1 }
 0x4fe   : > { %v11252_v20 = vadd.f32 %v11251_v49, %v11250_v0  ;;  %v13732_v49 = vld [vmem:[%s14047_s22 + $0x28] sm:$0xff] }
 0x500   : > { %v11253_v62 = vmul.f32 0.00390625, %v11252_v20 }
 0x502   : > { %13516 = vmatmul.mubr.msk.f32.vlgmr.msra.gmra.mxu0 %vm18912_vm1, %v11253_v62  ;;  %v13733_v62 = vld [vmem:[%s14047_s22 + $0x30] sm:$0xff] }
 0x5c2   : > { %v11328_v21 = vpop.f32.mrf.mxu0 }
 0x5c3   : > { %v11329_v2 = vadd.f32 %v11328_v21, %v11258_v60  ;;  %v13734_v21 = vld [vmem:[%s14047_s22 + $0x38] sm:$0xff] }
 0x5c4   : > { %v13517_v61 = vpop.f32.mrf.mxu0 }
 0x5c5   : > { %vm11333_vm8 = vcmp.ge.f32.partialorder %v11329_v2, 0.0  ;;  %v11335_v42 = vmul.f32 %v11334_v5, %v11329_v2 }
 0x5c7   : > { %v11336_v31 = vsel %vm11333_vm8, %v11329_v2, %v11335_v42  ;;  %v13735_v2 = vld [vmem:[%s14047_s22 + $0x40] sm:$0xff]  ;;  %v13736_v42 = vld [vmem:[%s14047_s22 + $0x48] sm:$0xff] }
 0x5c8   : > { %13521 = vmatmul.mubr.msk.f32.vlgmr.msra.gmra.mxu1 %vm11339_vm9, %v11336_v31 }
 0x688   : > { %v11409_v59 = vpop.f32.mrf.mxu1 }
 0x689   : > { %v11410_v1 = vadd.f32 %v11409_v59, %v11338_v22  ;;  %v13737_v22 = vld [vmem:[%s14047_s22 + $0x50] sm:$0xff] }
 0x68a   : > { %v13522_v18 = vpop.f32.mrf.mxu1 }
 0x68b   : > { %v11413_v38 = vsub.f32 0.0, %v11410_v1  ;;  %v13738_v1 = vld [vmem:[%s14047_s22 + $0x58] sm:$0xff] }
 0x68d   : > { %v11414_v11 = vmul.f32 1.442695, %v11413_v38  ;;  %v13739_v38 = vld [vmem:[%s14047_s22 + $0x60] sm:$0xff] }
 0x68f   : > { %13689 = vpow2.f32 %v11414_v11 }
 0x69c   : > { %v13690_v52 = vpop.eup %13689 }
 0x69d   : > { %v11416_v15 = vadd.f32 1.0, %v13690_v52  ;;  %v13740_v52 = vld [vmem:[%s14047_s22 + $0x68] sm:$0xff] }
 0x69f   : > { %13691 = vrcp.f32 %v11416_v15 }
 0x6ac   : > { %v13692_v39 = vpop.eup %13691 }
 0x6ad   : > { %v11422_v13 = vrot.slane %v13692_v39, %v11421_v17  ;;  %v13742_v39 = vld [vmem:[%s14047_s22 + $0x78] sm:$0xff] }
 0x6af   : > { %v11423_v9 = vmul.f32 %v11422_v13, %v17948_v10  ;;  %v11424_v24 = vmul.f32 %v11422_v13, %v17961_v56  ;;  %v11425_v36 = vmul.f32 %v11422_v13, %v17958_v44  ;;  %v11426_v46 = vmul.f32 %v11422_v13, %v17970_v34 }
 0x6b0   : > { %v11427_v7 = vmul.f32 %v11422_v13, %v17981_v43  ;;  %v11428_v29 = vmul.f32 %v11422_v13, %v18003_v45  ;;  %v11429_v27 = vmul.f32 %v11422_v13, %v17998_v32  ;;  %v11430_v28 = vmul.f32 %v11422_v13, %v18010_v40 }
 0x6b1   : > { %v11431_v54 = vmul.f32 %v11422_v13, %v18021_v12  ;;  %v11432_v0 = vmul.f32 %v11422_v13, %v18043_v63  ;;  %v11433_v10 = vmul.f32 %v11422_v13, %v18038_v23  ;;  %v11434_v56 = vmul.f32 %v11422_v13, %v18050_v16 }
 0x6b2   : > { %v11435_v44 = vmul.f32 %v11422_v13, %v18061_v4  ;;  %v11436_v34 = vmul.f32 %v11422_v13, %v18081_v33  ;;  %v11437_v43 = vmul.f32 %v11422_v13, %v18076_v41  ;;  %v11438_v45 = vmul.f32 %v11422_v13, %v18088_v53 }
 0x6b3   : > { %v11439_v32 = vmul.f32 %v11422_v13, %v18097_v26  ;;  %v11440_v40 = vmul.f32 %v11422_v13, %v18117_v6  ;;  %v11441_v12 = vmul.f32 %v11422_v13, %v18112_v37  ;;  %v11442_v23 = vmul.f32 %v11422_v13, %v18124_v47 }
 0x6b4   : > { %v11443_v63 = vmul.f32 %v11422_v13, %v18133_v25  ;;  %v11444_v16 = vmul.f32 %v11422_v13, %v18151_v19  ;;  %v11445_v4 = vmul.f32 %v11422_v13, %v18146_v14  ;;  %v11446_v41 = vmul.f32 %v11422_v13, %v18157_v48  ;;  %v13727_v19 = vld [vmem:[%s14047_s22] sm:$0xff] }
 0x6b5   : > { %v11447_v33 = vmul.f32 %v11422_v13, %v18166_v58  ;;  %v11448_v53 = vmul.f32 %v11422_v13, %v18183_v57  ;;  %v11449_v26 = vmul.f32 %v11422_v13, %v18178_v50  ;;  %v11450_v37 = vmul.f32 %v11422_v13, %v18187_v35  ;;  %v13728_v58 = vld [vmem:[%s14047_s22 + $0x8] sm:$0xff]  ;;  %v13729_v57 = vld [vmem:[%s14047_s22 + $0x10] sm:$0xff] }
 0x6b6   : > { %v11451_v6 = vmul.f32 %v11422_v13, %v18195_v8  ;;  %v11452_v47 = vmul.f32 %v11422_v13, %v18207_v51  ;;  %v18257_v25 = vmul.f32 %v11422_v13, %v18202_v30  ;;  %v18260_v14 = vmul.f32 %v11422_v13, %v18210_v3  ;;  %v13730_v8 = vld [vmem:[%s14047_s22 + $0x18] sm:$0xff]  ;;  %v13731_v51 = vld [vmem:[%s14047_s22 + $0x20] sm:$0xff] }
 0x6b7   : > { %v18263_v48 = vadd.f32 %v13727_v19, %v11423_v9  ;;  %v18266_v50 = vadd.f32 %v13728_v58, %v11424_v24  ;;  %v18269_v35 = vadd.f32 %v13729_v57, %v11425_v36  ;;  %v18272_v30 = vadd.f32 %v13730_v8, %v11426_v46  ;;  %v13743_v9 = vld [vmem:[%s14047_s22 + $0x80] sm:$0xff]  ;;  %v13744_v36 = vld [vmem:[%s14047_s22 + $0x88] sm:$0xff]  ;;  %v13754_v58 = vld [vmem:[%s14047_s22 + $0xd8] sm:$0xff] }
 0x6b8   : > { %v18275_v3 = vadd.f32 %v13731_v51, %v11427_v7  ;;  %v18278_v20 = vadd.f32 %v13732_v49, %v11428_v29  ;;  %v18281_v60 = vadd.f32 %v13733_v62, %v11429_v27  ;;  %v18284_v5 = vadd.f32 %v13734_v21, %v11430_v28  ;;  %v13745_v7 = vld [vmem:[%s14047_s22 + $0x90] sm:$0xff]  ;;  %v13746_v27 = vld [vmem:[%s14047_s22 + $0x98] sm:$0xff]  ;;  %v13755_v57 = vld [vmem:[%s14047_s22 + $0xe0] sm:$0xff] }
 0x6b9   : > { %v18287_v61 = vadd.f32 %v13735_v2, %v11431_v54  ;;  %v18290_v31 = vadd.f32 %v13736_v42, %v11432_v0  ;;  %v18293_v59 = vadd.f32 %v13737_v22, %v11433_v10  ;;  %v18296_v18 = vadd.f32 %v13738_v1, %v11434_v56  ;;  %v13747_v54 = vld [vmem:[%s14047_s22 + $0xa0] sm:$0xff]  ;;  %v13748_v10 = vld [vmem:[%s14047_s22 + $0xa8] sm:$0xff]  ;;  %v13758_v49 = vld [vmem:[%s14047_s22 + $0xf8] sm:$0xff] }
 0x6ba   : > { %v18299_v11 = vadd.f32 %v13739_v38, %v11435_v44  ;;  %v18302_v15 = vadd.f32 %v13740_v52, %v11436_v34  ;;  %v18305_v17 = vadd.f32 %v13741_v55, %v11437_v43  ;;  %v18308_v13 = vadd.f32 %v13742_v39, %v11438_v45  ;;  %v13749_v44 = vld [vmem:[%s14047_s22 + $0xb0] sm:$0xff]  ;;  %v13750_v43 = vld [vmem:[%s14047_s22 + $0xb8] sm:$0xff] }
 0x6bb   : > { %v18311_v24 = vadd.f32 %v13743_v9, %v11439_v32  ;;  %v18314_v46 = vadd.f32 %v13744_v36, %v11440_v40  ;;  %v18317_v29 = vadd.f32 %v13745_v7, %v11441_v12  ;;  %v18320_v28 = vadd.f32 %v13746_v27, %v11442_v23  ;;  %v13751_v32 = vld [vmem:[%s14047_s22 + $0xc0] sm:$0xff]  ;;  %v13752_v12 = vld [vmem:[%s14047_s22 + $0xc8] sm:$0xff] }
 0x6bc   : > { %v18323_v0 = vadd.f32 %v13747_v54, %v11443_v63  ;;  %v18326_v56 = vadd.f32 %v13748_v10, %v11444_v16  ;;  %v18329_v34 = vadd.f32 %v13749_v44, %v11445_v4  ;;  %v18332_v45 = vadd.f32 %v13750_v43, %v11446_v41  ;;  %v13753_v63 = vld [vmem:[%s14047_s22 + $0xd0] sm:$0xff]  ;;  %v13756_v4 = vld [vmem:[%s14047_s22 + $0xe8] sm:$0xff] }
 0x6bd   : > { %v18335_v40 = vadd.f32 %v13751_v32, %v11447_v33  ;;  %v18338_v23 = vadd.f32 %v13752_v12, %v11448_v53  ;;  %v18341_v19 = vadd.f32 %v13753_v63, %v11449_v26  ;;  %v18344_v16 = vadd.f32 %v13754_v58, %v11450_v37  ;;  %v13757_v41 = vld [vmem:[%s14047_s22 + $0xf0] sm:$0xff]  ;;  %s514_s22 = sand.u32 1, %s13811_s26   ;;  %v19549_v26 = vld [vmem:[#allocation64_spill] sm:$0xff] }
 0x6be   : > { %v18347_v8 = vadd.f32 %v13755_v57, %v11451_v6  ;;  %v18350_v51 = vadd.f32 %v13756_v4, %v11452_v47  ;;  %v18354_v33 = vadd.f32 %v13757_v41, %v18257_v25  ;;  %v18358_v53 = vadd.f32 %v13758_v49, %v18260_v14  ;;  %s18411_s20 = sshll.u32 %s514_s22, 8  ;;  %s18635_s17 = scalar_lea.sflag [#allocation7], %s514_s22 }
 0x6bf   : > { %19544 = vst [vmem:[#allocation106_spill] sm:$0xff] %v18335_v40  ;;  %19545 = vst [vmem:[#allocation108_spill] sm:$0xff] %v18338_v23  ;;  %vm11487_vm4 = vcmp.ge.f32.partialorder %v18263_v48, 0.0  ;;  %vm11488_vm5 = vcmp.ge.f32.partialorder %v18266_v50, 0.0  ;;  %vm11489_vm6 = vcmp.ge.f32.partialorder %v18269_v35, 0.0  ;;  %vm11490_vm7 = vcmp.ge.f32.partialorder %v18272_v30, 0.0 }
 0x6c0   : > { %19546 = vst [vmem:[#allocation58_spill] sm:$0xff] %v18344_v16  ;;  %19547 = vst [vmem:[#allocation56_spill] sm:$0xff] %v18347_v8  ;;  %vm11491_vm10 = vcmp.ge.f32.partialorder %v18275_v3, 0.0  ;;  %vm11492_vm11 = vcmp.ge.f32.partialorder %v18278_v20, 0.0  ;;  %vm11493_vm12 = vcmp.ge.f32.partialorder %v18281_v60, 0.0  ;;  %vm11494_vm13 = vcmp.ge.f32.partialorder %v18284_v5, 0.0 }
 0x6c1   : > { %19548 = vst [vmem:[#allocation116_spill] sm:$0xff] %v18350_v51  ;;  %vm11495_vm14 = vcmp.ge.f32.partialorder %v18287_v61, 0.0  ;;  %vm11496_vm15 = vcmp.ge.f32.partialorder %v18290_v31, 0.0  ;;  %vm11497_vm2 = vcmp.ge.f32.partialorder %v18293_v59, 0.0  ;;  %vm11498_vm3 = vcmp.ge.f32.partialorder %v18296_v18, 0.0  ;;  %s18486_s27 = scalar_lea.vmem [#allocation6], %s18411_s20 }
 0x6c2   : > { %v11519_v37 = vmul.f32 %v18263_v48, %v19549_v26  ;;  %v11520_v6 = vmul.f32 %v18266_v50, %v19549_v26  ;;  %v11521_v47 = vmul.f32 %v18269_v35, %v19549_v26  ;;  %v11522_v25 = vmul.f32 %v18272_v30, %v19549_v26  ;;  %s11629_s19 = sshll.u32 %s18486_s27, 4  ;;  %s18583_s19 = int_to_ptr.vmem [resolvable:$true] %s11629_s19 }
 0x6c3   : > { %v11523_v14 = vmul.f32 %v18275_v3, %v19549_v26  ;;  %v11524_v62 = vmul.f32 %v18278_v20, %v19549_v26  ;;  %v11525_v21 = vmul.f32 %v18281_v60, %v19549_v26  ;;  %v11526_v2 = vmul.f32 %v18284_v5, %v19549_v26  ;;  %s13759_s24 = scalar_lea.vmem %s18583_s19, 4096  ;;  %p13766_p0 = scmp.lt.s32.totalorder %s18583_s19, %s13764_s30 }
 0x6c4   : > { %v11527_v42 = vmul.f32 %v18287_v61, %v19549_v26  ;;  %v11528_v22 = vmul.f32 %v18290_v31, %v19549_v26  ;;  %v11529_v1 = vmul.f32 %v18293_v59, %v19549_v26  ;;  %v11530_v38 = vmul.f32 %v18296_v18, %v19549_v26  ;;  %p13760_p11 = scmp.ne.s32.totalorder %s18583_s19, %s13759_s24  ;;  %p13767_p1 = scmp.lt.s32.totalorder %s13765_s0, %s13759_s24 }
 0x6c5   : > { %v11531_v52 = vmul.f32 %v18299_v11, %v19549_v26  ;;  %v11532_v55 = vmul.f32 %v18302_v15, %v19549_v26  ;;  %v11533_v39 = vmul.f32 %v18305_v17, %v19549_v26  ;;  %v11534_v9 = vmul.f32 %v18308_v13, %v19549_v26 }
 0x6c6   : > { %vm11515_vm8 = vcmp.ge.f32.partialorder %v18347_v8, 0.0  ;;  %vm11516_vm9 = vcmp.ge.f32.partialorder %v18350_v51, 0.0  ;;  %vm11517_vm1 = vcmp.ge.f32.partialorder %v18354_v33, 0.0  ;;  %vm11518_vm0 = vcmp.ge.f32.partialorder %v18358_v53, 0.0  ;;  %p13761_p12 = pnand %p13760_p11, %p13957_p5  ;;  %p13768_p2 = por %p13767_p1, %p13766_p0 }
 0x6c7   : > { %v11535_v36 = vmul.f32 %v18311_v24, %v19549_v26  ;;  %v11536_v7 = vmul.f32 %v18314_v46, %v19549_v26  ;;  %v11537_v27 = vmul.f32 %v18317_v29, %v19549_v26  ;;  %v11538_v54 = vmul.f32 %v18320_v28, %v19549_v26 }
 0x6c8   : > { %v11539_v10 = vmul.f32 %v18323_v0, %v19549_v26  ;;  %v11540_v44 = vmul.f32 %v18326_v56, %v19549_v26  ;;  %v11541_v43 = vmul.f32 %v18329_v34, %v19549_v26  ;;  %v11542_v32 = vmul.f32 %v18332_v45, %v19549_v26  ;;  %p13762_p13 = pneg %p13761_p12 }
 0x6c9   : > { %v11543_v12 = vmul.f32 %v18335_v40, %v19549_v26  ;;  %v11544_v63 = vmul.f32 %v18338_v23, %v19549_v26  ;;  %v11545_v58 = vmul.f32 %v18341_v19, %v19549_v26  ;;  %v11546_v57 = vmul.f32 %v18344_v16, %v19549_v26 }
 0x6ca   : > { %v11547_v4 = vmul.f32 %v18347_v8, %v19549_v26  ;;  %v11548_v41 = vmul.f32 %v18350_v51, %v19549_v26  ;;  %v11549_v49 = vmul.f32 %v18354_v33, %v19549_v26  ;;  %v11550_v40 = vmul.f32 %v18358_v53, %v19549_v26  ;;  %p13769_p3 = pnand %p13768_p2, %p13762_p13 }
 0x6cb   : > { %v11551_v23 = vsel %vm11487_vm4, %v18263_v48, %v11519_v37  ;;  %v11552_v16 = vsel %vm11488_vm5, %v18266_v50, %v11520_v6  ;;  %v11553_v8 = vsel %vm11489_vm6, %v18269_v35, %v11521_v47  ;;  %v11554_v51 = vsel %vm11490_vm7, %v18272_v30, %v11522_v25 }
 0x6cc   : > { %v11555_v26 = vsel %vm11491_vm10, %v18275_v3, %v11523_v14  ;;  %v11556_v48 = vsel %vm11492_vm11, %v18278_v20, %v11524_v62  ;;  %v11557_v50 = vsel %vm11493_vm12, %v18281_v60, %v11525_v21  ;;  %v11558_v35 = vsel %vm11494_vm13, %v18284_v5, %v11526_v2 }
 0x6cd   : > { %vm19550_vm4 = vcmask 261120   ;;  %v11559_v30 = vsel %vm11495_vm14, %v18287_v61, %v11527_v42  ;;  %v11560_v3 = vsel %vm11496_vm15, %v18290_v31, %v11528_v22  ;;  %v11561_v20 = vsel %vm11497_vm2, %v18293_v59, %v11529_v1 }
 0x6ce   : > { %11583 = vst.msk [vmem:[%s18486_s27] sm:$0xff] %vm19550_vm4, %v11551_v23  ;;  %vm19551_vm5 = vmmov %vm19550_vm4  ;;  %v11562_v60 = vsel %vm11498_vm3, %v18296_v18, %v11530_v38  ;;  %vm19558_vm14 = vcmp.ge.f32.partialorder %v18299_v11, 0.0  ;;  %vm19559_vm15 = vcmp.ge.f32.partialorder %v18302_v15, 0.0  ;;  %vm19560_vm2 = vcmp.ge.f32.partialorder %v18305_v17, 0.0  ;;  %v19586_v23 = vld [vmem:[#allocation58_spill] sm:$0xff] }
 0x6cf   : > { %11584 = vst.msk [vmem:[%s18486_s27 + $0x8] sm:$0xff] %vm19551_vm5, %v11552_v16  ;;  %vm19552_vm6 = vmmov %vm19550_vm4  ;;  %v11563_v5 = vsel %vm19558_vm14, %v18299_v11, %v11531_v52  ;;  %v11564_v61 = vsel %vm19559_vm15, %v18302_v15, %v11532_v55  ;;  %v11565_v31 = vsel %vm19560_vm2, %v18305_v17, %v11533_v39  ;;  %vm19561_vm3 = vcmp.ge.f32.partialorder %v18308_v13, 0.0 }
 0x6d0   : > { %11585 = vst.msk [vmem:[%s18486_s27 + $0x10] sm:$0xff] %vm19552_vm6, %v11553_v8  ;;  %vm19553_vm7 = vmmov %vm19550_vm4  ;;  %v11566_v59 = vsel %vm19561_vm3, %v18308_v13, %v11534_v9  ;;  %v19592_v8 = vld [vmem:[#allocation56_spill] sm:$0xff]  ;;  %v11581_v6 = vsel %vm11517_vm1, %v18354_v33, %v11549_v49  ;;  %v11582_v47 = vsel %vm11518_vm0, %v18358_v53, %v11550_v40 }
 0x6d1   : > { %11586 = vst.msk [vmem:[%s18486_s27 + $0x18] sm:$0xff] %vm19553_vm7, %v11554_v51  ;;  %vm19554_vm10 = vmmov %vm19550_vm4  ;;  %v19593_v51 = vld [vmem:[#allocation116_spill] sm:$0xff] }
 0x6d2   : > { %11587 = vst.msk [vmem:[%s18486_s27 + $0x20] sm:$0xff] %vm19554_vm10, %v11555_v26  ;;  %vm19555_vm11 = vmmov %vm19550_vm4  ;;  %vm19565_vm10 = vcmp.ge.f32.partialorder %v18311_v24, 0.0  ;;  %v11580_v37 = vsel %vm11516_vm9, %v19593_v51, %v11548_v41 }
 0x6d3   : > { %11588 = vst.msk [vmem:[%s18486_s27 + $0x28] sm:$0xff] %vm19555_vm11, %v11556_v48  ;;  %vm19556_vm12 = vmmov %vm19550_vm4  ;;  %v11567_v18 = vsel %vm19565_vm10, %v18311_v24, %v11535_v36  ;;  %vm19566_vm11 = vcmp.ge.f32.partialorder %v18314_v46, 0.0 }
 0x6d4   : > { %11589 = vst.msk [vmem:[%s18486_s27 + $0x30] sm:$0xff] %vm19556_vm12, %v11557_v50  ;;  %vm19557_vm13 = vmmov %vm19550_vm4  ;;  %v11568_v11 = vsel %vm19566_vm11, %v18314_v46, %v11536_v7  ;;  %vm19567_vm12 = vcmp.ge.f32.partialorder %v18317_v29, 0.0 }
 0x6d5   : > { %11590 = vst.msk [vmem:[%s18486_s27 + $0x38] sm:$0xff] %vm19557_vm13, %v11558_v35  ;;  %vm19562_vm5 = vmmov %vm19550_vm4  ;;  %v11569_v15 = vsel %vm19567_vm12, %v18317_v29, %v11537_v27  ;;  %vm19568_vm13 = vcmp.ge.f32.partialorder %v18320_v28, 0.0 }
 0x6d6   : > { %11591 = vst.msk [vmem:[%s18486_s27 + $0x40] sm:$0xff] %vm19550_vm4, %v11559_v30  ;;  %vm19563_vm6 = vmmov %vm19550_vm4  ;;  %v11570_v17 = vsel %vm19568_vm13, %v18320_v28, %v11538_v54  ;;  %v19581_v28 = vld [vmem:[#allocation106_spill] sm:$0xff] }
 0x6d7   : > { %11592 = vst.msk [vmem:[%s18486_s27 + $0x48] sm:$0xff] %vm19562_vm5, %v11560_v3  ;;  %vm19564_vm7 = vmmov %vm19550_vm4  ;;  %vm19574_vm5 = vcmp.ge.f32.partialorder %v18326_v56, 0.0 }
 0x6d8   : > { %11593 = vst.msk [vmem:[%s18486_s27 + $0x50] sm:$0xff] %vm19563_vm6, %v11561_v20  ;;  %vm19569_vm14 = vmmov %vm19550_vm4  ;;  %v11572_v24 = vsel %vm19574_vm5, %v18326_v56, %v11540_v44  ;;  %vm19575_vm6 = vcmp.ge.f32.partialorder %v18329_v34, 0.0  ;;  %v19583_v56 = vld [vmem:[#allocation108_spill] sm:$0xff] }
 0x6d9   : > { %11594 = vst.msk [vmem:[%s18486_s27 + $0x58] sm:$0xff] %vm19564_vm7, %v11562_v60  ;;  %vm19570_vm15 = vmmov %vm19550_vm4  ;;  %v11573_v46 = vsel %vm19575_vm6, %v18329_v34, %v11541_v43  ;;  %vm19576_vm7 = vcmp.ge.f32.partialorder %v18332_v45, 0.0 }
 0x6da   : > { %11595 = vst.msk [vmem:[%s18486_s27 + $0x60] sm:$0xff] %vm19569_vm14, %v11563_v5  ;;  %vm19571_vm2 = vmmov %vm19550_vm4  ;;  %vm19573_vm4 = vcmp.ge.f32.partialorder %v18323_v0, 0.0  ;;  %v11574_v29 = vsel %vm19576_vm7, %v18332_v45, %v11542_v32  ;;  %vm19582_vm14 = vcmp.ge.f32.partialorder %v19581_v28, 0.0 }
 0x6db   : > { %11596 = vst.msk [vmem:[%s18486_s27 + $0x68] sm:$0xff] %vm19570_vm15, %v11564_v61  ;;  %vm19572_vm3 = vmmov %vm19571_vm2  ;;  %v11571_v13 = vsel %vm19573_vm4, %v18323_v0, %v11539_v10  ;;  %v11575_v0 = vsel %vm19582_vm14, %v19581_v28, %v11543_v12  ;;  %vm19584_vm15 = vcmp.ge.f32.partialorder %v19583_v56, 0.0 }
 0x6dc   : > { %11597 = vst.msk [vmem:[%s18486_s27 + $0x70] sm:$0xff] %vm19571_vm2, %v11565_v31  ;;  %vm19577_vm10 = vmmov %vm19571_vm2  ;;  %v11576_v34 = vsel %vm19584_vm15, %v19583_v56, %v11544_v63 }
 0x6dd   : > { %11598 = vst.msk [vmem:[%s18486_s27 + $0x78] sm:$0xff] %vm19572_vm3, %v11566_v59  ;;  %vm19578_vm11 = vmmov %vm19571_vm2  ;;  %vm19587_vm3 = vcmp.ge.f32.partialorder %v19586_v23, 0.0 }
 0x6de   : > { %11599 = vst.msk [vmem:[%s18486_s27 + $0x80] sm:$0xff] %vm19577_vm10, %v11567_v18  ;;  %vm19579_vm12 = vmmov %vm19571_vm2  ;;  %v11578_v16 = vsel %vm19587_vm3, %v19586_v23, %v11546_v57 }
 0x6df   : > { %11600 = vst.msk [vmem:[%s18486_s27 + $0x88] sm:$0xff] %vm19578_vm11, %v11568_v11  ;;  %vm19580_vm13 = vmmov %vm19571_vm2  ;;  %vm19585_vm2 = vcmp.ge.f32.partialorder %v18341_v19, 0.0 }
 0x6e0   : > { %11601 = vst.msk [vmem:[%s18486_s27 + $0x90] sm:$0xff] %vm19579_vm12, %v11569_v15  ;;  %v11577_v45 = vsel %vm19585_vm2, %v18341_v19, %v11545_v58  ;;  %vm19588_vm4 = vmmov %vm19577_vm10  ;;  %v11579_v19 = vsel %vm11515_vm8, %v19592_v8, %v11547_v4 }
 0x6e1   : > { %11602 = vst.msk [vmem:[%s18486_s27 + $0x98] sm:$0xff] %vm19580_vm13, %v11570_v17  ;;  %vm19589_vm5 = vmmov %vm19588_vm4 }
 0x6e2   : > { %11603 = vst.msk [vmem:[%s18486_s27 + $0xa0] sm:$0xff] %vm19588_vm4, %v11571_v13  ;;  %vm19590_vm6 = vmmov %vm19588_vm4 }
 0x6e3   : > { %11604 = vst.msk [vmem:[%s18486_s27 + $0xa8] sm:$0xff] %vm19589_vm5, %v11572_v24  ;;  %vm19591_vm7 = vmmov %vm19588_vm4 }
 0x6e4   : > { %11605 = vst.msk [vmem:[%s18486_s27 + $0xb0] sm:$0xff] %vm19590_vm6, %v11573_v46  ;;  %vm19594_vm10 = vmmov %vm19588_vm4 }
 0x6e5   : > { %11606 = vst.msk [vmem:[%s18486_s27 + $0xb8] sm:$0xff] %vm19591_vm7, %v11574_v29  ;;  %vm19595_vm11 = vmmov %vm19588_vm4 }
 0x6e6   : > { %11607 = vst.msk [vmem:[%s18486_s27 + $0xc0] sm:$0xff] %vm19594_vm10, %v11575_v0  ;;  %vm19596_vm12 = vmmov %vm19588_vm4 }
 0x6e7   : > { %11608 = vst.msk [vmem:[%s18486_s27 + $0xc8] sm:$0xff] %vm19595_vm11, %v11576_v34  ;;  %vm19597_vm8 = vmmov %vm19588_vm4 }
 0x6e8   : > { %11609 = vst.msk [vmem:[%s18486_s27 + $0xd0] sm:$0xff] %vm19596_vm12, %v11577_v45  ;;  %vm19598_vm13 = vmmov %vm19588_vm4 }
 0x6e9   : > { %11610 = vst.msk [vmem:[%s18486_s27 + $0xd8] sm:$0xff] %vm19597_vm8, %v11578_v16  ;;  %vm19599_vm9 = vmmov %vm19588_vm4 }
 0x6ea   : > { %11611 = vst.msk [vmem:[%s18486_s27 + $0xe0] sm:$0xff] %vm19598_vm13, %v11579_v19  ;;  %vm19600_vm14 = vmmov %vm19588_vm4 }
 0x6eb   : > { %11612 = vst.msk [vmem:[%s18486_s27 + $0xe8] sm:$0xff] %vm19599_vm9, %v11580_v37  ;;  %vm19601_vm1 = vmmov %vm19588_vm4 }
 0x6ec   : > { %11613 = vst.msk [vmem:[%s18486_s27 + $0xf0] sm:$0xff] %vm19600_vm14, %v11581_v6 }
 0x6ed   : > { %11614 = vst.msk [vmem:[%s18486_s27 + $0xf8] sm:$0xff] %vm19601_vm1, %v11582_v47 }
 0x6ee   : > { %13772 = shalt.err (!%p13769_p3)
}
 0x6ef   : > { %s13773_s22 = scalar_lea.hbm %s18581_s23, 4096  ;;  %s13777_s29 = scalar_lea.hbm %s18691_s16, 8192 }
 0x6f0   : > { %p13774_p4 = scmp.ne.s32.totalorder %s18581_s23, %s13773_s22  ;;  %p13778_p9 = scmp.lt.s32.totalorder %s18581_s23, %s18691_s16 }
 0x6f1   : > { %p13779_p10 = scmp.lt.s32.totalorder %s13777_s29, %s13773_s22 }
 0x6f2   : > { %p13775_p7 = pnand %p13774_p4, %p13957_p5 }
 0x6f3   : > { %p13780_p11 = por %p13779_p10, %p13778_p9 }
 0x6f4   : > { %p13776_p8 = pneg %p13775_p7 }
 0x6f6   : > { %p13781_p12 = pnand %p13780_p11, %p13776_p8 }
 0x6f8   : > { %13784 = shalt.err (!%p13781_p12)
}
 0x6f9   : > { %s13826_s24 = smov 128   ;;  %s13827_s15 = smov 8  }
 0x6fa   : > { %13523 = dma.vmem_to_hbm [thread:$0]  (%p13957_p5), %s18583_s19, 4096, %s18581_s23, %s18635_s17, %s13826_s24, %s13826_s24, %s13827_s15  }
 0x6fb PF: > { %p13529_p13 = scmp.ge.s32.totalorder %s13819_s28, 2  ;;  %s11644_s0 = sand.u32 1, %s13807_s25  }
 0x6fc   : > { %s11645_s22 = scalar_lea.sflag [#allocation7], %s11644_s0 }
 0x6fd   : > { %p13526_p0 = pnand %p13529_p13, %p13961_p6 }
 0x6ff   : > { %p13527_p1 = pneg %p13526_p0 }
 0x701   : > { %13802 = dma.done.wait (%p13527_p1), %s11645_s22, 4096  }
 0x702   : > { %13804 = vsyncadd (%p13527_p1), %s11645_s22, 4294963200  ;;  %s19603_s28 = sld [smem:[#allocation10_spill]]  ;;  %s19606_s25 = smov %s13811_s26 }
 0x703   : > { %s19604_s20 = sld [smem:[#allocation9_spill]] }
 0x704   : > { %s19605_s27 = sld [smem:[#allocation11_spill]] }
 0x708   : > { %p28_p2 = scmp.ge.s32.totalorder %s19603_s28, 4  }
 0x709   : > { %s19607_s26 = smov %s19604_s20 }
 0x70a   :  { %30 = sbr.rel (!%p28_p2) target bundleno = 7 (0x7), region = 135 }
 0x70f   :  { %11650 = vsyncpa [#allocation7], 1 }
 0x710   :  { %11652 = vsyncpa [#allocation7 + $0x1], 1 }

</bundles_post_ra>
